<compile_context>
chip_gen: v7x
topology: tpu7x:2x2x1
jax: 0.10.0
libtpu: 0.0.40
codegen_flags: <defaults>
</compile_context>

<pallas_src>
import jax
import jax.numpy as jnp
from jax.experimental import pallas as pl
from jax.experimental.pallas import tpu as pltpu

# ---- shapes implied by the module -------------------------------------------
C_IN, C_OUT, KSZ, STRIDE = 3, 16, 5, 2
POOL = 2
H_IN = 243                                   # forced by fc1.in_features
H_CONV = (H_IN - KSZ) // STRIDE + 1          # 120
H_POOL = H_CONV // POOL                      # 60
HW = H_POOL * H_POOL                         # 3600
PK = (POOL - 1) * STRIDE + KSZ               # 7   (pool-window receptive field)
PFEAT = C_IN * PK * PK                       # 147
FLAT = C_OUT * HW                            # 57600
HIDDEN = 64
VMEM_LIMIT = 32 * 1024 * 1024                # safe on v5e/v6e/v7x


# ---- Pallas kernels ----------------------------------------------------------

def conv_relu_pool_kernel(p_ref, w_ref, b_ref, o_ref):
    """Fused conv(as matmul) + 2x2 maxpool + bias + ReLU for one image.

    p_ref: (1, 147, 3600) bf16  7x7/stride-4 im2col patches (feature = ci*49+ph*7+pw)
    w_ref: (64, 147)      bf16  conv weight embedded at the 4 pool-quadrant offsets
                                (row = q*16 + co, q = dh*2 + dw)
    b_ref: (16, 1)        f32   conv bias (column -> broadcasts over lanes)
    o_ref: (1, 16, 3600)  bf16  pooled + ReLU'd feature map, channel-major
    """
    z = jnp.dot(w_ref[...], p_ref[0], preferred_element_type=jnp.float32)  # (64, 3600)
    # 2x2 max-pool == max over the 4 quadrant row-groups (free sublane slices).
    z = jnp.maximum(jnp.maximum(z[0:16], z[16:32]),
                    jnp.maximum(z[32:48], z[48:64]))                       # (16, 3600)
    # Per-channel bias add and the monotone ReLU commute with the max.
    o_ref[0] = jnp.maximum(z + b_ref[...], 0.0).astype(o_ref.dtype)


def fc_kernel(x_ref, w1_ref, s1_ref, b1_ref, w2_ref, b2_ref, o_ref, acc_ref):
    """Fused fc1(int8 weights) + ReLU + dropout(identity) + fc2 + bias + sigmoid.

    grid = (K // tk,): a single "arbitrary" axis walks the K=57600 contraction with an
    (N, 64) f32 VMEM accumulator; everything after fc1 runs in the last-k epilogue.
    """
    k = pl.program_id(0)

    @pl.when(k == 0)
    def _():
        acc_ref[...] = jnp.zeros_like(acc_ref)

    # int8 -> bf16 widen (|q| <= 127 is exact in bf16); per-row scales applied after
    # the K loop.  Contraction over the last (lane) dim of both operands keeps both
    # VMEM blocks lane-dense (same pattern as q @ k^T in attention kernels).
    w = w1_ref[...].astype(jnp.float32).astype(jnp.bfloat16)              # (64, tk)
    acc_ref[...] += jax.lax.dot_general(
        x_ref[...], w,
        dimension_numbers=(((1,), (1,)), ((), ())),
        preferred_element_type=jnp.float32)                               # (N, 64)

    @pl.when(k == pl.num_programs(0) - 1)
    def _():
        h = jnp.maximum(acc_ref[...] * s1_ref[...] + b1_ref[...], 0.0)    # fc1 + ReLU
        # nn.Dropout(p=0.3) is the identity in inference mode.
        z = jnp.sum(h * w2_ref[...], axis=1, keepdims=True) + b2_ref[...]  # fc2 + b2
        o_ref[...] = 1.0 / (1.0 + jnp.exp(-z))                            # sigmoid


# ---- pallas_call wrappers ----------------------------------------------------

def conv_relu_pool(p, w_all, bc):
    N = p.shape[0]
    return pl.pallas_call(
        conv_relu_pool_kernel,
        out_shape=jax.ShapeDtypeStruct((N, C_OUT, HW), jnp.bfloat16),
        grid_spec=pltpu.PrefetchScalarGridSpec(
            num_scalar_prefetch=0,
            grid=(N,),
            in_specs=[pl.BlockSpec((1, PFEAT, HW), lambda n: (n, 0, 0)),
                      pl.BlockSpec((4 * C_OUT, PFEAT), lambda n: (0, 0)),
                      pl.BlockSpec((C_OUT, 1), lambda n: (0, 0))],
            out_specs=pl.BlockSpec((1, C_OUT, HW), lambda n: (n, 0, 0))),
        compiler_params=pltpu.CompilerParams(
            dimension_semantics=("parallel",),
            vmem_limit_bytes=VMEM_LIMIT),
    )(p, w_all, bc)


def fc_head(x_flat, w1q, s1, b1, w2, b2, *, tk=19200):
    N, K = x_flat.shape
    assert K % tk == 0 and tk % 128 == 0
    return pl.pallas_call(
        fc_kernel,
        out_shape=jax.ShapeDtypeStruct((N, 1), jnp.float32),
        grid_spec=pltpu.PrefetchScalarGridSpec(
            num_scalar_prefetch=0,
            grid=(K // tk,),
            in_specs=[pl.BlockSpec((N, tk), lambda k: (0, k)),
                      pl.BlockSpec((HIDDEN, tk), lambda k: (0, k)),
                      pl.BlockSpec((1, HIDDEN), lambda k: (0, 0)),
                      pl.BlockSpec((1, HIDDEN), lambda k: (0, 0)),
                      pl.BlockSpec((1, HIDDEN), lambda k: (0, 0)),
                      pl.BlockSpec((1, 1), lambda k: (0, 0))],
            out_specs=pl.BlockSpec((N, 1), lambda k: (0, 0)),
            scratch_shapes=[pltpu.VMEM((N, HIDDEN), jnp.float32)]),
        compiler_params=pltpu.CompilerParams(
            dimension_semantics=("arbitrary",),
            vmem_limit_bytes=VMEM_LIMIT),
    )(x_flat, w1q, s1, b1, w2, b2)


# ---- glue: single im2col producer (plain JAX, one tiny grouped conv) ----------

def _pool_window_patches(x):
    """x: (N, 3, 243, 243) f32 -> (N, 147, 3600) bf16: 7x7/stride-4 im2col patches.

    One pooled output pixel's receptive field is 7x7 with stride 4, so a single
    patches tensor covers all four 2x2-pool quadrants (the quadrant/kernel-offset
    selection lives in the zero-embedded conv weights) -> ~half the HBM bytes of
    materializing four separate 5x5 quadrant patch tensors.
    """
    N = x.shape[0]
    p = jax.lax.conv_general_dilated_patches(
        x.astype(jnp.bfloat16),                     # identity extraction: exact in bf16
        filter_shape=(PK, PK),
        window_strides=(POOL * STRIDE, POOL * STRIDE),
        padding="VALID",
        dimension_numbers=("NCHW", "OIHW", "NCHW"))  # (N, 147, 60, 60), channel-major
    return p.reshape(N, PFEAT, HW)


# ---- one-time parameter layout / dtype / quantization prep --------------------

def prepare_params(params):
    """Run once outside the jitted forward."""
    # Embed the 5x5 conv weight at the four 2x2-pool quadrant offsets of a 7x7 window
    # and stack q-major: row = (dh*2 + dw)*16 + co.
    w = params["wc"]                                               # (16, 3, 5, 5)
    wq = jnp.zeros((2, 2, C_OUT, C_IN, PK, PK), jnp.float32)
    for dh in range(2):
        for dw in range(2):
            wq = wq.at[dh, dw, :, :, 2 * dh:2 * dh + KSZ, 2 * dw:2 * dw + KSZ].set(w)
    w_all = wq.reshape(4 * C_OUT, PFEAT).astype(jnp.bfloat16)      # (64, 147)

    # fc1 weight: int8 per-hidden-unit quantization, stored K-innermost (lane-dense).
    w1 = params["w1"]                                              # (64, 57600)
    s1 = jnp.maximum(jnp.max(jnp.abs(w1), axis=1, keepdims=True), 1e-8) / 127.0
    w1q = jnp.clip(jnp.round(w1 / s1), -127, 127).astype(jnp.int8)  # (64, 57600)

    return dict(
        w_all=w_all,
        bc=params["bc"].reshape(C_OUT, 1).astype(jnp.float32),        # (16, 1)
        w1q=w1q,
        s1=s1.reshape(1, HIDDEN).astype(jnp.float32),                 # (1, 64)
        b1=params["b1"].reshape(1, HIDDEN).astype(jnp.float32),       # (1, 64)
        w2=params["w2"].reshape(1, HIDDEN).astype(jnp.float32),       # (1, 64)
        b2=params["b2"].reshape(1, 1).astype(jnp.float32),            # (1, 1)
    )


# ---- forward ------------------------------------------------------------------

def tumor_net_forward(x, fp):
    N = x.shape[0]
    p = _pool_window_patches(x)                                    # (N, 147, 3600) bf16
    pooled = conv_relu_pool(p, fp["w_all"], fp["bc"])              # (N, 16, 3600) bf16
    x_flat = pooled.reshape(N, FLAT)                               # torch.flatten order
    return fc_head(x_flat, fp["w1q"], fp["s1"], fp["b1"],
                   fp["w2"], fp["b2"])                             # (N, 1) f32


# ---- deterministic parameter init ----------------------------------------------

def init_params(key):
    ks = jax.random.split(key, 6)
    kfeat = C_IN * KSZ * KSZ
    return dict(
        wc=jax.random.normal(ks[0], (C_OUT, C_IN, KSZ, KSZ), jnp.float32) / jnp.sqrt(kfeat),
        bc=jax.random.normal(ks[1], (C_OUT,), jnp.float32) * 0.01,
        w1=jax.random.normal(ks[2], (HIDDEN, FLAT), jnp.float32) / jnp.sqrt(FLAT),
        b1=jax.random.normal(ks[3], (HIDDEN,), jnp.float32) * 0.01,
        w2=jax.random.normal(ks[4], (1, HIDDEN), jnp.float32) / jnp.sqrt(HIDDEN),
        b2=jax.random.normal(ks[5], (1,), jnp.float32) * 0.01,
    )


# ---- pure-JAX f32 reference (sanity check) --------------------------------------

def reference_forward(x, params):
    y = jax.lax.conv_general_dilated(
        x, params["wc"], window_strides=(STRIDE, STRIDE), padding="VALID",
        dimension_numbers=("NCHW", "OIHW", "NCHW"))
    y = jnp.maximum(y + params["bc"][None, :, None, None], 0.0)
    y = jax.lax.reduce_window(y, -jnp.inf, jax.lax.max,
                              (1, 1, 2, 2), (1, 1, 2, 2), "VALID")
    f = y.reshape(y.shape[0], -1)
    h = jnp.maximum(f @ params["w1"].T + params["b1"], 0.0)
    z = h @ params["w2"].T + params["b2"]
    return jax.nn.sigmoid(z)


if __name__ == "__main__":
    key = jax.random.PRNGKey(0)
    pkey, xkey = jax.random.split(key)
    params = init_params(pkey)
    fparams = prepare_params(params)        # one-time layout / bf16 / int8 prep

    # batch=2; spatial 243 is dictated by fc1.in_features = 16*60*60
    x = jax.random.normal(xkey, (2, C_IN, H_IN, H_IN), jnp.float32)

    fwd = jax.jit(tumor_net_forward)
    out = jax.block_until_ready(fwd(x, fparams))
    assert out.shape == (2, 1), out.shape

    ref = jax.block_until_ready(jax.jit(reference_forward)(x, params))
    assert jnp.allclose(out, ref, atol=2e-2, rtol=2e-2), (out, ref)

    print("KERNEL_OK")
</pallas_src>

<mosaic_0001>
module attributes {stable_mosaic.version = 11 : i64} {
  func.func @conv_relu_pool_kernel(%arg0: i32, %arg1: memref<1x147x3600xbf16, #tpu.memory_space<vmem>>, %arg2: memref<64x147xbf16, #tpu.memory_space<vmem>>, %arg3: memref<16x1xf32, #tpu.memory_space<vmem>>, %arg4: memref<1x16x3600xbf16, #tpu.memory_space<vmem>>) attributes {dimension_semantics = [#tpu.dimension_semantics<parallel>], iteration_bounds = array<i64: 2>, scalar_prefetch = 0 : i64, scratch_operands = 0 : i64, tpu.core_type = #tpu.core_type<tc>, window_params = [{transform_indices = @transform_0, window_bounds = array<i64: 1, 147, 3600>}, {pipeline_mode = #tpu.pipeline_mode<synchronous>, transform_indices = @transform_1, window_bounds = array<i64: 64, 147>}, {pipeline_mode = #tpu.pipeline_mode<synchronous>, transform_indices = @transform_2, window_bounds = array<i64: 16, 1>}, {transform_indices = @transform_3, window_bounds = array<i64: 1, 16, 3600>}]} {
    %c0 = arith.constant 0 : index
    %c0_0 = arith.constant 0 : index
    %0 = vector.load %arg2[%c0, %c0_0] : memref<64x147xbf16, #tpu.memory_space<vmem>>, vector<64x147xbf16>
    %c0_1 = arith.constant 0 : index
    %c0_2 = arith.constant 0 : index
    %c0_3 = arith.constant 0 : index
    %1 = vector.load %arg1[%c0_1, %c0_2, %c0_3] : memref<1x147x3600xbf16, #tpu.memory_space<vmem>>, vector<1x147x3600xbf16>
    %2 = vector.shape_cast %1 : vector<1x147x3600xbf16> to vector<147x3600xbf16>
    %cst = arith.constant dense<0.000000e+00> : vector<64x3600xf32>
    %3 = tpu.matmul %0, %2, %cst {dimension_numbers = #tpu.dot_dimension_numbers<[1], [0], [0], [1], [0, 0, 1, 1], [], []>} : vector<64x147xbf16>, vector<147x3600xbf16>, vector<64x3600xf32> -> vector<64x3600xf32>
    %4 = vector.extract_strided_slice %3 {offsets = [0, 0], sizes = [16, 3600], strides = [1, 1]} : vector<64x3600xf32> to vector<16x3600xf32>
    %5 = vector.extract_strided_slice %3 {offsets = [16, 0], sizes = [16, 3600], strides = [1, 1]} : vector<64x3600xf32> to vector<16x3600xf32>
    %6 = arith.maximumf %4, %5 : vector<16x3600xf32>
    %7 = vector.extract_strided_slice %3 {offsets = [32, 0], sizes = [16, 3600], strides = [1, 1]} : vector<64x3600xf32> to vector<16x3600xf32>
    %8 = vector.extract_strided_slice %3 {offsets = [48, 0], sizes = [16, 3600], strides = [1, 1]} : vector<64x3600xf32> to vector<16x3600xf32>
    %9 = arith.maximumf %7, %8 : vector<16x3600xf32>
    %10 = arith.maximumf %6, %9 : vector<16x3600xf32>
    %c0_4 = arith.constant 0 : index
    %c0_5 = arith.constant 0 : index
    %11 = vector.load %arg3[%c0_4, %c0_5] : memref<16x1xf32, #tpu.memory_space<vmem>>, vector<16x1xf32>
    %12 = vector.broadcast %11 : vector<16x1xf32> to vector<16x3600xf32>
    %13 = arith.addf %10, %12 : vector<16x3600xf32>
    %cst_6 = arith.constant 0.000000e+00 : f32
    %14 = vector.broadcast %cst_6 : f32 to vector<16x3600xf32>
    %15 = arith.maximumf %13, %14 : vector<16x3600xf32>
    %16 = arith.truncf %15 : vector<16x3600xf32> to vector<16x3600xbf16>
    %c0_7 = arith.constant 0 : index
    %c0_8 = arith.constant 0 : index
    %c0_9 = arith.constant 0 : index
    %17 = vector.load %arg4[%c0_7, %c0_8, %c0_9] : memref<1x16x3600xbf16, #tpu.memory_space<vmem>>, vector<1x16x3600xbf16>
    %18 = vector.shape_cast %17 : vector<1x16x3600xbf16> to vector<16x3600xbf16>
    %19 = vector.shape_cast %16 : vector<16x3600xbf16> to vector<1x16x3600xbf16>
    tpu.vector_store %arg4[%c0_7, %c0_8, %c0_9], %19 {strides = array<i32>} : memref<1x16x3600xbf16, #tpu.memory_space<vmem>>, vector<1x16x3600xbf16>,
    return
  }
  func.func @transform_0(%arg0: i32) -> (i32, i32, i32) {
    %c0_i32 = arith.constant 0 : i32
    %c0_i32_0 = arith.constant 0 : i32
    %c0_i32_1 = arith.constant 0 : i32
    return %arg0, %c0_i32, %c0_i32_0 : i32, i32, i32
  }
  func.func @transform_1(%arg0: i32) -> (i32, i32) {
    %c0_i32 = arith.constant 0 : i32
    %c0_i32_0 = arith.constant 0 : i32
    %c0_i32_1 = arith.constant 0 : i32
    return %c0_i32, %c0_i32_0 : i32, i32
  }
  func.func @transform_2(%arg0: i32) -> (i32, i32) {
    %c0_i32 = arith.constant 0 : i32
    %c0_i32_0 = arith.constant 0 : i32
    %c0_i32_1 = arith.constant 0 : i32
    return %c0_i32, %c0_i32_0 : i32, i32
  }
  func.func @transform_3(%arg0: i32) -> (i32, i32, i32) {
    %c0_i32 = arith.constant 0 : i32
    %c0_i32_0 = arith.constant 0 : i32
    %c0_i32_1 = arith.constant 0 : i32
    return %arg0, %c0_i32, %c0_i32_0 : i32, i32, i32
  }
}

module attributes {stable_mosaic.version = 11 : i64} {
  func.func @fc_kernel(%arg0: i32, %arg1: memref<2x19200xbf16, #tpu.memory_space<vmem>>, %arg2: memref<64x19200xi8, #tpu.memory_space<vmem>>, %arg3: memref<1x64xf32, #tpu.memory_space<vmem>>, %arg4: memref<1x64xf32, #tpu.memory_space<vmem>>, %arg5: memref<1x64xf32, #tpu.memory_space<vmem>>, %arg6: memref<1x1xf32, #tpu.memory_space<vmem>>, %arg7: memref<2x1xf32, #tpu.memory_space<vmem>>, %arg8: memref<2x64xf32, #tpu.memory_space<vmem>>) attributes {dimension_semantics = [#tpu.dimension_semantics<arbitrary>], iteration_bounds = array<i64: 3>, scalar_prefetch = 0 : i64, scratch_operands = 1 : i64, tpu.core_type = #tpu.core_type<tc>, window_params = [{transform_indices = @transform_0, window_bounds = array<i64: 2, 19200>}, {transform_indices = @transform_1, window_bounds = array<i64: 64, 19200>}, {pipeline_mode = #tpu.pipeline_mode<synchronous>, transform_indices = @transform_2, window_bounds = array<i64: 1, 64>}, {pipeline_mode = #tpu.pipeline_mode<synchronous>, transform_indices = @transform_3, window_bounds = array<i64: 1, 64>}, {pipeline_mode = #tpu.pipeline_mode<synchronous>, transform_indices = @transform_4, window_bounds = array<i64: 1, 64>}, {pipeline_mode = #tpu.pipeline_mode<synchronous>, transform_indices = @transform_5, window_bounds = array<i64: 1, 1>}, {pipeline_mode = #tpu.pipeline_mode<synchronous>, transform_indices = @transform_6, window_bounds = array<i64: 2, 1>}]} {
    %c0_i32 = arith.constant 0 : i32
    %0 = arith.cmpi eq, %arg0, %c0_i32 : i32
    %1 = arith.extui %0 : i1 to i32
    %c0_i32_0 = arith.constant 0 : i32
    %2 = arith.cmpi ne, %1, %c0_i32_0 : i32
    scf.if %2 {
      %cst_9 = arith.constant 0.000000e+00 : f32
      %14 = vector.broadcast %cst_9 : f32 to vector<2x64xf32>
      %c0_10 = arith.constant 0 : index
      %c0_11 = arith.constant 0 : index
      %15 = vector.load %arg8[%c0_10, %c0_11] : memref<2x64xf32, #tpu.memory_space<vmem>>, vector<2x64xf32>
      tpu.vector_store %arg8[%c0_10, %c0_11], %14 {strides = array<i32>} : memref<2x64xf32, #tpu.memory_space<vmem>>, vector<2x64xf32>,
    } else {
    }
    %c0 = arith.constant 0 : index
    %c0_1 = arith.constant 0 : index
    %3 = vector.load %arg2[%c0, %c0_1] : memref<64x19200xi8, #tpu.memory_space<vmem>>, vector<64x19200xi8>
    %4 = arith.sitofp %3 : vector<64x19200xi8> to vector<64x19200xf32>
    %5 = arith.truncf %4 : vector<64x19200xf32> to vector<64x19200xbf16>
    %c0_2 = arith.constant 0 : index
    %c0_3 = arith.constant 0 : index
    %6 = vector.load %arg8[%c0_2, %c0_3] : memref<2x64xf32, #tpu.memory_space<vmem>>, vector<2x64xf32>
    %c0_4 = arith.constant 0 : index
    %c0_5 = arith.constant 0 : index
    %7 = vector.load %arg1[%c0_4, %c0_5] : memref<2x19200xbf16, #tpu.memory_space<vmem>>, vector<2x19200xbf16>
    %cst = arith.constant dense<0.000000e+00> : vector<2x64xf32>
    %8 = tpu.matmul %7, %5, %cst {dimension_numbers = #tpu.dot_dimension_numbers<[1], [1], [0], [0], [0, 0, 1, 0], [], []>} : vector<2x19200xbf16>, vector<64x19200xbf16>, vector<2x64xf32> -> vector<2x64xf32>
    %9 = arith.addf %6, %8 : vector<2x64xf32>
    %c0_6 = arith.constant 0 : index
    %c0_7 = arith.constant 0 : index
    %10 = vector.load %arg8[%c0_6, %c0_7] : memref<2x64xf32, #tpu.memory_space<vmem>>, vector<2x64xf32>
    tpu.vector_store %arg8[%c0_6, %c0_7], %9 {strides = array<i32>} : memref<2x64xf32, #tpu.memory_space<vmem>>, vector<2x64xf32>,
    %c2_i32 = arith.constant 2 : i32
    %11 = arith.cmpi eq, %arg0, %c2_i32 : i32
    %12 = arith.extui %11 : i1 to i32
    %c0_i32_8 = arith.constant 0 : i32
    %13 = arith.cmpi ne, %12, %c0_i32_8 : i32
    scf.if %13 {
      %c0_9 = arith.constant 0 : index
      %c0_10 = arith.constant 0 : index
      %14 = vector.load %arg8[%c0_9, %c0_10] : memref<2x64xf32, #tpu.memory_space<vmem>>, vector<2x64xf32>
      %c0_11 = arith.constant 0 : index
      %c0_12 = arith.constant 0 : index
      %15 = vector.load %arg3[%c0_11, %c0_12] : memref<1x64xf32, #tpu.memory_space<vmem>>, vector<1x64xf32>
      %16 = vector.broadcast %15 : vector<1x64xf32> to vector<2x64xf32>
      %17 = arith.mulf %14, %16 : vector<2x64xf32>
      %c0_13 = arith.constant 0 : index
      %c0_14 = arith.constant 0 : index
      %18 = vector.load %arg4[%c0_13, %c0_14] : memref<1x64xf32, #tpu.memory_space<vmem>>, vector<1x64xf32>
      %19 = vector.broadcast %18 : vector<1x64xf32> to vector<2x64xf32>
      %20 = arith.addf %17, %19 : vector<2x64xf32>
      %cst_15 = arith.constant 0.000000e+00 : f32
      %21 = vector.broadcast %cst_15 : f32 to vector<2x64xf32>
      %22 = arith.maximumf %20, %21 : vector<2x64xf32>
      %c0_16 = arith.constant 0 : index
      %c0_17 = arith.constant 0 : index
      %23 = vector.load %arg5[%c0_16, %c0_17] : memref<1x64xf32, #tpu.memory_space<vmem>>, vector<1x64xf32>
      %24 = vector.broadcast %23 : vector<1x64xf32> to vector<2x64xf32>
      %25 = arith.mulf %22, %24 : vector<2x64xf32>
      %cst_18 = arith.constant dense<0.000000e+00> : vector<2xf32>
      %26 = vector.multi_reduction <add>, %25, %cst_18 [1] : vector<2x64xf32> to vector<2xf32>
      %27 = vector.shape_cast %26 : vector<2xf32> to vector<2x1xf32>
      %c0_19 = arith.constant 0 : index
      %c0_20 = arith.constant 0 : index
      %28 = vector.load %arg6[%c0_19, %c0_20] : memref<1x1xf32, #tpu.memory_space<vmem>>, vector<1x1xf32>
      %29 = vector.broadcast %28 : vector<1x1xf32> to vector<2x1xf32>
      %30 = arith.addf %27, %29 : vector<2x1xf32>
      %cst_21 = arith.constant 0.000000e+00 : f32
      %31 = vector.broadcast %cst_21 : f32 to vector<2x1xf32>
      %32 = arith.subf %31, %30 : vector<2x1xf32>
      %33 = math.exp %32 : vector<2x1xf32>
      %cst_22 = arith.constant 1.000000e+00 : f32
      %34 = vector.broadcast %cst_22 : f32 to vector<2x1xf32>
      %35 = arith.addf %34, %33 : vector<2x1xf32>
      %cst_23 = arith.constant 1.000000e+00 : f32
      %36 = vector.broadcast %cst_23 : f32 to vector<2x1xf32>
      %37 = arith.divf %36, %35 : vector<2x1xf32>
      %c0_24 = arith.constant 0 : index
      %c0_25 = arith.constant 0 : index
      %38 = vector.load %arg7[%c0_24, %c0_25] : memref<2x1xf32, #tpu.memory_space<vmem>>, vector<2x1xf32>
      tpu.vector_store %arg7[%c0_24, %c0_25], %37 {strides = array<i32>} : memref<2x1xf32, #tpu.memory_space<vmem>>, vector<2x1xf32>,
    } else {
    }
    return
  }
  func.func @transform_0(%arg0: i32) -> (i32, i32) {
    %c0_i32 = arith.constant 0 : i32
    %c0_i32_0 = arith.constant 0 : i32
    return %c0_i32, %arg0 : i32, i32
  }
  func.func @transform_1(%arg0: i32) -> (i32, i32) {
    %c0_i32 = arith.constant 0 : i32
    %c0_i32_0 = arith.constant 0 : i32
    return %c0_i32, %arg0 : i32, i32
  }
  func.func @transform_2(%arg0: i32) -> (i32, i32) {
    %c0_i32 = arith.constant 0 : i32
    %c0_i32_0 = arith.constant 0 : i32
    %c0_i32_1 = arith.constant 0 : i32
    return %c0_i32, %c0_i32_0 : i32, i32
  }
  func.func @transform_3(%arg0: i32) -> (i32, i32) {
    %c0_i32 = arith.constant 0 : i32
    %c0_i32_0 = arith.constant 0 : i32
    %c0_i32_1 = arith.constant 0 : i32
    return %c0_i32, %c0_i32_0 : i32, i32
  }
  func.func @transform_4(%arg0: i32) -> (i32, i32) {
    %c0_i32 = arith.constant 0 : i32
    %c0_i32_0 = arith.constant 0 : i32
    %c0_i32_1 = arith.constant 0 : i32
    return %c0_i32, %c0_i32_0 : i32, i32
  }
  func.func @transform_5(%arg0: i32) -> (i32, i32) {
    %c0_i32 = arith.constant 0 : i32
    %c0_i32_0 = arith.constant 0 : i32
    %c0_i32_1 = arith.constant 0 : i32
    return %c0_i32, %c0_i32_0 : i32, i32
  }
  func.func @transform_6(%arg0: i32) -> (i32, i32) {
    %c0_i32 = arith.constant 0 : i32
    %c0_i32_0 = arith.constant 0 : i32
    %c0_i32_1 = arith.constant 0 : i32
    return %c0_i32, %c0_i32_0 : i32, i32
  }
}

</mosaic_0001>

<bundles_post_ra>
// kernel: tumor_net_forward.2
= control target key start
LH: loop header
LB: loop body
LE: loop exit
PB: predicated region body
PF: predicated region fallthrough
CT: control target
= control target key end

     0   :  { %s4570_s12 = smov 0   ;;  %s5409_s0 = inlined_call_operand.vmem [shape: bf16[2,147,3600], index: 0, kind: input, shape index: {}]   ;;  %s5410_s1 = inlined_call_operand.vmem [shape: bf16[64,147], index: 1, kind: input, shape index: {}]   ;;  %s5411_s2 = inlined_call_operand.vmem [shape: f32[16,1], index: 2, kind: input, shape index: {}]   ;;  %s5412_s3 = inlined_call_operand.vmem [shape: bf16[2,16,3600], index: 3, kind: output, shape index: {}]  }
   0x1 LB: > { %s3643_s13 = sadd.s32 4294967295, %s4546_s12   ;;  %p3647_p0 = scmp.ge.s32.totalorder %s4546_s12, 1  ;;  %s4546_s12 = sphi %s4570_s12, %s13_s12  }
   0x2   : > { %p137_p1 = scmp.lt.s32.totalorder %s4546_s12, 3 }
   0x4   : > { %p138_p2 = pnand %p3647_p0, %p137_p1 }
   0x5   : > { %p161_p3 = scmp.lt.s32.totalorder (!%p138_p2), %s3643_s13, 1  ;;  %v4581_v0 = vld [vmem:[%s5410_s1 + $0x4] ss:$8 sps:$4 sm:$0xff] (!%p138_p2)   ;;  %vm1888_vm0 = vcmask (!%p138_p2), 154624   ;;  %v4548_v27 = vmov (!%p138_p2), 0   ;;  %vm1901_vm1 = vcmask (!%p138_p2), 1040384  }
   0x6   : > { %141 = sbr.rel (%p138_p2) target bundleno = 573 (0x23d), region = 32  ;;  %3948 = vmatprep.mubr.msk.bf16.mxu0 (!%p138_p2), %vm1888_vm0, %v4581_v0  ;;  %3952 = vmatprep.mubr.msk.bf16.mxu1 (!%p138_p2), %vm1888_vm0, %v4581_v0  ;;  %vm1902_vm2 = vcmask (!%p138_p2), 1041408   ;;  %v4549_v34 = vmov (!%p138_p2), 65535   ;;  %v4645_v53 = vld [vmem:[%s5410_s1] ss:$8 sps:$4 sm:$0xff] (!%p138_p2)   ;;  %vm3571_vm3 = vcmask (!%p138_p2), 125952  }
   0x7   : > { %4102 = vset.pattern.permute.xlu0 (!%p138_p2), %v4548_v27  ;;  %v1903_v35 = vsel (!%p138_p2), %vm1901_vm1, 4294967295, %v4549_v34  ;;  %v4654_v58 = vld [vmem:[%s5410_s1 + $0x14] ss:$8 sps:$4 sm:$0xff] (!%p138_p2)   ;;  %v4669_v63 = vld [vmem:[%s5410_s1 + $0x10] ss:$8 sps:$4 sm:$0xff] (!%p138_p2)  }
   0x8   : > { %v4632_v42 = vsel (!%p138_p2), %vm1902_vm2, %v1903_v35, 0 }
   0xd   : > { %s5414_s13 = smov (!%p161_p3, %s3643_s13), 1 }
   0xe   : > { %s4090_s16 = smul.u32 2204, %s5414_s13 }
   0xf   : > { %s4091_s30 = smul.u32 232, %s5414_s13 }
  0x10   : > { %s4593_s19 = scalar_lea.vmem %s5409_s0, %s4090_s16 }
  0x11   : > { %v4103_v1 = vld [vmem:[%s4593_s19 + $0x4] ss:$116 sps:$4 sm:$0xff]   ;;  %v4105_v2 = vld [vmem:[%s4593_s19 + $0xc] ss:$116 sps:$4 sm:$0xff]   ;;  %v4108_v4 = vld [vmem:[%s4593_s19 + $0x8] ss:$116 sps:$4 sm:$0xff]   ;;  %s5213_s5 = scalar_lea.vmem %s5412_s3, %s4091_s30 }
  0x12   : > { %1992 = vmatprep.subr.bf16.mxu0 %v4103_v1  ;;  %v4107_v3 = vld [vmem:[%s4593_s19] ss:$116 sps:$4 sm:$0xff]   ;;  %2065 = vmatprep.subr.bf16.mxu1 %v4105_v2  ;;  %v4113_v7 = vld [vmem:[%s4593_s19 + $0xe8] ss:$116 sps:$4 sm:$0xff]   ;;  %v4114_v8 = vld [vmem:[%s4593_s19 + $0xf0] ss:$116 sps:$4 sm:$0xff]  }
  0x13   : > { %v4109_v5 = vld [vmem:[%s4593_s19 + $0xec] ss:$116 sps:$4 sm:$0xff]   ;;  %1993 = vmatpush1.bf16.msra.mxu0 %v4107_v3  ;;  %2066 = vmatpush1.bf16.msra.mxu1 %v4108_v4  ;;  %v4111_v6 = vld [vmem:[%s4593_s19 + $0xf4] ss:$116 sps:$4 sm:$0xff]   ;;  %v4117_v10 = vld [vmem:[%s4593_s19 + $0x1dc] ss:$116 sps:$4 sm:$0xff]  }
  0x14   : > { %1994 = vmatprep.subr.bf16.mxu0 %v4109_v5  ;;  %2067 = vmatprep.subr.bf16.mxu1 %v4111_v6  ;;  %v4115_v9 = vld [vmem:[%s4593_s19 + $0x1d4] ss:$116 sps:$4 sm:$0xff]   ;;  %v4119_v11 = vld [vmem:[%s4593_s19 + $0x1d0] ss:$116 sps:$4 sm:$0xff]   ;;  %v4120_v12 = vld [vmem:[%s4593_s19 + $0x1d8] ss:$116 sps:$4 sm:$0xff]  }
  0x15   : > { %v4121_v13 = vld [vmem:[%s4593_s19 + $0x2bc] ss:$116 sps:$4 sm:$0xff]   ;;  %v4123_v14 = vld [vmem:[%s4593_s19 + $0x2c4] ss:$116 sps:$4 sm:$0xff]   ;;  %v4126_v16 = vld [vmem:[%s4593_s19 + $0x2c0] ss:$116 sps:$4 sm:$0xff]  }
  0x16   : > { %v4125_v15 = vld [vmem:[%s4593_s19 + $0x2b8] ss:$116 sps:$4 sm:$0xff]   ;;  %v4131_v19 = vld [vmem:[%s4593_s19 + $0x3a0] ss:$116 sps:$4 sm:$0xff]   ;;  %v4132_v20 = vld [vmem:[%s4593_s19 + $0x3a8] ss:$116 sps:$4 sm:$0xff]  }
  0x17   : > { %1995 = vmatpush1.bf16.msra.mxu0 %v4113_v7  ;;  %2068 = vmatpush1.bf16.msra.mxu1 %v4114_v8  ;;  %v4127_v17 = vld [vmem:[%s4593_s19 + $0x3a4] ss:$116 sps:$4 sm:$0xff]   ;;  %v4129_v18 = vld [vmem:[%s4593_s19 + $0x3ac] ss:$116 sps:$4 sm:$0xff]   ;;  %v4135_v22 = vld [vmem:[%s4593_s19 + $0x494] ss:$116 sps:$4 sm:$0xff]  }
  0x18   : > { %1996 = vmatprep.subr.bf16.mxu0 %v4115_v9  ;;  %2069 = vmatprep.subr.bf16.mxu1 %v4117_v10  ;;  %v4133_v21 = vld [vmem:[%s4593_s19 + $0x48c] ss:$116 sps:$4 sm:$0xff]   ;;  %v4137_v23 = vld [vmem:[%s4593_s19 + $0x488] ss:$116 sps:$4 sm:$0xff]   ;;  %v4138_v24 = vld [vmem:[%s4593_s19 + $0x490] ss:$116 sps:$4 sm:$0xff]  }
  0x19   : > { %v4139_v25 = vld [vmem:[%s4593_s19 + $0x574] ss:$116 sps:$4 sm:$0xff]   ;;  %v4141_v26 = vld [vmem:[%s4593_s19 + $0x57c] ss:$116 sps:$4 sm:$0xff]   ;;  %v4144_v29 = vld [vmem:[%s4593_s19 + $0x578] ss:$116 sps:$4 sm:$0xff]  }
  0x1a   : > { %v4143_v28 = vld [vmem:[%s4593_s19 + $0x570] ss:$116 sps:$4 sm:$0xff]   ;;  %v450_v32 = vld [vmem:[%s4593_s19 + $0x828] sm:$0x33]  ;;  %v4150_v37 = vld [vmem:[%s4593_s19 + $0x660] ss:$116 sps:$4 sm:$0xff]  }
  0x1b   : > { %1997 = vmatpush1.bf16.msra.mxu0 %v4119_v11  ;;  %2070 = vmatpush1.bf16.msra.mxu1 %v4120_v12  ;;  %v4145_v30 = vld [vmem:[%s4593_s19 + $0x65c] ss:$116 sps:$4 sm:$0xff]   ;;  %v4147_v31 = vld [vmem:[%s4593_s19 + $0x664] ss:$116 sps:$4 sm:$0xff]   ;;  %v4153_v39 = vld [vmem:[%s4593_s19 + $0x74c] ss:$116 sps:$4 sm:$0xff]   ;;  %v3920_v40 = vcombine.high %v450_v32, %v450_v32  ;;  %v3919_v45 = vcombine.low %v450_v32, %v450_v32 }
  0x1c   : > { %1998 = vmatprep.subr.bf16.mxu0 %v4121_v13  ;;  %2071 = vmatprep.subr.bf16.mxu1 %v4123_v14  ;;  %v451_v33 = vld [vmem:[%s4593_s19 + $0x830] sm:$0x33]  ;;  %v4149_v36 = vld [vmem:[%s4593_s19 + $0x658] ss:$116 sps:$4 sm:$0xff]   ;;  %v4156_v44 = vld [vmem:[%s4593_s19 + $0x748] ss:$116 sps:$4 sm:$0xff]  }
  0x1d   : > { %v4151_v38 = vld [vmem:[%s4593_s19 + $0x744] ss:$116 sps:$4 sm:$0xff]   ;;  %v3922_v41 = vcombine.high %v451_v33, %v451_v33  ;;  %v4155_v43 = vld [vmem:[%s4593_s19 + $0x740] ss:$116 sps:$4 sm:$0xff]   ;;  %v3921_v46 = vcombine.low %v451_v33, %v451_v33  ;;  %v1909_v47 = vand.u32 %v3920_v40, %v4632_v42  ;;  %v1906_v49 = vand.u32 %v3919_v45, %v4632_v42  ;;  %v4169_v52 = vld [vmem:[%s4593_s19 + $0x1c] ss:$116 sps:$4 sm:$0xff]  }
  0x1e   : > { %v4166_v51 = vld [vmem:[%s4593_s19 + $0x14] ss:$116 sps:$4 sm:$0xff]   ;;  %v4164_v54 = vld [vmem:[%s4593_s19 + $0x10] ss:$116 sps:$4 sm:$0xff]   ;;  %v4167_v55 = vld [vmem:[%s4593_s19 + $0x18] ss:$116 sps:$4 sm:$0xff]  }
  0x1f   : > { %1999 = vmatpush1.bf16.msra.mxu0 %v4125_v15  ;;  %2072 = vmatpush1.bf16.msra.mxu1 %v4126_v16  ;;  %v1915_v48 = vand.u32 %v3922_v41, %v4632_v42  ;;  %v1912_v50 = vand.u32 %v3921_v46, %v4632_v42  ;;  %v4172_v56 = vld [vmem:[%s4593_s19 + $0xfc] ss:$116 sps:$4 sm:$0xff]   ;;  %v4175_v57 = vld [vmem:[%s4593_s19 + $0x104] ss:$116 sps:$4 sm:$0xff]   ;;  %v4173_v60 = vld [vmem:[%s4593_s19 + $0x100] ss:$116 sps:$4 sm:$0xff]  }
  0x20   : > { %2000 = vmatprep.subr.bf16.mxu0 %v4127_v17  ;;  %2073 = vmatprep.subr.bf16.mxu1 %v4129_v18  ;;  %v4170_v59 = vld [vmem:[%s4593_s19 + $0xf8] ss:$116 sps:$4 sm:$0xff]   ;;  %v4179_v1 = vld [vmem:[%s4593_s19 + $0x1e0] ss:$116 sps:$4 sm:$0xff]   ;;  %v4182_v2 = vld [vmem:[%s4593_s19 + $0x1e8] ss:$116 sps:$4 sm:$0xff]  }
  0x21   : > { %v4181_v61 = vld [vmem:[%s4593_s19 + $0x1e4] ss:$116 sps:$4 sm:$0xff]   ;;  %v4184_v62 = vld [vmem:[%s4593_s19 + $0x1ec] ss:$116 sps:$4 sm:$0xff]   ;;  %v4190_v4 = vld [vmem:[%s4593_s19 + $0x2d4] ss:$116 sps:$4 sm:$0xff]  }
  0x22   : > { %v4187_v3 = vld [vmem:[%s4593_s19 + $0x2cc] ss:$116 sps:$4 sm:$0xff]   ;;  %v4185_v6 = vld [vmem:[%s4593_s19 + $0x2c8] ss:$116 sps:$4 sm:$0xff]   ;;  %v4188_v7 = vld [vmem:[%s4593_s19 + $0x2d0] ss:$116 sps:$4 sm:$0xff]  }
  0x23   : > { %2001 = vmatpush1.bf16.msra.mxu0 %v4131_v19  ;;  %2074 = vmatpush1.bf16.msra.mxu1 %v4132_v20  ;;  %v4678_v5 = vld [vmem:[%s5410_s1 + $0x24] ss:$8 sps:$4 sm:$0xff]   ;;  %v4196_v8 = vld [vmem:[%s4593_s19 + $0x3b4] ss:$116 sps:$4 sm:$0xff]   ;;  %v4199_v9 = vld [vmem:[%s4593_s19 + $0x3bc] ss:$116 sps:$4 sm:$0xff]  }
  0x24   : > { %2002 = vmatprep.subr.bf16.mxu0 %v4133_v21  ;;  %2075 = vmatprep.subr.bf16.mxu1 %v4135_v22  ;;  %v4693_v10 = vld [vmem:[%s5410_s1 + $0x20] ss:$8 sps:$4 sm:$0xff]   ;;  %v4194_v11 = vld [vmem:[%s4593_s19 + $0x3b0] ss:$116 sps:$4 sm:$0xff]   ;;  %v4197_v12 = vld [vmem:[%s4593_s19 + $0x3b8] ss:$116 sps:$4 sm:$0xff]  }
  0x25   : > { %v4202_v13 = vld [vmem:[%s4593_s19 + $0x49c] ss:$116 sps:$4 sm:$0xff]   ;;  %v4205_v14 = vld [vmem:[%s4593_s19 + $0x4a4] ss:$116 sps:$4 sm:$0xff]   ;;  %v4203_v17 = vld [vmem:[%s4593_s19 + $0x4a0] ss:$116 sps:$4 sm:$0xff]  }
  0x26   : > { %v4702_v15 = vld [vmem:[%s5410_s1 + $0x34] ss:$8 sps:$4 sm:$0xff]   ;;  %v4200_v16 = vld [vmem:[%s4593_s19 + $0x498] ss:$116 sps:$4 sm:$0xff]   ;;  %v4221_v34 = vld [vmem:[%s4593_s19 + $0x750] ss:$116 sps:$4 sm:$0xff]  }
  0x27   : > { %2003 = vmatpush1.bf16.msra.mxu0 %v4137_v23  ;;  %2076 = vmatpush1.bf16.msra.mxu1 %v4138_v24  ;;  %v4211_v18 = vld [vmem:[%s4593_s19 + $0x584] ss:$116 sps:$4 sm:$0xff]   ;;  %v4214_v19 = vld [vmem:[%s4593_s19 + $0x58c] ss:$116 sps:$4 sm:$0xff]   ;;  %v4212_v22 = vld [vmem:[%s4593_s19 + $0x588] ss:$116 sps:$4 sm:$0xff]  }
  0x28   : > { %2004 = vmatprep.subr.bf16.mxu0 %v4139_v25  ;;  %2077 = vmatprep.subr.bf16.mxu1 %v4141_v26  ;;  %v4717_v20 = vld [vmem:[%s5410_s1 + $0x30] ss:$8 sps:$4 sm:$0xff]   ;;  %v4209_v21 = vld [vmem:[%s4593_s19 + $0x580] ss:$116 sps:$4 sm:$0xff]   ;;  %v4234_v46 = vld [vmem:[%s4593_s19 + $0x28] ss:$116 sps:$4 sm:$0xff]  }
  0x29   : > { %v4217_v23 = vld [vmem:[%s4593_s19 + $0x66c] ss:$116 sps:$4 sm:$0xff]   ;;  %v4220_v24 = vld [vmem:[%s4593_s19 + $0x674] ss:$116 sps:$4 sm:$0xff]   ;;  %v452_v25 = vld [vmem:[%s4593_s19 + $0x838] sm:$0x33] }
  0x2a   : > { %v453_v26 = vld [vmem:[%s4593_s19 + $0x840] sm:$0x33]  ;;  %v3924_v32 = vcombine.high %v452_v25, %v452_v25  ;;  %v4224_v35 = vld [vmem:[%s4593_s19 + $0x758] ss:$116 sps:$4 sm:$0xff]  }
  0x2b   : > { %2005 = vmatpush1.bf16.msra.mxu0 %v4143_v28  ;;  %2078 = vmatpush1.bf16.msra.mxu1 %v4144_v29  ;;  %v4215_v28 = vld [vmem:[%s4593_s19 + $0x668] ss:$116 sps:$4 sm:$0xff]   ;;  %v4218_v29 = vld [vmem:[%s4593_s19 + $0x670] ss:$116 sps:$4 sm:$0xff]   ;;  %v3926_v33 = vcombine.high %v453_v26, %v453_v26  ;;  %v4231_v45 = vld [vmem:[%s4593_s19 + $0x20] ss:$116 sps:$4 sm:$0xff]  }
  0x2c   : > { %2006 = vmatprep.subr.bf16.mxu0 %v4145_v30  ;;  %2079 = vmatprep.subr.bf16.mxu1 %v4147_v31  ;;  %v4223_v30 = vld [vmem:[%s4593_s19 + $0x754] ss:$116 sps:$4 sm:$0xff]   ;;  %v4226_v31 = vld [vmem:[%s4593_s19 + $0x75c] ss:$116 sps:$4 sm:$0xff]  }
  0x2f   : > { %2007 = vmatpush1.bf16.msra.mxu0 %v4149_v36  ;;  %2080 = vmatpush1.bf16.msra.mxu1 %v4150_v37  ;;  %v3923_v36 = vcombine.low %v452_v25, %v452_v25  ;;  %v3925_v37 = vcombine.low %v453_v26, %v453_v26 }
  0x30   : > { %2008 = vmatprep.subr.bf16.mxu0 %v4151_v38  ;;  %2081 = vmatprep.subr.bf16.mxu1 %v4153_v39  ;;  %v1921_v38 = vand.u32 %v3924_v32, %v4632_v42  ;;  %v1927_v39 = vand.u32 %v3926_v33, %v4632_v42 }
  0x31   : > { %v1918_v40 = vand.u32 %v3923_v36, %v4632_v42  ;;  %v1924_v41 = vand.u32 %v3925_v37, %v4632_v42  ;;  %v4294_v36 = vld [vmem:[%s4593_s19 + $0x3c] ss:$116 sps:$4 sm:$0xff]  }
  0x32   : > { %v4289_v37 = vld [vmem:[%s4593_s19 + $0x30] ss:$116 sps:$4 sm:$0xff]  }
  0x33   : > { %2009 = vmatpush1.bf16.msra.mxu0 %v4155_v43  ;;  %2082 = vmatpush1.bf16.msra.mxu1 %v4156_v44  ;;  %v4233_v43 = vld [vmem:[%s4593_s19 + $0x24] ss:$116 sps:$4 sm:$0xff]   ;;  %v4236_v44 = vld [vmem:[%s4593_s19 + $0x2c] ss:$116 sps:$4 sm:$0xff]  }
  0x34   : > { %2010 = vmatprep.subr.bf16.mxu0 %v1909_v47  ;;  %2083 = vmatprep.subr.bf16.mxu1 %v1915_v48  ;;  %v4239_v47 = vld [vmem:[%s4593_s19 + $0x10c] ss:$116 sps:$4 sm:$0xff]   ;;  %v4242_v48 = vld [vmem:[%s4593_s19 + $0x114] ss:$116 sps:$4 sm:$0xff]  }
  0x37   : > { %2011 = vmatpush1.bf16.msra.mxu0 %v1906_v49  ;;  %2084 = vmatpush1.bf16.msra.mxu1 %v1912_v50  ;;  %v4237_v49 = vld [vmem:[%s4593_s19 + $0x108] ss:$116 sps:$4 sm:$0xff]   ;;  %v4240_v50 = vld [vmem:[%s4593_s19 + $0x110] ss:$116 sps:$4 sm:$0xff]  }
  0x38   : > { %2138 = vmatprep.subr.bf16.mxu0 %v4166_v51  ;;  %2211 = vmatprep.subr.bf16.mxu1 %v4169_v52  ;;  %v4245_v51 = vld [vmem:[%s4593_s19 + $0x1f4] ss:$116 sps:$4 sm:$0xff]   ;;  %v4248_v52 = vld [vmem:[%s4593_s19 + $0x1fc] ss:$116 sps:$4 sm:$0xff]  }
  0x3a   : > { %2025 = vmatmul.mubr.bf16.vlgmr.msra.gmra.mrb[0].mxu0 %v4645_v53  ;;  %2098 = vmatmul.mubr.bf16.vlgmr.msra.gmra.mrb[0].mxu1 %v4645_v53 }
  0x3b   : > { %2139 = vmatpush1.bf16.msra.mxu0 %v4164_v54  ;;  %2212 = vmatpush1.bf16.msra.mxu1 %v4167_v55  ;;  %v4243_v54 = vld [vmem:[%s4593_s19 + $0x1f0] ss:$116 sps:$4 sm:$0xff]   ;;  %v4246_v55 = vld [vmem:[%s4593_s19 + $0x1f8] ss:$116 sps:$4 sm:$0xff]  }
  0x3c   : > { %2140 = vmatprep.subr.bf16.mxu0 %v4172_v56  ;;  %2213 = vmatprep.subr.bf16.mxu1 %v4175_v57  ;;  %v4251_v56 = vld [vmem:[%s4593_s19 + $0x2dc] ss:$116 sps:$4 sm:$0xff]   ;;  %v4254_v57 = vld [vmem:[%s4593_s19 + $0x2e4] ss:$116 sps:$4 sm:$0xff]  }
  0x3d   : > { %3949 = vmatprep.mubr.msk.bf16.mxu0 %vm1888_vm0, %v4654_v58  ;;  %3953 = vmatprep.mubr.msk.bf16.mxu1 %vm1888_vm0, %v4654_v58 }
  0x3f   : > { %2141 = vmatpush1.bf16.msra.mxu0 %v4170_v59  ;;  %2214 = vmatpush1.bf16.msra.mxu1 %v4173_v60  ;;  %v4249_v59 = vld [vmem:[%s4593_s19 + $0x2d8] ss:$116 sps:$4 sm:$0xff]   ;;  %v4252_v60 = vld [vmem:[%s4593_s19 + $0x2e0] ss:$116 sps:$4 sm:$0xff]  }
  0x40   : > { %2142 = vmatprep.subr.bf16.mxu0 %v4181_v61  ;;  %2215 = vmatprep.subr.bf16.mxu1 %v4184_v62  ;;  %v4257_v61 = vld [vmem:[%s4593_s19 + $0x3c4] ss:$116 sps:$4 sm:$0xff]   ;;  %v4260_v62 = vld [vmem:[%s4593_s19 + $0x3cc] ss:$116 sps:$4 sm:$0xff]  }
  0x42   : > { %2035 = vmatmul.mubr.bf16.gmra.mrb[4].mxu0 %v4669_v63  ;;  %2108 = vmatmul.mubr.bf16.gmra.mrb[4].mxu1 %v4669_v63 }
  0x43   : > { %2143 = vmatpush1.bf16.msra.mxu0 %v4179_v1  ;;  %2216 = vmatpush1.bf16.msra.mxu1 %v4182_v2  ;;  %v4255_v1 = vld [vmem:[%s4593_s19 + $0x3c0] ss:$116 sps:$4 sm:$0xff]  }
  0x44   : > { %2144 = vmatprep.subr.bf16.mxu0 %v4187_v3  ;;  %2217 = vmatprep.subr.bf16.mxu1 %v4190_v4  ;;  %v3253_v2 = vld [vmem:[%s5411_s2] sm:$0xff]  ;;  %v4258_v3 = vld [vmem:[%s4593_s19 + $0x3c8] ss:$116 sps:$4 sm:$0xff]  }
  0x45   : > { %3950 = vmatprep.mubr.msk.bf16.mxu0 %vm1888_vm0, %v4678_v5  ;;  %3954 = vmatprep.mubr.msk.bf16.mxu1 %vm1888_vm0, %v4678_v5  ;;  %v4263_v4 = vld [vmem:[%s4593_s19 + $0x4ac] ss:$116 sps:$4 sm:$0xff]  }
  0x46   : > { %3257 = vperm.xlu0 %4102, %v3253_v2   ;;  %v4325_v2 = vld [vmem:[%s4593_s19 + $0x5a0] ss:$116 sps:$4 sm:$0xff]  }
  0x47   : > { %2145 = vmatpush1.bf16.msra.mxu0 %v4185_v6  ;;  %2218 = vmatpush1.bf16.msra.mxu1 %v4188_v7  ;;  %v4266_v6 = vld [vmem:[%s4593_s19 + $0x4b4] ss:$116 sps:$4 sm:$0xff]  }
  0x48   : > { %2146 = vmatprep.subr.bf16.mxu0 %v4196_v8  ;;  %2219 = vmatprep.subr.bf16.mxu1 %v4199_v9  ;;  %v4261_v7 = vld [vmem:[%s4593_s19 + $0x4a8] ss:$116 sps:$4 sm:$0xff]   ;;  %v4264_v8 = vld [vmem:[%s4593_s19 + $0x4b0] ss:$116 sps:$4 sm:$0xff]  }
  0x49   : > { %v3254_v9 = vld [vmem:[%s5411_s2 + $0x8] sm:$0xff] }
  0x4a   : > { %2045 = vmatmul.mubr.bf16.gmra.mrb[8].mxu0 %v4693_v10  ;;  %2118 = vmatmul.mubr.bf16.gmra.mrb[8].mxu1 %v4693_v10 }
  0x4b   : > { %2147 = vmatpush1.bf16.msra.mxu0 %v4194_v11  ;;  %2220 = vmatpush1.bf16.msra.mxu1 %v4197_v12  ;;  %v4269_v11 = vld [vmem:[%s4593_s19 + $0x594] ss:$116 sps:$4 sm:$0xff]   ;;  %v4272_v12 = vld [vmem:[%s4593_s19 + $0x59c] ss:$116 sps:$4 sm:$0xff]  }
  0x4c   : > { %2148 = vmatprep.subr.bf16.mxu0 %v4202_v13  ;;  %2221 = vmatprep.subr.bf16.mxu1 %v4205_v14  ;;  %v4267_v13 = vld [vmem:[%s4593_s19 + $0x590] ss:$116 sps:$4 sm:$0xff]   ;;  %v4270_v14 = vld [vmem:[%s4593_s19 + $0x598] ss:$116 sps:$4 sm:$0xff]  }
  0x4d   : > { %3951 = vmatprep.mubr.msk.bf16.mxu0 %vm1888_vm0, %v4702_v15  ;;  %3955 = vmatprep.mubr.msk.bf16.mxu1 %vm1888_vm0, %v4702_v15 }
  0x4e   : > { %3262 = vperm.xlu0 %4102, %v3254_v9   ;;  %v4331_v9 = vld [vmem:[%s4593_s19 + $0x688] ss:$116 sps:$4 sm:$0xff]  }
  0x4f   : > { %2149 = vmatpush1.bf16.msra.mxu0 %v4200_v16  ;;  %2222 = vmatpush1.bf16.msra.mxu1 %v4203_v17  ;;  %v4275_v16 = vld [vmem:[%s4593_s19 + $0x67c] ss:$116 sps:$4 sm:$0xff]   ;;  %v4278_v17 = vld [vmem:[%s4593_s19 + $0x684] ss:$116 sps:$4 sm:$0xff]  }
  0x50   : > { %2150 = vmatprep.subr.bf16.mxu0 %v4211_v18  ;;  %2223 = vmatprep.subr.bf16.mxu1 %v4214_v19  ;;  %v454_v18 = vld [vmem:[%s4593_s19 + $0x848] sm:$0x33]  ;;  %v455_v19 = vld [vmem:[%s4593_s19 + $0x850] sm:$0x33] }
  0x51   : > { %v3928_v25 = vcombine.high %v454_v18, %v454_v18  ;;  %v3930_v26 = vcombine.high %v455_v19, %v455_v19 }
  0x52   : > { %2055 = vmatmul.mubr.bf16.gmra.mrb[12].mxu0 %v4717_v20  ;;  %2128 = vmatmul.mubr.bf16.gmra.mrb[12].mxu1 %v4717_v20 }
  0x53   : > { %2151 = vmatpush1.bf16.msra.mxu0 %v4209_v21  ;;  %2224 = vmatpush1.bf16.msra.mxu1 %v4212_v22  ;;  %v4273_v21 = vld [vmem:[%s4593_s19 + $0x678] ss:$116 sps:$4 sm:$0xff]   ;;  %v4276_v22 = vld [vmem:[%s4593_s19 + $0x680] ss:$116 sps:$4 sm:$0xff]   ;;  %v1933_v32 = vand.u32 %v3928_v25, %v4632_v42  ;;  %v1939_v33 = vand.u32 %v3930_v26, %v4632_v42 }
  0x54   : > { %2152 = vmatprep.subr.bf16.mxu0 %v4217_v23  ;;  %2225 = vmatprep.subr.bf16.mxu1 %v4220_v24  ;;  %v4281_v23 = vld [vmem:[%s4593_s19 + $0x764] ss:$116 sps:$4 sm:$0xff]   ;;  %v4284_v24 = vld [vmem:[%s4593_s19 + $0x76c] ss:$116 sps:$4 sm:$0xff]  }
  0x55   : > { %3956 = vmatprep.mubr.msk.bf16.mxu0 %vm1888_vm0, %v4581_v0  ;;  %3960 = vmatprep.mubr.msk.bf16.mxu1 %vm1888_vm0, %v4581_v0 }
  0x57   : > { %2153 = vmatpush1.bf16.msra.mxu0 %v4215_v28  ;;  %2226 = vmatpush1.bf16.msra.mxu1 %v4218_v29  ;;  %v4279_v28 = vld [vmem:[%s4593_s19 + $0x760] ss:$116 sps:$4 sm:$0xff]   ;;  %v4282_v29 = vld [vmem:[%s4593_s19 + $0x768] ss:$116 sps:$4 sm:$0xff]  }
  0x58   : > { %2154 = vmatprep.subr.bf16.mxu0 %v4223_v30  ;;  %2227 = vmatprep.subr.bf16.mxu1 %v4226_v31  ;;  %v3927_v30 = vcombine.low %v454_v18, %v454_v18  ;;  %v3929_v31 = vcombine.low %v455_v19, %v455_v19  ;;  %v4337_v18 = vld [vmem:[%s4593_s19 + $0x770] ss:$116 sps:$4 sm:$0xff]   ;;  %v4340_v19 = vld [vmem:[%s4593_s19 + $0x778] ss:$116 sps:$4 sm:$0xff]  }
  0x5b   : > { %2155 = vmatpush1.bf16.msra.mxu0 %v4221_v34  ;;  %2228 = vmatpush1.bf16.msra.mxu1 %v4224_v35  ;;  %v1936_v34 = vand.u32 %v3929_v31, %v4632_v42  ;;  %v4291_v35 = vld [vmem:[%s4593_s19 + $0x34] ss:$116 sps:$4 sm:$0xff]  }
  0x5c   : > { %2156 = vmatprep.subr.bf16.mxu0 %v1921_v38  ;;  %2229 = vmatprep.subr.bf16.mxu1 %v1927_v39  ;;  %v4292_v38 = vld [vmem:[%s4593_s19 + $0x38] ss:$116 sps:$4 sm:$0xff]   ;;  %v4297_v39 = vld [vmem:[%s4593_s19 + $0x11c] ss:$116 sps:$4 sm:$0xff]  }
  0x5d   : > { %v4350_v31 = vld [vmem:[%s4593_s19 + $0x48] ss:$116 sps:$4 sm:$0xff]  }
  0x5f   : > { %2157 = vmatpush1.bf16.msra.mxu0 %v1918_v40  ;;  %2230 = vmatpush1.bf16.msra.mxu1 %v1924_v41  ;;  %v4300_v40 = vld [vmem:[%s4593_s19 + $0x124] ss:$116 sps:$4 sm:$0xff]  }
  0x60   : > { %2284 = vmatprep.subr.bf16.mxu0 %v4233_v43  ;;  %2357 = vmatprep.subr.bf16.mxu1 %v4236_v44  ;;  %v4295_v41 = vld [vmem:[%s4593_s19 + $0x118] ss:$116 sps:$4 sm:$0xff]   ;;  %v4298_v43 = vld [vmem:[%s4593_s19 + $0x120] ss:$116 sps:$4 sm:$0xff]  }
  0x61   : > { %v4303_v44 = vld [vmem:[%s4593_s19 + $0x204] ss:$116 sps:$4 sm:$0xff]  }
  0x62   : > { %2171 = vmatmul.mubr.bf16.vlgmr.msra.gmra.mrb[16].mxu0 %v4645_v53  ;;  %2244 = vmatmul.mubr.bf16.vlgmr.msra.gmra.mrb[16].mxu1 %v4645_v53 }
  0x63   : > { %2285 = vmatpush1.bf16.msra.mxu0 %v4231_v45  ;;  %2358 = vmatpush1.bf16.msra.mxu1 %v4234_v46  ;;  %v4306_v45 = vld [vmem:[%s4593_s19 + $0x20c] ss:$116 sps:$4 sm:$0xff]  }
  0x64   : > { %2286 = vmatprep.subr.bf16.mxu0 %v4239_v47  ;;  %2359 = vmatprep.subr.bf16.mxu1 %v4242_v48  ;;  %v4301_v46 = vld [vmem:[%s4593_s19 + $0x200] ss:$116 sps:$4 sm:$0xff]   ;;  %v4304_v47 = vld [vmem:[%s4593_s19 + $0x208] ss:$116 sps:$4 sm:$0xff]  }
  0x65   : > { %3957 = vmatprep.mubr.msk.bf16.mxu0 %vm1888_vm0, %v4654_v58  ;;  %3961 = vmatprep.mubr.msk.bf16.mxu1 %vm1888_vm0, %v4654_v58  ;;  %v4309_v48 = vld [vmem:[%s4593_s19 + $0x2ec] ss:$116 sps:$4 sm:$0xff]  }
  0x67   : > { %2287 = vmatpush1.bf16.msra.mxu0 %v4237_v49  ;;  %2360 = vmatpush1.bf16.msra.mxu1 %v4240_v50  ;;  %v4312_v49 = vld [vmem:[%s4593_s19 + $0x2f4] ss:$116 sps:$4 sm:$0xff]  }
  0x68   : > { %2288 = vmatprep.subr.bf16.mxu0 %v4245_v51  ;;  %2361 = vmatprep.subr.bf16.mxu1 %v4248_v52  ;;  %v4307_v50 = vld [vmem:[%s4593_s19 + $0x2e8] ss:$116 sps:$4 sm:$0xff]   ;;  %v4310_v51 = vld [vmem:[%s4593_s19 + $0x2f0] ss:$116 sps:$4 sm:$0xff]  }
  0x69   : > { %v4315_v52 = vld [vmem:[%s4593_s19 + $0x3d4] ss:$116 sps:$4 sm:$0xff]  }
  0x6a   : > { %2181 = vmatmul.mubr.bf16.gmra.mrb[20].mxu0 %v4669_v63  ;;  %2254 = vmatmul.mubr.bf16.gmra.mrb[20].mxu1 %v4669_v63 }
  0x6b   : > { %2289 = vmatpush1.bf16.msra.mxu0 %v4243_v54  ;;  %2362 = vmatpush1.bf16.msra.mxu1 %v4246_v55  ;;  %v4318_v54 = vld [vmem:[%s4593_s19 + $0x3dc] ss:$116 sps:$4 sm:$0xff]  }
  0x6c   : > { %2290 = vmatprep.subr.bf16.mxu0 %v4251_v56  ;;  %2363 = vmatprep.subr.bf16.mxu1 %v4254_v57  ;;  %v4313_v55 = vld [vmem:[%s4593_s19 + $0x3d0] ss:$116 sps:$4 sm:$0xff]   ;;  %v4316_v56 = vld [vmem:[%s4593_s19 + $0x3d8] ss:$116 sps:$4 sm:$0xff]  }
  0x6d   : > { %3958 = vmatprep.mubr.msk.bf16.mxu0 %vm1888_vm0, %v4678_v5  ;;  %3962 = vmatprep.mubr.msk.bf16.mxu1 %vm1888_vm0, %v4678_v5  ;;  %v4321_v57 = vld [vmem:[%s4593_s19 + $0x4bc] ss:$116 sps:$4 sm:$0xff]  }
  0x6f   : > { %2291 = vmatpush1.bf16.msra.mxu0 %v4249_v59  ;;  %2364 = vmatpush1.bf16.msra.mxu1 %v4252_v60  ;;  %v4324_v59 = vld [vmem:[%s4593_s19 + $0x4c4] ss:$116 sps:$4 sm:$0xff]  }
  0x70   : > { %2292 = vmatprep.subr.bf16.mxu0 %v4257_v61  ;;  %2365 = vmatprep.subr.bf16.mxu1 %v4260_v62  ;;  %v4319_v60 = vld [vmem:[%s4593_s19 + $0x4b8] ss:$116 sps:$4 sm:$0xff]   ;;  %v4322_v61 = vld [vmem:[%s4593_s19 + $0x4c0] ss:$116 sps:$4 sm:$0xff]  }
  0x71   : > { %v4327_v62 = vld [vmem:[%s4593_s19 + $0x5a4] ss:$116 sps:$4 sm:$0xff]  }
  0x72   : > { %2191 = vmatmul.mubr.bf16.gmra.mrb[24].mxu0 %v4693_v10  ;;  %2264 = vmatmul.mubr.bf16.gmra.mrb[24].mxu1 %v4693_v10 }
  0x73   : > { %2293 = vmatpush1.bf16.msra.mxu0 %v4255_v1  ;;  %2366 = vmatpush1.bf16.msra.mxu1 %v4258_v3  ;;  %v4330_v1 = vld [vmem:[%s4593_s19 + $0x5ac] ss:$116 sps:$4 sm:$0xff]   ;;  %v4328_v3 = vld [vmem:[%s4593_s19 + $0x5a8] ss:$116 sps:$4 sm:$0xff]  }
  0x74   : > { %2294 = vmatprep.subr.bf16.mxu0 %v4263_v4  ;;  %2367 = vmatprep.subr.bf16.mxu1 %v4266_v6  ;;  %v4333_v4 = vld [vmem:[%s4593_s19 + $0x68c] ss:$116 sps:$4 sm:$0xff]   ;;  %v4336_v6 = vld [vmem:[%s4593_s19 + $0x694] ss:$116 sps:$4 sm:$0xff]  }
  0x75   : > { %3959 = vmatprep.mubr.msk.bf16.mxu0 %vm1888_vm0, %v4702_v15  ;;  %3963 = vmatprep.mubr.msk.bf16.mxu1 %vm1888_vm0, %v4702_v15 }
  0x77   : > { %2295 = vmatpush1.bf16.msra.mxu0 %v4261_v7  ;;  %2368 = vmatpush1.bf16.msra.mxu1 %v4264_v8  ;;  %v456_v7 = vld [vmem:[%s4593_s19 + $0x858] sm:$0x33]  ;;  %v457_v8 = vld [vmem:[%s4593_s19 + $0x860] sm:$0x33] }
  0x78   : > { %2296 = vmatprep.subr.bf16.mxu0 %v4269_v11  ;;  %2369 = vmatprep.subr.bf16.mxu1 %v4272_v12  ;;  %v4334_v11 = vld [vmem:[%s4593_s19 + $0x690] ss:$116 sps:$4 sm:$0xff]   ;;  %v4339_v12 = vld [vmem:[%s4593_s19 + $0x774] ss:$116 sps:$4 sm:$0xff]  }
  0x7a   : > { %2201 = vmatmul.mubr.bf16.gmra.mrb[28].mxu0 %v4717_v20  ;;  %2274 = vmatmul.mubr.bf16.gmra.mrb[28].mxu1 %v4717_v20 }
  0x7b   : > { %2297 = vmatpush1.bf16.msra.mxu0 %v4267_v13  ;;  %2370 = vmatpush1.bf16.msra.mxu1 %v4270_v14  ;;  %v4342_v13 = vld [vmem:[%s4593_s19 + $0x77c] ss:$116 sps:$4 sm:$0xff]   ;;  %v3932_v14 = vcombine.high %v456_v7, %v456_v7 }
  0x7c   : > { %2298 = vmatprep.subr.bf16.mxu0 %v4275_v16  ;;  %2371 = vmatprep.subr.bf16.mxu1 %v4278_v17  ;;  %v3934_v16 = vcombine.high %v457_v8, %v457_v8  ;;  %v4872_v17 = vld [vmem:[%s5410_s1 + $0x4] ss:$8 sps:$4 sm:$0xff]  }
  0x7d   : > { %3964 = vmatprep.mubr.msk.bf16.mxu0 %vm1888_vm0, %v4581_v0  ;;  %3968 = vmatprep.mubr.msk.bf16.mxu1 %vm1888_vm0, %v4581_v0  ;;  %v1930_v0 = vand.u32 %v3927_v30, %v4632_v42  ;;  %v4347_v30 = vld [vmem:[%s4593_s19 + $0x40] ss:$116 sps:$4 sm:$0xff]  }
  0x7f   : > { %2299 = vmatpush1.bf16.msra.mxu0 %v4273_v21  ;;  %2372 = vmatpush1.bf16.msra.mxu1 %v4276_v22  ;;  %v3931_v21 = vcombine.low %v456_v7, %v456_v7  ;;  %v3933_v22 = vcombine.low %v457_v8, %v457_v8  ;;  %v4407_v8 = vld [vmem:[%s4593_s19 + $0x54] ss:$116 sps:$4 sm:$0xff]  }
  0x80   : > { %2300 = vmatprep.subr.bf16.mxu0 %v4281_v23  ;;  %2373 = vmatprep.subr.bf16.mxu1 %v4284_v24  ;;  %v1945_v23 = vand.u32 %v3932_v14, %v4632_v42  ;;  %v1951_v24 = vand.u32 %v3934_v16, %v4632_v42  ;;  %v4416_v14 = vld [vmem:[%s4593_s19 + $0x144] ss:$116 sps:$4 sm:$0xff]   ;;  %v4959_v16 = vld [vmem:[%s5410_s1] ss:$8 sps:$4 sm:$0xff]  }
  0x81   : > { %v1942_v25 = vand.u32 %v3931_v21, %v4632_v42  ;;  %v1948_v26 = vand.u32 %v3933_v22, %v4632_v42  ;;  %v4419_v21 = vld [vmem:[%s4593_s19 + $0x224] ss:$116 sps:$4 sm:$0xff]   ;;  %v4422_v22 = vld [vmem:[%s4593_s19 + $0x22c] ss:$116 sps:$4 sm:$0xff]  }
  0x83   : > { %2301 = vmatpush1.bf16.msra.mxu0 %v4279_v28  ;;  %2374 = vmatpush1.bf16.msra.mxu1 %v4282_v29  ;;  %v4349_v28 = vld [vmem:[%s4593_s19 + $0x44] ss:$116 sps:$4 sm:$0xff]   ;;  %v4352_v29 = vld [vmem:[%s4593_s19 + $0x4c] ss:$116 sps:$4 sm:$0xff]  }
  0x84   : > { %2302 = vmatprep.subr.bf16.mxu0 %v1933_v32  ;;  %2375 = vmatprep.subr.bf16.mxu1 %v1939_v33  ;;  %v4355_v32 = vld [vmem:[%s4593_s19 + $0x12c] ss:$116 sps:$4 sm:$0xff]   ;;  %v4358_v33 = vld [vmem:[%s4593_s19 + $0x134] ss:$116 sps:$4 sm:$0xff]  }
  0x87   : > { %2303 = vmatpush1.bf16.msra.mxu0 %v1930_v0  ;;  %2376 = vmatpush1.bf16.msra.mxu1 %v1936_v34  ;;  %v4353_v0 = vld [vmem:[%s4593_s19 + $0x128] ss:$116 sps:$4 sm:$0xff]   ;;  %v4356_v34 = vld [vmem:[%s4593_s19 + $0x130] ss:$116 sps:$4 sm:$0xff]  }
  0x88   : > { %2430 = vmatprep.subr.bf16.mxu0 %v4291_v35  ;;  %2503 = vmatprep.subr.bf16.mxu1 %v4294_v36  ;;  %v4361_v35 = vld [vmem:[%s4593_s19 + $0x214] ss:$116 sps:$4 sm:$0xff]   ;;  %v4364_v36 = vld [vmem:[%s4593_s19 + $0x21c] ss:$116 sps:$4 sm:$0xff]  }
  0x8a   : > { %2317 = vmatmul.mubr.bf16.vlgmr.msra.gmra.mrb[32].mxu0 %v4645_v53  ;;  %2390 = vmatmul.mubr.bf16.vlgmr.msra.gmra.mrb[32].mxu1 %v4645_v53 }
  0x8b   : > { %2431 = vmatpush1.bf16.msra.mxu0 %v4289_v37  ;;  %2504 = vmatpush1.bf16.msra.mxu1 %v4292_v38  ;;  %v4362_v37 = vld [vmem:[%s4593_s19 + $0x218] ss:$116 sps:$4 sm:$0xff]   ;;  %v4367_v38 = vld [vmem:[%s4593_s19 + $0x2fc] ss:$116 sps:$4 sm:$0xff]  }
  0x8c   : > { %2432 = vmatprep.subr.bf16.mxu0 %v4297_v39  ;;  %2505 = vmatprep.subr.bf16.mxu1 %v4300_v40  ;;  %v4370_v39 = vld [vmem:[%s4593_s19 + $0x304] ss:$116 sps:$4 sm:$0xff]   ;;  %v4368_v40 = vld [vmem:[%s4593_s19 + $0x300] ss:$116 sps:$4 sm:$0xff]  }
  0x8d   : > { %3965 = vmatprep.mubr.msk.bf16.mxu0 %vm1888_vm0, %v4654_v58  ;;  %3969 = vmatprep.mubr.msk.bf16.mxu1 %vm1888_vm0, %v4654_v58 }
  0x8f   : > { %2433 = vmatpush1.bf16.msra.mxu0 %v4295_v41  ;;  %2506 = vmatpush1.bf16.msra.mxu1 %v4298_v43  ;;  %v4373_v41 = vld [vmem:[%s4593_s19 + $0x3e4] ss:$116 sps:$4 sm:$0xff]   ;;  %v4376_v43 = vld [vmem:[%s4593_s19 + $0x3ec] ss:$116 sps:$4 sm:$0xff]  }
  0x90   : > { %2434 = vmatprep.subr.bf16.mxu0 %v4303_v44  ;;  %2507 = vmatprep.subr.bf16.mxu1 %v4306_v45  ;;  %v4374_v44 = vld [vmem:[%s4593_s19 + $0x3e8] ss:$116 sps:$4 sm:$0xff]   ;;  %v4379_v45 = vld [vmem:[%s4593_s19 + $0x4cc] ss:$116 sps:$4 sm:$0xff]  }
  0x92   : > { %2327 = vmatmul.mubr.bf16.gmra.mrb[36].mxu0 %v4669_v63  ;;  %2400 = vmatmul.mubr.bf16.gmra.mrb[36].mxu1 %v4669_v63 }
  0x93   : > { %2435 = vmatpush1.bf16.msra.mxu0 %v4301_v46  ;;  %2508 = vmatpush1.bf16.msra.mxu1 %v4304_v47  ;;  %v4382_v46 = vld [vmem:[%s4593_s19 + $0x4d4] ss:$116 sps:$4 sm:$0xff]  }
  0x94   : > { %2436 = vmatprep.subr.bf16.mxu0 %v4309_v48  ;;  %2509 = vmatprep.subr.bf16.mxu1 %v4312_v49  ;;  %v4377_v47 = vld [vmem:[%s4593_s19 + $0x4c8] ss:$116 sps:$4 sm:$0xff]   ;;  %v4380_v48 = vld [vmem:[%s4593_s19 + $0x4d0] ss:$116 sps:$4 sm:$0xff]  }
  0x95   : > { %3966 = vmatprep.mubr.msk.bf16.mxu0 %vm1888_vm0, %v4678_v5  ;;  %3970 = vmatprep.mubr.msk.bf16.mxu1 %vm1888_vm0, %v4678_v5  ;;  %v4388_v49 = vld [vmem:[%s4593_s19 + $0x5bc] ss:$116 sps:$4 sm:$0xff]  }
  0x97   : > { %2437 = vmatpush1.bf16.msra.mxu0 %v4307_v50  ;;  %2510 = vmatpush1.bf16.msra.mxu1 %v4310_v51  ;;  %v4386_v50 = vld [vmem:[%s4593_s19 + $0x5b8] ss:$116 sps:$4 sm:$0xff]   ;;  %v4391_v51 = vld [vmem:[%s4593_s19 + $0x69c] ss:$116 sps:$4 sm:$0xff]  }
  0x98   : > { %2438 = vmatprep.subr.bf16.mxu0 %v4315_v52  ;;  %2511 = vmatprep.subr.bf16.mxu1 %v4318_v54  ;;  %v4394_v52 = vld [vmem:[%s4593_s19 + $0x6a4] ss:$116 sps:$4 sm:$0xff]   ;;  %v458_v54 = vld [vmem:[%s4593_s19 + $0x868] sm:$0x33] }
  0x9a   : > { %2337 = vmatmul.mubr.bf16.gmra.mrb[40].mxu0 %v4693_v10  ;;  %2410 = vmatmul.mubr.bf16.gmra.mrb[40].mxu1 %v4693_v10 }
  0x9b   : > { %2439 = vmatpush1.bf16.msra.mxu0 %v4313_v55  ;;  %2512 = vmatpush1.bf16.msra.mxu1 %v4316_v56  ;;  %v459_v55 = vld [vmem:[%s4593_s19 + $0x870] sm:$0x33] }
  0x9c   : > { %2440 = vmatprep.subr.bf16.mxu0 %v4321_v57  ;;  %2513 = vmatprep.subr.bf16.mxu1 %v4324_v59  ;;  %v4392_v56 = vld [vmem:[%s4593_s19 + $0x6a0] ss:$116 sps:$4 sm:$0xff]   ;;  %v4397_v57 = vld [vmem:[%s4593_s19 + $0x784] ss:$116 sps:$4 sm:$0xff]  }
  0x9d   : > { %3967 = vmatprep.mubr.msk.bf16.mxu0 %vm1888_vm0, %v4702_v15  ;;  %3971 = vmatprep.mubr.msk.bf16.mxu1 %vm1888_vm0, %v4702_v15  ;;  %v4400_v59 = vld [vmem:[%s4593_s19 + $0x78c] ss:$116 sps:$4 sm:$0xff]  }
  0x9f   : > { %2441 = vmatpush1.bf16.msra.mxu0 %v4319_v60  ;;  %2514 = vmatpush1.bf16.msra.mxu1 %v4322_v61  ;;  %v3936_v60 = vcombine.high %v458_v54, %v458_v54  ;;  %v3938_v61 = vcombine.high %v459_v55, %v459_v55 }
  0xa0   : > { %2442 = vmatprep.subr.bf16.mxu0 %v4327_v62  ;;  %2515 = vmatprep.subr.bf16.mxu1 %v4330_v1  ;;  %v4398_v62 = vld [vmem:[%s4593_s19 + $0x788] ss:$116 sps:$4 sm:$0xff]   ;;  %v3935_v1 = vcombine.low %v458_v54, %v458_v54  ;;  %v4453_v54 = vld [vmem:[%s4593_s19 + $0x790] ss:$116 sps:$4 sm:$0xff]  }
  0xa2   : > { %2347 = vmatmul.mubr.bf16.gmra.mrb[44].mxu0 %v4717_v20  ;;  %2420 = vmatmul.mubr.bf16.gmra.mrb[44].mxu1 %v4717_v20 }
  0xa3   : > { %2443 = vmatpush1.bf16.msra.mxu0 %v4325_v2  ;;  %2516 = vmatpush1.bf16.msra.mxu1 %v4328_v3  ;;  %v3937_v2 = vcombine.low %v459_v55, %v459_v55  ;;  %v1957_v3 = vand.u32 %v3936_v60, %v4632_v42  ;;  %v4456_v55 = vld [vmem:[%s4593_s19 + $0x798] ss:$116 sps:$4 sm:$0xff]  }
  0xa4   : > { %2444 = vmatprep.subr.bf16.mxu0 %v4333_v4  ;;  %2517 = vmatprep.subr.bf16.mxu1 %v4336_v6  ;;  %v1963_v4 = vand.u32 %v3938_v61, %v4632_v42  ;;  %v1954_v6 = vand.u32 %v3935_v1, %v4632_v42  ;;  %v4463_v1 = vld [vmem:[%s4593_s19 + $0x60] ss:$116 sps:$4 sm:$0xff]  }
  0xa5   : > { %3972 = vmatprep.mubr.msk.bf16.mxu0 %vm1888_vm0, %v4872_v17  ;;  %3976 = vmatprep.mubr.msk.bf16.mxu1 %vm1888_vm0, %v4872_v17  ;;  %v1960_v7 = vand.u32 %v3937_v2, %v4632_v42  ;;  %v4466_v2 = vld [vmem:[%s4593_s19 + $0x68] ss:$116 sps:$4 sm:$0xff]  }
  0xa7   : > { %2445 = vmatpush1.bf16.msra.mxu0 %v4331_v9  ;;  %2518 = vmatpush1.bf16.msra.mxu1 %v4334_v11  ;;  %v4410_v9 = vld [vmem:[%s4593_s19 + $0x5c] ss:$116 sps:$4 sm:$0xff]  }
  0xa8   : > { %2446 = vmatprep.subr.bf16.mxu0 %v4339_v12  ;;  %2519 = vmatprep.subr.bf16.mxu1 %v4342_v13  ;;  %v4405_v11 = vld [vmem:[%s4593_s19 + $0x50] ss:$116 sps:$4 sm:$0xff]   ;;  %v4408_v12 = vld [vmem:[%s4593_s19 + $0x58] ss:$116 sps:$4 sm:$0xff]  }
  0xa9   : > { %v4413_v13 = vld [vmem:[%s4593_s19 + $0x13c] ss:$116 sps:$4 sm:$0xff]  }
  0xab   : > { %2447 = vmatpush1.bf16.msra.mxu0 %v4337_v18  ;;  %2520 = vmatpush1.bf16.msra.mxu1 %v4340_v19  ;;  %v4411_v18 = vld [vmem:[%s4593_s19 + $0x138] ss:$116 sps:$4 sm:$0xff]   ;;  %v4414_v19 = vld [vmem:[%s4593_s19 + $0x140] ss:$116 sps:$4 sm:$0xff]  }
  0xac   : > { %2448 = vmatprep.subr.bf16.mxu0 %v1945_v23  ;;  %2521 = vmatprep.subr.bf16.mxu1 %v1951_v24  ;;  %v4970_v23 = vld [vmem:[%s5410_s1 + $0x14] ss:$8 sps:$4 sm:$0xff]  }
  0xad   : > { %v4417_v24 = vld [vmem:[%s4593_s19 + $0x220] ss:$116 sps:$4 sm:$0xff]  }
  0xaf   : > { %2449 = vmatpush1.bf16.msra.mxu0 %v1942_v25  ;;  %2522 = vmatpush1.bf16.msra.mxu1 %v1948_v26  ;;  %v4420_v25 = vld [vmem:[%s4593_s19 + $0x228] ss:$116 sps:$4 sm:$0xff]   ;;  %v4425_v26 = vld [vmem:[%s4593_s19 + $0x30c] ss:$116 sps:$4 sm:$0xff]  }
  0xb0   : > { %2576 = vmatprep.subr.bf16.mxu0 %v4349_v28  ;;  %2649 = vmatprep.subr.bf16.mxu1 %v4352_v29  ;;  %v4428_v28 = vld [vmem:[%s4593_s19 + $0x314] ss:$116 sps:$4 sm:$0xff]   ;;  %v4983_v29 = vld [vmem:[%s5410_s1 + $0x10] ss:$8 sps:$4 sm:$0xff]  }
  0xb2   : > { %2463 = vmatmul.mubr.bf16.vlgmr.msra.gmra.mrb[48].mxu0 %v4645_v53  ;;  %2536 = vmatmul.mubr.bf16.vlgmr.msra.gmra.mrb[48].mxu1 %v4645_v53  ;;  %v4359_v53 = vld [vmem:[%s4593_s19 + $0x210] ss:$116 sps:$4 sm:$0xff]  }
  0xb3   : > { %2577 = vmatpush1.bf16.msra.mxu0 %v4347_v30  ;;  %2650 = vmatpush1.bf16.msra.mxu1 %v4350_v31  ;;  %v4423_v30 = vld [vmem:[%s4593_s19 + $0x308] ss:$116 sps:$4 sm:$0xff]   ;;  %v4426_v31 = vld [vmem:[%s4593_s19 + $0x310] ss:$116 sps:$4 sm:$0xff]  }
  0xb4   : > { %2578 = vmatprep.subr.bf16.mxu0 %v4355_v32  ;;  %2651 = vmatprep.subr.bf16.mxu1 %v4358_v33  ;;  %v4431_v32 = vld [vmem:[%s4593_s19 + $0x3f4] ss:$116 sps:$4 sm:$0xff]   ;;  %v4434_v33 = vld [vmem:[%s4593_s19 + $0x3fc] ss:$116 sps:$4 sm:$0xff]  }
  0xb5   : > { %3973 = vmatprep.mubr.msk.bf16.mxu0 %vm1888_vm0, %v4654_v58  ;;  %3977 = vmatprep.mubr.msk.bf16.mxu1 %vm1888_vm0, %v4654_v58  ;;  %v4365_v58 = vld [vmem:[%s4593_s19 + $0x2f8] ss:$116 sps:$4 sm:$0xff]  }
  0xb7   : > { %2579 = vmatpush1.bf16.msra.mxu0 %v4353_v0  ;;  %2652 = vmatpush1.bf16.msra.mxu1 %v4356_v34  ;;  %v4994_v0 = vld [vmem:[%s5410_s1 + $0x24] ss:$8 sps:$4 sm:$0xff]  }
  0xb8   : > { %2580 = vmatprep.subr.bf16.mxu0 %v4361_v35  ;;  %2653 = vmatprep.subr.bf16.mxu1 %v4364_v36  ;;  %v4429_v34 = vld [vmem:[%s4593_s19 + $0x3f0] ss:$116 sps:$4 sm:$0xff]   ;;  %v4432_v35 = vld [vmem:[%s4593_s19 + $0x3f8] ss:$116 sps:$4 sm:$0xff]  }
  0xb9   : > { %v4437_v36 = vld [vmem:[%s4593_s19 + $0x4dc] ss:$116 sps:$4 sm:$0xff]  }
  0xba   : > { %2473 = vmatmul.mubr.bf16.gmra.mrb[52].mxu0 %v4669_v63  ;;  %2546 = vmatmul.mubr.bf16.gmra.mrb[52].mxu1 %v4669_v63  ;;  %v4371_v63 = vld [vmem:[%s4593_s19 + $0x3e0] ss:$116 sps:$4 sm:$0xff]  }
  0xbb   : > { %2581 = vmatpush1.bf16.msra.mxu0 %v4359_v53  ;;  %2654 = vmatpush1.bf16.msra.mxu1 %v4362_v37  ;;  %v4440_v53 = vld [vmem:[%s4593_s19 + $0x4e4] ss:$116 sps:$4 sm:$0xff]   ;;  %v5007_v37 = vld [vmem:[%s5410_s1 + $0x20] ss:$8 sps:$4 sm:$0xff]  }
  0xbc   : > { %2582 = vmatprep.subr.bf16.mxu0 %v4367_v38  ;;  %2655 = vmatprep.subr.bf16.mxu1 %v4370_v39  ;;  %v4435_v38 = vld [vmem:[%s4593_s19 + $0x4d8] ss:$116 sps:$4 sm:$0xff]   ;;  %v4438_v39 = vld [vmem:[%s4593_s19 + $0x4e0] ss:$116 sps:$4 sm:$0xff]  }
  0xbd   : > { %3974 = vmatprep.mubr.msk.bf16.mxu0 %vm1888_vm0, %v4678_v5  ;;  %3978 = vmatprep.mubr.msk.bf16.mxu1 %vm1888_vm0, %v4678_v5  ;;  %v4385_v5 = vld [vmem:[%s4593_s19 + $0x5b4] ss:$116 sps:$4 sm:$0xff]  }
  0xbf   : > { %2583 = vmatpush1.bf16.msra.mxu0 %v4365_v58  ;;  %2656 = vmatpush1.bf16.msra.mxu1 %v4368_v40  ;;  %v4443_v58 = vld [vmem:[%s4593_s19 + $0x5c4] ss:$116 sps:$4 sm:$0xff]   ;;  %v4446_v40 = vld [vmem:[%s4593_s19 + $0x5cc] ss:$116 sps:$4 sm:$0xff]  }
  0xc0   : > { %2584 = vmatprep.subr.bf16.mxu0 %v4373_v41  ;;  %2657 = vmatprep.subr.bf16.mxu1 %v4376_v43  ;;  %v5018_v41 = vld [vmem:[%s5410_s1 + $0x34] ss:$8 sps:$4 sm:$0xff]  }
  0xc1   : > { %v4441_v43 = vld [vmem:[%s4593_s19 + $0x5c0] ss:$116 sps:$4 sm:$0xff]  }
  0xc2   : > { %2483 = vmatmul.mubr.bf16.gmra.mrb[56].mxu0 %v4693_v10  ;;  %2556 = vmatmul.mubr.bf16.gmra.mrb[56].mxu1 %v4693_v10  ;;  %v4383_v10 = vld [vmem:[%s4593_s19 + $0x5b0] ss:$116 sps:$4 sm:$0xff]  }
  0xc3   : > { %2585 = vmatpush1.bf16.msra.mxu0 %v4371_v63  ;;  %2658 = vmatpush1.bf16.msra.mxu1 %v4374_v44  ;;  %v4444_v63 = vld [vmem:[%s4593_s19 + $0x5c8] ss:$116 sps:$4 sm:$0xff]   ;;  %v4449_v44 = vld [vmem:[%s4593_s19 + $0x6ac] ss:$116 sps:$4 sm:$0xff]  }
  0xc4   : > { %2586 = vmatprep.subr.bf16.mxu0 %v4379_v45  ;;  %2659 = vmatprep.subr.bf16.mxu1 %v4382_v46  ;;  %v4452_v45 = vld [vmem:[%s4593_s19 + $0x6b4] ss:$116 sps:$4 sm:$0xff]   ;;  %v460_v46 = vld [vmem:[%s4593_s19 + $0x878] sm:$0x33] }
  0xc5   : > { %3975 = vmatprep.mubr.msk.bf16.mxu0 %vm1888_vm0, %v4702_v15  ;;  %3979 = vmatprep.mubr.msk.bf16.mxu1 %vm1888_vm0, %v4702_v15  ;;  %v4389_v15 = vld [vmem:[%s4593_s19 + $0x698] ss:$116 sps:$4 sm:$0xff]  }
  0xc7   : > { %2587 = vmatpush1.bf16.msra.mxu0 %v4377_v47  ;;  %2660 = vmatpush1.bf16.msra.mxu1 %v4380_v48  ;;  %v461_v47 = vld [vmem:[%s4593_s19 + $0x880] sm:$0x33]  ;;  %v5033_v48 = vld [vmem:[%s5410_s1 + $0x30] ss:$8 sps:$4 sm:$0xff]  }
  0xc8   : > { %2588 = vmatprep.subr.bf16.mxu0 %v4385_v5  ;;  %2661 = vmatprep.subr.bf16.mxu1 %v4388_v49  ;;  %v4447_v5 = vld [vmem:[%s4593_s19 + $0x6a8] ss:$116 sps:$4 sm:$0xff]   ;;  %v4450_v49 = vld [vmem:[%s4593_s19 + $0x6b0] ss:$116 sps:$4 sm:$0xff]  }
  0xca   : > { %2493 = vmatmul.mubr.bf16.gmra.mrb[60].mxu0 %v4717_v20  ;;  %2566 = vmatmul.mubr.bf16.gmra.mrb[60].mxu1 %v4717_v20  ;;  %v4395_v20 = vld [vmem:[%s4593_s19 + $0x780] ss:$116 sps:$4 sm:$0xff]  }
  0xcb   : > { %2589 = vmatpush1.bf16.msra.mxu0 %v4383_v10  ;;  %2662 = vmatpush1.bf16.msra.mxu1 %v4386_v50  ;;  %v4455_v10 = vld [vmem:[%s4593_s19 + $0x794] ss:$116 sps:$4 sm:$0xff]   ;;  %v4458_v50 = vld [vmem:[%s4593_s19 + $0x79c] ss:$116 sps:$4 sm:$0xff]  }
  0xcc   : > { %2590 = vmatprep.subr.bf16.mxu0 %v4391_v51  ;;  %2663 = vmatprep.subr.bf16.mxu1 %v4394_v52  ;;  %v3940_v51 = vcombine.high %v460_v46, %v460_v46  ;;  %v3942_v52 = vcombine.high %v461_v47, %v461_v47 }
  0xcd   : > { %3980 = vmatprep.mubr.msk.bf16.mxu0 %vm1888_vm0, %v4872_v17  ;;  %3984 = vmatprep.mubr.msk.bf16.mxu1 %vm1888_vm0, %v4872_v17 }
  0xcf   : > { %2591 = vmatpush1.bf16.msra.mxu0 %v4389_v15  ;;  %2664 = vmatpush1.bf16.msra.mxu1 %v4392_v56  ;;  %v3939_v15 = vcombine.low %v460_v46, %v460_v46  ;;  %v3941_v56 = vcombine.low %v461_v47, %v461_v47 }
  0xd0   : > { %2592 = vmatprep.subr.bf16.mxu0 %v4397_v57  ;;  %2665 = vmatprep.subr.bf16.mxu1 %v4400_v59  ;;  %v1969_v57 = vand.u32 %v3940_v51, %v4632_v42  ;;  %v1975_v59 = vand.u32 %v3942_v52, %v4632_v42  ;;  %v4499_v51 = vld [vmem:[%s4593_s19 + $0x5d0] ss:$116 sps:$4 sm:$0xff]   ;;  %v4502_v52 = vld [vmem:[%s4593_s19 + $0x5d8] ss:$116 sps:$4 sm:$0xff]  }
  0xd1   : > { %v1966_v60 = vand.u32 %v3939_v15, %v4632_v42  ;;  %v1972_v61 = vand.u32 %v3941_v56, %v4632_v42 }
  0xd3   : > { %2593 = vmatpush1.bf16.msra.mxu0 %v4395_v20  ;;  %2666 = vmatpush1.bf16.msra.mxu1 %v4398_v62  ;;  %v4465_v20 = vld [vmem:[%s4593_s19 + $0x64] ss:$116 sps:$4 sm:$0xff]   ;;  %v4468_v62 = vld [vmem:[%s4593_s19 + $0x6c] ss:$116 sps:$4 sm:$0xff]  }
  0xd4   : > { %2594 = vmatprep.subr.bf16.mxu0 %v1957_v3  ;;  %2667 = vmatprep.subr.bf16.mxu1 %v1963_v4  ;;  %v4471_v3 = vld [vmem:[%s4593_s19 + $0x14c] ss:$116 sps:$4 sm:$0xff]   ;;  %v4474_v4 = vld [vmem:[%s4593_s19 + $0x154] ss:$116 sps:$4 sm:$0xff]  }
  0xd7   : > { %2595 = vmatpush1.bf16.msra.mxu0 %v1954_v6  ;;  %2668 = vmatpush1.bf16.msra.mxu1 %v1960_v7  ;;  %v4469_v6 = vld [vmem:[%s4593_s19 + $0x148] ss:$116 sps:$4 sm:$0xff]   ;;  %v4472_v7 = vld [vmem:[%s4593_s19 + $0x150] ss:$116 sps:$4 sm:$0xff]  }
  0xd8   : > { %2722 = vmatprep.subr.bf16.mxu0 %v4407_v8  ;;  %2795 = vmatprep.subr.bf16.mxu1 %v4410_v9  ;;  %v4477_v8 = vld [vmem:[%s4593_s19 + $0x234] ss:$116 sps:$4 sm:$0xff]   ;;  %v4480_v9 = vld [vmem:[%s4593_s19 + $0x23c] ss:$116 sps:$4 sm:$0xff]  }
  0xda   : > { %2609 = vmatmul.mubr.bf16.vlgmr.msra.gmra.mrb[64].mxu0 %v4959_v16  ;;  %2682 = vmatmul.mubr.bf16.vlgmr.msra.gmra.mrb[64].mxu1 %v4959_v16 }
  0xdb   : > { %2723 = vmatpush1.bf16.msra.mxu0 %v4405_v11  ;;  %2796 = vmatpush1.bf16.msra.mxu1 %v4408_v12  ;;  %v4475_v11 = vld [vmem:[%s4593_s19 + $0x230] ss:$116 sps:$4 sm:$0xff]   ;;  %v4478_v12 = vld [vmem:[%s4593_s19 + $0x238] ss:$116 sps:$4 sm:$0xff]  }
  0xdc   : > { %2724 = vmatprep.subr.bf16.mxu0 %v4413_v13  ;;  %2797 = vmatprep.subr.bf16.mxu1 %v4416_v14  ;;  %v4483_v13 = vld [vmem:[%s4593_s19 + $0x31c] ss:$116 sps:$4 sm:$0xff]   ;;  %v4486_v14 = vld [vmem:[%s4593_s19 + $0x324] ss:$116 sps:$4 sm:$0xff]  }
  0xdd   : > { %3981 = vmatprep.mubr.msk.bf16.mxu0 %vm1888_vm0, %v4970_v23  ;;  %3985 = vmatprep.mubr.msk.bf16.mxu1 %vm1888_vm0, %v4970_v23 }
  0xdf   : > { %2725 = vmatpush1.bf16.msra.mxu0 %v4411_v18  ;;  %2798 = vmatpush1.bf16.msra.mxu1 %v4414_v19  ;;  %v4481_v18 = vld [vmem:[%s4593_s19 + $0x318] ss:$116 sps:$4 sm:$0xff]   ;;  %v4484_v19 = vld [vmem:[%s4593_s19 + $0x320] ss:$116 sps:$4 sm:$0xff]  }
  0xe0   : > { %2726 = vmatprep.subr.bf16.mxu0 %v4419_v21  ;;  %2799 = vmatprep.subr.bf16.mxu1 %v4422_v22  ;;  %v4489_v21 = vld [vmem:[%s4593_s19 + $0x404] ss:$116 sps:$4 sm:$0xff]   ;;  %v4492_v22 = vld [vmem:[%s4593_s19 + $0x40c] ss:$116 sps:$4 sm:$0xff]  }
  0xe2   : > { %2619 = vmatmul.mubr.bf16.gmra.mrb[68].mxu0 %v4983_v29  ;;  %2692 = vmatmul.mubr.bf16.gmra.mrb[68].mxu1 %v4983_v29 }
  0xe3   : > { %2727 = vmatpush1.bf16.msra.mxu0 %v4417_v24  ;;  %2800 = vmatpush1.bf16.msra.mxu1 %v4420_v25 }
  0xe4   : > { %2728 = vmatprep.subr.bf16.mxu0 %v4425_v26  ;;  %2801 = vmatprep.subr.bf16.mxu1 %v4428_v28 }
  0xe5   : > { %3982 = vmatprep.mubr.msk.bf16.mxu0 %vm1888_vm0, %v4994_v0  ;;  %3986 = vmatprep.mubr.msk.bf16.mxu1 %vm1888_vm0, %v4994_v0 }
  0xe7   : > { %2729 = vmatpush1.bf16.msra.mxu0 %v4423_v30  ;;  %2802 = vmatpush1.bf16.msra.mxu1 %v4426_v31 }
  0xe8   : > { %2730 = vmatprep.subr.bf16.mxu0 %v4431_v32  ;;  %2803 = vmatprep.subr.bf16.mxu1 %v4434_v33  ;;  %v4487_v32 = vld [vmem:[%s4593_s19 + $0x400] ss:$116 sps:$4 sm:$0xff]   ;;  %v4490_v33 = vld [vmem:[%s4593_s19 + $0x408] ss:$116 sps:$4 sm:$0xff]  }
  0xea   : > { %2629 = vmatmul.mubr.bf16.gmra.mrb[72].mxu0 %v5007_v37  ;;  %2702 = vmatmul.mubr.bf16.gmra.mrb[72].mxu1 %v5007_v37 }
  0xeb   : > { %2731 = vmatpush1.bf16.msra.mxu0 %v4429_v34  ;;  %2804 = vmatpush1.bf16.msra.mxu1 %v4432_v35 }
  0xec   : > { %2732 = vmatprep.subr.bf16.mxu0 %v4437_v36  ;;  %2805 = vmatprep.subr.bf16.mxu1 %v4440_v53  ;;  %v4495_v36 = vld [vmem:[%s4593_s19 + $0x4ec] ss:$116 sps:$4 sm:$0xff]   ;;  %v4498_v53 = vld [vmem:[%s4593_s19 + $0x4f4] ss:$116 sps:$4 sm:$0xff]  }
  0xed   : > { %3983 = vmatprep.mubr.msk.bf16.mxu0 %vm1888_vm0, %v5018_v41  ;;  %3987 = vmatprep.mubr.msk.bf16.mxu1 %vm1888_vm0, %v5018_v41 }
  0xef   : > { %2733 = vmatpush1.bf16.msra.mxu0 %v4435_v38  ;;  %2806 = vmatpush1.bf16.msra.mxu1 %v4438_v39  ;;  %v4493_v38 = vld [vmem:[%s4593_s19 + $0x4e8] ss:$116 sps:$4 sm:$0xff]   ;;  %v4496_v39 = vld [vmem:[%s4593_s19 + $0x4f0] ss:$116 sps:$4 sm:$0xff]  }
  0xf0   : > { %2734 = vmatprep.subr.bf16.mxu0 %v4443_v58  ;;  %2807 = vmatprep.subr.bf16.mxu1 %v4446_v40  ;;  %v4501_v58 = vld [vmem:[%s4593_s19 + $0x5d4] ss:$116 sps:$4 sm:$0xff]   ;;  %v4504_v40 = vld [vmem:[%s4593_s19 + $0x5dc] ss:$116 sps:$4 sm:$0xff]  }
  0xf2   : > { %2639 = vmatmul.mubr.bf16.gmra.mrb[76].mxu0 %v5033_v48  ;;  %2712 = vmatmul.mubr.bf16.gmra.mrb[76].mxu1 %v5033_v48 }
  0xf3   : > { %2735 = vmatpush1.bf16.msra.mxu0 %v4441_v43  ;;  %2808 = vmatpush1.bf16.msra.mxu1 %v4444_v63 }
  0xf4   : > { %2736 = vmatprep.subr.bf16.mxu0 %v4449_v44  ;;  %2809 = vmatprep.subr.bf16.mxu1 %v4452_v45 }
  0xf5   : > { %3988 = vmatprep.mubr.msk.bf16.mxu0 %vm1888_vm0, %v4872_v17  ;;  %3992 = vmatprep.mubr.msk.bf16.mxu1 %vm1888_vm0, %v4872_v17 }
  0xf7   : > { %2737 = vmatpush1.bf16.msra.mxu0 %v4447_v5  ;;  %2810 = vmatpush1.bf16.msra.mxu1 %v4450_v49 }
  0xf8   : > { %2738 = vmatprep.subr.bf16.mxu0 %v4455_v10  ;;  %2811 = vmatprep.subr.bf16.mxu1 %v4458_v50 }
  0xfb   : > { %2739 = vmatpush1.bf16.msra.mxu0 %v4453_v54  ;;  %2812 = vmatpush1.bf16.msra.mxu1 %v4456_v55 }
  0xfc   : > { %2740 = vmatprep.subr.bf16.mxu0 %v1969_v57  ;;  %2813 = vmatprep.subr.bf16.mxu1 %v1975_v59  ;;  %v4507_v57 = vld [vmem:[%s4593_s19 + $0x6bc] ss:$116 sps:$4 sm:$0xff]   ;;  %v4510_v59 = vld [vmem:[%s4593_s19 + $0x6c4] ss:$116 sps:$4 sm:$0xff]  }
  0xff   : > { %2741 = vmatpush1.bf16.msra.mxu0 %v1966_v60  ;;  %2814 = vmatpush1.bf16.msra.mxu1 %v1972_v61 }
 0x100   : > { %2868 = vmatprep.subr.bf16.mxu0 %v4465_v20  ;;  %2941 = vmatprep.subr.bf16.mxu1 %v4468_v62  ;;  %v462_v20 = vld [vmem:[%s4593_s19 + $0x888] sm:$0x33]  ;;  %v463_v62 = vld [vmem:[%s4593_s19 + $0x890] sm:$0x33] }
 0x102   : > { %2755 = vmatmul.mubr.bf16.vlgmr.msra.gmra.mrb[80].mxu0 %v4959_v16  ;;  %2828 = vmatmul.mubr.bf16.vlgmr.msra.gmra.mrb[80].mxu1 %v4959_v16 }
 0x103   : > { %2869 = vmatpush1.bf16.msra.mxu0 %v4463_v1  ;;  %2942 = vmatpush1.bf16.msra.mxu1 %v4466_v2  ;;  %v4505_v1 = vld [vmem:[%s4593_s19 + $0x6b8] ss:$116 sps:$4 sm:$0xff]   ;;  %v4508_v2 = vld [vmem:[%s4593_s19 + $0x6c0] ss:$116 sps:$4 sm:$0xff]  }
 0x104   : > { %2870 = vmatprep.subr.bf16.mxu0 %v4471_v3  ;;  %2943 = vmatprep.subr.bf16.mxu1 %v4474_v4  ;;  %v4513_v3 = vld [vmem:[%s4593_s19 + $0x7a4] ss:$116 sps:$4 sm:$0xff]   ;;  %v4516_v4 = vld [vmem:[%s4593_s19 + $0x7ac] ss:$116 sps:$4 sm:$0xff]  }
 0x105   : > { %3989 = vmatprep.mubr.msk.bf16.mxu0 %vm1888_vm0, %v4970_v23  ;;  %3993 = vmatprep.mubr.msk.bf16.mxu1 %vm1888_vm0, %v4970_v23 }
 0x107   : > { %2871 = vmatpush1.bf16.msra.mxu0 %v4469_v6  ;;  %2944 = vmatpush1.bf16.msra.mxu1 %v4472_v7  ;;  %v3944_v6 = vcombine.high %v462_v20, %v462_v20  ;;  %v3946_v7 = vcombine.high %v463_v62, %v463_v62 }
 0x108   : > { %2872 = vmatprep.subr.bf16.mxu0 %v4477_v8  ;;  %2945 = vmatprep.subr.bf16.mxu1 %v4480_v9 }
 0x10a   : > { %2765 = vmatmul.mubr.bf16.gmra.mrb[84].mxu0 %v4983_v29  ;;  %2838 = vmatmul.mubr.bf16.gmra.mrb[84].mxu1 %v4983_v29 }
 0x10b   : > { %2873 = vmatpush1.bf16.msra.mxu0 %v4475_v11  ;;  %2946 = vmatpush1.bf16.msra.mxu1 %v4478_v12 }
 0x10c   : > { %2874 = vmatprep.subr.bf16.mxu0 %v4483_v13  ;;  %2947 = vmatprep.subr.bf16.mxu1 %v4486_v14  ;;  %v4511_v13 = vld [vmem:[%s4593_s19 + $0x7a0] ss:$116 sps:$4 sm:$0xff]   ;;  %v4514_v14 = vld [vmem:[%s4593_s19 + $0x7a8] ss:$116 sps:$4 sm:$0xff]  }
 0x10d   : > { %v5077_v24 = vpop.f32.mrb[0].mxu0  ;;  %v5079_v25 = vpop.f32.mrb[0].mxu1  ;;  %3990 = vmatprep.mubr.msk.bf16.mxu0 %vm1888_vm0, %v4994_v0  ;;  %3994 = vmatprep.mubr.msk.bf16.mxu1 %vm1888_vm0, %v4994_v0 }
 0x10e   : > { %v5085_v26 = vpop.f32.mrb[1].mxu0  ;;  %v5087_v28 = vpop.f32.mrb[1].mxu1 }
 0x10f   : > { %v5089_v30 = vpop.f32.mrb[2].mxu0  ;;  %v5091_v31 = vpop.f32.mrb[2].mxu1  ;;  %2875 = vmatpush1.bf16.msra.mxu0 %v4481_v18  ;;  %2948 = vmatpush1.bf16.msra.mxu1 %v4484_v19 }
 0x110   : > { %v5095_v34 = vpop.f32.mrb[3].mxu0  ;;  %v5097_v35 = vpop.f32.mrb[3].mxu1  ;;  %2876 = vmatprep.subr.bf16.mxu0 %v4489_v21  ;;  %2949 = vmatprep.subr.bf16.mxu1 %v4492_v22  ;;  %v3943_v21 = vcombine.low %v462_v20, %v462_v20  ;;  %v3945_v22 = vcombine.low %v463_v62, %v463_v62 }
 0x112   : > { %2775 = vmatmul.mubr.bf16.gmra.mrb[88].mxu0 %v5007_v37  ;;  %2848 = vmatmul.mubr.bf16.gmra.mrb[88].mxu1 %v5007_v37 }
 0x113   : > { %2877 = vmatpush1.bf16.msra.mxu0 %v4487_v32  ;;  %2950 = vmatpush1.bf16.msra.mxu1 %v4490_v33 }
 0x114   : > { %2878 = vmatprep.subr.bf16.mxu0 %v4495_v36  ;;  %2951 = vmatprep.subr.bf16.mxu1 %v4498_v53  ;;  %v1981_v36 = vand.u32 %v3944_v6, %v4632_v42  ;;  %v1987_v53 = vand.u32 %v3946_v7, %v4632_v42 }
 0x115   : > { %v5107_v43 = vpop.f32.mrb[4].mxu0  ;;  %v5109_v63 = vpop.f32.mrb[4].mxu1  ;;  %3991 = vmatprep.mubr.msk.bf16.mxu0 %vm1888_vm0, %v5018_v41  ;;  %3995 = vmatprep.mubr.msk.bf16.mxu1 %vm1888_vm0, %v5018_v41 }
 0x116   : > { %v3079_v44 = vmax.f32 %v5077_v24, %v5107_v43  ;;  %v3081_v45 = vmax.f32 %v5079_v25, %v5109_v63  ;;  %v5119_v46 = vpop.f32.mrb[5].mxu0  ;;  %v5121_v47 = vpop.f32.mrb[5].mxu1 }
 0x117   : > { %v3080_v5 = vmax.f32 %v5085_v26, %v5119_v46  ;;  %v3082_v49 = vmax.f32 %v5087_v28, %v5121_v47  ;;  %v5127_v10 = vpop.f32.mrb[6].mxu0  ;;  %v5129_v50 = vpop.f32.mrb[6].mxu1  ;;  %2879 = vmatpush1.bf16.msra.mxu0 %v4493_v38  ;;  %2952 = vmatpush1.bf16.msra.mxu1 %v4496_v39  ;;  %v1978_v38 = vand.u32 %v3943_v21, %v4632_v42 }
 0x118   : > { %v3108_v54 = vmax.f32 %v5089_v30, %v5127_v10  ;;  %v3110_v55 = vmax.f32 %v5091_v31, %v5129_v50  ;;  %v5137_v15 = vpop.f32.mrb[7].mxu0  ;;  %v5139_v56 = vpop.f32.mrb[7].mxu1  ;;  %2880 = vmatprep.subr.bf16.mxu0 %v4501_v58  ;;  %2953 = vmatprep.subr.bf16.mxu1 %v4504_v40  ;;  %v1984_v39 = vand.u32 %v3945_v22, %v4632_v42 }
 0x119   : > { %v3109_v60 = vmax.f32 %v5095_v34, %v5137_v15  ;;  %v3111_v61 = vmax.f32 %v5097_v35, %v5139_v56 }
 0x11a   : > { %2785 = vmatmul.mubr.bf16.gmra.mrb[92].mxu0 %v5033_v48  ;;  %2858 = vmatmul.mubr.bf16.gmra.mrb[92].mxu1 %v5033_v48 }
 0x11b   : > { %2881 = vmatpush1.bf16.msra.mxu0 %v4499_v51  ;;  %2954 = vmatpush1.bf16.msra.mxu1 %v4502_v52 }
 0x11c   : > { %2882 = vmatprep.subr.bf16.mxu0 %v4507_v57  ;;  %2955 = vmatprep.subr.bf16.mxu1 %v4510_v59 }
 0x11d   : > { %v2046_v8 = vpop.f32.mrb[8].mxu0  ;;  %v2119_v9 = vpop.f32.mrb[8].mxu1  ;;  %3996 = vmatprep.mubr.msk.bf16.mxu0 %vm1888_vm0, %v4872_v17  ;;  %4000 = vmatprep.mubr.msk.bf16.mxu1 %vm1888_vm0, %v4872_v17 }
 0x11e   : > { %v2048_v11 = vpop.f32.mrb[9].mxu0  ;;  %v2121_v12 = vpop.f32.mrb[9].mxu1 }
 0x11f   : > { %2883 = vmatpush1.bf16.msra.mxu0 %v4505_v1  ;;  %2956 = vmatpush1.bf16.msra.mxu1 %v4508_v2  ;;  %v2050_v18 = vpop.f32.mrb[10].mxu0  ;;  %v2123_v19 = vpop.f32.mrb[10].mxu1 }
 0x120   : > { %2884 = vmatprep.subr.bf16.mxu0 %v4513_v3  ;;  %2957 = vmatprep.subr.bf16.mxu1 %v4516_v4  ;;  %v2052_v32 = vpop.f32.mrb[11].mxu0  ;;  %v2125_v33 = vpop.f32.mrb[11].mxu1 }
 0x121   : > { %v5163_v17 = vpop.permute.xlu0 %3257 }
 0x123   : > { %2885 = vmatpush1.bf16.msra.mxu0 %v4511_v13  ;;  %2958 = vmatpush1.bf16.msra.mxu1 %v4514_v14 }
 0x124   : > { %2886 = vmatprep.subr.bf16.mxu0 %v1981_v36  ;;  %2959 = vmatprep.subr.bf16.mxu1 %v1987_v53 }
 0x125   : > { %v2056_v58 = vpop.f32.mrb[12].mxu0  ;;  %v2129_v40 = vpop.f32.mrb[12].mxu1 }
 0x126   : > { %v3137_v51 = vmax.f32 %v2046_v8, %v2056_v58  ;;  %v3139_v52 = vmax.f32 %v2119_v9, %v2129_v40  ;;  %v2058_v57 = vpop.f32.mrb[13].mxu0  ;;  %v2131_v59 = vpop.f32.mrb[13].mxu1 }
 0x127   : > { %v3138_v20 = vmax.f32 %v2048_v11, %v2058_v57  ;;  %v3140_v62 = vmax.f32 %v2121_v12, %v2131_v59  ;;  %v2060_v1 = vpop.f32.mrb[14].mxu0  ;;  %v2133_v2 = vpop.f32.mrb[14].mxu1  ;;  %2887 = vmatpush1.bf16.msra.mxu0 %v1978_v38  ;;  %2960 = vmatpush1.bf16.msra.mxu1 %v1984_v39  ;;  %v4521_v11 = vld [vmem:[%s4593_s19 + $0x70] ss:$116 sps:$4 sm:$0xff]   ;;  %v4526_v57 = vld [vmem:[%s4593_s19 + $0x4f8] ss:$116 sps:$4 sm:$0xff]  }
 0x128   : > { %v3195_v3 = vmax.f32 %v3079_v44, %v3137_v51  ;;  %v3197_v4 = vmax.f32 %v3081_v45, %v3139_v52  ;;  %v3166_v6 = vmax.f32 %v2050_v18, %v2060_v1  ;;  %v3168_v7 = vmax.f32 %v2123_v19, %v2133_v2  ;;  %v2062_v8 = vpop.f32.mrb[15].mxu0  ;;  %v2135_v9 = vpop.f32.mrb[15].mxu1  ;;  %3014 = vmatprep.subr.bf16.mxu0 %v4548_v27  ;;  %v4523_v19 = vld [vmem:[%s4593_s19 + $0x240] ss:$116 sps:$4 sm:$0xff]   ;;  %v4525_v52 = vld [vmem:[%s4593_s19 + $0x410] ss:$116 sps:$4 sm:$0xff]  }
 0x129   : > { %v3196_v12 = vmax.f32 %v3080_v5, %v3138_v20  ;;  %v3198_v24 = vmax.f32 %v3082_v49, %v3140_v62  ;;  %v3167_v43 = vmax.f32 %v2052_v32, %v2062_v8  ;;  %v3169_v44 = vmax.f32 %v2125_v33, %v2135_v9  ;;  %4070 = vmatprep.subr.bf16.mxu1 %v4548_v27  ;;  %v5182_v25 = vpop.permute.xlu0 %3262  ;;  %v4524_v32 = vld [vmem:[%s4593_s19 + $0x328] ss:$116 sps:$4 sm:$0xff]  }
 0x12a   : > { %v3265_v63 = vadd.f32 %v5163_v17, %v3195_v3  ;;  %v3267_v45 = vadd.f32 %v5163_v17, %v3197_v4  ;;  %v3224_v26 = vmax.f32 %v3108_v54, %v3166_v6  ;;  %v3226_v28 = vmax.f32 %v3110_v55, %v3168_v7  ;;  %2901 = vmatmul.mubr.bf16.vlgmr.msra.gmra.mrb[96].mxu0 %v4959_v16  ;;  %v4522_v54 = vld [vmem:[%s4593_s19 + $0x158] ss:$116 sps:$4 sm:$0xff]  }
 0x12b   : > { %v3266_v46 = vadd.f32 %v5163_v17, %v3196_v12  ;;  %v3268_v47 = vadd.f32 %v5163_v17, %v3198_v24  ;;  %v3225_v5 = vmax.f32 %v3109_v60, %v3167_v43  ;;  %v3227_v49 = vmax.f32 %v3111_v61, %v3169_v44  ;;  %2974 = vmatmul.mubr.bf16.vlgmr.msra.gmra.mrb[96].mxu1 %v4959_v16  ;;  %v4527_v43 = vld [vmem:[%s4593_s19 + $0x5e0] ss:$116 sps:$4 sm:$0xff]  }
 0x12c   : > { %v3323_v30 = vmax.f32 %v3265_v63, 0.0  ;;  %v3325_v10 = vmax.f32 %v3267_v45, 0.0  ;;  %v3294_v31 = vadd.f32 %v5182_v25, %v3224_v26  ;;  %v3296_v50 = vadd.f32 %v5182_v25, %v3226_v28  ;;  %3015 = vmatpush1.bf16.msra.mxu0 %v4521_v11  ;;  %4080 = vmatpush1.bf16.msra.mxu1 %v4521_v11  ;;  %v4539_v45 = vld [vmem:[%s5410_s1 + $0x4] ss:$8 sps:$4 sm:$0xff]   ;;  %v4528_v26 = vld [vmem:[%s4593_s19 + $0x6c8] ss:$116 sps:$4 sm:$0xff]  }
 0x12d   : > { %v3324_v55 = vmax.f32 %v3266_v46, 0.0  ;;  %v3326_v13 = vmax.f32 %v3268_v47, 0.0  ;;  %v3295_v34 = vadd.f32 %v5182_v25, %v3225_v5  ;;  %v3297_v15 = vadd.f32 %v5182_v25, %v3227_v49  ;;  %3016 = vmatprep.subr.bf16.mxu0 %v4548_v27  ;;  %4071 = vmatprep.subr.bf16.mxu1 %v4548_v27 }
 0x12e   : > { %v3352_v35 = vmax.f32 %v3294_v31, 0.0  ;;  %v3354_v56 = vmax.f32 %v3296_v50, 0.0  ;;  %3997 = vmatprep.mubr.msk.bf16.mxu0 %vm1888_vm0, %v4970_v23  ;;  %4001 = vmatprep.mubr.msk.bf16.mxu1 %vm1888_vm0, %v4970_v23 }
 0x12f   : > { %v4040_v60 = vpack.c.bf16 %v3324_v55, %v3323_v30  ;;  %v4041_v61 = vpack.c.bf16 %v3326_v13, %v3325_v10  ;;  %v3353_v14 = vmax.f32 %v3295_v34, 0.0  ;;  %v3355_v18 = vmax.f32 %v3297_v15, 0.0  ;;  %v4529_v10 = vld [vmem:[%s4593_s19 + $0x7b0] ss:$116 sps:$4 sm:$0xff]  }
 0x130   : > { %3017 = vmatpush1.bf16.msra.mxu0 %v4522_v54  ;;  %4081 = vmatpush1.bf16.msra.mxu1 %v4522_v54  ;;  %v4530_v54 = vld [vmem:[%s4593_s19 + $0x898] ss:$0 sps:$4 sm:$0x33]  }
 0x131   : > { %3557 = vst [vmem:[%s5213_s5] sm:$0xff] %v4040_v60  ;;  %3558 = vst [vmem:[%s5213_s5 + $0x8] sm:$0xff] %v4041_v61  ;;  %v4055_v21 = vpack.c.bf16 %v3353_v14, %v3352_v35  ;;  %v4056_v22 = vpack.c.bf16 %v3355_v18, %v3354_v56  ;;  %3018 = vmatprep.subr.bf16.mxu0 %v4548_v27  ;;  %4072 = vmatprep.subr.bf16.mxu1 %v4548_v27 }
 0x132   : > { %2911 = vmatmul.mubr.bf16.gmra.mrb[100].mxu0 %v4983_v29  ;;  %v1990_v55 = vand.u32 %v4530_v54, %v4632_v42 }
 0x133   : > { %3573 = vst [vmem:[%s5213_s5 + $0x74] sm:$0xff] %v4055_v21  ;;  %3574 = vst [vmem:[%s5213_s5 + $0x7c] sm:$0xff] %v4056_v22  ;;  %2984 = vmatmul.mubr.bf16.gmra.mrb[100].mxu1 %v4983_v29  ;;  %3998 = vmatprep.mubr.msk.bf16.mxu0 %vm1888_vm0, %v4994_v0 }
 0x134   : > { %3019 = vmatpush1.bf16.msra.mxu0 %v4523_v19  ;;  %4082 = vmatpush1.bf16.msra.mxu1 %v4523_v19 }
 0x135   : > { %v5231_v33 = vpop.f32.mrb[16].mxu0  ;;  %v5233_v36 = vpop.f32.mrb[16].mxu1  ;;  %3020 = vmatprep.subr.bf16.mxu0 %v4548_v27  ;;  %4073 = vmatprep.subr.bf16.mxu1 %v4548_v27 }
 0x136   : > { %v5237_v53 = vpop.f32.mrb[17].mxu0  ;;  %v5239_v38 = vpop.f32.mrb[17].mxu1  ;;  %4002 = vmatprep.mubr.msk.bf16.mxu1 %vm1888_vm0, %v4994_v0 }
 0x137   : > { %v5243_v39 = vpop.f32.mrb[18].mxu0  ;;  %v5245_v58 = vpop.f32.mrb[18].mxu1 }
 0x138   : > { %3021 = vmatpush1.bf16.msra.mxu0 %v4524_v32  ;;  %4083 = vmatpush1.bf16.msra.mxu1 %v4524_v32  ;;  %v5247_v40 = vpop.f32.mrb[19].mxu0  ;;  %v5249_v51 = vpop.f32.mrb[19].mxu1 }
 0x139   : > { %3022 = vmatprep.subr.bf16.mxu0 %v4548_v27  ;;  %4074 = vmatprep.subr.bf16.mxu1 %v4548_v27 }
 0x13a   : > { %2921 = vmatmul.mubr.bf16.gmra.mrb[104].mxu0 %v5007_v37 }
 0x13b   : > { %2994 = vmatmul.mubr.bf16.gmra.mrb[104].mxu1 %v5007_v37  ;;  %3999 = vmatprep.mubr.msk.bf16.mxu0 %vm1888_vm0, %v5018_v41 }
 0x13c   : > { %3023 = vmatpush1.bf16.msra.mxu0 %v4525_v52  ;;  %4084 = vmatpush1.bf16.msra.mxu1 %v4525_v52 }
 0x13d   : > { %v5259_v59 = vpop.f32.mrb[20].mxu0  ;;  %v5261_v20 = vpop.f32.mrb[20].mxu1  ;;  %3024 = vmatprep.subr.bf16.mxu0 %v4548_v27  ;;  %4075 = vmatprep.subr.bf16.mxu1 %v4548_v27 }
 0x13e   : > { %v3083_v62 = vmax.f32 %v5231_v33, %v5259_v59  ;;  %v3085_v1 = vmax.f32 %v5233_v36, %v5261_v20  ;;  %v5269_v2 = vpop.f32.mrb[21].mxu0  ;;  %v5271_v3 = vpop.f32.mrb[21].mxu1  ;;  %4003 = vmatprep.mubr.msk.bf16.mxu1 %vm1888_vm0, %v5018_v41 }
 0x13f   : > { %v3084_v4 = vmax.f32 %v5237_v53, %v5269_v2  ;;  %v3086_v6 = vmax.f32 %v5239_v38, %v5271_v3  ;;  %v5279_v7 = vpop.f32.mrb[22].mxu0  ;;  %v5281_v8 = vpop.f32.mrb[22].mxu1 }
 0x140   : > { %v3112_v9 = vmax.f32 %v5243_v39, %v5279_v7  ;;  %v3114_v11 = vmax.f32 %v5245_v58, %v5281_v8  ;;  %3025 = vmatpush1.bf16.msra.mxu0 %v4526_v57  ;;  %4085 = vmatpush1.bf16.msra.mxu1 %v4526_v57  ;;  %v5287_v12 = vpop.f32.mrb[23].mxu0  ;;  %v5289_v24 = vpop.f32.mrb[23].mxu1 }
 0x141   : > { %v3113_v44 = vmax.f32 %v5247_v40, %v5287_v12  ;;  %v3115_v63 = vmax.f32 %v5249_v51, %v5289_v24  ;;  %3026 = vmatprep.subr.bf16.mxu0 %v4548_v27  ;;  %4076 = vmatprep.subr.bf16.mxu1 %v4548_v27 }
 0x142   : > { %2931 = vmatmul.mubr.bf16.gmra.mrb[108].mxu0 %v5033_v48 }
 0x143   : > { %3004 = vmatmul.mubr.bf16.gmra.mrb[108].mxu1 %v5033_v48  ;;  %4004 = vmatprep.mubr.msk.bf16.mxu0 %vm1888_vm0, %v4539_v45 }
 0x144   : > { %3027 = vmatpush1.bf16.msra.mxu0 %v4527_v43  ;;  %4086 = vmatpush1.bf16.msra.mxu1 %v4527_v43 }
 0x145   : > { %3028 = vmatprep.subr.bf16.mxu0 %v4548_v27  ;;  %4077 = vmatprep.subr.bf16.mxu1 %v4548_v27  ;;  %v2192_v28 = vpop.f32.mrb[24].mxu0  ;;  %v2265_v46 = vpop.f32.mrb[24].mxu1 }
 0x146   : > { %v2194_v47 = vpop.f32.mrb[25].mxu0  ;;  %v2267_v5 = vpop.f32.mrb[25].mxu1  ;;  %4006 = vmatprep.mubr.msk.bf16.mxu1 %vm1888_vm0, %v4994_v0 }
 0x147   : > { %v2196_v49 = vpop.f32.mrb[26].mxu0  ;;  %v2269_v30 = vpop.f32.mrb[26].mxu1 }
 0x148   : > { %3029 = vmatpush1.bf16.msra.mxu0 %v4528_v26  ;;  %4087 = vmatpush1.bf16.msra.mxu1 %v4528_v26  ;;  %v2198_v31 = vpop.f32.mrb[27].mxu0  ;;  %v2271_v50 = vpop.f32.mrb[27].mxu1 }
 0x149   : > { %3030 = vmatprep.subr.bf16.mxu0 %v4548_v27  ;;  %4078 = vmatprep.subr.bf16.mxu1 %v4548_v27 }
 0x14c   : > { %3031 = vmatpush1.bf16.msra.mxu0 %v4529_v10  ;;  %4088 = vmatpush1.bf16.msra.mxu1 %v4529_v10 }
 0x14d   : > { %v2202_v13 = vpop.f32.mrb[28].mxu0  ;;  %v2275_v34 = vpop.f32.mrb[28].mxu1  ;;  %3032 = vmatprep.subr.bf16.mxu0 %v4548_v27  ;;  %4079 = vmatprep.subr.bf16.mxu1 %v4548_v27 }
 0x14e   : > { %v3141_v0 = vmax.f32 %v2192_v28, %v2202_v13  ;;  %v3143_v15 = vmax.f32 %v2265_v46, %v2275_v34  ;;  %v2204_v35 = vpop.f32.mrb[29].mxu0  ;;  %v2277_v56 = vpop.f32.mrb[29].mxu1 }
 0x14f   : > { %v3142_v60 = vmax.f32 %v2194_v47, %v2204_v35  ;;  %v3144_v61 = vmax.f32 %v2267_v5, %v2277_v56  ;;  %v2206_v14 = vpop.f32.mrb[30].mxu0  ;;  %v2279_v18 = vpop.f32.mrb[30].mxu1 }
 0x150   : > { %v3199_v19 = vmax.f32 %v3083_v62, %v3141_v0  ;;  %v3201_v21 = vmax.f32 %v3085_v1, %v3143_v15  ;;  %v3170_v22 = vmax.f32 %v2196_v49, %v2206_v14  ;;  %v3172_v32 = vmax.f32 %v2269_v30, %v2279_v18  ;;  %3033 = vmatpush1.bf16.msra.mxu0 %v1990_v55  ;;  %v2208_v42 = vpop.f32.mrb[31].mxu0  ;;  %v2281_v33 = vpop.f32.mrb[31].mxu1 }
 0x151   : > { %v3200_v36 = vmax.f32 %v3084_v4, %v3142_v60  ;;  %v3202_v53 = vmax.f32 %v3086_v6, %v3144_v61  ;;  %4089 = vmatpush1.bf16.msra.mxu1 %v1990_v55  ;;  %v3171_v38 = vmax.f32 %v2198_v31, %v2208_v42  ;;  %v3173_v27 = vmax.f32 %v2271_v50, %v2281_v33 }
 0x152   : > { %v3269_v40 = vadd.f32 %v5163_v17, %v3199_v19  ;;  %v3271_v51 = vadd.f32 %v5163_v17, %v3201_v21  ;;  %v3228_v52 = vmax.f32 %v3112_v9, %v3170_v22  ;;  %v3230_v57 = vmax.f32 %v3114_v11, %v3172_v32 }
 0x153   : > { %v3270_v59 = vadd.f32 %v5163_v17, %v3200_v36  ;;  %v3272_v20 = vadd.f32 %v5163_v17, %v3202_v53  ;;  %v3229_v62 = vmax.f32 %v3113_v44, %v3171_v38  ;;  %v3231_v1 = vmax.f32 %v3115_v63, %v3173_v27  ;;  %3047 = vmatmul.mubr.bf16.vlgmr.msra.gmra.mrb[112].mxu0 %v4959_v16 }
 0x154   : > { %v3327_v2 = vmax.f32 %v3269_v40, 0.0  ;;  %v3329_v3 = vmax.f32 %v3271_v51, 0.0  ;;  %v3298_v4 = vadd.f32 %v5182_v25, %v3228_v52  ;;  %v3300_v39 = vadd.f32 %v5182_v25, %v3230_v57  ;;  %3063 = vmatmul.mubr.bf16.vlgmr.msra.gmra.mrb[112].mxu1 %v5007_v37  ;;  %4005 = vmatprep.mubr.msk.bf16.mxu0 %vm1888_vm0, %v4970_v23 }
 0x155   : > { %v3328_v58 = vmax.f32 %v3270_v59, 0.0  ;;  %v3330_v6 = vmax.f32 %v3272_v20, 0.0  ;;  %v3299_v7 = vadd.f32 %v5182_v25, %v3229_v62  ;;  %v3301_v16 = vadd.f32 %v5182_v25, %v3231_v1  ;;  %4007 = vmatprep.mubr.msk.bf16.mxu1 %vm1888_vm0, %v5018_v41 }
 0x156   : > { %v3356_v8 = vmax.f32 %v3298_v4, 0.0  ;;  %v3358_v9 = vmax.f32 %v3300_v39, 0.0 }
 0x157   : > { %v4042_v11 = vpack.c.bf16 %v3328_v58, %v3327_v2  ;;  %v4043_v12 = vpack.c.bf16 %v3330_v6, %v3329_v3  ;;  %v3357_v24 = vmax.f32 %v3299_v7, 0.0  ;;  %v3359_v37 = vmax.f32 %v3301_v16, 0.0 }
 0x159   : > { %3559 = vst [vmem:[%s5213_s5 + $0x10] sm:$0xff] %v4042_v11  ;;  %3560 = vst [vmem:[%s5213_s5 + $0x18] sm:$0xff] %v4043_v12  ;;  %v4057_v23 = vpack.c.bf16 %v3357_v24, %v3356_v8  ;;  %v4058_v43 = vpack.c.bf16 %v3359_v37, %v3358_v9 }
 0x15b   : > { %3575 = vst [vmem:[%s5213_s5 + $0x84] sm:$0xff] %v4057_v23  ;;  %3576 = vst [vmem:[%s5213_s5 + $0x8c] sm:$0xff] %v4058_v43  ;;  %3055 = vmatmul.mubr.bf16.gmra.mrb[116].mxu0 %v4983_v29 }
 0x15c   : > { %3071 = vmatmul.mubr.bf16.gmra.mrb[116].mxu1 %v5033_v48 }
 0x15d   : > { %v2318_v44 = vpop.f32.mrb[32].mxu0  ;;  %v2391_v63 = vpop.f32.mrb[32].mxu1 }
 0x15e   : > { %v2320_v45 = vpop.f32.mrb[33].mxu0  ;;  %v2393_v41 = vpop.f32.mrb[33].mxu1 }
 0x15f   : > { %v2322_v26 = vpop.f32.mrb[34].mxu0  ;;  %v2395_v28 = vpop.f32.mrb[34].mxu1 }
 0x160   : > { %v2324_v46 = vpop.f32.mrb[35].mxu0  ;;  %v2397_v47 = vpop.f32.mrb[35].mxu1 }
 0x165   : > { %v2328_v5 = vpop.f32.mrb[36].mxu0  ;;  %v2401_v49 = vpop.f32.mrb[36].mxu1 }
 0x166   : > { %v3087_v30 = vmax.f32 %v2318_v44, %v2328_v5  ;;  %v3089_v10 = vmax.f32 %v2391_v63, %v2401_v49  ;;  %v2330_v31 = vpop.f32.mrb[37].mxu0  ;;  %v2403_v50 = vpop.f32.mrb[37].mxu1 }
 0x167   : > { %v3088_v54 = vmax.f32 %v2320_v45, %v2330_v31  ;;  %v3090_v55 = vmax.f32 %v2393_v41, %v2403_v50  ;;  %v2332_v13 = vpop.f32.mrb[38].mxu0  ;;  %v2405_v29 = vpop.f32.mrb[38].mxu1 }
 0x168   : > { %v3116_v34 = vmax.f32 %v2322_v26, %v2332_v13  ;;  %v3118_v48 = vmax.f32 %v2395_v28, %v2405_v29  ;;  %v2334_v0 = vpop.f32.mrb[39].mxu0  ;;  %v2407_v15 = vpop.f32.mrb[39].mxu1 }
 0x169   : > { %v3117_v35 = vmax.f32 %v2324_v46, %v2334_v0  ;;  %v3119_v56 = vmax.f32 %v2397_v47, %v2407_v15 }
 0x16d   : > { %v2338_v60 = vpop.f32.mrb[40].mxu0  ;;  %v2411_v61 = vpop.f32.mrb[40].mxu1 }
 0x16e   : > { %v2340_v14 = vpop.f32.mrb[41].mxu0  ;;  %v2413_v18 = vpop.f32.mrb[41].mxu1 }
 0x16f   : > { %v2342_v19 = vpop.f32.mrb[42].mxu0  ;;  %v2415_v21 = vpop.f32.mrb[42].mxu1 }
 0x170   : > { %v2344_v22 = vpop.f32.mrb[43].mxu0  ;;  %v2417_v32 = vpop.f32.mrb[43].mxu1 }
 0x175   : > { %v2348_v42 = vpop.f32.mrb[44].mxu0  ;;  %v2421_v33 = vpop.f32.mrb[44].mxu1 }
 0x176   : > { %v3145_v36 = vmax.f32 %v2338_v60, %v2348_v42  ;;  %v3147_v53 = vmax.f32 %v2411_v61, %v2421_v33  ;;  %v2350_v38 = vpop.f32.mrb[45].mxu0  ;;  %v2423_v27 = vpop.f32.mrb[45].mxu1 }
 0x177   : > { %v3146_v40 = vmax.f32 %v2340_v14, %v2350_v38  ;;  %v3148_v51 = vmax.f32 %v2413_v18, %v2423_v27  ;;  %v2352_v52 = vpop.f32.mrb[46].mxu0  ;;  %v2425_v57 = vpop.f32.mrb[46].mxu1 }
 0x178   : > { %v3203_v59 = vmax.f32 %v3087_v30, %v3145_v36  ;;  %v3205_v20 = vmax.f32 %v3089_v10, %v3147_v53  ;;  %v3174_v62 = vmax.f32 %v2342_v19, %v2352_v52  ;;  %v3176_v1 = vmax.f32 %v2415_v21, %v2425_v57  ;;  %v2354_v2 = vpop.f32.mrb[47].mxu0  ;;  %v2427_v3 = vpop.f32.mrb[47].mxu1 }
 0x179   : > { %v3204_v4 = vmax.f32 %v3088_v54, %v3146_v40  ;;  %v3206_v39 = vmax.f32 %v3090_v55, %v3148_v51  ;;  %v3175_v58 = vmax.f32 %v2344_v22, %v2354_v2  ;;  %v3177_v6 = vmax.f32 %v2417_v32, %v2427_v3 }
 0x17a   : > { %v3273_v7 = vadd.f32 %v5163_v17, %v3203_v59  ;;  %v3275_v16 = vadd.f32 %v5163_v17, %v3205_v20  ;;  %v3232_v8 = vmax.f32 %v3116_v34, %v3174_v62  ;;  %v3234_v9 = vmax.f32 %v3118_v48, %v3176_v1 }
 0x17b   : > { %v3274_v11 = vadd.f32 %v5163_v17, %v3204_v4  ;;  %v3276_v12 = vadd.f32 %v5163_v17, %v3206_v39  ;;  %v3233_v24 = vmax.f32 %v3117_v35, %v3175_v58  ;;  %v3235_v37 = vmax.f32 %v3119_v56, %v3177_v6 }
 0x17c   : > { %v3331_v23 = vmax.f32 %v3273_v7, 0.0  ;;  %v3333_v43 = vmax.f32 %v3275_v16, 0.0  ;;  %v3302_v44 = vadd.f32 %v5182_v25, %v3232_v8  ;;  %v3304_v63 = vadd.f32 %v5182_v25, %v3234_v9 }
 0x17d   : > { %v3332_v45 = vmax.f32 %v3274_v11, 0.0  ;;  %v3334_v41 = vmax.f32 %v3276_v12, 0.0  ;;  %v3303_v26 = vadd.f32 %v5182_v25, %v3233_v24  ;;  %v3305_v28 = vadd.f32 %v5182_v25, %v3235_v37 }
 0x17e   : > { %v3360_v46 = vmax.f32 %v3302_v44, 0.0  ;;  %v3362_v47 = vmax.f32 %v3304_v63, 0.0 }
 0x17f   : > { %v4044_v5 = vpack.c.bf16 %v3332_v45, %v3331_v23  ;;  %v4045_v49 = vpack.c.bf16 %v3334_v41, %v3333_v43  ;;  %v3361_v30 = vmax.f32 %v3303_v26, 0.0  ;;  %v3363_v10 = vmax.f32 %v3305_v28, 0.0 }
 0x181   : > { %3561 = vst [vmem:[%s5213_s5 + $0x20] sm:$0xff] %v4044_v5  ;;  %3562 = vst [vmem:[%s5213_s5 + $0x28] sm:$0xff] %v4045_v49  ;;  %v4059_v31 = vpack.c.bf16 %v3361_v30, %v3360_v46  ;;  %v4060_v50 = vpack.c.bf16 %v3363_v10, %v3362_v47 }
 0x183   : > { %3577 = vst [vmem:[%s5213_s5 + $0x94] sm:$0xff] %v4059_v31  ;;  %3578 = vst [vmem:[%s5213_s5 + $0x9c] sm:$0xff] %v4060_v50 }
 0x185   : > { %v2464_v54 = vpop.f32.mrb[48].mxu0  ;;  %v2537_v55 = vpop.f32.mrb[48].mxu1 }
 0x186   : > { %v2466_v13 = vpop.f32.mrb[49].mxu0  ;;  %v2539_v29 = vpop.f32.mrb[49].mxu1 }
 0x187   : > { %v2468_v34 = vpop.f32.mrb[50].mxu0  ;;  %v2541_v48 = vpop.f32.mrb[50].mxu1 }
 0x188   : > { %v2470_v0 = vpop.f32.mrb[51].mxu0  ;;  %v2543_v15 = vpop.f32.mrb[51].mxu1 }
 0x18d   : > { %v2474_v35 = vpop.f32.mrb[52].mxu0  ;;  %v2547_v56 = vpop.f32.mrb[52].mxu1 }
 0x18e   : > { %v3091_v60 = vmax.f32 %v2464_v54, %v2474_v35  ;;  %v3093_v61 = vmax.f32 %v2537_v55, %v2547_v56  ;;  %v2476_v14 = vpop.f32.mrb[53].mxu0  ;;  %v2549_v18 = vpop.f32.mrb[53].mxu1 }
 0x18f   : > { %v3092_v19 = vmax.f32 %v2466_v13, %v2476_v14  ;;  %v3094_v21 = vmax.f32 %v2539_v29, %v2549_v18  ;;  %v2478_v22 = vpop.f32.mrb[54].mxu0  ;;  %v2551_v32 = vpop.f32.mrb[54].mxu1 }
 0x190   : > { %v3120_v42 = vmax.f32 %v2468_v34, %v2478_v22  ;;  %v3122_v33 = vmax.f32 %v2541_v48, %v2551_v32  ;;  %v2480_v36 = vpop.f32.mrb[55].mxu0  ;;  %v2553_v53 = vpop.f32.mrb[55].mxu1 }
 0x191   : > { %v3121_v38 = vmax.f32 %v2470_v0, %v2480_v36  ;;  %v3123_v27 = vmax.f32 %v2543_v15, %v2553_v53 }
 0x195   : > { %v2484_v40 = vpop.f32.mrb[56].mxu0  ;;  %v2557_v51 = vpop.f32.mrb[56].mxu1 }
 0x196   : > { %v2486_v52 = vpop.f32.mrb[57].mxu0  ;;  %v2559_v57 = vpop.f32.mrb[57].mxu1 }
 0x197   : > { %v2488_v59 = vpop.f32.mrb[58].mxu0  ;;  %v2561_v20 = vpop.f32.mrb[58].mxu1 }
 0x198   : > { %v2490_v62 = vpop.f32.mrb[59].mxu0  ;;  %v2563_v1 = vpop.f32.mrb[59].mxu1 }
 0x19d   : > { %v2494_v2 = vpop.f32.mrb[60].mxu0  ;;  %v2567_v3 = vpop.f32.mrb[60].mxu1 }
 0x19e   : > { %v3149_v4 = vmax.f32 %v2484_v40, %v2494_v2  ;;  %v3151_v39 = vmax.f32 %v2557_v51, %v2567_v3  ;;  %v2496_v58 = vpop.f32.mrb[61].mxu0  ;;  %v2569_v6 = vpop.f32.mrb[61].mxu1 }
 0x19f   : > { %v3150_v7 = vmax.f32 %v2486_v52, %v2496_v58  ;;  %v3152_v16 = vmax.f32 %v2559_v57, %v2569_v6  ;;  %v2498_v8 = vpop.f32.mrb[62].mxu0  ;;  %v2571_v9 = vpop.f32.mrb[62].mxu1 }
 0x1a0   : > { %v3207_v11 = vmax.f32 %v3091_v60, %v3149_v4  ;;  %v3209_v12 = vmax.f32 %v3093_v61, %v3151_v39  ;;  %v3178_v24 = vmax.f32 %v2488_v59, %v2498_v8  ;;  %v3180_v37 = vmax.f32 %v2561_v20, %v2571_v9  ;;  %v2500_v23 = vpop.f32.mrb[63].mxu0  ;;  %v2573_v43 = vpop.f32.mrb[63].mxu1 }
 0x1a1   : > { %v3208_v44 = vmax.f32 %v3092_v19, %v3150_v7  ;;  %v3210_v63 = vmax.f32 %v3094_v21, %v3152_v16  ;;  %v3179_v45 = vmax.f32 %v2490_v62, %v2500_v23  ;;  %v3181_v41 = vmax.f32 %v2563_v1, %v2573_v43 }
 0x1a2   : > { %v3277_v26 = vadd.f32 %v5163_v17, %v3207_v11  ;;  %v3279_v28 = vadd.f32 %v5163_v17, %v3209_v12  ;;  %v3236_v46 = vmax.f32 %v3120_v42, %v3178_v24  ;;  %v3238_v47 = vmax.f32 %v3122_v33, %v3180_v37 }
 0x1a3   : > { %v3278_v5 = vadd.f32 %v5163_v17, %v3208_v44  ;;  %v3280_v49 = vadd.f32 %v5163_v17, %v3210_v63  ;;  %v3237_v30 = vmax.f32 %v3121_v38, %v3179_v45  ;;  %v3239_v10 = vmax.f32 %v3123_v27, %v3181_v41 }
 0x1a4   : > { %v3335_v31 = vmax.f32 %v3277_v26, 0.0  ;;  %v3337_v50 = vmax.f32 %v3279_v28, 0.0  ;;  %v3306_v54 = vadd.f32 %v5182_v25, %v3236_v46  ;;  %v3308_v55 = vadd.f32 %v5182_v25, %v3238_v47 }
 0x1a5   : > { %v3336_v13 = vmax.f32 %v3278_v5, 0.0  ;;  %v3338_v29 = vmax.f32 %v3280_v49, 0.0  ;;  %v3307_v34 = vadd.f32 %v5182_v25, %v3237_v30  ;;  %v3309_v48 = vadd.f32 %v5182_v25, %v3239_v10 }
 0x1a6   : > { %v3364_v0 = vmax.f32 %v3306_v54, 0.0  ;;  %v3366_v15 = vmax.f32 %v3308_v55, 0.0 }
 0x1a7   : > { %v4046_v35 = vpack.c.bf16 %v3336_v13, %v3335_v31  ;;  %v4047_v56 = vpack.c.bf16 %v3338_v29, %v3337_v50  ;;  %v3365_v60 = vmax.f32 %v3307_v34, 0.0  ;;  %v3367_v61 = vmax.f32 %v3309_v48, 0.0 }
 0x1a9   : > { %3563 = vst [vmem:[%s5213_s5 + $0x30] sm:$0xff] %v4046_v35  ;;  %3564 = vst [vmem:[%s5213_s5 + $0x38] sm:$0xff] %v4047_v56  ;;  %v4061_v14 = vpack.c.bf16 %v3365_v60, %v3364_v0  ;;  %v4062_v18 = vpack.c.bf16 %v3367_v61, %v3366_v15 }
 0x1ab   : > { %3579 = vst [vmem:[%s5213_s5 + $0xa4] sm:$0xff] %v4061_v14  ;;  %3580 = vst [vmem:[%s5213_s5 + $0xac] sm:$0xff] %v4062_v18 }
 0x1ad   : > { %v2610_v19 = vpop.f32.mrb[64].mxu0  ;;  %v2683_v21 = vpop.f32.mrb[64].mxu1 }
 0x1ae   : > { %v2612_v22 = vpop.f32.mrb[65].mxu0  ;;  %v2685_v32 = vpop.f32.mrb[65].mxu1 }
 0x1af   : > { %v2614_v42 = vpop.f32.mrb[66].mxu0  ;;  %v2687_v33 = vpop.f32.mrb[66].mxu1 }
 0x1b0   : > { %v2616_v36 = vpop.f32.mrb[67].mxu0  ;;  %v2689_v53 = vpop.f32.mrb[67].mxu1 }
 0x1b5   : > { %v2620_v38 = vpop.f32.mrb[68].mxu0  ;;  %v2693_v27 = vpop.f32.mrb[68].mxu1 }
 0x1b6   : > { %v3095_v40 = vmax.f32 %v2610_v19, %v2620_v38  ;;  %v3097_v51 = vmax.f32 %v2683_v21, %v2693_v27  ;;  %v2622_v52 = vpop.f32.mrb[69].mxu0  ;;  %v2695_v57 = vpop.f32.mrb[69].mxu1 }
 0x1b7   : > { %v3096_v59 = vmax.f32 %v2612_v22, %v2622_v52  ;;  %v3098_v20 = vmax.f32 %v2685_v32, %v2695_v57  ;;  %v2624_v62 = vpop.f32.mrb[70].mxu0  ;;  %v2697_v1 = vpop.f32.mrb[70].mxu1 }
 0x1b8   : > { %v3124_v2 = vmax.f32 %v2614_v42, %v2624_v62  ;;  %v3126_v3 = vmax.f32 %v2687_v33, %v2697_v1  ;;  %v2626_v4 = vpop.f32.mrb[71].mxu0  ;;  %v2699_v39 = vpop.f32.mrb[71].mxu1 }
 0x1b9   : > { %v3125_v58 = vmax.f32 %v2616_v36, %v2626_v4  ;;  %v3127_v6 = vmax.f32 %v2689_v53, %v2699_v39 }
 0x1bd   : > { %v2630_v7 = vpop.f32.mrb[72].mxu0  ;;  %v2703_v16 = vpop.f32.mrb[72].mxu1 }
 0x1be   : > { %v2632_v8 = vpop.f32.mrb[73].mxu0  ;;  %v2705_v9 = vpop.f32.mrb[73].mxu1 }
 0x1bf   : > { %v2634_v11 = vpop.f32.mrb[74].mxu0  ;;  %v2707_v12 = vpop.f32.mrb[74].mxu1 }
 0x1c0   : > { %v2636_v24 = vpop.f32.mrb[75].mxu0  ;;  %v2709_v37 = vpop.f32.mrb[75].mxu1 }
 0x1c5   : > { %v2640_v23 = vpop.f32.mrb[76].mxu0  ;;  %v2713_v43 = vpop.f32.mrb[76].mxu1 }
 0x1c6   : > { %v3153_v44 = vmax.f32 %v2630_v7, %v2640_v23  ;;  %v3155_v63 = vmax.f32 %v2703_v16, %v2713_v43  ;;  %v2642_v45 = vpop.f32.mrb[77].mxu0  ;;  %v2715_v41 = vpop.f32.mrb[77].mxu1 }
 0x1c7   : > { %v3154_v26 = vmax.f32 %v2632_v8, %v2642_v45  ;;  %v3156_v28 = vmax.f32 %v2705_v9, %v2715_v41  ;;  %v2644_v46 = vpop.f32.mrb[78].mxu0  ;;  %v2717_v47 = vpop.f32.mrb[78].mxu1 }
 0x1c8   : > { %v3211_v5 = vmax.f32 %v3095_v40, %v3153_v44  ;;  %v3213_v49 = vmax.f32 %v3097_v51, %v3155_v63  ;;  %v3182_v30 = vmax.f32 %v2634_v11, %v2644_v46  ;;  %v3184_v10 = vmax.f32 %v2707_v12, %v2717_v47  ;;  %v2646_v31 = vpop.f32.mrb[79].mxu0  ;;  %v2719_v50 = vpop.f32.mrb[79].mxu1 }
 0x1c9   : > { %v3212_v54 = vmax.f32 %v3096_v59, %v3154_v26  ;;  %v3214_v55 = vmax.f32 %v3098_v20, %v3156_v28  ;;  %v3183_v13 = vmax.f32 %v2636_v24, %v2646_v31  ;;  %v3185_v29 = vmax.f32 %v2709_v37, %v2719_v50 }
 0x1ca   : > { %v3281_v34 = vadd.f32 %v5163_v17, %v3211_v5  ;;  %v3283_v48 = vadd.f32 %v5163_v17, %v3213_v49  ;;  %v3240_v0 = vmax.f32 %v3124_v2, %v3182_v30  ;;  %v3242_v15 = vmax.f32 %v3126_v3, %v3184_v10 }
 0x1cb   : > { %v3282_v35 = vadd.f32 %v5163_v17, %v3212_v54  ;;  %v3284_v56 = vadd.f32 %v5163_v17, %v3214_v55  ;;  %v3241_v60 = vmax.f32 %v3125_v58, %v3183_v13  ;;  %v3243_v61 = vmax.f32 %v3127_v6, %v3185_v29 }
 0x1cc   : > { %v3339_v14 = vmax.f32 %v3281_v34, 0.0  ;;  %v3341_v18 = vmax.f32 %v3283_v48, 0.0  ;;  %v3310_v19 = vadd.f32 %v5182_v25, %v3240_v0  ;;  %v3312_v21 = vadd.f32 %v5182_v25, %v3242_v15 }
 0x1cd   : > { %v3340_v22 = vmax.f32 %v3282_v35, 0.0  ;;  %v3342_v32 = vmax.f32 %v3284_v56, 0.0  ;;  %v3311_v42 = vadd.f32 %v5182_v25, %v3241_v60  ;;  %v3313_v33 = vadd.f32 %v5182_v25, %v3243_v61 }
 0x1ce   : > { %v3368_v36 = vmax.f32 %v3310_v19, 0.0  ;;  %v3370_v53 = vmax.f32 %v3312_v21, 0.0 }
 0x1cf   : > { %v4048_v38 = vpack.c.bf16 %v3340_v22, %v3339_v14  ;;  %v4049_v27 = vpack.c.bf16 %v3342_v32, %v3341_v18  ;;  %v3369_v40 = vmax.f32 %v3311_v42, 0.0  ;;  %v3371_v51 = vmax.f32 %v3313_v33, 0.0 }
 0x1d1   : > { %3565 = vst [vmem:[%s5213_s5 + $0x40] sm:$0xff] %v4048_v38  ;;  %3566 = vst [vmem:[%s5213_s5 + $0x48] sm:$0xff] %v4049_v27  ;;  %v4063_v52 = vpack.c.bf16 %v3369_v40, %v3368_v36  ;;  %v4064_v57 = vpack.c.bf16 %v3371_v51, %v3370_v53 }
 0x1d3   : > { %3581 = vst [vmem:[%s5213_s5 + $0xb4] sm:$0xff] %v4063_v52  ;;  %3582 = vst [vmem:[%s5213_s5 + $0xbc] sm:$0xff] %v4064_v57 }
 0x1d5   : > { %v2756_v59 = vpop.f32.mrb[80].mxu0  ;;  %v2829_v20 = vpop.f32.mrb[80].mxu1 }
 0x1d6   : > { %v2758_v62 = vpop.f32.mrb[81].mxu0  ;;  %v2831_v1 = vpop.f32.mrb[81].mxu1 }
 0x1d7   : > { %v2760_v2 = vpop.f32.mrb[82].mxu0  ;;  %v2833_v3 = vpop.f32.mrb[82].mxu1 }
 0x1d8   : > { %v2762_v4 = vpop.f32.mrb[83].mxu0  ;;  %v2835_v39 = vpop.f32.mrb[83].mxu1 }
 0x1dd   : > { %v2766_v58 = vpop.f32.mrb[84].mxu0  ;;  %v2839_v6 = vpop.f32.mrb[84].mxu1 }
 0x1de   : > { %v3099_v7 = vmax.f32 %v2756_v59, %v2766_v58  ;;  %v3101_v16 = vmax.f32 %v2829_v20, %v2839_v6  ;;  %v2768_v8 = vpop.f32.mrb[85].mxu0  ;;  %v2841_v9 = vpop.f32.mrb[85].mxu1 }
 0x1df   : > { %v3100_v11 = vmax.f32 %v2758_v62, %v2768_v8  ;;  %v3102_v12 = vmax.f32 %v2831_v1, %v2841_v9  ;;  %v2770_v24 = vpop.f32.mrb[86].mxu0  ;;  %v2843_v37 = vpop.f32.mrb[86].mxu1 }
 0x1e0   : > { %v3128_v23 = vmax.f32 %v2760_v2, %v2770_v24  ;;  %v3130_v43 = vmax.f32 %v2833_v3, %v2843_v37  ;;  %v2772_v44 = vpop.f32.mrb[87].mxu0  ;;  %v2845_v63 = vpop.f32.mrb[87].mxu1 }
 0x1e1   : > { %v3129_v45 = vmax.f32 %v2762_v4, %v2772_v44  ;;  %v3131_v41 = vmax.f32 %v2835_v39, %v2845_v63 }
 0x1e5   : > { %v2776_v26 = vpop.f32.mrb[88].mxu0  ;;  %v2849_v28 = vpop.f32.mrb[88].mxu1 }
 0x1e6   : > { %v2778_v46 = vpop.f32.mrb[89].mxu0  ;;  %v2851_v47 = vpop.f32.mrb[89].mxu1 }
 0x1e7   : > { %v2780_v5 = vpop.f32.mrb[90].mxu0  ;;  %v2853_v49 = vpop.f32.mrb[90].mxu1 }
 0x1e8   : > { %v2782_v30 = vpop.f32.mrb[91].mxu0  ;;  %v2855_v10 = vpop.f32.mrb[91].mxu1 }
 0x1ed   : > { %v2786_v31 = vpop.f32.mrb[92].mxu0  ;;  %v2859_v50 = vpop.f32.mrb[92].mxu1 }
 0x1ee   : > { %v3157_v54 = vmax.f32 %v2776_v26, %v2786_v31  ;;  %v3159_v55 = vmax.f32 %v2849_v28, %v2859_v50  ;;  %v2788_v13 = vpop.f32.mrb[93].mxu0  ;;  %v2861_v29 = vpop.f32.mrb[93].mxu1 }
 0x1ef   : > { %v3158_v34 = vmax.f32 %v2778_v46, %v2788_v13  ;;  %v3160_v48 = vmax.f32 %v2851_v47, %v2861_v29  ;;  %v2790_v0 = vpop.f32.mrb[94].mxu0  ;;  %v2863_v15 = vpop.f32.mrb[94].mxu1 }
 0x1f0   : > { %v3215_v35 = vmax.f32 %v3099_v7, %v3157_v54  ;;  %v3217_v56 = vmax.f32 %v3101_v16, %v3159_v55  ;;  %v3186_v60 = vmax.f32 %v2780_v5, %v2790_v0  ;;  %v3188_v61 = vmax.f32 %v2853_v49, %v2863_v15  ;;  %v2792_v14 = vpop.f32.mrb[95].mxu0  ;;  %v2865_v18 = vpop.f32.mrb[95].mxu1 }
 0x1f1   : > { %v3216_v19 = vmax.f32 %v3100_v11, %v3158_v34  ;;  %v3218_v21 = vmax.f32 %v3102_v12, %v3160_v48  ;;  %v3187_v22 = vmax.f32 %v2782_v30, %v2792_v14  ;;  %v3189_v32 = vmax.f32 %v2855_v10, %v2865_v18 }
 0x1f2   : > { %v3285_v42 = vadd.f32 %v5163_v17, %v3215_v35  ;;  %v3287_v33 = vadd.f32 %v5163_v17, %v3217_v56  ;;  %v3244_v36 = vmax.f32 %v3128_v23, %v3186_v60  ;;  %v3246_v53 = vmax.f32 %v3130_v43, %v3188_v61 }
 0x1f3   : > { %v3286_v38 = vadd.f32 %v5163_v17, %v3216_v19  ;;  %v3288_v27 = vadd.f32 %v5163_v17, %v3218_v21  ;;  %v3245_v40 = vmax.f32 %v3129_v45, %v3187_v22  ;;  %v3247_v51 = vmax.f32 %v3131_v41, %v3189_v32 }
 0x1f4   : > { %v3343_v52 = vmax.f32 %v3285_v42, 0.0  ;;  %v3345_v57 = vmax.f32 %v3287_v33, 0.0  ;;  %v3314_v59 = vadd.f32 %v5182_v25, %v3244_v36  ;;  %v3316_v20 = vadd.f32 %v5182_v25, %v3246_v53 }
 0x1f5   : > { %v3344_v62 = vmax.f32 %v3286_v38, 0.0  ;;  %v3346_v1 = vmax.f32 %v3288_v27, 0.0  ;;  %v3315_v2 = vadd.f32 %v5182_v25, %v3245_v40  ;;  %v3317_v3 = vadd.f32 %v5182_v25, %v3247_v51 }
 0x1f6   : > { %v3372_v4 = vmax.f32 %v3314_v59, 0.0  ;;  %v3374_v39 = vmax.f32 %v3316_v20, 0.0 }
 0x1f7   : > { %v4050_v58 = vpack.c.bf16 %v3344_v62, %v3343_v52  ;;  %v4051_v6 = vpack.c.bf16 %v3346_v1, %v3345_v57  ;;  %v3373_v7 = vmax.f32 %v3315_v2, 0.0  ;;  %v3375_v16 = vmax.f32 %v3317_v3, 0.0 }
 0x1f9   : > { %3567 = vst [vmem:[%s5213_s5 + $0x50] sm:$0xff] %v4050_v58  ;;  %3568 = vst [vmem:[%s5213_s5 + $0x58] sm:$0xff] %v4051_v6  ;;  %v4065_v8 = vpack.c.bf16 %v3373_v7, %v3372_v4  ;;  %v4066_v9 = vpack.c.bf16 %v3375_v16, %v3374_v39 }
 0x1fb   : > { %3583 = vst [vmem:[%s5213_s5 + $0xc4] sm:$0xff] %v4065_v8  ;;  %3584 = vst [vmem:[%s5213_s5 + $0xcc] sm:$0xff] %v4066_v9 }
 0x1fd   : > { %v2902_v11 = vpop.f32.mrb[96].mxu0 }
 0x1fe   : > { %v2975_v12 = vpop.f32.mrb[96].mxu1  ;;  %v2904_v24 = vpop.f32.mrb[97].mxu0 }
 0x1ff   : > { %v2977_v37 = vpop.f32.mrb[97].mxu1  ;;  %v2906_v23 = vpop.f32.mrb[98].mxu0 }
 0x200   : > { %v2979_v43 = vpop.f32.mrb[98].mxu1  ;;  %v2908_v44 = vpop.f32.mrb[99].mxu0 }
 0x201   : > { %v2981_v63 = vpop.f32.mrb[99].mxu1 }
 0x205   : > { %v2912_v45 = vpop.f32.mrb[100].mxu0 }
 0x206   : > { %v3103_v41 = vmax.f32 %v2902_v11, %v2912_v45  ;;  %v2985_v26 = vpop.f32.mrb[100].mxu1  ;;  %v2914_v28 = vpop.f32.mrb[101].mxu0 }
 0x207   : > { %v3105_v46 = vmax.f32 %v2975_v12, %v2985_v26  ;;  %v3104_v47 = vmax.f32 %v2904_v24, %v2914_v28  ;;  %v2987_v5 = vpop.f32.mrb[101].mxu1  ;;  %v2916_v49 = vpop.f32.mrb[102].mxu0 }
 0x208   : > { %v3106_v30 = vmax.f32 %v2977_v37, %v2987_v5  ;;  %v3132_v10 = vmax.f32 %v2906_v23, %v2916_v49  ;;  %v2989_v31 = vpop.f32.mrb[102].mxu1  ;;  %v2918_v50 = vpop.f32.mrb[103].mxu0 }
 0x209   : > { %v3134_v54 = vmax.f32 %v2979_v43, %v2989_v31  ;;  %v3133_v55 = vmax.f32 %v2908_v44, %v2918_v50  ;;  %v2991_v13 = vpop.f32.mrb[103].mxu1 }
 0x20a   : > { %v3135_v29 = vmax.f32 %v2981_v63, %v2991_v13 }
 0x20d   : > { %v2922_v34 = vpop.f32.mrb[104].mxu0 }
 0x20e   : > { %v2995_v48 = vpop.f32.mrb[104].mxu1  ;;  %v2924_v0 = vpop.f32.mrb[105].mxu0 }
 0x20f   : > { %v2997_v15 = vpop.f32.mrb[105].mxu1  ;;  %v2926_v35 = vpop.f32.mrb[106].mxu0 }
 0x210   : > { %v2999_v56 = vpop.f32.mrb[106].mxu1  ;;  %v2928_v60 = vpop.f32.mrb[107].mxu0 }
 0x211   : > { %v3001_v61 = vpop.f32.mrb[107].mxu1 }
 0x215   : > { %v2932_v14 = vpop.f32.mrb[108].mxu0 }
 0x216   : > { %v3161_v18 = vmax.f32 %v2922_v34, %v2932_v14  ;;  %v3005_v19 = vpop.f32.mrb[108].mxu1  ;;  %v2934_v21 = vpop.f32.mrb[109].mxu0 }
 0x217   : > { %v3163_v22 = vmax.f32 %v2995_v48, %v3005_v19  ;;  %v3162_v32 = vmax.f32 %v2924_v0, %v2934_v21  ;;  %v3007_v42 = vpop.f32.mrb[109].mxu1  ;;  %v2936_v33 = vpop.f32.mrb[110].mxu0 }
 0x218   : > { %v3219_v36 = vmax.f32 %v3103_v41, %v3161_v18  ;;  %v3164_v53 = vmax.f32 %v2997_v15, %v3007_v42  ;;  %v3190_v38 = vmax.f32 %v2926_v35, %v2936_v33  ;;  %v3009_v27 = vpop.f32.mrb[110].mxu1  ;;  %v2938_v40 = vpop.f32.mrb[111].mxu0 }
 0x219   : > { %v3221_v51 = vmax.f32 %v3105_v46, %v3163_v22  ;;  %v3220_v52 = vmax.f32 %v3104_v47, %v3162_v32  ;;  %v3192_v57 = vmax.f32 %v2999_v56, %v3009_v27  ;;  %v3191_v59 = vmax.f32 %v2928_v60, %v2938_v40  ;;  %v3011_v20 = vpop.f32.mrb[111].mxu1 }
 0x21a   : > { %v3289_v62 = vadd.f32 %v5163_v17, %v3219_v36  ;;  %v3222_v1 = vmax.f32 %v3106_v30, %v3164_v53  ;;  %v3248_v2 = vmax.f32 %v3132_v10, %v3190_v38  ;;  %v3193_v3 = vmax.f32 %v3001_v61, %v3011_v20 }
 0x21b   : > { %v3291_v4 = vadd.f32 %v5163_v17, %v3221_v51  ;;  %v3290_v39 = vadd.f32 %v5163_v17, %v3220_v52  ;;  %v3250_v58 = vmax.f32 %v3134_v54, %v3192_v57  ;;  %v3249_v6 = vmax.f32 %v3133_v55, %v3191_v59 }
 0x21c   : > { %v3347_v7 = vmax.f32 %v3289_v62, 0.0  ;;  %v3292_v16 = vadd.f32 %v5163_v17, %v3222_v1  ;;  %v3318_v8 = vadd.f32 %v5182_v25, %v3248_v2  ;;  %v3251_v9 = vmax.f32 %v3135_v29, %v3193_v3 }
 0x21d   : > { %v3349_v11 = vmax.f32 %v3291_v4, 0.0  ;;  %v3348_v12 = vmax.f32 %v3290_v39, 0.0  ;;  %v3320_v24 = vadd.f32 %v5182_v25, %v3250_v58  ;;  %v3319_v37 = vadd.f32 %v5182_v25, %v3249_v6 }
 0x21e   : > { %v3350_v23 = vmax.f32 %v3292_v16, 0.0  ;;  %v3376_v43 = vmax.f32 %v3318_v8, 0.0  ;;  %v3321_v44 = vadd.f32 %v5182_v25, %v3251_v9 }
 0x21f   : > { %v4052_v63 = vpack.c.bf16 %v3348_v12, %v3347_v7  ;;  %v3378_v45 = vmax.f32 %v3320_v24, 0.0  ;;  %v3377_v41 = vmax.f32 %v3319_v37, 0.0 }
 0x220   : > { %v4053_v26 = vpack.c.bf16 %v3350_v23, %v3349_v11  ;;  %v3379_v28 = vmax.f32 %v3321_v44, 0.0 }
 0x221   : > { %3569 = vst [vmem:[%s5213_s5 + $0x60] sm:$0xff] %v4052_v63  ;;  %v4067_v46 = vpack.c.bf16 %v3377_v41, %v3376_v43 }
 0x222   : > { %3570 = vst [vmem:[%s5213_s5 + $0x68] sm:$0xff] %v4053_v26  ;;  %v4068_v47 = vpack.c.bf16 %v3379_v28, %v3378_v45 }
 0x223   : > { %3585 = vst [vmem:[%s5213_s5 + $0xd4] sm:$0xff] %v4067_v46 }
 0x224   : > { %3586 = vst [vmem:[%s5213_s5 + $0xdc] sm:$0xff] %v4068_v47 }
 0x226   : > { %v3048_v5 = vpop.f32.mrb[112].mxu0 }
 0x227   : > { %v3064_v49 = vpop.f32.mrb[112].mxu1  ;;  %v3050_v30 = vpop.f32.mrb[113].mxu0 }
 0x228   : > { %v3066_v10 = vpop.f32.mrb[113].mxu1  ;;  %v3051_v31 = vpop.f32.mrb[114].mxu0 }
 0x229   : > { %v3067_v50 = vpop.f32.mrb[114].mxu1  ;;  %v3053_v54 = vpop.f32.mrb[115].mxu0 }
 0x22a   : > { %v3069_v55 = vpop.f32.mrb[115].mxu1 }
 0x22e   : > { %v3056_v13 = vpop.f32.mrb[116].mxu0 }
 0x22f   : > { %v3107_v29 = vmax.f32 %v3048_v5, %v3056_v13  ;;  %v3072_v34 = vpop.f32.mrb[116].mxu1  ;;  %v3058_v48 = vpop.f32.mrb[117].mxu0 }
 0x230   : > { %v3165_v0 = vmax.f32 %v3064_v49, %v3072_v34  ;;  %v3074_v15 = vpop.f32.mrb[117].mxu1  ;;  %v3059_v35 = vpop.f32.mrb[118].mxu0 }
 0x231   : > { %v3136_v56 = vmax.f32 %v3051_v31, %v3059_v35  ;;  %v3075_v60 = vpop.f32.mrb[118].mxu1  ;;  %v3061_v61 = vpop.f32.mrb[119].mxu0 }
 0x232   : > { %v3223_v14 = vmax.f32 %v3107_v29, %v3165_v0  ;;  %v3194_v18 = vmax.f32 %v3067_v50, %v3075_v60  ;;  %v3077_v19 = vpop.f32.mrb[119].mxu1 }
 0x234   : > { %v3293_v21 = vadd.f32 %v5163_v17, %v3223_v14  ;;  %v3252_v22 = vmax.f32 %v3136_v56, %v3194_v18 }
 0x236   : > { %v3351_v32 = vmax.f32 %v3293_v21, 0.0  ;;  %v3322_v42 = vadd.f32 %v5182_v25, %v3252_v22 }
 0x238   : > { %v4054_v33 = vpack.c.bf16 %v3351_v32, %v3351_v32  ;;  %v3380_v36 = vmax.f32 %v3322_v42, 0.0 }
 0x23a   : > { %3572 = vst.msk [vmem:[%s5213_s5 + $0x70] sm:$0xf] %vm3571_vm3, %v4054_v33  ;;  %v4069_v53 = vpack.c.bf16 %v3380_v36, %v3380_v36 }
 0x23c   : > { %3587 = vst.msk [vmem:[%s5213_s5 + $0xe4] sm:$0xf] %vm3571_vm3, %v4069_v53 }
 0x23d PF: > { %s13_s12 = sadd.s32 1, %s4546_s12  }
 0x23e   : > { %p10_p4 = scmp.ge.s32.totalorder %s13_s12, 4  }
 0x240   :  { %12 = sbr.rel (!%p10_p4) target bundleno = 1 (0x1), region = 62 }

// kernel: tumor_net_forward.3
= control target key start
LH: loop header
LB: loop body
LE: loop exit
PB: predicated region body
PF: predicated region fallthrough
CT: control target
= control target key end

     0   :  { %s7461_s0 = inlined_call_operand.vmem [shape: bf16[2,57600], index: 0, kind: input, shape index: {}]   ;;  %s7462_s1 = inlined_call_operand.vmem [shape: s8[64,57600], index: 1, kind: input, shape index: {}]   ;;  %s7463_s2 = inlined_call_operand.vmem [shape: f32[1,64], index: 2, kind: input, shape index: {}]   ;;  %s7464_s3 = inlined_call_operand.vmem [shape: f32[1,64], index: 3, kind: input, shape index: {}]   ;;  %s7465_s4 = inlined_call_operand.vmem [shape: f32[1,64], index: 4, kind: input, shape index: {}]   ;;  %s7466_s5 = inlined_call_operand.<no memory space> [shape: f32[1,1], index: 5, kind: input, shape index: {}]   ;;  %s7467_s6 = inlined_call_operand.vmem [shape: f32[2,1], index: 6, kind: output, shape index: {}]  }
   0x1   :  { %v11_v0 = vstv %s7466_s5 }
   0x2   :  { %12 = vst [vmem:[#allocation3] sm:$0x1] %v11_v0 }
   0x3   :  { %s6126_s23 = smov 0   ;;  %s6128_s24 = smov 0  }
   0x4   :  { %s6130_s25 = smov 0  }
   0x5 LB: > { %s6142_s5 = sadd.s32 4294967295, %s6084_s25   ;;  %s6145_s26 = sadd.s32 1, %s6084_s25   ;;  %s6084_s25 = sphi %s6130_s25, %s7470_s25   ;;  %s6080_s24 = sphi %s6128_s24, %s7469_s24   ;;  %s6076_s23 = sphi %s6126_s23, %s7468_s23  }
   0x6   : > { %s48_s27 = ssub.s32 %s6084_s25, %s6145_s26  ;;  %s51_s28 = sadd.s32 1, %s6080_s24 }
   0x7   : > { %p49_p0 = scmp.eq.s32.totalorder %s48_s27, 0  ;;  %p58_p1 = scmp.ne.s32.totalorder %s6080_s24, %s6076_s23 }
   0x8   : > { %p59_p2 = scmp.eq.s32.totalorder %s6084_s25, 0  ;;  %p5999_p4 = scmp.ge.s32.totalorder %s6084_s25, 3 }
   0x9   : > { %s6154_s29 = scalar_select %p49_p0, %s6080_s24, %s51_s28  }
   0xa   : > { %p60_p3 = por %p59_p2, %p58_p1  ;;  %201 = sbr.rel (%p5999_p4) target bundleno = 172 (0xac), region = 32 }
  0x11   : > { %212 = sbr.rel (!%p60_p3) target bundleno = 172 (0xac), region = 40  ;;  %s214_s30 = sand.u32 (%p60_p3), 1, %s6080_s24  }
  0x12   : > { %s6010_s7 = smul.u32 (%p60_p3), 1200, %s6084_s25 }
  0x13   : > { %s6011_s8 = smul.u32 (%p60_p3), 2400, %s214_s30 }
  0x14   : > { %s6162_s11 = scalar_lea.vmem (%p60_p3), %s7462_s1, %s6010_s7 }
  0x15   : > { %v232_v1 = vld [vmem:[%s6162_s11] sm:$0xff] (%p60_p3)  ;;  %v234_v2 = vld [vmem:[%s6162_s11 + $0x8] sm:$0xff] (%p60_p3)  ;;  %v236_v3 = vld [vmem:[%s6162_s11 + $0x10] sm:$0xff] (%p60_p3)  ;;  %s6167_s12 = scalar_lea.vmem (%p60_p3), [#allocation4], %s6011_s8 }
  0x16   : > { %233 = vst [vmem:[%s6167_s12] sm:$0xff] (%p60_p3), %v232_v1  ;;  %235 = vst [vmem:[%s6167_s12 + $0x8] sm:$0xff] (%p60_p3), %v234_v2  ;;  %v238_v4 = vld [vmem:[%s6162_s11 + $0x18] sm:$0xff] (%p60_p3)  ;;  %v240_v5 = vld [vmem:[%s6162_s11 + $0x20] sm:$0xff] (%p60_p3) }
  0x17   : > { %237 = vst [vmem:[%s6167_s12 + $0x10] sm:$0xff] (%p60_p3), %v236_v3  ;;  %v242_v6 = vld [vmem:[%s6162_s11 + $0x28] sm:$0xff] (%p60_p3)  ;;  %239 = vst [vmem:[%s6167_s12 + $0x18] sm:$0xff] (%p60_p3), %v238_v4  ;;  %v244_v7 = vld [vmem:[%s6162_s11 + $0x30] sm:$0xff] (%p60_p3) }
  0x18   : > { %241 = vst [vmem:[%s6167_s12 + $0x20] sm:$0xff] %v240_v5  ;;  %243 = vst [vmem:[%s6167_s12 + $0x28] sm:$0xff] %v242_v6  ;;  %v246_v8 = vld [vmem:[%s6162_s11 + $0x38] sm:$0xff]  ;;  %v248_v9 = vld [vmem:[%s6162_s11 + $0x40] sm:$0xff] }
  0x19   : > { %245 = vst [vmem:[%s6167_s12 + $0x30] sm:$0xff] %v244_v7  ;;  %247 = vst [vmem:[%s6167_s12 + $0x38] sm:$0xff] %v246_v8  ;;  %v250_v10 = vld [vmem:[%s6162_s11 + $0x48] sm:$0xff]  ;;  %v252_v11 = vld [vmem:[%s6162_s11 + $0x50] sm:$0xff] }
  0x1a   : > { %249 = vst [vmem:[%s6167_s12 + $0x40] sm:$0xff] %v248_v9  ;;  %v254_v12 = vld [vmem:[%s6162_s11 + $0x58] sm:$0xff]  ;;  %251 = vst [vmem:[%s6167_s12 + $0x48] sm:$0xff] %v250_v10  ;;  %v256_v13 = vld [vmem:[%s6162_s11 + $0x60] sm:$0xff] }
  0x1b   : > { %253 = vst [vmem:[%s6167_s12 + $0x50] sm:$0xff] %v252_v11  ;;  %255 = vst [vmem:[%s6167_s12 + $0x58] sm:$0xff] %v254_v12  ;;  %v258_v14 = vld [vmem:[%s6162_s11 + $0x68] sm:$0xff]  ;;  %v260_v15 = vld [vmem:[%s6162_s11 + $0x70] sm:$0xff] }
  0x1c   : > { %257 = vst [vmem:[%s6167_s12 + $0x60] sm:$0xff] %v256_v13  ;;  %259 = vst [vmem:[%s6167_s12 + $0x68] sm:$0xff] %v258_v14  ;;  %v262_v16 = vld [vmem:[%s6162_s11 + $0x78] sm:$0xff]  ;;  %v264_v17 = vld [vmem:[%s6162_s11 + $0x80] sm:$0xff] }
  0x1d   : > { %261 = vst [vmem:[%s6167_s12 + $0x70] sm:$0xff] %v260_v15  ;;  %v266_v18 = vld [vmem:[%s6162_s11 + $0x88] sm:$0xff]  ;;  %263 = vst [vmem:[%s6167_s12 + $0x78] sm:$0xff] %v262_v16  ;;  %v268_v19 = vld [vmem:[%s6162_s11 + $0x90] sm:$0xff] }
  0x1e   : > { %265 = vst [vmem:[%s6167_s12 + $0x80] sm:$0xff] %v264_v17  ;;  %267 = vst [vmem:[%s6167_s12 + $0x88] sm:$0xff] %v266_v18  ;;  %v270_v20 = vld [vmem:[%s6162_s11 + $0x98] sm:$0xff]  ;;  %v272_v21 = vld [vmem:[%s6162_s11 + $0xa0] sm:$0xff] }
  0x1f   : > { %269 = vst [vmem:[%s6167_s12 + $0x90] sm:$0xff] %v268_v19  ;;  %271 = vst [vmem:[%s6167_s12 + $0x98] sm:$0xff] %v270_v20  ;;  %v274_v22 = vld [vmem:[%s6162_s11 + $0xa8] sm:$0xff]  ;;  %v276_v23 = vld [vmem:[%s6162_s11 + $0xb0] sm:$0xff] }
  0x20   : > { %273 = vst [vmem:[%s6167_s12 + $0xa0] sm:$0xff] %v272_v21  ;;  %v278_v24 = vld [vmem:[%s6162_s11 + $0xb8] sm:$0xff]  ;;  %275 = vst [vmem:[%s6167_s12 + $0xa8] sm:$0xff] %v274_v22  ;;  %v280_v25 = vld [vmem:[%s6162_s11 + $0xc0] sm:$0xff] }
  0x21   : > { %277 = vst [vmem:[%s6167_s12 + $0xb0] sm:$0xff] %v276_v23  ;;  %279 = vst [vmem:[%s6167_s12 + $0xb8] sm:$0xff] %v278_v24  ;;  %v282_v26 = vld [vmem:[%s6162_s11 + $0xc8] sm:$0xff]  ;;  %v284_v27 = vld [vmem:[%s6162_s11 + $0xd0] sm:$0xff] }
  0x22   : > { %281 = vst [vmem:[%s6167_s12 + $0xc0] sm:$0xff] %v280_v25  ;;  %283 = vst [vmem:[%s6167_s12 + $0xc8] sm:$0xff] %v282_v26  ;;  %v286_v28 = vld [vmem:[%s6162_s11 + $0xd8] sm:$0xff]  ;;  %v288_v29 = vld [vmem:[%s6162_s11 + $0xe0] sm:$0xff] }
  0x23   : > { %285 = vst [vmem:[%s6167_s12 + $0xd0] sm:$0xff] %v284_v27  ;;  %v290_v30 = vld [vmem:[%s6162_s11 + $0xe8] sm:$0xff]  ;;  %287 = vst [vmem:[%s6167_s12 + $0xd8] sm:$0xff] %v286_v28  ;;  %v292_v31 = vld [vmem:[%s6162_s11 + $0xf0] sm:$0xff] }
  0x24   : > { %289 = vst [vmem:[%s6167_s12 + $0xe0] sm:$0xff] %v288_v29  ;;  %291 = vst [vmem:[%s6167_s12 + $0xe8] sm:$0xff] %v290_v30  ;;  %v294_v32 = vld [vmem:[%s6162_s11 + $0xf8] sm:$0xff]  ;;  %v296_v33 = vld [vmem:[%s6162_s11 + $0x100] sm:$0xff] }
  0x25   : > { %293 = vst [vmem:[%s6167_s12 + $0xf0] sm:$0xff] %v292_v31  ;;  %295 = vst [vmem:[%s6167_s12 + $0xf8] sm:$0xff] %v294_v32  ;;  %v298_v34 = vld [vmem:[%s6162_s11 + $0x108] sm:$0xff]  ;;  %v300_v35 = vld [vmem:[%s6162_s11 + $0x110] sm:$0xff] }
  0x26   : > { %297 = vst [vmem:[%s6167_s12 + $0x100] sm:$0xff] %v296_v33  ;;  %v302_v36 = vld [vmem:[%s6162_s11 + $0x118] sm:$0xff]  ;;  %299 = vst [vmem:[%s6167_s12 + $0x108] sm:$0xff] %v298_v34  ;;  %v304_v37 = vld [vmem:[%s6162_s11 + $0x120] sm:$0xff] }
  0x27   : > { %301 = vst [vmem:[%s6167_s12 + $0x110] sm:$0xff] %v300_v35  ;;  %303 = vst [vmem:[%s6167_s12 + $0x118] sm:$0xff] %v302_v36  ;;  %v306_v38 = vld [vmem:[%s6162_s11 + $0x128] sm:$0xff]  ;;  %v308_v39 = vld [vmem:[%s6162_s11 + $0x130] sm:$0xff] }
  0x28   : > { %305 = vst [vmem:[%s6167_s12 + $0x120] sm:$0xff] %v304_v37  ;;  %307 = vst [vmem:[%s6167_s12 + $0x128] sm:$0xff] %v306_v38  ;;  %v310_v40 = vld [vmem:[%s6162_s11 + $0x138] sm:$0xff]  ;;  %v312_v41 = vld [vmem:[%s6162_s11 + $0x140] sm:$0xff] }
  0x29   : > { %309 = vst [vmem:[%s6167_s12 + $0x130] sm:$0xff] %v308_v39  ;;  %v314_v42 = vld [vmem:[%s6162_s11 + $0x148] sm:$0xff]  ;;  %311 = vst [vmem:[%s6167_s12 + $0x138] sm:$0xff] %v310_v40  ;;  %v316_v43 = vld [vmem:[%s6162_s11 + $0x150] sm:$0xff] }
  0x2a   : > { %313 = vst [vmem:[%s6167_s12 + $0x140] sm:$0xff] %v312_v41  ;;  %315 = vst [vmem:[%s6167_s12 + $0x148] sm:$0xff] %v314_v42  ;;  %v318_v44 = vld [vmem:[%s6162_s11 + $0x158] sm:$0xff]  ;;  %v320_v45 = vld [vmem:[%s6162_s11 + $0x160] sm:$0xff] }
  0x2b   : > { %317 = vst [vmem:[%s6167_s12 + $0x150] sm:$0xff] %v316_v43  ;;  %319 = vst [vmem:[%s6167_s12 + $0x158] sm:$0xff] %v318_v44  ;;  %v322_v46 = vld [vmem:[%s6162_s11 + $0x168] sm:$0xff]  ;;  %v324_v47 = vld [vmem:[%s6162_s11 + $0x170] sm:$0xff] }
  0x2c   : > { %321 = vst [vmem:[%s6167_s12 + $0x160] sm:$0xff] %v320_v45  ;;  %v326_v48 = vld [vmem:[%s6162_s11 + $0x178] sm:$0xff]  ;;  %323 = vst [vmem:[%s6167_s12 + $0x168] sm:$0xff] %v322_v46  ;;  %v328_v49 = vld [vmem:[%s6162_s11 + $0x180] sm:$0xff] }
  0x2d   : > { %325 = vst [vmem:[%s6167_s12 + $0x170] sm:$0xff] %v324_v47  ;;  %327 = vst [vmem:[%s6167_s12 + $0x178] sm:$0xff] %v326_v48  ;;  %v330_v50 = vld [vmem:[%s6162_s11 + $0x188] sm:$0xff]  ;;  %v332_v51 = vld [vmem:[%s6162_s11 + $0x190] sm:$0xff] }
  0x2e   : > { %329 = vst [vmem:[%s6167_s12 + $0x180] sm:$0xff] %v328_v49  ;;  %331 = vst [vmem:[%s6167_s12 + $0x188] sm:$0xff] %v330_v50  ;;  %v334_v52 = vld [vmem:[%s6162_s11 + $0x198] sm:$0xff]  ;;  %v336_v53 = vld [vmem:[%s6162_s11 + $0x1a0] sm:$0xff] }
  0x2f   : > { %333 = vst [vmem:[%s6167_s12 + $0x190] sm:$0xff] %v332_v51  ;;  %v338_v54 = vld [vmem:[%s6162_s11 + $0x1a8] sm:$0xff]  ;;  %335 = vst [vmem:[%s6167_s12 + $0x198] sm:$0xff] %v334_v52  ;;  %v340_v55 = vld [vmem:[%s6162_s11 + $0x1b0] sm:$0xff] }
  0x30   : > { %337 = vst [vmem:[%s6167_s12 + $0x1a0] sm:$0xff] %v336_v53  ;;  %339 = vst [vmem:[%s6167_s12 + $0x1a8] sm:$0xff] %v338_v54  ;;  %v342_v56 = vld [vmem:[%s6162_s11 + $0x1b8] sm:$0xff]  ;;  %v344_v57 = vld [vmem:[%s6162_s11 + $0x1c0] sm:$0xff] }
  0x31   : > { %341 = vst [vmem:[%s6167_s12 + $0x1b0] sm:$0xff] %v340_v55  ;;  %343 = vst [vmem:[%s6167_s12 + $0x1b8] sm:$0xff] %v342_v56  ;;  %v346_v58 = vld [vmem:[%s6162_s11 + $0x1c8] sm:$0xff]  ;;  %v348_v59 = vld [vmem:[%s6162_s11 + $0x1d0] sm:$0xff] }
  0x32   : > { %345 = vst [vmem:[%s6167_s12 + $0x1c0] sm:$0xff] %v344_v57  ;;  %v350_v60 = vld [vmem:[%s6162_s11 + $0x1d8] sm:$0xff]  ;;  %347 = vst [vmem:[%s6167_s12 + $0x1c8] sm:$0xff] %v346_v58  ;;  %v352_v61 = vld [vmem:[%s6162_s11 + $0x1e0] sm:$0xff] }
  0x33   : > { %349 = vst [vmem:[%s6167_s12 + $0x1d0] sm:$0xff] %v348_v59  ;;  %351 = vst [vmem:[%s6167_s12 + $0x1d8] sm:$0xff] %v350_v60  ;;  %v354_v62 = vld [vmem:[%s6162_s11 + $0x1e8] sm:$0xff]  ;;  %v356_v63 = vld [vmem:[%s6162_s11 + $0x1f0] sm:$0xff] }
  0x34   : > { %353 = vst [vmem:[%s6167_s12 + $0x1e0] sm:$0xff] %v352_v61  ;;  %355 = vst [vmem:[%s6167_s12 + $0x1e8] sm:$0xff] %v354_v62  ;;  %v358_v0 = vld [vmem:[%s6162_s11 + $0x1f8] sm:$0xff]  ;;  %v360_v1 = vld [vmem:[%s6162_s11 + $0x200] sm:$0xff] }
  0x35   : > { %357 = vst [vmem:[%s6167_s12 + $0x1f0] sm:$0xff] %v356_v63  ;;  %v362_v2 = vld [vmem:[%s6162_s11 + $0x208] sm:$0xff]  ;;  %359 = vst [vmem:[%s6167_s12 + $0x1f8] sm:$0xff] %v358_v0  ;;  %v364_v3 = vld [vmem:[%s6162_s11 + $0x210] sm:$0xff] }
  0x36   : > { %361 = vst [vmem:[%s6167_s12 + $0x200] sm:$0xff] %v360_v1  ;;  %363 = vst [vmem:[%s6167_s12 + $0x208] sm:$0xff] %v362_v2  ;;  %v366_v4 = vld [vmem:[%s6162_s11 + $0x218] sm:$0xff]  ;;  %v368_v5 = vld [vmem:[%s6162_s11 + $0x220] sm:$0xff] }
  0x37   : > { %365 = vst [vmem:[%s6167_s12 + $0x210] sm:$0xff] %v364_v3  ;;  %367 = vst [vmem:[%s6167_s12 + $0x218] sm:$0xff] %v366_v4  ;;  %v370_v6 = vld [vmem:[%s6162_s11 + $0x228] sm:$0xff]  ;;  %v372_v7 = vld [vmem:[%s6162_s11 + $0x230] sm:$0xff] }
  0x38   : > { %369 = vst [vmem:[%s6167_s12 + $0x220] sm:$0xff] %v368_v5  ;;  %v374_v8 = vld [vmem:[%s6162_s11 + $0x238] sm:$0xff]  ;;  %371 = vst [vmem:[%s6167_s12 + $0x228] sm:$0xff] %v370_v6  ;;  %v376_v9 = vld [vmem:[%s6162_s11 + $0x240] sm:$0xff] }
  0x39   : > { %373 = vst [vmem:[%s6167_s12 + $0x230] sm:$0xff] %v372_v7  ;;  %375 = vst [vmem:[%s6167_s12 + $0x238] sm:$0xff] %v374_v8  ;;  %v378_v10 = vld [vmem:[%s6162_s11 + $0x248] sm:$0xff]  ;;  %v380_v11 = vld [vmem:[%s6162_s11 + $0x250] sm:$0xff] }
  0x3a   : > { %377 = vst [vmem:[%s6167_s12 + $0x240] sm:$0xff] %v376_v9  ;;  %379 = vst [vmem:[%s6167_s12 + $0x248] sm:$0xff] %v378_v10  ;;  %v382_v12 = vld [vmem:[%s6162_s11 + $0x258] sm:$0xff]  ;;  %v384_v13 = vld [vmem:[%s6162_s11 + $0x260] sm:$0xff] }
  0x3b   : > { %381 = vst [vmem:[%s6167_s12 + $0x250] sm:$0xff] %v380_v11  ;;  %v386_v14 = vld [vmem:[%s6162_s11 + $0x268] sm:$0xff]  ;;  %383 = vst [vmem:[%s6167_s12 + $0x258] sm:$0xff] %v382_v12  ;;  %v388_v15 = vld [vmem:[%s6162_s11 + $0x270] sm:$0xff] }
  0x3c   : > { %385 = vst [vmem:[%s6167_s12 + $0x260] sm:$0xff] %v384_v13  ;;  %387 = vst [vmem:[%s6167_s12 + $0x268] sm:$0xff] %v386_v14  ;;  %v390_v16 = vld [vmem:[%s6162_s11 + $0x278] sm:$0xff]  ;;  %v392_v17 = vld [vmem:[%s6162_s11 + $0x280] sm:$0xff] }
  0x3d   : > { %389 = vst [vmem:[%s6167_s12 + $0x270] sm:$0xff] %v388_v15  ;;  %391 = vst [vmem:[%s6167_s12 + $0x278] sm:$0xff] %v390_v16  ;;  %v394_v18 = vld [vmem:[%s6162_s11 + $0x288] sm:$0xff]  ;;  %v396_v19 = vld [vmem:[%s6162_s11 + $0x290] sm:$0xff] }
  0x3e   : > { %393 = vst [vmem:[%s6167_s12 + $0x280] sm:$0xff] %v392_v17  ;;  %v398_v20 = vld [vmem:[%s6162_s11 + $0x298] sm:$0xff]  ;;  %395 = vst [vmem:[%s6167_s12 + $0x288] sm:$0xff] %v394_v18  ;;  %v400_v21 = vld [vmem:[%s6162_s11 + $0x2a0] sm:$0xff] }
  0x3f   : > { %397 = vst [vmem:[%s6167_s12 + $0x290] sm:$0xff] %v396_v19  ;;  %399 = vst [vmem:[%s6167_s12 + $0x298] sm:$0xff] %v398_v20  ;;  %v402_v22 = vld [vmem:[%s6162_s11 + $0x2a8] sm:$0xff]  ;;  %v404_v23 = vld [vmem:[%s6162_s11 + $0x2b0] sm:$0xff] }
  0x40   : > { %401 = vst [vmem:[%s6167_s12 + $0x2a0] sm:$0xff] %v400_v21  ;;  %403 = vst [vmem:[%s6167_s12 + $0x2a8] sm:$0xff] %v402_v22  ;;  %v406_v24 = vld [vmem:[%s6162_s11 + $0x2b8] sm:$0xff]  ;;  %v408_v25 = vld [vmem:[%s6162_s11 + $0x2c0] sm:$0xff] }
  0x41   : > { %405 = vst [vmem:[%s6167_s12 + $0x2b0] sm:$0xff] %v404_v23  ;;  %v410_v26 = vld [vmem:[%s6162_s11 + $0x2c8] sm:$0xff]  ;;  %407 = vst [vmem:[%s6167_s12 + $0x2b8] sm:$0xff] %v406_v24  ;;  %v412_v27 = vld [vmem:[%s6162_s11 + $0x2d0] sm:$0xff] }
  0x42   : > { %409 = vst [vmem:[%s6167_s12 + $0x2c0] sm:$0xff] %v408_v25  ;;  %411 = vst [vmem:[%s6167_s12 + $0x2c8] sm:$0xff] %v410_v26  ;;  %v414_v28 = vld [vmem:[%s6162_s11 + $0x2d8] sm:$0xff]  ;;  %v416_v29 = vld [vmem:[%s6162_s11 + $0x2e0] sm:$0xff] }
  0x43   : > { %413 = vst [vmem:[%s6167_s12 + $0x2d0] sm:$0xff] %v412_v27  ;;  %415 = vst [vmem:[%s6167_s12 + $0x2d8] sm:$0xff] %v414_v28  ;;  %v418_v30 = vld [vmem:[%s6162_s11 + $0x2e8] sm:$0xff]  ;;  %v420_v31 = vld [vmem:[%s6162_s11 + $0x2f0] sm:$0xff] }
  0x44   : > { %417 = vst [vmem:[%s6167_s12 + $0x2e0] sm:$0xff] %v416_v29  ;;  %v422_v32 = vld [vmem:[%s6162_s11 + $0x2f8] sm:$0xff]  ;;  %419 = vst [vmem:[%s6167_s12 + $0x2e8] sm:$0xff] %v418_v30  ;;  %v424_v33 = vld [vmem:[%s6162_s11 + $0x300] sm:$0xff] }
  0x45   : > { %421 = vst [vmem:[%s6167_s12 + $0x2f0] sm:$0xff] %v420_v31  ;;  %423 = vst [vmem:[%s6167_s12 + $0x2f8] sm:$0xff] %v422_v32  ;;  %v426_v34 = vld [vmem:[%s6162_s11 + $0x308] sm:$0xff]  ;;  %v428_v35 = vld [vmem:[%s6162_s11 + $0x310] sm:$0xff] }
  0x46   : > { %425 = vst [vmem:[%s6167_s12 + $0x300] sm:$0xff] %v424_v33  ;;  %427 = vst [vmem:[%s6167_s12 + $0x308] sm:$0xff] %v426_v34  ;;  %v430_v36 = vld [vmem:[%s6162_s11 + $0x318] sm:$0xff]  ;;  %v432_v37 = vld [vmem:[%s6162_s11 + $0x320] sm:$0xff] }
  0x47   : > { %429 = vst [vmem:[%s6167_s12 + $0x310] sm:$0xff] %v428_v35  ;;  %v434_v38 = vld [vmem:[%s6162_s11 + $0x328] sm:$0xff]  ;;  %431 = vst [vmem:[%s6167_s12 + $0x318] sm:$0xff] %v430_v36  ;;  %v436_v39 = vld [vmem:[%s6162_s11 + $0x330] sm:$0xff] }
  0x48   : > { %433 = vst [vmem:[%s6167_s12 + $0x320] sm:$0xff] %v432_v37  ;;  %435 = vst [vmem:[%s6167_s12 + $0x328] sm:$0xff] %v434_v38  ;;  %v438_v40 = vld [vmem:[%s6162_s11 + $0x338] sm:$0xff]  ;;  %v440_v41 = vld [vmem:[%s6162_s11 + $0x340] sm:$0xff] }
  0x49   : > { %437 = vst [vmem:[%s6167_s12 + $0x330] sm:$0xff] %v436_v39  ;;  %439 = vst [vmem:[%s6167_s12 + $0x338] sm:$0xff] %v438_v40  ;;  %v442_v42 = vld [vmem:[%s6162_s11 + $0x348] sm:$0xff]  ;;  %v444_v43 = vld [vmem:[%s6162_s11 + $0x350] sm:$0xff] }
  0x4a   : > { %441 = vst [vmem:[%s6167_s12 + $0x340] sm:$0xff] %v440_v41  ;;  %v446_v44 = vld [vmem:[%s6162_s11 + $0x358] sm:$0xff]  ;;  %443 = vst [vmem:[%s6167_s12 + $0x348] sm:$0xff] %v442_v42  ;;  %v448_v45 = vld [vmem:[%s6162_s11 + $0x360] sm:$0xff] }
  0x4b   : > { %445 = vst [vmem:[%s6167_s12 + $0x350] sm:$0xff] %v444_v43  ;;  %447 = vst [vmem:[%s6167_s12 + $0x358] sm:$0xff] %v446_v44  ;;  %v450_v46 = vld [vmem:[%s6162_s11 + $0x368] sm:$0xff]  ;;  %v452_v47 = vld [vmem:[%s6162_s11 + $0x370] sm:$0xff] }
  0x4c   : > { %449 = vst [vmem:[%s6167_s12 + $0x360] sm:$0xff] %v448_v45  ;;  %451 = vst [vmem:[%s6167_s12 + $0x368] sm:$0xff] %v450_v46  ;;  %v454_v48 = vld [vmem:[%s6162_s11 + $0x378] sm:$0xff]  ;;  %v456_v49 = vld [vmem:[%s6162_s11 + $0x380] sm:$0xff] }
  0x4d   : > { %453 = vst [vmem:[%s6167_s12 + $0x370] sm:$0xff] %v452_v47  ;;  %v458_v50 = vld [vmem:[%s6162_s11 + $0x388] sm:$0xff]  ;;  %455 = vst [vmem:[%s6167_s12 + $0x378] sm:$0xff] %v454_v48  ;;  %v460_v51 = vld [vmem:[%s6162_s11 + $0x390] sm:$0xff] }
  0x4e   : > { %457 = vst [vmem:[%s6167_s12 + $0x380] sm:$0xff] %v456_v49  ;;  %459 = vst [vmem:[%s6167_s12 + $0x388] sm:$0xff] %v458_v50  ;;  %v462_v52 = vld [vmem:[%s6162_s11 + $0x398] sm:$0xff]  ;;  %v464_v53 = vld [vmem:[%s6162_s11 + $0x3a0] sm:$0xff] }
  0x4f   : > { %461 = vst [vmem:[%s6167_s12 + $0x390] sm:$0xff] %v460_v51  ;;  %463 = vst [vmem:[%s6167_s12 + $0x398] sm:$0xff] %v462_v52  ;;  %v466_v54 = vld [vmem:[%s6162_s11 + $0x3a8] sm:$0xff]  ;;  %v468_v55 = vld [vmem:[%s6162_s11 + $0x3b0] sm:$0xff] }
  0x50   : > { %465 = vst [vmem:[%s6167_s12 + $0x3a0] sm:$0xff] %v464_v53  ;;  %v470_v56 = vld [vmem:[%s6162_s11 + $0x3b8] sm:$0xff]  ;;  %467 = vst [vmem:[%s6167_s12 + $0x3a8] sm:$0xff] %v466_v54  ;;  %v472_v57 = vld [vmem:[%s6162_s11 + $0x3c0] sm:$0xff] }
  0x51   : > { %469 = vst [vmem:[%s6167_s12 + $0x3b0] sm:$0xff] %v468_v55  ;;  %471 = vst [vmem:[%s6167_s12 + $0x3b8] sm:$0xff] %v470_v56  ;;  %v474_v58 = vld [vmem:[%s6162_s11 + $0x3c8] sm:$0xff]  ;;  %v476_v59 = vld [vmem:[%s6162_s11 + $0x3d0] sm:$0xff] }
  0x52   : > { %473 = vst [vmem:[%s6167_s12 + $0x3c0] sm:$0xff] %v472_v57  ;;  %475 = vst [vmem:[%s6167_s12 + $0x3c8] sm:$0xff] %v474_v58  ;;  %v478_v60 = vld [vmem:[%s6162_s11 + $0x3d8] sm:$0xff]  ;;  %v480_v61 = vld [vmem:[%s6162_s11 + $0x3e0] sm:$0xff] }
  0x53   : > { %477 = vst [vmem:[%s6167_s12 + $0x3d0] sm:$0xff] %v476_v59  ;;  %v482_v62 = vld [vmem:[%s6162_s11 + $0x3e8] sm:$0xff]  ;;  %479 = vst [vmem:[%s6167_s12 + $0x3d8] sm:$0xff] %v478_v60  ;;  %v484_v63 = vld [vmem:[%s6162_s11 + $0x3f0] sm:$0xff] }
  0x54   : > { %481 = vst [vmem:[%s6167_s12 + $0x3e0] sm:$0xff] %v480_v61  ;;  %483 = vst [vmem:[%s6167_s12 + $0x3e8] sm:$0xff] %v482_v62  ;;  %v486_v0 = vld [vmem:[%s6162_s11 + $0x3f8] sm:$0xff]  ;;  %v488_v1 = vld [vmem:[%s6162_s11 + $0x400] sm:$0xff] }
  0x55   : > { %485 = vst [vmem:[%s6167_s12 + $0x3f0] sm:$0xff] %v484_v63  ;;  %487 = vst [vmem:[%s6167_s12 + $0x3f8] sm:$0xff] %v486_v0  ;;  %v490_v2 = vld [vmem:[%s6162_s11 + $0x408] sm:$0xff]  ;;  %v492_v3 = vld [vmem:[%s6162_s11 + $0x410] sm:$0xff] }
  0x56   : > { %489 = vst [vmem:[%s6167_s12 + $0x400] sm:$0xff] %v488_v1  ;;  %v494_v4 = vld [vmem:[%s6162_s11 + $0x418] sm:$0xff]  ;;  %491 = vst [vmem:[%s6167_s12 + $0x408] sm:$0xff] %v490_v2  ;;  %v496_v5 = vld [vmem:[%s6162_s11 + $0x420] sm:$0xff] }
  0x57   : > { %493 = vst [vmem:[%s6167_s12 + $0x410] sm:$0xff] %v492_v3  ;;  %495 = vst [vmem:[%s6167_s12 + $0x418] sm:$0xff] %v494_v4  ;;  %v498_v6 = vld [vmem:[%s6162_s11 + $0x428] sm:$0xff]  ;;  %v500_v7 = vld [vmem:[%s6162_s11 + $0x430] sm:$0xff] }
  0x58   : > { %497 = vst [vmem:[%s6167_s12 + $0x420] sm:$0xff] %v496_v5  ;;  %499 = vst [vmem:[%s6167_s12 + $0x428] sm:$0xff] %v498_v6  ;;  %v502_v8 = vld [vmem:[%s6162_s11 + $0x438] sm:$0xff]  ;;  %v504_v9 = vld [vmem:[%s6162_s11 + $0x440] sm:$0xff] }
  0x59   : > { %501 = vst [vmem:[%s6167_s12 + $0x430] sm:$0xff] %v500_v7  ;;  %v506_v10 = vld [vmem:[%s6162_s11 + $0x448] sm:$0xff]  ;;  %503 = vst [vmem:[%s6167_s12 + $0x438] sm:$0xff] %v502_v8  ;;  %v508_v11 = vld [vmem:[%s6162_s11 + $0x450] sm:$0xff] }
  0x5a   : > { %505 = vst [vmem:[%s6167_s12 + $0x440] sm:$0xff] %v504_v9  ;;  %507 = vst [vmem:[%s6167_s12 + $0x448] sm:$0xff] %v506_v10  ;;  %v510_v12 = vld [vmem:[%s6162_s11 + $0x458] sm:$0xff]  ;;  %v512_v13 = vld [vmem:[%s6162_s11 + $0x460] sm:$0xff] }
  0x5b   : > { %509 = vst [vmem:[%s6167_s12 + $0x450] sm:$0xff] %v508_v11  ;;  %511 = vst [vmem:[%s6167_s12 + $0x458] sm:$0xff] %v510_v12  ;;  %v514_v14 = vld [vmem:[%s6162_s11 + $0x468] sm:$0xff]  ;;  %v516_v15 = vld [vmem:[%s6162_s11 + $0x470] sm:$0xff] }
  0x5c   : > { %513 = vst [vmem:[%s6167_s12 + $0x460] sm:$0xff] %v512_v13  ;;  %v518_v16 = vld [vmem:[%s6162_s11 + $0x478] sm:$0xff]  ;;  %515 = vst [vmem:[%s6167_s12 + $0x468] sm:$0xff] %v514_v14  ;;  %v520_v17 = vld [vmem:[%s6162_s11 + $0x480] sm:$0xff] }
  0x5d   : > { %517 = vst [vmem:[%s6167_s12 + $0x470] sm:$0xff] %v516_v15  ;;  %519 = vst [vmem:[%s6167_s12 + $0x478] sm:$0xff] %v518_v16  ;;  %v522_v18 = vld [vmem:[%s6162_s11 + $0x488] sm:$0xff]  ;;  %v524_v19 = vld [vmem:[%s6162_s11 + $0x490] sm:$0xff] }
  0x5e   : > { %521 = vst [vmem:[%s6167_s12 + $0x480] sm:$0xff] %v520_v17  ;;  %523 = vst [vmem:[%s6167_s12 + $0x488] sm:$0xff] %v522_v18  ;;  %v526_v20 = vld [vmem:[%s6162_s11 + $0x498] sm:$0xff]  ;;  %v528_v21 = vld [vmem:[%s6162_s11 + $0x4a0] sm:$0xff] }
  0x5f   : > { %525 = vst [vmem:[%s6167_s12 + $0x490] sm:$0xff] %v524_v19  ;;  %v530_v22 = vld [vmem:[%s6162_s11 + $0x4a8] sm:$0xff]  ;;  %527 = vst [vmem:[%s6167_s12 + $0x498] sm:$0xff] %v526_v20  ;;  %v532_v23 = vld [vmem:[%s6162_s11 + $0xe10] sm:$0xff] }
  0x60   : > { %529 = vst [vmem:[%s6167_s12 + $0x4a0] sm:$0xff] %v528_v21  ;;  %531 = vst [vmem:[%s6167_s12 + $0x4a8] sm:$0xff] %v530_v22  ;;  %v534_v24 = vld [vmem:[%s6162_s11 + $0xe18] sm:$0xff]  ;;  %v536_v25 = vld [vmem:[%s6162_s11 + $0xe20] sm:$0xff] }
  0x61   : > { %533 = vst [vmem:[%s6167_s12 + $0x4b0] sm:$0xff] %v532_v23  ;;  %535 = vst [vmem:[%s6167_s12 + $0x4b8] sm:$0xff] %v534_v24  ;;  %v538_v26 = vld [vmem:[%s6162_s11 + $0xe28] sm:$0xff]  ;;  %v540_v27 = vld [vmem:[%s6162_s11 + $0xe30] sm:$0xff] }
  0x62   : > { %537 = vst [vmem:[%s6167_s12 + $0x4c0] sm:$0xff] %v536_v25  ;;  %v542_v28 = vld [vmem:[%s6162_s11 + $0xe38] sm:$0xff]  ;;  %539 = vst [vmem:[%s6167_s12 + $0x4c8] sm:$0xff] %v538_v26  ;;  %v544_v29 = vld [vmem:[%s6162_s11 + $0xe40] sm:$0xff] }
  0x63   : > { %541 = vst [vmem:[%s6167_s12 + $0x4d0] sm:$0xff] %v540_v27  ;;  %543 = vst [vmem:[%s6167_s12 + $0x4d8] sm:$0xff] %v542_v28  ;;  %v546_v30 = vld [vmem:[%s6162_s11 + $0xe48] sm:$0xff]  ;;  %v548_v31 = vld [vmem:[%s6162_s11 + $0xe50] sm:$0xff] }
  0x64   : > { %545 = vst [vmem:[%s6167_s12 + $0x4e0] sm:$0xff] %v544_v29  ;;  %547 = vst [vmem:[%s6167_s12 + $0x4e8] sm:$0xff] %v546_v30  ;;  %v550_v32 = vld [vmem:[%s6162_s11 + $0xe58] sm:$0xff]  ;;  %v552_v33 = vld [vmem:[%s6162_s11 + $0xe60] sm:$0xff] }
  0x65   : > { %549 = vst [vmem:[%s6167_s12 + $0x4f0] sm:$0xff] %v548_v31  ;;  %v554_v34 = vld [vmem:[%s6162_s11 + $0xe68] sm:$0xff]  ;;  %551 = vst [vmem:[%s6167_s12 + $0x4f8] sm:$0xff] %v550_v32  ;;  %v556_v35 = vld [vmem:[%s6162_s11 + $0xe70] sm:$0xff] }
  0x66   : > { %553 = vst [vmem:[%s6167_s12 + $0x500] sm:$0xff] %v552_v33  ;;  %555 = vst [vmem:[%s6167_s12 + $0x508] sm:$0xff] %v554_v34  ;;  %v558_v36 = vld [vmem:[%s6162_s11 + $0xe78] sm:$0xff]  ;;  %v560_v37 = vld [vmem:[%s6162_s11 + $0xe80] sm:$0xff] }
  0x67   : > { %557 = vst [vmem:[%s6167_s12 + $0x510] sm:$0xff] %v556_v35  ;;  %559 = vst [vmem:[%s6167_s12 + $0x518] sm:$0xff] %v558_v36  ;;  %v562_v38 = vld [vmem:[%s6162_s11 + $0xe88] sm:$0xff]  ;;  %v564_v39 = vld [vmem:[%s6162_s11 + $0xe90] sm:$0xff] }
  0x68   : > { %561 = vst [vmem:[%s6167_s12 + $0x520] sm:$0xff] %v560_v37  ;;  %v566_v40 = vld [vmem:[%s6162_s11 + $0xe98] sm:$0xff]  ;;  %563 = vst [vmem:[%s6167_s12 + $0x528] sm:$0xff] %v562_v38  ;;  %v568_v41 = vld [vmem:[%s6162_s11 + $0xea0] sm:$0xff] }
  0x69   : > { %565 = vst [vmem:[%s6167_s12 + $0x530] sm:$0xff] %v564_v39  ;;  %567 = vst [vmem:[%s6167_s12 + $0x538] sm:$0xff] %v566_v40  ;;  %v570_v42 = vld [vmem:[%s6162_s11 + $0xea8] sm:$0xff]  ;;  %v572_v43 = vld [vmem:[%s6162_s11 + $0xeb0] sm:$0xff] }
  0x6a   : > { %569 = vst [vmem:[%s6167_s12 + $0x540] sm:$0xff] %v568_v41  ;;  %571 = vst [vmem:[%s6167_s12 + $0x548] sm:$0xff] %v570_v42  ;;  %v574_v44 = vld [vmem:[%s6162_s11 + $0xeb8] sm:$0xff]  ;;  %v576_v45 = vld [vmem:[%s6162_s11 + $0xec0] sm:$0xff] }
  0x6b   : > { %573 = vst [vmem:[%s6167_s12 + $0x550] sm:$0xff] %v572_v43  ;;  %v578_v46 = vld [vmem:[%s6162_s11 + $0xec8] sm:$0xff]  ;;  %575 = vst [vmem:[%s6167_s12 + $0x558] sm:$0xff] %v574_v44  ;;  %v580_v47 = vld [vmem:[%s6162_s11 + $0xed0] sm:$0xff] }
  0x6c   : > { %577 = vst [vmem:[%s6167_s12 + $0x560] sm:$0xff] %v576_v45  ;;  %579 = vst [vmem:[%s6167_s12 + $0x568] sm:$0xff] %v578_v46  ;;  %v582_v48 = vld [vmem:[%s6162_s11 + $0xed8] sm:$0xff]  ;;  %v584_v49 = vld [vmem:[%s6162_s11 + $0xee0] sm:$0xff] }
  0x6d   : > { %581 = vst [vmem:[%s6167_s12 + $0x570] sm:$0xff] %v580_v47  ;;  %583 = vst [vmem:[%s6167_s12 + $0x578] sm:$0xff] %v582_v48  ;;  %v586_v50 = vld [vmem:[%s6162_s11 + $0xee8] sm:$0xff]  ;;  %v588_v51 = vld [vmem:[%s6162_s11 + $0xef0] sm:$0xff] }
  0x6e   : > { %585 = vst [vmem:[%s6167_s12 + $0x580] sm:$0xff] %v584_v49  ;;  %v590_v52 = vld [vmem:[%s6162_s11 + $0xef8] sm:$0xff]  ;;  %587 = vst [vmem:[%s6167_s12 + $0x588] sm:$0xff] %v586_v50  ;;  %v592_v53 = vld [vmem:[%s6162_s11 + $0xf00] sm:$0xff] }
  0x6f   : > { %589 = vst [vmem:[%s6167_s12 + $0x590] sm:$0xff] %v588_v51  ;;  %591 = vst [vmem:[%s6167_s12 + $0x598] sm:$0xff] %v590_v52  ;;  %v594_v54 = vld [vmem:[%s6162_s11 + $0xf08] sm:$0xff]  ;;  %v596_v55 = vld [vmem:[%s6162_s11 + $0xf10] sm:$0xff] }
  0x70   : > { %593 = vst [vmem:[%s6167_s12 + $0x5a0] sm:$0xff] %v592_v53  ;;  %595 = vst [vmem:[%s6167_s12 + $0x5a8] sm:$0xff] %v594_v54  ;;  %v598_v56 = vld [vmem:[%s6162_s11 + $0xf18] sm:$0xff]  ;;  %v600_v57 = vld [vmem:[%s6162_s11 + $0xf20] sm:$0xff] }
  0x71   : > { %597 = vst [vmem:[%s6167_s12 + $0x5b0] sm:$0xff] %v596_v55  ;;  %v602_v58 = vld [vmem:[%s6162_s11 + $0xf28] sm:$0xff]  ;;  %599 = vst [vmem:[%s6167_s12 + $0x5b8] sm:$0xff] %v598_v56  ;;  %v604_v59 = vld [vmem:[%s6162_s11 + $0xf30] sm:$0xff] }
  0x72   : > { %601 = vst [vmem:[%s6167_s12 + $0x5c0] sm:$0xff] %v600_v57  ;;  %603 = vst [vmem:[%s6167_s12 + $0x5c8] sm:$0xff] %v602_v58  ;;  %v606_v60 = vld [vmem:[%s6162_s11 + $0xf38] sm:$0xff]  ;;  %v608_v61 = vld [vmem:[%s6162_s11 + $0xf40] sm:$0xff] }
  0x73   : > { %605 = vst [vmem:[%s6167_s12 + $0x5d0] sm:$0xff] %v604_v59  ;;  %607 = vst [vmem:[%s6167_s12 + $0x5d8] sm:$0xff] %v606_v60  ;;  %v610_v62 = vld [vmem:[%s6162_s11 + $0xf48] sm:$0xff]  ;;  %v612_v63 = vld [vmem:[%s6162_s11 + $0xf50] sm:$0xff] }
  0x74   : > { %609 = vst [vmem:[%s6167_s12 + $0x5e0] sm:$0xff] %v608_v61  ;;  %v614_v0 = vld [vmem:[%s6162_s11 + $0xf58] sm:$0xff]  ;;  %611 = vst [vmem:[%s6167_s12 + $0x5e8] sm:$0xff] %v610_v62  ;;  %v616_v1 = vld [vmem:[%s6162_s11 + $0xf60] sm:$0xff] }
  0x75   : > { %613 = vst [vmem:[%s6167_s12 + $0x5f0] sm:$0xff] %v612_v63  ;;  %615 = vst [vmem:[%s6167_s12 + $0x5f8] sm:$0xff] %v614_v0  ;;  %v618_v2 = vld [vmem:[%s6162_s11 + $0xf68] sm:$0xff]  ;;  %v620_v3 = vld [vmem:[%s6162_s11 + $0xf70] sm:$0xff] }
  0x76   : > { %617 = vst [vmem:[%s6167_s12 + $0x600] sm:$0xff] %v616_v1  ;;  %619 = vst [vmem:[%s6167_s12 + $0x608] sm:$0xff] %v618_v2  ;;  %v622_v4 = vld [vmem:[%s6162_s11 + $0xf78] sm:$0xff]  ;;  %v624_v5 = vld [vmem:[%s6162_s11 + $0xf80] sm:$0xff] }
  0x77   : > { %621 = vst [vmem:[%s6167_s12 + $0x610] sm:$0xff] %v620_v3  ;;  %v626_v6 = vld [vmem:[%s6162_s11 + $0xf88] sm:$0xff]  ;;  %623 = vst [vmem:[%s6167_s12 + $0x618] sm:$0xff] %v622_v4  ;;  %v628_v7 = vld [vmem:[%s6162_s11 + $0xf90] sm:$0xff] }
  0x78   : > { %625 = vst [vmem:[%s6167_s12 + $0x620] sm:$0xff] %v624_v5  ;;  %627 = vst [vmem:[%s6167_s12 + $0x628] sm:$0xff] %v626_v6  ;;  %v630_v8 = vld [vmem:[%s6162_s11 + $0xf98] sm:$0xff]  ;;  %v632_v9 = vld [vmem:[%s6162_s11 + $0xfa0] sm:$0xff] }
  0x79   : > { %629 = vst [vmem:[%s6167_s12 + $0x630] sm:$0xff] %v628_v7  ;;  %631 = vst [vmem:[%s6167_s12 + $0x638] sm:$0xff] %v630_v8  ;;  %v634_v10 = vld [vmem:[%s6162_s11 + $0xfa8] sm:$0xff]  ;;  %v636_v11 = vld [vmem:[%s6162_s11 + $0xfb0] sm:$0xff] }
  0x7a   : > { %633 = vst [vmem:[%s6167_s12 + $0x640] sm:$0xff] %v632_v9  ;;  %v638_v12 = vld [vmem:[%s6162_s11 + $0xfb8] sm:$0xff]  ;;  %635 = vst [vmem:[%s6167_s12 + $0x648] sm:$0xff] %v634_v10  ;;  %v640_v13 = vld [vmem:[%s6162_s11 + $0xfc0] sm:$0xff] }
  0x7b   : > { %637 = vst [vmem:[%s6167_s12 + $0x650] sm:$0xff] %v636_v11  ;;  %639 = vst [vmem:[%s6167_s12 + $0x658] sm:$0xff] %v638_v12  ;;  %v642_v14 = vld [vmem:[%s6162_s11 + $0xfc8] sm:$0xff]  ;;  %v644_v15 = vld [vmem:[%s6162_s11 + $0xfd0] sm:$0xff] }
  0x7c   : > { %641 = vst [vmem:[%s6167_s12 + $0x660] sm:$0xff] %v640_v13  ;;  %643 = vst [vmem:[%s6167_s12 + $0x668] sm:$0xff] %v642_v14  ;;  %v646_v16 = vld [vmem:[%s6162_s11 + $0xfd8] sm:$0xff]  ;;  %v648_v17 = vld [vmem:[%s6162_s11 + $0xfe0] sm:$0xff] }
  0x7d   : > { %645 = vst [vmem:[%s6167_s12 + $0x670] sm:$0xff] %v644_v15  ;;  %v650_v18 = vld [vmem:[%s6162_s11 + $0xfe8] sm:$0xff]  ;;  %647 = vst [vmem:[%s6167_s12 + $0x678] sm:$0xff] %v646_v16  ;;  %v652_v19 = vld [vmem:[%s6162_s11 + $0xff0] sm:$0xff] }
  0x7e   : > { %649 = vst [vmem:[%s6167_s12 + $0x680] sm:$0xff] %v648_v17  ;;  %651 = vst [vmem:[%s6167_s12 + $0x688] sm:$0xff] %v650_v18  ;;  %v654_v20 = vld [vmem:[%s6162_s11 + $0xff8] sm:$0xff]  ;;  %v656_v21 = vld [vmem:[%s6162_s11 + $0x1000] sm:$0xff] }
  0x7f   : > { %653 = vst [vmem:[%s6167_s12 + $0x690] sm:$0xff] %v652_v19  ;;  %655 = vst [vmem:[%s6167_s12 + $0x698] sm:$0xff] %v654_v20  ;;  %v658_v22 = vld [vmem:[%s6162_s11 + $0x1008] sm:$0xff]  ;;  %v660_v23 = vld [vmem:[%s6162_s11 + $0x1010] sm:$0xff] }
  0x80   : > { %657 = vst [vmem:[%s6167_s12 + $0x6a0] sm:$0xff] %v656_v21  ;;  %v662_v24 = vld [vmem:[%s6162_s11 + $0x1018] sm:$0xff]  ;;  %659 = vst [vmem:[%s6167_s12 + $0x6a8] sm:$0xff] %v658_v22  ;;  %v664_v25 = vld [vmem:[%s6162_s11 + $0x1020] sm:$0xff] }
  0x81   : > { %661 = vst [vmem:[%s6167_s12 + $0x6b0] sm:$0xff] %v660_v23  ;;  %663 = vst [vmem:[%s6167_s12 + $0x6b8] sm:$0xff] %v662_v24  ;;  %v666_v26 = vld [vmem:[%s6162_s11 + $0x1028] sm:$0xff]  ;;  %v668_v27 = vld [vmem:[%s6162_s11 + $0x1030] sm:$0xff] }
  0x82   : > { %665 = vst [vmem:[%s6167_s12 + $0x6c0] sm:$0xff] %v664_v25  ;;  %667 = vst [vmem:[%s6167_s12 + $0x6c8] sm:$0xff] %v666_v26  ;;  %v670_v28 = vld [vmem:[%s6162_s11 + $0x1038] sm:$0xff]  ;;  %v672_v29 = vld [vmem:[%s6162_s11 + $0x1040] sm:$0xff] }
  0x83   : > { %669 = vst [vmem:[%s6167_s12 + $0x6d0] sm:$0xff] %v668_v27  ;;  %v674_v30 = vld [vmem:[%s6162_s11 + $0x1048] sm:$0xff]  ;;  %671 = vst [vmem:[%s6167_s12 + $0x6d8] sm:$0xff] %v670_v28  ;;  %v676_v31 = vld [vmem:[%s6162_s11 + $0x1050] sm:$0xff] }
  0x84   : > { %673 = vst [vmem:[%s6167_s12 + $0x6e0] sm:$0xff] %v672_v29  ;;  %675 = vst [vmem:[%s6167_s12 + $0x6e8] sm:$0xff] %v674_v30  ;;  %v678_v32 = vld [vmem:[%s6162_s11 + $0x1058] sm:$0xff]  ;;  %v680_v33 = vld [vmem:[%s6162_s11 + $0x1060] sm:$0xff] }
  0x85   : > { %677 = vst [vmem:[%s6167_s12 + $0x6f0] sm:$0xff] %v676_v31  ;;  %679 = vst [vmem:[%s6167_s12 + $0x6f8] sm:$0xff] %v678_v32  ;;  %v682_v34 = vld [vmem:[%s6162_s11 + $0x1068] sm:$0xff]  ;;  %v684_v35 = vld [vmem:[%s6162_s11 + $0x1070] sm:$0xff] }
  0x86   : > { %681 = vst [vmem:[%s6167_s12 + $0x700] sm:$0xff] %v680_v33  ;;  %v686_v36 = vld [vmem:[%s6162_s11 + $0x1078] sm:$0xff]  ;;  %683 = vst [vmem:[%s6167_s12 + $0x708] sm:$0xff] %v682_v34  ;;  %v688_v37 = vld [vmem:[%s6162_s11 + $0x1080] sm:$0xff] }
  0x87   : > { %685 = vst [vmem:[%s6167_s12 + $0x710] sm:$0xff] %v684_v35  ;;  %687 = vst [vmem:[%s6167_s12 + $0x718] sm:$0xff] %v686_v36  ;;  %v690_v38 = vld [vmem:[%s6162_s11 + $0x1088] sm:$0xff]  ;;  %v692_v39 = vld [vmem:[%s6162_s11 + $0x1090] sm:$0xff] }
  0x88   : > { %689 = vst [vmem:[%s6167_s12 + $0x720] sm:$0xff] %v688_v37  ;;  %691 = vst [vmem:[%s6167_s12 + $0x728] sm:$0xff] %v690_v38  ;;  %v694_v40 = vld [vmem:[%s6162_s11 + $0x1098] sm:$0xff]  ;;  %v696_v41 = vld [vmem:[%s6162_s11 + $0x10a0] sm:$0xff] }
  0x89   : > { %693 = vst [vmem:[%s6167_s12 + $0x730] sm:$0xff] %v692_v39  ;;  %v698_v42 = vld [vmem:[%s6162_s11 + $0x10a8] sm:$0xff]  ;;  %695 = vst [vmem:[%s6167_s12 + $0x738] sm:$0xff] %v694_v40  ;;  %v700_v43 = vld [vmem:[%s6162_s11 + $0x10b0] sm:$0xff] }
  0x8a   : > { %697 = vst [vmem:[%s6167_s12 + $0x740] sm:$0xff] %v696_v41  ;;  %699 = vst [vmem:[%s6167_s12 + $0x748] sm:$0xff] %v698_v42  ;;  %v702_v44 = vld [vmem:[%s6162_s11 + $0x10b8] sm:$0xff]  ;;  %v704_v45 = vld [vmem:[%s6162_s11 + $0x10c0] sm:$0xff] }
  0x8b   : > { %701 = vst [vmem:[%s6167_s12 + $0x750] sm:$0xff] %v700_v43  ;;  %703 = vst [vmem:[%s6167_s12 + $0x758] sm:$0xff] %v702_v44  ;;  %v706_v46 = vld [vmem:[%s6162_s11 + $0x10c8] sm:$0xff]  ;;  %v708_v47 = vld [vmem:[%s6162_s11 + $0x10d0] sm:$0xff] }
  0x8c   : > { %705 = vst [vmem:[%s6167_s12 + $0x760] sm:$0xff] %v704_v45  ;;  %v710_v48 = vld [vmem:[%s6162_s11 + $0x10d8] sm:$0xff]  ;;  %707 = vst [vmem:[%s6167_s12 + $0x768] sm:$0xff] %v706_v46  ;;  %v712_v49 = vld [vmem:[%s6162_s11 + $0x10e0] sm:$0xff] }
  0x8d   : > { %709 = vst [vmem:[%s6167_s12 + $0x770] sm:$0xff] %v708_v47  ;;  %711 = vst [vmem:[%s6167_s12 + $0x778] sm:$0xff] %v710_v48  ;;  %v714_v50 = vld [vmem:[%s6162_s11 + $0x10e8] sm:$0xff]  ;;  %v716_v51 = vld [vmem:[%s6162_s11 + $0x10f0] sm:$0xff] }
  0x8e   : > { %713 = vst [vmem:[%s6167_s12 + $0x780] sm:$0xff] %v712_v49  ;;  %715 = vst [vmem:[%s6167_s12 + $0x788] sm:$0xff] %v714_v50  ;;  %v718_v52 = vld [vmem:[%s6162_s11 + $0x10f8] sm:$0xff]  ;;  %v720_v53 = vld [vmem:[%s6162_s11 + $0x1100] sm:$0xff] }
  0x8f   : > { %717 = vst [vmem:[%s6167_s12 + $0x790] sm:$0xff] %v716_v51  ;;  %v722_v54 = vld [vmem:[%s6162_s11 + $0x1108] sm:$0xff]  ;;  %719 = vst [vmem:[%s6167_s12 + $0x798] sm:$0xff] %v718_v52  ;;  %v724_v55 = vld [vmem:[%s6162_s11 + $0x1110] sm:$0xff] }
  0x90   : > { %721 = vst [vmem:[%s6167_s12 + $0x7a0] sm:$0xff] %v720_v53  ;;  %723 = vst [vmem:[%s6167_s12 + $0x7a8] sm:$0xff] %v722_v54  ;;  %v726_v56 = vld [vmem:[%s6162_s11 + $0x1118] sm:$0xff]  ;;  %v728_v57 = vld [vmem:[%s6162_s11 + $0x1120] sm:$0xff] }
  0x91   : > { %725 = vst [vmem:[%s6167_s12 + $0x7b0] sm:$0xff] %v724_v55  ;;  %727 = vst [vmem:[%s6167_s12 + $0x7b8] sm:$0xff] %v726_v56  ;;  %v730_v58 = vld [vmem:[%s6162_s11 + $0x1128] sm:$0xff]  ;;  %v732_v59 = vld [vmem:[%s6162_s11 + $0x1130] sm:$0xff] }
  0x92   : > { %729 = vst [vmem:[%s6167_s12 + $0x7c0] sm:$0xff] %v728_v57  ;;  %v734_v60 = vld [vmem:[%s6162_s11 + $0x1138] sm:$0xff]  ;;  %731 = vst [vmem:[%s6167_s12 + $0x7c8] sm:$0xff] %v730_v58  ;;  %v736_v61 = vld [vmem:[%s6162_s11 + $0x1140] sm:$0xff] }
  0x93   : > { %733 = vst [vmem:[%s6167_s12 + $0x7d0] sm:$0xff] %v732_v59  ;;  %735 = vst [vmem:[%s6167_s12 + $0x7d8] sm:$0xff] %v734_v60  ;;  %v738_v62 = vld [vmem:[%s6162_s11 + $0x1148] sm:$0xff]  ;;  %v740_v63 = vld [vmem:[%s6162_s11 + $0x1150] sm:$0xff] }
  0x94   : > { %737 = vst [vmem:[%s6167_s12 + $0x7e0] sm:$0xff] %v736_v61  ;;  %739 = vst [vmem:[%s6167_s12 + $0x7e8] sm:$0xff] %v738_v62  ;;  %v742_v0 = vld [vmem:[%s6162_s11 + $0x1158] sm:$0xff]  ;;  %v744_v1 = vld [vmem:[%s6162_s11 + $0x1160] sm:$0xff] }
  0x95   : > { %741 = vst [vmem:[%s6167_s12 + $0x7f0] sm:$0xff] %v740_v63  ;;  %v746_v2 = vld [vmem:[%s6162_s11 + $0x1168] sm:$0xff]  ;;  %743 = vst [vmem:[%s6167_s12 + $0x7f8] sm:$0xff] %v742_v0  ;;  %v748_v3 = vld [vmem:[%s6162_s11 + $0x1170] sm:$0xff] }
  0x96   : > { %745 = vst [vmem:[%s6167_s12 + $0x800] sm:$0xff] %v744_v1  ;;  %747 = vst [vmem:[%s6167_s12 + $0x808] sm:$0xff] %v746_v2  ;;  %v750_v4 = vld [vmem:[%s6162_s11 + $0x1178] sm:$0xff]  ;;  %v752_v5 = vld [vmem:[%s6162_s11 + $0x1180] sm:$0xff] }
  0x97   : > { %749 = vst [vmem:[%s6167_s12 + $0x810] sm:$0xff] %v748_v3  ;;  %751 = vst [vmem:[%s6167_s12 + $0x818] sm:$0xff] %v750_v4  ;;  %v754_v6 = vld [vmem:[%s6162_s11 + $0x1188] sm:$0xff]  ;;  %v756_v7 = vld [vmem:[%s6162_s11 + $0x1190] sm:$0xff] }
  0x98   : > { %753 = vst [vmem:[%s6167_s12 + $0x820] sm:$0xff] %v752_v5  ;;  %v758_v8 = vld [vmem:[%s6162_s11 + $0x1198] sm:$0xff]  ;;  %755 = vst [vmem:[%s6167_s12 + $0x828] sm:$0xff] %v754_v6  ;;  %v760_v9 = vld [vmem:[%s6162_s11 + $0x11a0] sm:$0xff] }
  0x99   : > { %757 = vst [vmem:[%s6167_s12 + $0x830] sm:$0xff] %v756_v7  ;;  %759 = vst [vmem:[%s6167_s12 + $0x838] sm:$0xff] %v758_v8  ;;  %v762_v10 = vld [vmem:[%s6162_s11 + $0x11a8] sm:$0xff]  ;;  %v764_v11 = vld [vmem:[%s6162_s11 + $0x11b0] sm:$0xff] }
  0x9a   : > { %761 = vst [vmem:[%s6167_s12 + $0x840] sm:$0xff] %v760_v9  ;;  %763 = vst [vmem:[%s6167_s12 + $0x848] sm:$0xff] %v762_v10  ;;  %v766_v12 = vld [vmem:[%s6162_s11 + $0x11b8] sm:$0xff]  ;;  %v768_v13 = vld [vmem:[%s6162_s11 + $0x11c0] sm:$0xff] }
  0x9b   : > { %765 = vst [vmem:[%s6167_s12 + $0x850] sm:$0xff] %v764_v11  ;;  %v770_v14 = vld [vmem:[%s6162_s11 + $0x11c8] sm:$0xff]  ;;  %767 = vst [vmem:[%s6167_s12 + $0x858] sm:$0xff] %v766_v12  ;;  %v772_v15 = vld [vmem:[%s6162_s11 + $0x11d0] sm:$0xff] }
  0x9c   : > { %769 = vst [vmem:[%s6167_s12 + $0x860] sm:$0xff] %v768_v13  ;;  %771 = vst [vmem:[%s6167_s12 + $0x868] sm:$0xff] %v770_v14  ;;  %v774_v16 = vld [vmem:[%s6162_s11 + $0x11d8] sm:$0xff]  ;;  %v776_v17 = vld [vmem:[%s6162_s11 + $0x11e0] sm:$0xff] }
  0x9d   : > { %773 = vst [vmem:[%s6167_s12 + $0x870] sm:$0xff] %v772_v15  ;;  %775 = vst [vmem:[%s6167_s12 + $0x878] sm:$0xff] %v774_v16  ;;  %v778_v18 = vld [vmem:[%s6162_s11 + $0x11e8] sm:$0xff]  ;;  %v780_v19 = vld [vmem:[%s6162_s11 + $0x11f0] sm:$0xff] }
  0x9e   : > { %777 = vst [vmem:[%s6167_s12 + $0x880] sm:$0xff] %v776_v17  ;;  %v782_v20 = vld [vmem:[%s6162_s11 + $0x11f8] sm:$0xff]  ;;  %779 = vst [vmem:[%s6167_s12 + $0x888] sm:$0xff] %v778_v18  ;;  %v784_v21 = vld [vmem:[%s6162_s11 + $0x1200] sm:$0xff] }
  0x9f   : > { %781 = vst [vmem:[%s6167_s12 + $0x890] sm:$0xff] %v780_v19  ;;  %783 = vst [vmem:[%s6167_s12 + $0x898] sm:$0xff] %v782_v20  ;;  %v786_v22 = vld [vmem:[%s6162_s11 + $0x1208] sm:$0xff]  ;;  %v788_v23 = vld [vmem:[%s6162_s11 + $0x1210] sm:$0xff] }
  0xa0   : > { %785 = vst [vmem:[%s6167_s12 + $0x8a0] sm:$0xff] %v784_v21  ;;  %787 = vst [vmem:[%s6167_s12 + $0x8a8] sm:$0xff] %v786_v22  ;;  %v790_v24 = vld [vmem:[%s6162_s11 + $0x1218] sm:$0xff]  ;;  %v792_v25 = vld [vmem:[%s6162_s11 + $0x1220] sm:$0xff] }
  0xa1   : > { %789 = vst [vmem:[%s6167_s12 + $0x8b0] sm:$0xff] %v788_v23  ;;  %v794_v26 = vld [vmem:[%s6162_s11 + $0x1228] sm:$0xff]  ;;  %791 = vst [vmem:[%s6167_s12 + $0x8b8] sm:$0xff] %v790_v24  ;;  %v796_v27 = vld [vmem:[%s6162_s11 + $0x1230] sm:$0xff] }
  0xa2   : > { %793 = vst [vmem:[%s6167_s12 + $0x8c0] sm:$0xff] %v792_v25  ;;  %795 = vst [vmem:[%s6167_s12 + $0x8c8] sm:$0xff] %v794_v26  ;;  %v798_v28 = vld [vmem:[%s6162_s11 + $0x1238] sm:$0xff]  ;;  %v800_v29 = vld [vmem:[%s6162_s11 + $0x1240] sm:$0xff] }
  0xa3   : > { %797 = vst [vmem:[%s6167_s12 + $0x8d0] sm:$0xff] %v796_v27  ;;  %799 = vst [vmem:[%s6167_s12 + $0x8d8] sm:$0xff] %v798_v28  ;;  %v802_v30 = vld [vmem:[%s6162_s11 + $0x1248] sm:$0xff]  ;;  %v804_v31 = vld [vmem:[%s6162_s11 + $0x1250] sm:$0xff] }
  0xa4   : > { %801 = vst [vmem:[%s6167_s12 + $0x8e0] sm:$0xff] %v800_v29  ;;  %v806_v32 = vld [vmem:[%s6162_s11 + $0x1258] sm:$0xff]  ;;  %803 = vst [vmem:[%s6167_s12 + $0x8e8] sm:$0xff] %v802_v30  ;;  %v808_v33 = vld [vmem:[%s6162_s11 + $0x1260] sm:$0xff] }
  0xa5   : > { %805 = vst [vmem:[%s6167_s12 + $0x8f0] sm:$0xff] %v804_v31  ;;  %807 = vst [vmem:[%s6167_s12 + $0x8f8] sm:$0xff] %v806_v32  ;;  %v810_v34 = vld [vmem:[%s6162_s11 + $0x1268] sm:$0xff]  ;;  %v812_v35 = vld [vmem:[%s6162_s11 + $0x1270] sm:$0xff] }
  0xa6   : > { %809 = vst [vmem:[%s6167_s12 + $0x900] sm:$0xff] %v808_v33  ;;  %811 = vst [vmem:[%s6167_s12 + $0x908] sm:$0xff] %v810_v34  ;;  %v814_v36 = vld [vmem:[%s6162_s11 + $0x1278] sm:$0xff]  ;;  %v816_v37 = vld [vmem:[%s6162_s11 + $0x1280] sm:$0xff] }
  0xa7   : > { %813 = vst [vmem:[%s6167_s12 + $0x910] sm:$0xff] %v812_v35  ;;  %v818_v38 = vld [vmem:[%s6162_s11 + $0x1288] sm:$0xff]  ;;  %815 = vst [vmem:[%s6167_s12 + $0x918] sm:$0xff] %v814_v36  ;;  %v820_v39 = vld [vmem:[%s6162_s11 + $0x1290] sm:$0xff] }
  0xa8   : > { %817 = vst [vmem:[%s6167_s12 + $0x920] sm:$0xff] %v816_v37  ;;  %819 = vst [vmem:[%s6167_s12 + $0x928] sm:$0xff] %v818_v38  ;;  %v822_v40 = vld [vmem:[%s6162_s11 + $0x1298] sm:$0xff]  ;;  %v824_v41 = vld [vmem:[%s6162_s11 + $0x12a0] sm:$0xff] }
  0xa9   : > { %821 = vst [vmem:[%s6167_s12 + $0x930] sm:$0xff] %v820_v39  ;;  %823 = vst [vmem:[%s6167_s12 + $0x938] sm:$0xff] %v822_v40  ;;  %v826_v42 = vld [vmem:[%s6162_s11 + $0x12a8] sm:$0xff]  ;;  %v828_v43 = vld [vmem:[%s6162_s11 + $0x12b0] sm:$0xff] }
  0xaa   : > { %825 = vst [vmem:[%s6167_s12 + $0x940] sm:$0xff] %v824_v41  ;;  %v830_v44 = vld [vmem:[%s6162_s11 + $0x12b8] sm:$0xff]  ;;  %827 = vst [vmem:[%s6167_s12 + $0x948] sm:$0xff] %v826_v42 }
  0xab   : > { %829 = vst [vmem:[%s6167_s12 + $0x950] sm:$0xff] %v828_v43  ;;  %831 = vst [vmem:[%s6167_s12 + $0x958] sm:$0xff] %v830_v44 }
  0xac PF: > { %p6001_p5 = scmp.ge.s32.totalorder %s6084_s25, 1  ;;  %p836_p6 = scmp.lt.s32.totalorder %s6084_s25, 4 }
  0xae   : > { %p837_p7 = pnand %p6001_p5, %p836_p6 }
  0xaf   : > { %s843_s13 = sand.u32 (!%p837_p7), 1, %s6076_s23   ;;  %s871_s14 = smul.u32 (!%p837_p7), 150, %s6142_s5 }
  0xb0   : > { %840 = sbr.rel (%p837_p7) target bundleno = 1815 (0x717), region = 63  ;;  %p6002_p9 = scmp.ne.s32.totalorder (!%p837_p7), %s6142_s5, 0 }
  0xb1   : > { %s6012_s15 = smul.u32 (!%p837_p7), 2400, %s843_s13  ;;  %p872_p8 = scmp.lt.s32.totalorder (!%p837_p7), %s871_s14, 449 }
  0xb3   : > { %s6775_s19 = scalar_lea.vmem (!%p837_p7), [#allocation4], %s6012_s15 }
  0xb7   : > { %s7472_s14 = smov (!%p872_p8, %s871_s14), 449  ;;  %881 = sbr.rel (%p6002_p9) target bundleno = 190 (0xbe), region = 71 }
  0xb8   : > { %s6773_s18 = scalar_lea.vmem %s7461_s0, %s7472_s14  ;;  %vm882_vm0 = vcmask (!%p6002_p9), 517120   ;;  %v6086_v45 = vmov (!%p6002_p9), 0.0  }
  0xb9   : > { %883 = vst.msk [vmem:[#allocation2] sm:$0x3] (!%p6002_p9), %vm882_vm0, %v6086_v45 }
  0xbe PF: > { %v885_v46 = vld [vmem:[%s6775_s19 + $0x8] sm:$0xff]  ;;  %v884_v47 = vld [vmem:[%s6775_s19] sm:$0xff]  ;;  %v887_v48 = vld [vmem:[%s6775_s19 + $0x18] sm:$0xff]  ;;  %v1827_v53 = vlaneseq  ;;  %v6087_v57 = vmov 1966171168   ;;  %vm5903_vm1 = vcmask 517120  }
  0xbf   : > { %v1185_v49 = vunpack.c.l.s8.bf16 %v885_v46  ;;  %v1335_v50 = vunpack.c.h.s8.bf16 %v885_v46  ;;  %v1184_v51 = vunpack.c.l.s8.bf16 %v884_v47  ;;  %v886_v52 = vld [vmem:[%s6775_s19 + $0x10] sm:$0xff]  ;;  %v1187_v54 = vunpack.c.l.s8.bf16 %v887_v48  ;;  %v1035_v60 = vld [vmem:[%s6775_s19 + $0x4b8] sm:$0xff]  ;;  %v1037_v61 = vld [vmem:[%s6775_s19 + $0x4c8] sm:$0xff]  ;;  %p6003_p10 = scmp.ne.s32.totalorder %s6142_s5, 2 }
  0xc0   : > { %v1337_v55 = vunpack.c.h.s8.bf16 %v887_v48  ;;  %v1186_v56 = vunpack.c.l.s8.bf16 %v886_v52  ;;  %v1825_v58 = vunpack.c.l.s4 %v6087_v57  ;;  %v1828_v59 = vshrl.u32 %v1827_v53, 7  ;;  %v1785_v0 = vld [vmem:[%s6773_s18] sm:$0xff]  ;;  %v1034_v6 = vld [vmem:[%s6775_s19 + $0x4b0] sm:$0xff]  ;;  %v889_v16 = vld [vmem:[%s6775_s19 + $0x28] sm:$0xff] }
  0xc1   : > { %2902 = vmatprep.subr.bf16.mxu0 %v1185_v49  ;;  %2942 = vmatprep.subr.bf16.mxu1 %v1187_v54  ;;  %v1334_v63 = vunpack.c.h.s8.bf16 %v884_v47  ;;  %v1336_v1 = vunpack.c.h.s8.bf16 %v886_v52  ;;  %v1485_v2 = vunpack.c.l.s8.bf16 %v1035_v60  ;;  %v1487_v4 = vunpack.c.l.s8.bf16 %v1037_v61  ;;  %v1036_v8 = vld [vmem:[%s6775_s19 + $0x4c0] sm:$0xff]  ;;  %v891_v17 = vld [vmem:[%s6775_s19 + $0x38] sm:$0xff]  ;;  %v890_v26 = vld [vmem:[%s6775_s19 + $0x30] sm:$0xff] }
  0xc2   : > { %2903 = vmatpush1.bf16.xpose.msra.mxu0 %v1184_v51  ;;  %2943 = vmatpush1.bf16.xpose.msra.mxu1 %v1186_v56  ;;  %v1826_v62 = vunpack.c.0.s8 %v1825_v58  ;;  %v1484_v10 = vunpack.c.l.s8.bf16 %v1034_v6  ;;  %v1486_v11 = vunpack.c.l.s8.bf16 %v1036_v8  ;;  %v1635_v12 = vunpack.c.h.s8.bf16 %v1035_v60  ;;  %v888_v25 = vld [vmem:[%s6775_s19 + $0x20] sm:$0xff]  ;;  %v1039_v34 = vld [vmem:[%s6775_s19 + $0x4d8] sm:$0xff]  ;;  %v1041_v35 = vld [vmem:[%s6775_s19 + $0x4e8] sm:$0xff] }
  0xc3   : > { %2904 = vmatprep.subr.bf16.mxu0 %v1335_v50  ;;  %2944 = vmatprep.subr.bf16.mxu1 %v1337_v55  ;;  %v1637_v14 = vunpack.c.h.s8.bf16 %v1037_v61  ;;  %v1823_v15 = vcombine.high %v1785_v0, %v1785_v0  ;;  %v1634_v19 = vunpack.c.h.s8.bf16 %v1034_v6  ;;  %v1636_v20 = vunpack.c.h.s8.bf16 %v1036_v8  ;;  %v1038_v40 = vld [vmem:[%s6775_s19 + $0x4d0] sm:$0xff]  ;;  %v1040_v41 = vld [vmem:[%s6775_s19 + $0x4e0] sm:$0xff]  ;;  %v893_v47 = vld [vmem:[%s6775_s19 + $0x48] sm:$0xff] }
  0xc4   : > { %v6785_v3 = vsub.s32 %v1826_v62, %v1828_v59  ;;  %v1189_v21 = vunpack.c.l.s8.bf16 %v889_v16  ;;  %v1191_v22 = vunpack.c.l.s8.bf16 %v891_v17  ;;  %v1188_v29 = vunpack.c.l.s8.bf16 %v888_v25  ;;  %v1786_v46 = vld [vmem:[%s6773_s18 + $0x8] sm:$0xff]  ;;  %v895_v48 = vld [vmem:[%s6775_s19 + $0x58] sm:$0xff]  ;;  %v894_v57 = vld [vmem:[%s6775_s19 + $0x50] sm:$0xff] }
  0xc5   : > { %v1190_v30 = vunpack.c.l.s8.bf16 %v890_v26  ;;  %v1339_v31 = vunpack.c.h.s8.bf16 %v889_v16  ;;  %v1341_v32 = vunpack.c.h.s8.bf16 %v891_v17  ;;  %v1338_v36 = vunpack.c.h.s8.bf16 %v888_v25  ;;  %v892_v56 = vld [vmem:[%s6775_s19 + $0x40] sm:$0xff]  ;;  %v1042_v8 = vld [vmem:[%s6775_s19 + $0x4f0] sm:$0xff]  ;;  %v899_v16 = vld [vmem:[%s6775_s19 + $0x78] sm:$0xff] }
  0xc6   : > { %v1830_v5 = vrot.slane %v1785_v0, %v6785_v3  ;;  %v1837_v18 = vrot.slane %v1823_v15, %v6785_v3  ;;  %v1340_v37 = vunpack.c.h.s8.bf16 %v890_v26  ;;  %v1489_v38 = vunpack.c.l.s8.bf16 %v1039_v34  ;;  %v897_v15 = vld [vmem:[%s6775_s19 + $0x68] sm:$0xff]  ;;  %v898_v25 = vld [vmem:[%s6775_s19 + $0x70] sm:$0xff] }
  0xc7   : > { %v1491_v39 = vunpack.c.l.s8.bf16 %v1041_v35  ;;  %v1488_v42 = vunpack.c.l.s8.bf16 %v1038_v40  ;;  %v1490_v43 = vunpack.c.l.s8.bf16 %v1040_v41  ;;  %v1639_v44 = vunpack.c.h.s8.bf16 %v1039_v34  ;;  %v1049_v34 = vld [vmem:[%s6775_s19 + $0x528] sm:$0xff] }
  0xc8   : > { %v1838_v7 = vcombine.high %v1830_v5, %v1830_v5  ;;  %v1839_v23 = vcombine.high %v1837_v18, %v1837_v18  ;;  %v1846_v24 = vrot.slane %v1830_v5, %v6785_v3  ;;  %v1641_v45 = vunpack.c.h.s8.bf16 %v1041_v35 }
  0xc9   : > { %v1879_v49 = vrot.slane %v1786_v46, %v6785_v3  ;;  %v1638_v50 = vunpack.c.h.s8.bf16 %v1038_v40  ;;  %v1640_v51 = vunpack.c.h.s8.bf16 %v1040_v41  ;;  %v1193_v52 = vunpack.c.l.s8.bf16 %v893_v47  ;;  %v1048_v40 = vld [vmem:[%s6775_s19 + $0x520] sm:$0xff] }
  0xca   : > { %2905 = vmatpush1.bf16.xpose.msra.mxu0 %v1334_v63  ;;  %2945 = vmatpush1.bf16.xpose.msra.mxu1 %v1336_v1  ;;  %v1860_v9 = vrot.slane %v1838_v7, %v6785_v3  ;;  %v1867_v27 = vrot.slane %v1839_v23, %v6785_v3  ;;  %v1868_v28 = vcombine.high %v1846_v24, %v1846_v24  ;;  %v1195_v53 = vunpack.c.l.s8.bf16 %v895_v48  ;;  %v1043_v1 = vld [vmem:[%s6775_s19 + $0x4f8] sm:$0xff] }
  0xcb   : > { %2906 = vmatprep.subr.bf16.mxu0 %v1485_v2  ;;  %2946 = vmatprep.subr.bf16.mxu1 %v1487_v4  ;;  %v1887_v54 = vcombine.high %v1879_v49, %v1879_v49  ;;  %v1853_v55 = vrot.slane %v1837_v18, %v6785_v3  ;;  %v1192_v59 = vunpack.c.l.s8.bf16 %v892_v56  ;;  %v1194_v61 = vunpack.c.l.s8.bf16 %v894_v57  ;;  %v1045_v2 = vld [vmem:[%s6775_s19 + $0x508] sm:$0xff] }
  0xcc   : > { %2934 = vmatprep.mubr.bf16.mxu0 %v1860_v9  ;;  %v1870_v13 = vcombine.high %v1860_v9, %v1860_v9  ;;  %v1871_v33 = vcombine.high %v1867_v27, %v1867_v27  ;;  %v1343_v62 = vunpack.c.h.s8.bf16 %v893_v47  ;;  %v1345_v63 = vunpack.c.h.s8.bf16 %v895_v48  ;;  %v1044_v9 = vld [vmem:[%s6775_s19 + $0x500] sm:$0xff]  ;;  %v903_v47 = vld [vmem:[%s6775_s19 + $0x98] sm:$0xff] }
  0xcd   : > { %v1909_v58 = vrot.slane %v1887_v54, %v6785_v3  ;;  %v1869_v60 = vcombine.high %v1853_v55, %v1853_v55  ;;  %v1342_v4 = vunpack.c.h.s8.bf16 %v892_v56  ;;  %v1344_v5 = vunpack.c.h.s8.bf16 %v894_v57  ;;  %v902_v56 = vld [vmem:[%s6775_s19 + $0x90] sm:$0xff] }
  0xce   : > { %2974 = vmatprep.mubr.bf16.mxu1 %v1870_v13  ;;  %v1493_v6 = vunpack.c.l.s8.bf16 %v1043_v1  ;;  %v1495_v7 = vunpack.c.l.s8.bf16 %v1045_v2  ;;  %v1645_v13 = vunpack.c.h.s8.bf16 %v1045_v2  ;;  %v1642_v18 = vunpack.c.h.s8.bf16 %v1042_v8 }
  0xcf   : > { %v1919_v0 = vcombine.high %v1909_v58, %v1909_v58  ;;  %v1895_v23 = vrot.slane %v1879_v49, %v6785_v3  ;;  %vm5952_vm2 = vcmask (!%p6003_p10), 1024  }
  0xd2   : > { %2907 = vmatpush1.bf16.xpose.msra.mxu0 %v1484_v10  ;;  %2947 = vmatpush1.bf16.xpose.msra.mxu1 %v1486_v11  ;;  %v1492_v10 = vunpack.c.l.s8.bf16 %v1042_v8  ;;  %v1494_v11 = vunpack.c.l.s8.bf16 %v1044_v9  ;;  %v1052_v8 = vld [vmem:[%s6775_s19 + $0x540] sm:$0xff] }
  0xd3   : > { %2908 = vmatprep.subr.bf16.mxu0 %v1635_v12  ;;  %2948 = vmatprep.subr.bf16.mxu1 %v1637_v14  ;;  %v1643_v12 = vunpack.c.h.s8.bf16 %v1043_v1  ;;  %v1872_v14 = vcombine.high %v1786_v46, %v1786_v46  ;;  %v901_v46 = vld [vmem:[%s6775_s19 + $0x88] sm:$0xff] }
  0xd4   : > { %v1053_v1 = vld [vmem:[%s6775_s19 + $0x548] sm:$0xff] }
  0xd5   : > { %v1886_v17 = vrot.slane %v1872_v14, %v6785_v3  ;;  %v905_v14 = vld [vmem:[%s6775_s19 + $0xa8] sm:$0xff] }
  0xd7   : > { %v1902_v54 = vrot.slane %v1886_v17, %v6785_v3 }
  0xda   : > { %2909 = vmatpush1.bf16.xpose.msra.mxu0 %v1634_v19  ;;  %2949 = vmatpush1.bf16.xpose.msra.mxu1 %v1636_v20  ;;  %v1644_v19 = vunpack.c.h.s8.bf16 %v1044_v9  ;;  %v1197_v20 = vunpack.c.l.s8.bf16 %v897_v15 }
  0xdb   : > { %2982 = vmatprep.subr.bf16.mxu0 %v1189_v21  ;;  %3022 = vmatprep.subr.bf16.mxu1 %v1191_v22  ;;  %v1199_v21 = vunpack.c.l.s8.bf16 %v899_v16  ;;  %v1888_v22 = vcombine.high %v1886_v17, %v1886_v17 }
  0xdd   : > { %v1916_v26 = vrot.slane %v1888_v22, %v6785_v3 }
  0xe1   : > { %2935 = vmatmul.mubr.bf16.vlgmr.msra.gmra.mrb[0].mxu0 %v1846_v24  ;;  %2975 = vmatmul.mubr.bf16.vlgmr.msra.gmra.mrb[0].mxu1 %v1868_v28  ;;  %v896_v24 = vld [vmem:[%s6775_s19 + $0x60] sm:$0xff]  ;;  %v1917_v28 = vcombine.high %v1895_v23, %v1895_v23 }
  0xe2   : > { %2983 = vmatpush1.bf16.xpose.msra.mxu0 %v1188_v29  ;;  %3023 = vmatpush1.bf16.xpose.msra.mxu1 %v1190_v30  ;;  %v1198_v29 = vunpack.c.l.s8.bf16 %v898_v25  ;;  %v1347_v30 = vunpack.c.h.s8.bf16 %v897_v15  ;;  %v1346_v35 = vunpack.c.h.s8.bf16 %v896_v24  ;;  %v907_v15 = vld [vmem:[%s6775_s19 + $0xb8] sm:$0xff] }
  0xe3   : > { %2984 = vmatprep.subr.bf16.mxu0 %v1339_v31  ;;  %3024 = vmatprep.subr.bf16.mxu1 %v1341_v32  ;;  %v1349_v31 = vunpack.c.h.s8.bf16 %v899_v16  ;;  %v1920_v32 = vcombine.high %v1916_v26, %v1916_v26 }
  0xe4   : > { %3014 = vmatprep.mubr.bf16.mxu0 %v1867_v27  ;;  %3054 = vmatprep.mubr.bf16.mxu1 %v1871_v33  ;;  %v1196_v27 = vunpack.c.l.s8.bf16 %v896_v24  ;;  %v1047_v33 = vld [vmem:[%s6775_s19 + $0x518] sm:$0xff]  ;;  %v906_v24 = vld [vmem:[%s6775_s19 + $0xb0] sm:$0xff] }
  0xea   : > { %2985 = vmatpush1.bf16.xpose.msra.mxu0 %v1338_v36  ;;  %3025 = vmatpush1.bf16.xpose.msra.mxu1 %v1340_v37  ;;  %v1348_v36 = vunpack.c.h.s8.bf16 %v898_v25  ;;  %v1497_v37 = vunpack.c.l.s8.bf16 %v1047_v33 }
  0xeb   : > { %2986 = vmatprep.subr.bf16.mxu0 %v1489_v38  ;;  %3026 = vmatprep.subr.bf16.mxu1 %v1491_v39  ;;  %v1499_v38 = vunpack.c.l.s8.bf16 %v1049_v34  ;;  %v1046_v39 = vld [vmem:[%s6775_s19 + $0x510] sm:$0xff] }
  0xec   : > { %v1496_v41 = vunpack.c.l.s8.bf16 %v1046_v39  ;;  %v1646_v49 = vunpack.c.h.s8.bf16 %v1046_v39  ;;  %v1056_v39 = vld [vmem:[%s6775_s19 + $0x560] sm:$0xff] }
  0xf2   : > { %2987 = vmatpush1.bf16.xpose.msra.mxu0 %v1488_v42  ;;  %3027 = vmatpush1.bf16.xpose.msra.mxu1 %v1490_v43  ;;  %v1498_v42 = vunpack.c.l.s8.bf16 %v1048_v40  ;;  %v1647_v43 = vunpack.c.h.s8.bf16 %v1047_v33  ;;  %v1057_v33 = vld [vmem:[%s6775_s19 + $0x568] sm:$0xff] }
  0xf3   : > { %2988 = vmatprep.subr.bf16.mxu0 %v1639_v44  ;;  %3028 = vmatprep.subr.bf16.mxu1 %v1641_v45  ;;  %v1649_v44 = vunpack.c.h.s8.bf16 %v1049_v34  ;;  %v1787_v45 = vld [vmem:[%s6773_s18 + $0x10] sm:$0xff] }
  0xf4   : > { %v1928_v48 = vrot.slane %v1787_v45, %v6785_v3 }
  0xf6   : > { %v1944_v22 = vrot.slane %v1928_v48, %v6785_v3 }
  0xfa   : > { %2989 = vmatpush1.bf16.xpose.msra.mxu0 %v1638_v50  ;;  %3029 = vmatpush1.bf16.xpose.msra.mxu1 %v1640_v51  ;;  %v1648_v50 = vunpack.c.h.s8.bf16 %v1048_v40  ;;  %v1201_v51 = vunpack.c.l.s8.bf16 %v901_v46 }
  0xfb   : > { %3062 = vmatprep.subr.bf16.mxu0 %v1193_v52  ;;  %3102 = vmatprep.subr.bf16.mxu1 %v1195_v53  ;;  %v1203_v52 = vunpack.c.l.s8.bf16 %v903_v47  ;;  %v1936_v53 = vcombine.high %v1928_v48, %v1928_v48 }
  0xfd   : > { %v1958_v57 = vrot.slane %v1936_v53, %v6785_v3 }
 0x101   : > { %3015 = vmatmul.mubr.bf16.vlgmr.msra.gmra.mrb[4].mxu0 %v1853_v55  ;;  %3055 = vmatmul.mubr.bf16.vlgmr.msra.gmra.mrb[4].mxu1 %v1869_v60  ;;  %v900_v55 = vld [vmem:[%s6775_s19 + $0x80] sm:$0xff]  ;;  %v1202_v60 = vunpack.c.l.s8.bf16 %v902_v56 }
 0x102   : > { %3063 = vmatpush1.bf16.xpose.msra.mxu0 %v1192_v59  ;;  %3103 = vmatpush1.bf16.xpose.msra.mxu1 %v1194_v61  ;;  %v1918_v59 = vcombine.high %v1902_v54, %v1902_v54  ;;  %v1351_v61 = vunpack.c.h.s8.bf16 %v901_v46  ;;  %v1350_v2 = vunpack.c.h.s8.bf16 %v900_v55  ;;  %v911_v46 = vld [vmem:[%s6775_s19 + $0xd8] sm:$0xff] }
 0x103   : > { %3064 = vmatprep.subr.bf16.mxu0 %v1343_v62  ;;  %3104 = vmatprep.subr.bf16.mxu1 %v1345_v63  ;;  %v1353_v62 = vunpack.c.h.s8.bf16 %v903_v47  ;;  %v1968_v63 = vcombine.high %v1958_v57, %v1958_v57 }
 0x104   : > { %3094 = vmatprep.mubr.bf16.mxu0 %v1909_v58  ;;  %3134 = vmatprep.mubr.bf16.mxu1 %v1919_v0  ;;  %v1200_v58 = vunpack.c.l.s8.bf16 %v900_v55  ;;  %v1051_v0 = vld [vmem:[%s6775_s19 + $0x538] sm:$0xff]  ;;  %v910_v55 = vld [vmem:[%s6775_s19 + $0xd0] sm:$0xff] }
 0x10a   : > { %3065 = vmatpush1.bf16.xpose.msra.mxu0 %v1342_v4  ;;  %3105 = vmatpush1.bf16.xpose.msra.mxu1 %v1344_v5  ;;  %v1352_v4 = vunpack.c.h.s8.bf16 %v902_v56  ;;  %v1501_v5 = vunpack.c.l.s8.bf16 %v1051_v0 }
 0x10b   : > { %3066 = vmatprep.subr.bf16.mxu0 %v1493_v6  ;;  %3106 = vmatprep.subr.bf16.mxu1 %v1495_v7  ;;  %v1503_v6 = vunpack.c.l.s8.bf16 %v1053_v1  ;;  %v1050_v7 = vld [vmem:[%s6775_s19 + $0x530] sm:$0xff] }
 0x10c   : > { %v1500_v9 = vunpack.c.l.s8.bf16 %v1050_v7  ;;  %v1650_v17 = vunpack.c.h.s8.bf16 %v1050_v7  ;;  %v1060_v7 = vld [vmem:[%s6775_s19 + $0x580] sm:$0xff] }
 0x112   : > { %3067 = vmatpush1.bf16.xpose.msra.mxu0 %v1492_v10  ;;  %3107 = vmatpush1.bf16.xpose.msra.mxu1 %v1494_v11  ;;  %v1502_v10 = vunpack.c.l.s8.bf16 %v1052_v8  ;;  %v1651_v11 = vunpack.c.h.s8.bf16 %v1051_v0  ;;  %v1061_v0 = vld [vmem:[%s6775_s19 + $0x588] sm:$0xff] }
 0x113   : > { %3068 = vmatprep.subr.bf16.mxu0 %v1643_v12  ;;  %3108 = vmatprep.subr.bf16.mxu1 %v1645_v13  ;;  %v1653_v12 = vunpack.c.h.s8.bf16 %v1053_v1  ;;  %v1921_v13 = vcombine.high %v1787_v45, %v1787_v45  ;;  %v909_v45 = vld [vmem:[%s6775_s19 + $0xc8] sm:$0xff] }
 0x115   : > { %v1935_v16 = vrot.slane %v1921_v13, %v6785_v3  ;;  %v913_v13 = vld [vmem:[%s6775_s19 + $0xe8] sm:$0xff] }
 0x117   : > { %v1951_v53 = vrot.slane %v1935_v16, %v6785_v3 }
 0x11a   : > { %3069 = vmatpush1.bf16.xpose.msra.mxu0 %v1642_v18  ;;  %3109 = vmatpush1.bf16.xpose.msra.mxu1 %v1644_v19  ;;  %v1652_v18 = vunpack.c.h.s8.bf16 %v1052_v8  ;;  %v1205_v19 = vunpack.c.l.s8.bf16 %v905_v14 }
 0x11b   : > { %3142 = vmatprep.subr.bf16.mxu0 %v1197_v20  ;;  %3182 = vmatprep.subr.bf16.mxu1 %v1199_v21  ;;  %v1207_v20 = vunpack.c.l.s8.bf16 %v907_v15  ;;  %v1937_v21 = vcombine.high %v1935_v16, %v1935_v16 }
 0x11d   : > { %v1965_v25 = vrot.slane %v1937_v21, %v6785_v3 }
 0x121   : > { %3095 = vmatmul.mubr.bf16.vlgmr.msra.gmra.mrb[8].mxu0 %v1895_v23  ;;  %3135 = vmatmul.mubr.bf16.vlgmr.msra.gmra.mrb[8].mxu1 %v1917_v28  ;;  %v904_v23 = vld [vmem:[%s6775_s19 + $0xa0] sm:$0xff]  ;;  %v1206_v28 = vunpack.c.l.s8.bf16 %v906_v24 }
 0x122   : > { %3143 = vmatpush1.bf16.xpose.msra.mxu0 %v1196_v27  ;;  %3183 = vmatpush1.bf16.xpose.msra.mxu1 %v1198_v29  ;;  %v1966_v27 = vcombine.high %v1944_v22, %v1944_v22  ;;  %v1355_v29 = vunpack.c.h.s8.bf16 %v905_v14  ;;  %v1354_v34 = vunpack.c.h.s8.bf16 %v904_v23  ;;  %v915_v14 = vld [vmem:[%s6775_s19 + $0xf8] sm:$0xff] }
 0x123   : > { %3144 = vmatprep.subr.bf16.mxu0 %v1347_v30  ;;  %3184 = vmatprep.subr.bf16.mxu1 %v1349_v31  ;;  %v1357_v30 = vunpack.c.h.s8.bf16 %v907_v15  ;;  %v1969_v31 = vcombine.high %v1965_v25, %v1965_v25 }
 0x124   : > { %3174 = vmatprep.mubr.bf16.mxu0 %v1916_v26  ;;  %3214 = vmatprep.mubr.bf16.mxu1 %v1920_v32  ;;  %v1204_v26 = vunpack.c.l.s8.bf16 %v904_v23  ;;  %v1055_v32 = vld [vmem:[%s6775_s19 + $0x558] sm:$0xff]  ;;  %v914_v23 = vld [vmem:[%s6775_s19 + $0xf0] sm:$0xff] }
 0x12a   : > { %3145 = vmatpush1.bf16.xpose.msra.mxu0 %v1346_v35  ;;  %3185 = vmatpush1.bf16.xpose.msra.mxu1 %v1348_v36  ;;  %v1356_v35 = vunpack.c.h.s8.bf16 %v906_v24  ;;  %v1505_v36 = vunpack.c.l.s8.bf16 %v1055_v32 }
 0x12b   : > { %3146 = vmatprep.subr.bf16.mxu0 %v1497_v37  ;;  %3186 = vmatprep.subr.bf16.mxu1 %v1499_v38  ;;  %v1507_v37 = vunpack.c.l.s8.bf16 %v1057_v33  ;;  %v1054_v38 = vld [vmem:[%s6775_s19 + $0x550] sm:$0xff] }
 0x12c   : > { %v1504_v40 = vunpack.c.l.s8.bf16 %v1054_v38  ;;  %v1654_v48 = vunpack.c.h.s8.bf16 %v1054_v38  ;;  %v1064_v38 = vld [vmem:[%s6775_s19 + $0x5a0] sm:$0xff] }
 0x132   : > { %3147 = vmatpush1.bf16.xpose.msra.mxu0 %v1496_v41  ;;  %3187 = vmatpush1.bf16.xpose.msra.mxu1 %v1498_v42  ;;  %v1506_v41 = vunpack.c.l.s8.bf16 %v1056_v39  ;;  %v1655_v42 = vunpack.c.h.s8.bf16 %v1055_v32  ;;  %v1065_v32 = vld [vmem:[%s6775_s19 + $0x5a8] sm:$0xff] }
 0x133   : > { %3148 = vmatprep.subr.bf16.mxu0 %v1647_v43  ;;  %3188 = vmatprep.subr.bf16.mxu1 %v1649_v44  ;;  %v1657_v43 = vunpack.c.h.s8.bf16 %v1057_v33  ;;  %v1788_v44 = vld [vmem:[%s6773_s18 + $0x18] sm:$0xff] }
 0x134   : > { %v1977_v47 = vrot.slane %v1788_v44, %v6785_v3 }
 0x136   : > { %v1993_v21 = vrot.slane %v1977_v47, %v6785_v3 }
 0x13a   : > { %3149 = vmatpush1.bf16.xpose.msra.mxu0 %v1646_v49  ;;  %3189 = vmatpush1.bf16.xpose.msra.mxu1 %v1648_v50  ;;  %v1656_v49 = vunpack.c.h.s8.bf16 %v1056_v39  ;;  %v1209_v50 = vunpack.c.l.s8.bf16 %v909_v45 }
 0x13b   : > { %3222 = vmatprep.subr.bf16.mxu0 %v1201_v51  ;;  %3262 = vmatprep.subr.bf16.mxu1 %v1203_v52  ;;  %v1211_v51 = vunpack.c.l.s8.bf16 %v911_v46  ;;  %v1985_v52 = vcombine.high %v1977_v47, %v1977_v47 }
 0x13d   : > { %v2007_v56 = vrot.slane %v1985_v52, %v6785_v3 }
 0x141   : > { %3175 = vmatmul.mubr.bf16.vlgmr.msra.gmra.mrb[12].mxu0 %v1902_v54  ;;  %3215 = vmatmul.mubr.bf16.vlgmr.msra.gmra.mrb[12].mxu1 %v1918_v59  ;;  %v908_v54 = vld [vmem:[%s6775_s19 + $0xc0] sm:$0xff]  ;;  %v1210_v59 = vunpack.c.l.s8.bf16 %v910_v55 }
 0x142   : > { %3223 = vmatpush1.bf16.xpose.msra.mxu0 %v1200_v58  ;;  %3263 = vmatpush1.bf16.xpose.msra.mxu1 %v1202_v60  ;;  %v1967_v58 = vcombine.high %v1951_v53, %v1951_v53  ;;  %v1359_v60 = vunpack.c.h.s8.bf16 %v909_v45  ;;  %v1358_v1 = vunpack.c.h.s8.bf16 %v908_v54  ;;  %v917_v45 = vld [vmem:[%s6775_s19 + $0x108] sm:$0xff] }
 0x143   : > { %3224 = vmatprep.subr.bf16.mxu0 %v1351_v61  ;;  %3264 = vmatprep.subr.bf16.mxu1 %v1353_v62  ;;  %v1361_v61 = vunpack.c.h.s8.bf16 %v911_v46  ;;  %v2017_v62 = vcombine.high %v2007_v56, %v2007_v56 }
 0x144   : > { %3254 = vmatprep.mubr.bf16.mxu0 %v1958_v57  ;;  %3294 = vmatprep.mubr.bf16.mxu1 %v1968_v63  ;;  %v1208_v57 = vunpack.c.l.s8.bf16 %v908_v54  ;;  %v1059_v63 = vld [vmem:[%s6775_s19 + $0x578] sm:$0xff] }
 0x14a   : > { %3225 = vmatpush1.bf16.xpose.msra.mxu0 %v1350_v2  ;;  %3265 = vmatpush1.bf16.xpose.msra.mxu1 %v1352_v4  ;;  %v1360_v2 = vunpack.c.h.s8.bf16 %v910_v55  ;;  %v1509_v4 = vunpack.c.l.s8.bf16 %v1059_v63  ;;  %v1664_v55 = vunpack.c.h.s8.bf16 %v1064_v38 }
 0x14b   : > { %3226 = vmatprep.subr.bf16.mxu0 %v1501_v5  ;;  %3266 = vmatprep.subr.bf16.mxu1 %v1503_v6  ;;  %v1511_v5 = vunpack.c.l.s8.bf16 %v1061_v0  ;;  %v1058_v6 = vld [vmem:[%s6775_s19 + $0x570] sm:$0xff] }
 0x14c   : > { %v1508_v8 = vunpack.c.l.s8.bf16 %v1058_v6  ;;  %v1658_v16 = vunpack.c.h.s8.bf16 %v1058_v6 }
 0x152   : > { %3227 = vmatpush1.bf16.xpose.msra.mxu0 %v1500_v9  ;;  %3267 = vmatpush1.bf16.xpose.msra.mxu1 %v1502_v10  ;;  %v1510_v9 = vunpack.c.l.s8.bf16 %v1060_v7  ;;  %v1659_v10 = vunpack.c.h.s8.bf16 %v1059_v63  ;;  %v918_v63 = vld [vmem:[%s6775_s19 + $0x110] sm:$0xff] }
 0x153   : > { %3228 = vmatprep.subr.bf16.mxu0 %v1651_v11  ;;  %3268 = vmatprep.subr.bf16.mxu1 %v1653_v12  ;;  %v1661_v11 = vunpack.c.h.s8.bf16 %v1061_v0  ;;  %v1970_v12 = vcombine.high %v1788_v44, %v1788_v44 }
 0x155   : > { %v6863_v15 = vrot.slane %v1970_v12, %v6785_v3 }
 0x15a   : > { %3229 = vmatpush1.bf16.xpose.msra.mxu0 %v1650_v17  ;;  %3269 = vmatpush1.bf16.xpose.msra.mxu1 %v1652_v18  ;;  %v1660_v17 = vunpack.c.h.s8.bf16 %v1060_v7  ;;  %v1213_v18 = vunpack.c.l.s8.bf16 %v913_v13 }
 0x15b   : > { %3302 = vmatprep.subr.bf16.mxu0 %v1205_v19  ;;  %3342 = vmatprep.subr.bf16.mxu1 %v1207_v20  ;;  %v1215_v19 = vunpack.c.l.s8.bf16 %v915_v14  ;;  %v1986_v20 = vcombine.high %v6863_v15, %v6863_v15 }
 0x15d   : > { %v2014_v24 = vrot.slane %v1986_v20, %v6785_v3 }
 0x161   : > { %3255 = vmatmul.mubr.bf16.vlgmr.msra.gmra.mrb[16].mxu0 %v1944_v22  ;;  %3295 = vmatmul.mubr.bf16.vlgmr.msra.gmra.mrb[16].mxu1 %v1966_v27  ;;  %v912_v22 = vld [vmem:[%s6775_s19 + $0xe0] sm:$0xff]  ;;  %v1214_v27 = vunpack.c.l.s8.bf16 %v914_v23 }
 0x162   : > { %3303 = vmatpush1.bf16.xpose.msra.mxu0 %v1204_v26  ;;  %3343 = vmatpush1.bf16.xpose.msra.mxu1 %v1206_v28  ;;  %v2015_v26 = vcombine.high %v1993_v21, %v1993_v21  ;;  %v1363_v28 = vunpack.c.h.s8.bf16 %v913_v13  ;;  %v1362_v33 = vunpack.c.h.s8.bf16 %v912_v22 }
 0x163   : > { %3304 = vmatprep.subr.bf16.mxu0 %v1355_v29  ;;  %3344 = vmatprep.subr.bf16.mxu1 %v1357_v30  ;;  %v1365_v29 = vunpack.c.h.s8.bf16 %v915_v14  ;;  %v2018_v30 = vcombine.high %v2014_v24, %v2014_v24  ;;  %v1066_v14 = vld [vmem:[%s6775_s19 + $0x5b0] sm:$0xff] }
 0x164   : > { %3334 = vmatprep.mubr.bf16.mxu0 %v1965_v25  ;;  %3374 = vmatprep.mubr.bf16.mxu1 %v1969_v31  ;;  %v1212_v25 = vunpack.c.l.s8.bf16 %v912_v22  ;;  %v1063_v31 = vld [vmem:[%s6775_s19 + $0x598] sm:$0xff]  ;;  %v921_v22 = vld [vmem:[%s6775_s19 + $0x128] sm:$0xff] }
 0x16a   : > { %3305 = vmatpush1.bf16.xpose.msra.mxu0 %v1354_v34  ;;  %3345 = vmatpush1.bf16.xpose.msra.mxu1 %v1356_v35  ;;  %v1364_v34 = vunpack.c.h.s8.bf16 %v914_v23  ;;  %v1513_v35 = vunpack.c.l.s8.bf16 %v1063_v31 }
 0x16b   : > { %3306 = vmatprep.subr.bf16.mxu0 %v1505_v36  ;;  %3346 = vmatprep.subr.bf16.mxu1 %v1507_v37  ;;  %v1515_v36 = vunpack.c.l.s8.bf16 %v1065_v32  ;;  %v1062_v37 = vld [vmem:[%s6775_s19 + $0x590] sm:$0xff] }
 0x16c   : > { %v1512_v39 = vunpack.c.l.s8.bf16 %v1062_v37  ;;  %v1662_v52 = vunpack.c.h.s8.bf16 %v1062_v37 }
 0x172   : > { %3307 = vmatpush1.bf16.xpose.msra.mxu0 %v1504_v40  ;;  %3347 = vmatpush1.bf16.xpose.msra.mxu1 %v1506_v41  ;;  %v1514_v40 = vunpack.c.l.s8.bf16 %v1064_v38  ;;  %v1663_v41 = vunpack.c.h.s8.bf16 %v1063_v31 }
 0x173   : > { %3308 = vmatprep.subr.bf16.mxu0 %v1655_v42  ;;  %3348 = vmatprep.subr.bf16.mxu1 %v1657_v43  ;;  %v1665_v42 = vunpack.c.h.s8.bf16 %v1065_v32  ;;  %v6876_v43 = vld [vmem:[%s6773_s18 + $0x20] sm:$0xff] }
 0x174   : > { %v2019_v20 = vcombine.high %v6876_v43, %v6876_v43 }
 0x17a   : > { %3309 = vmatpush1.bf16.xpose.msra.mxu0 %v1654_v48  ;;  %3349 = vmatpush1.bf16.xpose.msra.mxu1 %v1656_v49  ;;  %v919_v48 = vld [vmem:[%s6775_s19 + $0x118] sm:$0xff]  ;;  %v6882_v49 = vrot.slane %v6876_v43, %v6785_v3 }
 0x17b   : > { %3382 = vmatprep.subr.bf16.mxu0 %v1209_v50  ;;  %3422 = vmatprep.subr.bf16.mxu1 %v1211_v51  ;;  %v1369_v6 = vunpack.c.h.s8.bf16 %v919_v48 }
 0x181   : > { %3335 = vmatmul.mubr.bf16.vlgmr.msra.gmra.mrb[20].mxu0 %v1951_v53  ;;  %3375 = vmatmul.mubr.bf16.vlgmr.msra.gmra.mrb[20].mxu1 %v1967_v58  ;;  %v1219_v58 = vunpack.c.l.s8.bf16 %v919_v48 }
 0x182   : > { %3383 = vmatpush1.bf16.xpose.msra.mxu0 %v1208_v57  ;;  %3423 = vmatpush1.bf16.xpose.msra.mxu1 %v1210_v59 }
 0x183   : > { %3384 = vmatprep.subr.bf16.mxu0 %v1359_v60  ;;  %3424 = vmatprep.subr.bf16.mxu1 %v1361_v61  ;;  %v2034_v60 = vcombine.high %v6882_v49, %v6882_v49  ;;  %v2000_v61 = vrot.slane %v6863_v15, %v6785_v3  ;;  %v1068_v15 = vld [vmem:[%s6775_s19 + $0x5c0] sm:$0xff] }
 0x184   : > { %3414 = vmatprep.mubr.bf16.mxu0 %v2007_v56  ;;  %3454 = vmatprep.mubr.bf16.mxu1 %v2017_v62  ;;  %v1217_v56 = vunpack.c.l.s8.bf16 %v917_v45  ;;  %v916_v62 = vld [vmem:[%s6775_s19 + $0x100] sm:$0xff] }
 0x185   : > { %v2056_v0 = vrot.slane %v2034_v60, %v6785_v3 }
 0x187   : > { %v2066_v7 = vcombine.high %v2056_v0, %v2056_v0 }
 0x18a   : > { %3385 = vmatpush1.bf16.xpose.msra.mxu0 %v1358_v1  ;;  %3425 = vmatpush1.bf16.xpose.msra.mxu1 %v1360_v2  ;;  %v1216_v1 = vunpack.c.l.s8.bf16 %v916_v62  ;;  %v2016_v2 = vcombine.high %v2000_v61, %v2000_v61 }
 0x18b   : > { %3386 = vmatprep.subr.bf16.mxu0 %v1509_v4  ;;  %3426 = vmatprep.subr.bf16.mxu1 %v1511_v5  ;;  %v1218_v4 = vunpack.c.l.s8.bf16 %v918_v63  ;;  %v1367_v5 = vunpack.c.h.s8.bf16 %v917_v45 }
 0x192   : > { %3387 = vmatpush1.bf16.xpose.msra.mxu0 %v1508_v8  ;;  %3427 = vmatpush1.bf16.xpose.msra.mxu1 %v1510_v9  ;;  %v1067_v8 = vld [vmem:[%s6775_s19 + $0x5b8] sm:$0xff]  ;;  %v1069_v9 = vld [vmem:[%s6775_s19 + $0x5c8] sm:$0xff] }
 0x193   : > { %3388 = vmatprep.subr.bf16.mxu0 %v1659_v10  ;;  %3428 = vmatprep.subr.bf16.mxu1 %v1661_v11  ;;  %v1366_v10 = vunpack.c.h.s8.bf16 %v916_v62  ;;  %v1368_v11 = vunpack.c.h.s8.bf16 %v918_v63  ;;  %v1517_v12 = vunpack.c.l.s8.bf16 %v1067_v8  ;;  %v1519_v13 = vunpack.c.l.s8.bf16 %v1069_v9  ;;  %v925_v63 = vld [vmem:[%s6775_s19 + $0x148] sm:$0xff] }
 0x19a   : > { %3389 = vmatpush1.bf16.xpose.msra.mxu0 %v1658_v16  ;;  %3429 = vmatpush1.bf16.xpose.msra.mxu1 %v1660_v17  ;;  %v1516_v16 = vunpack.c.l.s8.bf16 %v1066_v14  ;;  %v1518_v17 = vunpack.c.l.s8.bf16 %v1068_v15 }
 0x19b   : > { %3462 = vmatprep.subr.bf16.mxu0 %v1213_v18  ;;  %3502 = vmatprep.subr.bf16.mxu1 %v1215_v19  ;;  %v1667_v18 = vunpack.c.h.s8.bf16 %v1067_v8  ;;  %v1669_v19 = vunpack.c.h.s8.bf16 %v1069_v9 }
 0x1a1   : > { %3415 = vmatmul.mubr.bf16.vlgmr.msra.gmra.mrb[24].mxu0 %v1993_v21  ;;  %3455 = vmatmul.mubr.bf16.vlgmr.msra.gmra.mrb[24].mxu1 %v2015_v26  ;;  %v923_v26 = vld [vmem:[%s6775_s19 + $0x138] sm:$0xff] }
 0x1a2   : > { %3463 = vmatpush1.bf16.xpose.msra.mxu0 %v1212_v25  ;;  %3503 = vmatpush1.bf16.xpose.msra.mxu1 %v1214_v27  ;;  %v6900_v27 = vrot.slane %v2019_v20, %v6785_v3 }
 0x1a3   : > { %3464 = vmatprep.subr.bf16.mxu0 %v1363_v28  ;;  %3504 = vmatprep.subr.bf16.mxu1 %v1365_v29  ;;  %v1666_v29 = vunpack.c.h.s8.bf16 %v1066_v14 }
 0x1a4   : > { %3494 = vmatprep.mubr.bf16.mxu0 %v2014_v24  ;;  %3534 = vmatprep.mubr.bf16.mxu1 %v2018_v30  ;;  %v2035_v38 = vcombine.high %v6900_v27, %v6900_v27 }
 0x1aa   : > { %3465 = vmatpush1.bf16.xpose.msra.mxu0 %v1362_v33  ;;  %3505 = vmatpush1.bf16.xpose.msra.mxu1 %v1364_v34  ;;  %v1668_v33 = vunpack.c.h.s8.bf16 %v1068_v15  ;;  %v1221_v34 = vunpack.c.l.s8.bf16 %v921_v22 }
 0x1ab   : > { %3466 = vmatprep.subr.bf16.mxu0 %v1513_v35  ;;  %3506 = vmatprep.subr.bf16.mxu1 %v1515_v36  ;;  %v1223_v36 = vunpack.c.l.s8.bf16 %v923_v26 }
 0x1b2   : > { %3467 = vmatpush1.bf16.xpose.msra.mxu0 %v1512_v39  ;;  %3507 = vmatpush1.bf16.xpose.msra.mxu1 %v1514_v40  ;;  %v2042_v39 = vrot.slane %v6882_v49, %v6785_v3  ;;  %v920_v40 = vld [vmem:[%s6775_s19 + $0x120] sm:$0xff]  ;;  %v1071_v49 = vld [vmem:[%s6775_s19 + $0x5d8] sm:$0xff] }
 0x1b3   : > { %3468 = vmatprep.subr.bf16.mxu0 %v1663_v41  ;;  %3508 = vmatprep.subr.bf16.mxu1 %v1665_v42  ;;  %v922_v41 = vld [vmem:[%s6775_s19 + $0x130] sm:$0xff]  ;;  %v2063_v42 = vrot.slane %v2035_v38, %v6785_v3  ;;  %v1220_v43 = vunpack.c.l.s8.bf16 %v920_v40 }
 0x1b4   : > { %v2936_v44 = vpop.f32.mrb[0].mxu0  ;;  %v2976_v47 = vpop.f32.mrb[0].mxu1  ;;  %v1222_v45 = vunpack.c.l.s8.bf16 %v922_v41 }
 0x1b5   : > { %v2938_v46 = vpop.f32.mrb[1].mxu0  ;;  %v2977_v50 = vadd.f32 %v2976_v47, %v2936_v44  ;;  %v2978_v53 = vpop.f32.mrb[1].mxu1  ;;  %v2064_v44 = vcombine.high %v2042_v39, %v2042_v39  ;;  %v1373_v47 = vunpack.c.h.s8.bf16 %v923_v26  ;;  %v2067_v48 = vcombine.high %v2063_v42, %v2063_v42 }
 0x1b6   : > { %v2939_v51 = vpop.f32.mrb[2].mxu0  ;;  %v2979_v57 = vpop.f32.mrb[2].mxu1  ;;  %v1371_v46 = vunpack.c.h.s8.bf16 %v921_v22  ;;  %v1521_v53 = vunpack.c.l.s8.bf16 %v1071_v49 }
 0x1b7   : > { %v2940_v54 = vpop.f32.mrb[3].mxu0  ;;  %v2980_v59 = vpop.f32.mrb[3].mxu1  ;;  %v1370_v51 = vunpack.c.h.s8.bf16 %v920_v40 }
 0x1b8   : > { %v1671_v59 = vunpack.c.h.s8.bf16 %v1071_v49 }
 0x1ba   : > { %3469 = vmatpush1.bf16.xpose.msra.mxu0 %v1662_v52  ;;  %3509 = vmatpush1.bf16.xpose.msra.mxu1 %v1664_v55  ;;  %v1372_v52 = vunpack.c.h.s8.bf16 %v922_v41  ;;  %v1070_v55 = vld [vmem:[%s6775_s19 + $0x5d0] sm:$0xff]  ;;  %v929_v41 = vld [vmem:[%s6775_s19 + $0x168] sm:$0xff] }
 0x1bb   : > { %3542 = vmatprep.subr.bf16.mxu0 %v1217_v56  ;;  %3582 = vmatprep.subr.bf16.mxu1 %v1219_v58  ;;  %v1072_v56 = vld [vmem:[%s6775_s19 + $0x5e0] sm:$0xff]  ;;  %v1520_v57 = vunpack.c.l.s8.bf16 %v1070_v55 }
 0x1bc   : > { %v1522_v58 = vunpack.c.l.s8.bf16 %v1072_v56 }
 0x1c1   : > { %3495 = vmatmul.mubr.bf16.vlgmr.msra.gmra.mrb[28].mxu0 %v2000_v61  ;;  %3535 = vmatmul.mubr.bf16.vlgmr.msra.gmra.mrb[28].mxu1 %v2016_v2  ;;  %v6914_v61 = vld [vmem:[%s6773_s18 + $0x28] sm:$0xff] }
 0x1c2   : > { %3543 = vmatpush1.bf16.xpose.msra.mxu0 %v1216_v1  ;;  %3583 = vmatpush1.bf16.xpose.msra.mxu1 %v1218_v4  ;;  %v927_v4 = vld [vmem:[%s6775_s19 + $0x158] sm:$0xff] }
 0x1c3   : > { %3544 = vmatprep.subr.bf16.mxu0 %v1367_v5  ;;  %3584 = vmatprep.subr.bf16.mxu1 %v1369_v6  ;;  %v6920_v5 = vrot.slane %v6914_v61, %v6785_v3  ;;  %v1227_v14 = vunpack.c.l.s8.bf16 %v927_v4 }
 0x1c4   : > { %3574 = vmatprep.mubr.bf16.mxu0 %v2056_v0  ;;  %3614 = vmatprep.mubr.bf16.mxu1 %v2066_v7  ;;  %v1670_v7 = vunpack.c.h.s8.bf16 %v1070_v55 }
 0x1ca   : > { %3545 = vmatpush1.bf16.xpose.msra.mxu0 %v1366_v10  ;;  %3585 = vmatpush1.bf16.xpose.msra.mxu1 %v1368_v11  ;;  %v1672_v11 = vunpack.c.h.s8.bf16 %v1072_v56 }
 0x1cb   : > { %3546 = vmatprep.subr.bf16.mxu0 %v1517_v12  ;;  %3586 = vmatprep.subr.bf16.mxu1 %v1519_v13  ;;  %v1225_v12 = vunpack.c.l.s8.bf16 %v925_v63 }
 0x1d2   : > { %3547 = vmatpush1.bf16.xpose.msra.mxu0 %v1516_v16  ;;  %3587 = vmatpush1.bf16.xpose.msra.mxu1 %v1518_v17  ;;  %v2083_v16 = vcombine.high %v6920_v5, %v6920_v5  ;;  %v2049_v17 = vrot.slane %v6900_v27, %v6785_v3  ;;  %v1075_v27 = vld [vmem:[%s6775_s19 + $0x5f8] sm:$0xff] }
 0x1d3   : > { %3548 = vmatprep.subr.bf16.mxu0 %v1667_v18  ;;  %3588 = vmatprep.subr.bf16.mxu1 %v1669_v19  ;;  %v924_v18 = vld [vmem:[%s6775_s19 + $0x140] sm:$0xff]  ;;  %v926_v19 = vld [vmem:[%s6775_s19 + $0x150] sm:$0xff] }
 0x1d4   : > { %v3016_v21 = vpop.f32.mrb[4].mxu0  ;;  %v3056_v25 = vpop.f32.mrb[4].mxu1  ;;  %v2105_v20 = vrot.slane %v2083_v16, %v6785_v3  ;;  %v2065_v22 = vcombine.high %v2049_v17, %v2049_v17 }
 0x1d5   : > { %v3017_v23 = vadd.f32 %v3016_v21, %v2977_v50  ;;  %v3018_v24 = vpop.f32.mrb[5].mxu0  ;;  %v3058_v30 = vpop.f32.mrb[5].mxu1  ;;  %v1073_v50 = vld [vmem:[%s6775_s19 + $0x5e8] sm:$0xff]  ;;  %v1224_v21 = vunpack.c.l.s8.bf16 %v924_v18 }
 0x1d6   : > { %v3019_v28 = vpop.f32.mrb[6].mxu0  ;;  %v3059_v35 = vpop.f32.mrb[6].mxu1  ;;  %v1523_v54 = vunpack.c.l.s8.bf16 %v1073_v50  ;;  %v1673_v60 = vunpack.c.h.s8.bf16 %v1073_v50  ;;  %v1375_v24 = vunpack.c.h.s8.bf16 %v925_v63  ;;  %v2115_v26 = vcombine.high %v2105_v20, %v2105_v20 }
 0x1d7   : > { %v3057_v31 = vadd.f32 %v3056_v25, %v3017_v23  ;;  %v3020_v32 = vpop.f32.mrb[7].mxu0  ;;  %v3060_v37 = vpop.f32.mrb[7].mxu1  ;;  %v1226_v23 = vunpack.c.l.s8.bf16 %v926_v19  ;;  %v1377_v25 = vunpack.c.h.s8.bf16 %v927_v4  ;;  %v1077_v28 = vld [vmem:[%s6775_s19 + $0x608] sm:$0xff]  ;;  %v1376_v30 = vunpack.c.h.s8.bf16 %v926_v19 }
 0x1d8   : > { %v1527_v32 = vunpack.c.l.s8.bf16 %v1077_v28  ;;  %v1675_v37 = vunpack.c.h.s8.bf16 %v1075_v27  ;;  %v1677_v38 = vunpack.c.h.s8.bf16 %v1077_v28  ;;  %v933_v19 = vld [vmem:[%s6775_s19 + $0x188] sm:$0xff] }
 0x1da   : > { %3549 = vmatpush1.bf16.xpose.msra.mxu0 %v1666_v29  ;;  %3589 = vmatpush1.bf16.xpose.msra.mxu1 %v1668_v33  ;;  %v1374_v29 = vunpack.c.h.s8.bf16 %v924_v18  ;;  %v1074_v33 = vld [vmem:[%s6775_s19 + $0x5f0] sm:$0xff] }
 0x1db   : > { %3622 = vmatprep.subr.bf16.mxu0 %v1221_v34  ;;  %3662 = vmatprep.subr.bf16.mxu1 %v1223_v36  ;;  %v1076_v34 = vld [vmem:[%s6775_s19 + $0x600] sm:$0xff]  ;;  %v1524_v35 = vunpack.c.l.s8.bf16 %v1074_v33 }
 0x1dc   : > { %v1526_v36 = vunpack.c.l.s8.bf16 %v1076_v34 }
 0x1e1   : > { %3575 = vmatmul.mubr.bf16.vlgmr.msra.gmra.mrb[32].mxu0 %v2042_v39  ;;  %3615 = vmatmul.mubr.bf16.vlgmr.msra.gmra.mrb[32].mxu1 %v2064_v44  ;;  %v2068_v39 = vcombine.high %v6914_v61, %v6914_v61 }
 0x1e2   : > { %3623 = vmatpush1.bf16.xpose.msra.mxu0 %v1220_v43  ;;  %3663 = vmatpush1.bf16.xpose.msra.mxu1 %v1222_v45  ;;  %v931_v45 = vld [vmem:[%s6775_s19 + $0x178] sm:$0xff] }
 0x1e3   : > { %3624 = vmatprep.subr.bf16.mxu0 %v1371_v46  ;;  %3664 = vmatprep.subr.bf16.mxu1 %v1373_v47  ;;  %v6938_v46 = vrot.slane %v2068_v39, %v6785_v3  ;;  %v1231_v55 = vunpack.c.l.s8.bf16 %v931_v45 }
 0x1e4   : > { %3654 = vmatprep.mubr.bf16.mxu0 %v2063_v42  ;;  %3694 = vmatprep.mubr.bf16.mxu1 %v2067_v48  ;;  %v1674_v48 = vunpack.c.h.s8.bf16 %v1074_v33 }
 0x1ea   : > { %3625 = vmatpush1.bf16.xpose.msra.mxu0 %v1370_v51  ;;  %3665 = vmatpush1.bf16.xpose.msra.mxu1 %v1372_v52  ;;  %v1676_v52 = vunpack.c.h.s8.bf16 %v1076_v34 }
 0x1eb   : > { %3626 = vmatprep.subr.bf16.mxu0 %v1521_v53  ;;  %3666 = vmatprep.subr.bf16.mxu1 %v1523_v54  ;;  %v1229_v53 = vunpack.c.l.s8.bf16 %v929_v41 }
 0x1f2   : > { %3627 = vmatpush1.bf16.xpose.msra.mxu0 %v1520_v57  ;;  %3667 = vmatpush1.bf16.xpose.msra.mxu1 %v1522_v58  ;;  %v2084_v57 = vcombine.high %v6938_v46, %v6938_v46  ;;  %v2091_v58 = vrot.slane %v6920_v5, %v6785_v3  ;;  %v1079_v5 = vld [vmem:[%s6775_s19 + $0x618] sm:$0xff] }
 0x1f3   : > { %3628 = vmatprep.subr.bf16.mxu0 %v1671_v59  ;;  %3668 = vmatprep.subr.bf16.mxu1 %v1673_v60  ;;  %v928_v59 = vld [vmem:[%s6775_s19 + $0x160] sm:$0xff]  ;;  %v930_v60 = vld [vmem:[%s6775_s19 + $0x170] sm:$0xff] }
 0x1f4   : > { %v3096_v62 = vpop.f32.mrb[8].mxu0  ;;  %v3136_v2 = vpop.f32.mrb[8].mxu1  ;;  %v2112_v61 = vrot.slane %v2084_v57, %v6785_v3  ;;  %v2113_v63 = vcombine.high %v2091_v58, %v2091_v58 }
 0x1f5   : > { %v3097_v0 = vadd.f32 %v3096_v62, %v3057_v31  ;;  %v3098_v1 = vpop.f32.mrb[9].mxu0  ;;  %v3138_v8 = vpop.f32.mrb[9].mxu1  ;;  %v1525_v31 = vunpack.c.l.s8.bf16 %v1075_v27  ;;  %v1228_v62 = vunpack.c.l.s8.bf16 %v928_v59 }
 0x1f6   : > { %v3099_v6 = vpop.f32.mrb[10].mxu0  ;;  %v3139_v13 = vpop.f32.mrb[10].mxu1  ;;  %v1379_v1 = vunpack.c.h.s8.bf16 %v929_v41  ;;  %v2116_v4 = vcombine.high %v2112_v61, %v2112_v61  ;;  %v1380_v8 = vunpack.c.h.s8.bf16 %v930_v60 }
 0x1f7   : > { %v3137_v9 = vadd.f32 %v3136_v2, %v3097_v0  ;;  %v3100_v10 = vpop.f32.mrb[11].mxu0  ;;  %v3140_v15 = vpop.f32.mrb[11].mxu1  ;;  %v1230_v0 = vunpack.c.l.s8.bf16 %v930_v60  ;;  %v1381_v2 = vunpack.c.h.s8.bf16 %v931_v45  ;;  %v1081_v6 = vld [vmem:[%s6775_s19 + $0x628] sm:$0xff] }
 0x1f8   : > { %v1531_v10 = vunpack.c.l.s8.bf16 %v1081_v6  ;;  %v1679_v15 = vunpack.c.h.s8.bf16 %v1079_v5  ;;  %v1681_v16 = vunpack.c.h.s8.bf16 %v1081_v6  ;;  %v937_v60 = vld [vmem:[%s6775_s19 + $0x1a8] sm:$0xff] }
 0x1fa   : > { %3629 = vmatpush1.bf16.xpose.msra.mxu0 %v1670_v7  ;;  %3669 = vmatpush1.bf16.xpose.msra.mxu1 %v1672_v11  ;;  %v1378_v7 = vunpack.c.h.s8.bf16 %v928_v59  ;;  %v1078_v11 = vld [vmem:[%s6775_s19 + $0x610] sm:$0xff] }
 0x1fb   : > { %3702 = vmatprep.subr.bf16.mxu0 %v1225_v12  ;;  %3742 = vmatprep.subr.bf16.mxu1 %v1227_v14  ;;  %v1080_v12 = vld [vmem:[%s6775_s19 + $0x620] sm:$0xff]  ;;  %v1528_v13 = vunpack.c.l.s8.bf16 %v1078_v11 }
 0x1fc   : > { %v1530_v14 = vunpack.c.l.s8.bf16 %v1080_v12 }
 0x201   : > { %3655 = vmatmul.mubr.bf16.vlgmr.msra.gmra.mrb[36].mxu0 %v2049_v17  ;;  %3695 = vmatmul.mubr.bf16.vlgmr.msra.gmra.mrb[36].mxu1 %v2065_v22  ;;  %v6952_v17 = vld [vmem:[%s6773_s18 + $0x30] sm:$0xff] }
 0x202   : > { %3703 = vmatpush1.bf16.xpose.msra.mxu0 %v1224_v21  ;;  %3743 = vmatpush1.bf16.xpose.msra.mxu1 %v1226_v23  ;;  %v935_v23 = vld [vmem:[%s6775_s19 + $0x198] sm:$0xff] }
 0x203   : > { %3704 = vmatprep.subr.bf16.mxu0 %v1375_v24  ;;  %3744 = vmatprep.subr.bf16.mxu1 %v1377_v25  ;;  %v6958_v24 = vrot.slane %v6952_v17, %v6785_v3  ;;  %v1235_v33 = vunpack.c.l.s8.bf16 %v935_v23 }
 0x204   : > { %3734 = vmatprep.mubr.bf16.mxu0 %v2105_v20  ;;  %3774 = vmatprep.mubr.bf16.mxu1 %v2115_v26  ;;  %v1678_v26 = vunpack.c.h.s8.bf16 %v1078_v11 }
 0x20a   : > { %3705 = vmatpush1.bf16.xpose.msra.mxu0 %v1374_v29  ;;  %3745 = vmatpush1.bf16.xpose.msra.mxu1 %v1376_v30  ;;  %v1680_v30 = vunpack.c.h.s8.bf16 %v1080_v12 }
 0x20b   : > { %3706 = vmatprep.subr.bf16.mxu0 %v1525_v31  ;;  %3746 = vmatprep.subr.bf16.mxu1 %v1527_v32  ;;  %v1233_v31 = vunpack.c.l.s8.bf16 %v933_v19 }
 0x212   : > { %3707 = vmatpush1.bf16.xpose.msra.mxu0 %v1524_v35  ;;  %3747 = vmatpush1.bf16.xpose.msra.mxu1 %v1526_v36  ;;  %v2132_v35 = vcombine.high %v6958_v24, %v6958_v24  ;;  %v2098_v36 = vrot.slane %v6938_v46, %v6785_v3  ;;  %v1083_v46 = vld [vmem:[%s6775_s19 + $0x638] sm:$0xff] }
 0x213   : > { %3708 = vmatprep.subr.bf16.mxu0 %v1675_v37  ;;  %3748 = vmatprep.subr.bf16.mxu1 %v1677_v38  ;;  %v932_v37 = vld [vmem:[%s6775_s19 + $0x180] sm:$0xff]  ;;  %v934_v38 = vld [vmem:[%s6775_s19 + $0x190] sm:$0xff] }
 0x214   : > { %v3176_v40 = vpop.f32.mrb[12].mxu0  ;;  %v3216_v44 = vpop.f32.mrb[12].mxu1  ;;  %v2154_v39 = vrot.slane %v2132_v35, %v6785_v3  ;;  %v2114_v41 = vcombine.high %v2098_v36, %v2098_v36 }
 0x215   : > { %v3177_v42 = vadd.f32 %v3176_v40, %v3137_v9  ;;  %v3178_v43 = vpop.f32.mrb[13].mxu0  ;;  %v3218_v49 = vpop.f32.mrb[13].mxu1  ;;  %v1529_v9 = vunpack.c.l.s8.bf16 %v1079_v5  ;;  %v1232_v40 = vunpack.c.l.s8.bf16 %v932_v37 }
 0x216   : > { %v3179_v47 = vpop.f32.mrb[14].mxu0  ;;  %v3219_v54 = vpop.f32.mrb[14].mxu1  ;;  %v1383_v43 = vunpack.c.h.s8.bf16 %v933_v19  ;;  %v2164_v45 = vcombine.high %v2154_v39, %v2154_v39  ;;  %v1384_v49 = vunpack.c.h.s8.bf16 %v934_v38 }
 0x217   : > { %v3217_v50 = vadd.f32 %v3216_v44, %v3177_v42  ;;  %v3180_v51 = vpop.f32.mrb[15].mxu0  ;;  %v3220_v56 = vpop.f32.mrb[15].mxu1  ;;  %v1234_v42 = vunpack.c.l.s8.bf16 %v934_v38  ;;  %v1385_v44 = vunpack.c.h.s8.bf16 %v935_v23  ;;  %v1085_v47 = vld [vmem:[%s6775_s19 + $0x648] sm:$0xff] }
 0x218   : > { %v1535_v51 = vunpack.c.l.s8.bf16 %v1085_v47  ;;  %v1683_v56 = vunpack.c.h.s8.bf16 %v1083_v46  ;;  %v1685_v57 = vunpack.c.h.s8.bf16 %v1085_v47  ;;  %v941_v38 = vld [vmem:[%s6775_s19 + $0x1c8] sm:$0xff] }
 0x21a   : > { %3709 = vmatpush1.bf16.xpose.msra.mxu0 %v1674_v48  ;;  %3749 = vmatpush1.bf16.xpose.msra.mxu1 %v1676_v52  ;;  %v1382_v48 = vunpack.c.h.s8.bf16 %v932_v37  ;;  %v1082_v52 = vld [vmem:[%s6775_s19 + $0x630] sm:$0xff] }
 0x21b   : > { %3782 = vmatprep.subr.bf16.mxu0 %v1229_v53  ;;  %3822 = vmatprep.subr.bf16.mxu1 %v1231_v55  ;;  %v1084_v53 = vld [vmem:[%s6775_s19 + $0x640] sm:$0xff]  ;;  %v1532_v54 = vunpack.c.l.s8.bf16 %v1082_v52 }
 0x21c   : > { %v1534_v55 = vunpack.c.l.s8.bf16 %v1084_v53 }
 0x221   : > { %3735 = vmatmul.mubr.bf16.vlgmr.msra.gmra.mrb[40].mxu0 %v2091_v58  ;;  %3775 = vmatmul.mubr.bf16.vlgmr.msra.gmra.mrb[40].mxu1 %v2113_v63  ;;  %v2117_v58 = vcombine.high %v6952_v17, %v6952_v17 }
 0x222   : > { %3783 = vmatpush1.bf16.xpose.msra.mxu0 %v1228_v62  ;;  %3823 = vmatpush1.bf16.xpose.msra.mxu1 %v1230_v0  ;;  %v939_v0 = vld [vmem:[%s6775_s19 + $0x1b8] sm:$0xff] }
 0x223   : > { %3784 = vmatprep.subr.bf16.mxu0 %v1379_v1  ;;  %3824 = vmatprep.subr.bf16.mxu1 %v1381_v2  ;;  %v6976_v1 = vrot.slane %v2117_v58, %v6785_v3  ;;  %v1239_v11 = vunpack.c.l.s8.bf16 %v939_v0 }
 0x224   : > { %3814 = vmatprep.mubr.bf16.mxu0 %v2112_v61  ;;  %3854 = vmatprep.mubr.bf16.mxu1 %v2116_v4  ;;  %v1682_v4 = vunpack.c.h.s8.bf16 %v1082_v52 }
 0x22a   : > { %3785 = vmatpush1.bf16.xpose.msra.mxu0 %v1378_v7  ;;  %3825 = vmatpush1.bf16.xpose.msra.mxu1 %v1380_v8  ;;  %v1684_v8 = vunpack.c.h.s8.bf16 %v1084_v53 }
 0x22b   : > { %3786 = vmatprep.subr.bf16.mxu0 %v1529_v9  ;;  %3826 = vmatprep.subr.bf16.mxu1 %v1531_v10  ;;  %v1237_v9 = vunpack.c.l.s8.bf16 %v937_v60 }
 0x232   : > { %3787 = vmatpush1.bf16.xpose.msra.mxu0 %v1528_v13  ;;  %3827 = vmatpush1.bf16.xpose.msra.mxu1 %v1530_v14  ;;  %v2133_v13 = vcombine.high %v6976_v1, %v6976_v1  ;;  %v2140_v14 = vrot.slane %v6958_v24, %v6785_v3  ;;  %v1087_v24 = vld [vmem:[%s6775_s19 + $0x658] sm:$0xff] }
 0x233   : > { %3788 = vmatprep.subr.bf16.mxu0 %v1679_v15  ;;  %3828 = vmatprep.subr.bf16.mxu1 %v1681_v16  ;;  %v936_v15 = vld [vmem:[%s6775_s19 + $0x1a0] sm:$0xff]  ;;  %v938_v16 = vld [vmem:[%s6775_s19 + $0x1b0] sm:$0xff] }
 0x234   : > { %v3256_v18 = vpop.f32.mrb[16].mxu0  ;;  %v3296_v22 = vpop.f32.mrb[16].mxu1  ;;  %v2161_v17 = vrot.slane %v2133_v13, %v6785_v3  ;;  %v2162_v19 = vcombine.high %v2140_v14, %v2140_v14 }
 0x235   : > { %v3257_v20 = vadd.f32 %v3256_v18, %v3217_v50  ;;  %v3258_v21 = vpop.f32.mrb[17].mxu0  ;;  %v3298_v27 = vpop.f32.mrb[17].mxu1  ;;  %v1533_v50 = vunpack.c.l.s8.bf16 %v1083_v46  ;;  %v1236_v18 = vunpack.c.l.s8.bf16 %v936_v15 }
 0x236   : > { %v3259_v25 = vpop.f32.mrb[18].mxu0  ;;  %v3299_v32 = vpop.f32.mrb[18].mxu1  ;;  %v1387_v21 = vunpack.c.h.s8.bf16 %v937_v60  ;;  %v2165_v23 = vcombine.high %v2161_v17, %v2161_v17  ;;  %v1388_v27 = vunpack.c.h.s8.bf16 %v938_v16 }
 0x237   : > { %v3297_v28 = vadd.f32 %v3296_v22, %v3257_v20  ;;  %v3260_v29 = vpop.f32.mrb[19].mxu0  ;;  %v3300_v34 = vpop.f32.mrb[19].mxu1  ;;  %v1238_v20 = vunpack.c.l.s8.bf16 %v938_v16  ;;  %v1389_v22 = vunpack.c.h.s8.bf16 %v939_v0  ;;  %v1089_v25 = vld [vmem:[%s6775_s19 + $0x668] sm:$0xff] }
 0x238   : > { %v1539_v29 = vunpack.c.l.s8.bf16 %v1089_v25  ;;  %v1687_v34 = vunpack.c.h.s8.bf16 %v1087_v24  ;;  %v1689_v35 = vunpack.c.h.s8.bf16 %v1089_v25  ;;  %v945_v16 = vld [vmem:[%s6775_s19 + $0x1e8] sm:$0xff] }
 0x23a   : > { %3789 = vmatpush1.bf16.xpose.msra.mxu0 %v1678_v26  ;;  %3829 = vmatpush1.bf16.xpose.msra.mxu1 %v1680_v30  ;;  %v1386_v26 = vunpack.c.h.s8.bf16 %v936_v15  ;;  %v1086_v30 = vld [vmem:[%s6775_s19 + $0x650] sm:$0xff] }
 0x23b   : > { %3862 = vmatprep.subr.bf16.mxu0 %v1233_v31  ;;  %3902 = vmatprep.subr.bf16.mxu1 %v1235_v33  ;;  %v1088_v31 = vld [vmem:[%s6775_s19 + $0x660] sm:$0xff]  ;;  %v1536_v32 = vunpack.c.l.s8.bf16 %v1086_v30 }
 0x23c   : > { %v1538_v33 = vunpack.c.l.s8.bf16 %v1088_v31 }
 0x241   : > { %3815 = vmatmul.mubr.bf16.vlgmr.msra.gmra.mrb[44].mxu0 %v2098_v36  ;;  %3855 = vmatmul.mubr.bf16.vlgmr.msra.gmra.mrb[44].mxu1 %v2114_v41  ;;  %v6990_v36 = vld [vmem:[%s6773_s18 + $0x38] sm:$0xff] }
 0x242   : > { %3863 = vmatpush1.bf16.xpose.msra.mxu0 %v1232_v40  ;;  %3903 = vmatpush1.bf16.xpose.msra.mxu1 %v1234_v42  ;;  %v943_v42 = vld [vmem:[%s6775_s19 + $0x1d8] sm:$0xff] }
 0x243   : > { %3864 = vmatprep.subr.bf16.mxu0 %v1383_v43  ;;  %3904 = vmatprep.subr.bf16.mxu1 %v1385_v44  ;;  %v6996_v43 = vrot.slane %v6990_v36, %v6785_v3  ;;  %v1243_v52 = vunpack.c.l.s8.bf16 %v943_v42 }
 0x244   : > { %3894 = vmatprep.mubr.bf16.mxu0 %v2154_v39  ;;  %3934 = vmatprep.mubr.bf16.mxu1 %v2164_v45  ;;  %v1686_v45 = vunpack.c.h.s8.bf16 %v1086_v30 }
 0x24a   : > { %3865 = vmatpush1.bf16.xpose.msra.mxu0 %v1382_v48  ;;  %3905 = vmatpush1.bf16.xpose.msra.mxu1 %v1384_v49  ;;  %v1688_v49 = vunpack.c.h.s8.bf16 %v1088_v31 }
 0x24b   : > { %3866 = vmatprep.subr.bf16.mxu0 %v1533_v50  ;;  %3906 = vmatprep.subr.bf16.mxu1 %v1535_v51  ;;  %v1241_v50 = vunpack.c.l.s8.bf16 %v941_v38 }
 0x252   : > { %3867 = vmatpush1.bf16.xpose.msra.mxu0 %v1532_v54  ;;  %3907 = vmatpush1.bf16.xpose.msra.mxu1 %v1534_v55  ;;  %v2181_v54 = vcombine.high %v6996_v43, %v6996_v43  ;;  %v2147_v55 = vrot.slane %v6976_v1, %v6785_v3  ;;  %v1091_v1 = vld [vmem:[%s6775_s19 + $0x678] sm:$0xff] }
 0x253   : > { %3868 = vmatprep.subr.bf16.mxu0 %v1683_v56  ;;  %3908 = vmatprep.subr.bf16.mxu1 %v1685_v57  ;;  %v940_v56 = vld [vmem:[%s6775_s19 + $0x1c0] sm:$0xff]  ;;  %v942_v57 = vld [vmem:[%s6775_s19 + $0x1d0] sm:$0xff] }
 0x254   : > { %v3336_v59 = vpop.f32.mrb[20].mxu0  ;;  %v3376_v63 = vpop.f32.mrb[20].mxu1  ;;  %v2203_v58 = vrot.slane %v2181_v54, %v6785_v3  ;;  %v2163_v60 = vcombine.high %v2147_v55, %v2147_v55 }
 0x255   : > { %v3337_v61 = vadd.f32 %v3336_v59, %v3297_v28  ;;  %v3338_v62 = vpop.f32.mrb[21].mxu0  ;;  %v3378_v5 = vpop.f32.mrb[21].mxu1  ;;  %v1537_v28 = vunpack.c.l.s8.bf16 %v1087_v24  ;;  %v1240_v59 = vunpack.c.l.s8.bf16 %v940_v56 }
 0x256   : > { %v3339_v2 = vpop.f32.mrb[22].mxu0  ;;  %v3379_v10 = vpop.f32.mrb[22].mxu1  ;;  %v1391_v62 = vunpack.c.h.s8.bf16 %v941_v38  ;;  %v2213_v0 = vcombine.high %v2203_v58, %v2203_v58  ;;  %v1392_v5 = vunpack.c.h.s8.bf16 %v942_v57 }
 0x257   : > { %v3377_v6 = vadd.f32 %v3376_v63, %v3337_v61  ;;  %v3340_v7 = vpop.f32.mrb[23].mxu0  ;;  %v3380_v12 = vpop.f32.mrb[23].mxu1  ;;  %v1242_v61 = vunpack.c.l.s8.bf16 %v942_v57  ;;  %v1393_v63 = vunpack.c.h.s8.bf16 %v943_v42  ;;  %v1093_v2 = vld [vmem:[%s6775_s19 + $0x688] sm:$0xff] }
 0x258   : > { %v1543_v7 = vunpack.c.l.s8.bf16 %v1093_v2  ;;  %v1691_v12 = vunpack.c.h.s8.bf16 %v1091_v1  ;;  %v1693_v13 = vunpack.c.h.s8.bf16 %v1093_v2  ;;  %v949_v57 = vld [vmem:[%s6775_s19 + $0x208] sm:$0xff] }
 0x25a   : > { %3869 = vmatpush1.bf16.xpose.msra.mxu0 %v1682_v4  ;;  %3909 = vmatpush1.bf16.xpose.msra.mxu1 %v1684_v8  ;;  %v1390_v4 = vunpack.c.h.s8.bf16 %v940_v56  ;;  %v1090_v8 = vld [vmem:[%s6775_s19 + $0x670] sm:$0xff] }
 0x25b   : > { %3942 = vmatprep.subr.bf16.mxu0 %v1237_v9  ;;  %3982 = vmatprep.subr.bf16.mxu1 %v1239_v11  ;;  %v1092_v9 = vld [vmem:[%s6775_s19 + $0x680] sm:$0xff]  ;;  %v1540_v10 = vunpack.c.l.s8.bf16 %v1090_v8 }
 0x25c   : > { %v1542_v11 = vunpack.c.l.s8.bf16 %v1092_v9 }
 0x261   : > { %3895 = vmatmul.mubr.bf16.vlgmr.msra.gmra.mrb[48].mxu0 %v2140_v14  ;;  %3935 = vmatmul.mubr.bf16.vlgmr.msra.gmra.mrb[48].mxu1 %v2162_v19  ;;  %v2166_v14 = vcombine.high %v6990_v36, %v6990_v36 }
 0x262   : > { %3943 = vmatpush1.bf16.xpose.msra.mxu0 %v1236_v18  ;;  %3983 = vmatpush1.bf16.xpose.msra.mxu1 %v1238_v20  ;;  %v947_v20 = vld [vmem:[%s6775_s19 + $0x1f8] sm:$0xff] }
 0x263   : > { %3944 = vmatprep.subr.bf16.mxu0 %v1387_v21  ;;  %3984 = vmatprep.subr.bf16.mxu1 %v1389_v22  ;;  %v7014_v21 = vrot.slane %v2166_v14, %v6785_v3  ;;  %v1247_v30 = vunpack.c.l.s8.bf16 %v947_v20 }
 0x264   : > { %3974 = vmatprep.mubr.bf16.mxu0 %v2161_v17  ;;  %4014 = vmatprep.mubr.bf16.mxu1 %v2165_v23  ;;  %v1690_v23 = vunpack.c.h.s8.bf16 %v1090_v8 }
 0x26a   : > { %3945 = vmatpush1.bf16.xpose.msra.mxu0 %v1386_v26  ;;  %3985 = vmatpush1.bf16.xpose.msra.mxu1 %v1388_v27  ;;  %v1692_v27 = vunpack.c.h.s8.bf16 %v1092_v9 }
 0x26b   : > { %3946 = vmatprep.subr.bf16.mxu0 %v1537_v28  ;;  %3986 = vmatprep.subr.bf16.mxu1 %v1539_v29  ;;  %v1245_v28 = vunpack.c.l.s8.bf16 %v945_v16 }
 0x272   : > { %3947 = vmatpush1.bf16.xpose.msra.mxu0 %v1536_v32  ;;  %3987 = vmatpush1.bf16.xpose.msra.mxu1 %v1538_v33  ;;  %v2182_v32 = vcombine.high %v7014_v21, %v7014_v21  ;;  %v2189_v33 = vrot.slane %v6996_v43, %v6785_v3  ;;  %v1095_v43 = vld [vmem:[%s6775_s19 + $0x698] sm:$0xff] }
 0x273   : > { %3948 = vmatprep.subr.bf16.mxu0 %v1687_v34  ;;  %3988 = vmatprep.subr.bf16.mxu1 %v1689_v35  ;;  %v944_v34 = vld [vmem:[%s6775_s19 + $0x1e0] sm:$0xff]  ;;  %v946_v35 = vld [vmem:[%s6775_s19 + $0x1f0] sm:$0xff] }
 0x274   : > { %v3416_v37 = vpop.f32.mrb[24].mxu0  ;;  %v3456_v41 = vpop.f32.mrb[24].mxu1  ;;  %v2210_v36 = vrot.slane %v2182_v32, %v6785_v3  ;;  %v2211_v38 = vcombine.high %v2189_v33, %v2189_v33 }
 0x275   : > { %v3417_v39 = vadd.f32 %v3416_v37, %v3377_v6  ;;  %v3418_v40 = vpop.f32.mrb[25].mxu0  ;;  %v3458_v46 = vpop.f32.mrb[25].mxu1  ;;  %v1541_v6 = vunpack.c.l.s8.bf16 %v1091_v1  ;;  %v1244_v37 = vunpack.c.l.s8.bf16 %v944_v34 }
 0x276   : > { %v3419_v44 = vpop.f32.mrb[26].mxu0  ;;  %v3459_v51 = vpop.f32.mrb[26].mxu1  ;;  %v1395_v40 = vunpack.c.h.s8.bf16 %v945_v16  ;;  %v2214_v42 = vcombine.high %v2210_v36, %v2210_v36  ;;  %v1396_v46 = vunpack.c.h.s8.bf16 %v946_v35 }
 0x277   : > { %v3457_v47 = vadd.f32 %v3456_v41, %v3417_v39  ;;  %v3420_v48 = vpop.f32.mrb[27].mxu0  ;;  %v3460_v53 = vpop.f32.mrb[27].mxu1  ;;  %v1246_v39 = vunpack.c.l.s8.bf16 %v946_v35  ;;  %v1397_v41 = vunpack.c.h.s8.bf16 %v947_v20  ;;  %v1097_v44 = vld [vmem:[%s6775_s19 + $0x6a8] sm:$0xff] }
 0x278   : > { %v1547_v48 = vunpack.c.l.s8.bf16 %v1097_v44  ;;  %v1695_v53 = vunpack.c.h.s8.bf16 %v1095_v43  ;;  %v1697_v54 = vunpack.c.h.s8.bf16 %v1097_v44  ;;  %v953_v35 = vld [vmem:[%s6775_s19 + $0x228] sm:$0xff] }
 0x27a   : > { %3949 = vmatpush1.bf16.xpose.msra.mxu0 %v1686_v45  ;;  %3989 = vmatpush1.bf16.xpose.msra.mxu1 %v1688_v49  ;;  %v1394_v45 = vunpack.c.h.s8.bf16 %v944_v34  ;;  %v1094_v49 = vld [vmem:[%s6775_s19 + $0x690] sm:$0xff] }
 0x27b   : > { %4022 = vmatprep.subr.bf16.mxu0 %v1241_v50  ;;  %4062 = vmatprep.subr.bf16.mxu1 %v1243_v52  ;;  %v1096_v50 = vld [vmem:[%s6775_s19 + $0x6a0] sm:$0xff]  ;;  %v1544_v51 = vunpack.c.l.s8.bf16 %v1094_v49 }
 0x27c   : > { %v1546_v52 = vunpack.c.l.s8.bf16 %v1096_v50 }
 0x281   : > { %3975 = vmatmul.mubr.bf16.vlgmr.msra.gmra.mrb[52].mxu0 %v2147_v55  ;;  %4015 = vmatmul.mubr.bf16.vlgmr.msra.gmra.mrb[52].mxu1 %v2163_v60  ;;  %v7028_v55 = vld [vmem:[%s6773_s18 + $0x40] sm:$0xff] }
 0x282   : > { %4023 = vmatpush1.bf16.xpose.msra.mxu0 %v1240_v59  ;;  %4063 = vmatpush1.bf16.xpose.msra.mxu1 %v1242_v61  ;;  %v951_v61 = vld [vmem:[%s6775_s19 + $0x218] sm:$0xff] }
 0x283   : > { %4024 = vmatprep.subr.bf16.mxu0 %v1391_v62  ;;  %4064 = vmatprep.subr.bf16.mxu1 %v1393_v63  ;;  %v7034_v62 = vrot.slane %v7028_v55, %v6785_v3  ;;  %v1251_v8 = vunpack.c.l.s8.bf16 %v951_v61 }
 0x284   : > { %4054 = vmatprep.mubr.bf16.mxu0 %v2203_v58  ;;  %4094 = vmatprep.mubr.bf16.mxu1 %v2213_v0  ;;  %v1694_v0 = vunpack.c.h.s8.bf16 %v1094_v49 }
 0x28a   : > { %4025 = vmatpush1.bf16.xpose.msra.mxu0 %v1390_v4  ;;  %4065 = vmatpush1.bf16.xpose.msra.mxu1 %v1392_v5  ;;  %v1696_v5 = vunpack.c.h.s8.bf16 %v1096_v50 }
 0x28b   : > { %4026 = vmatprep.subr.bf16.mxu0 %v1541_v6  ;;  %4066 = vmatprep.subr.bf16.mxu1 %v1543_v7  ;;  %v1249_v6 = vunpack.c.l.s8.bf16 %v949_v57 }
 0x292   : > { %4027 = vmatpush1.bf16.xpose.msra.mxu0 %v1540_v10  ;;  %4067 = vmatpush1.bf16.xpose.msra.mxu1 %v1542_v11  ;;  %v2230_v10 = vcombine.high %v7034_v62, %v7034_v62  ;;  %v2196_v11 = vrot.slane %v7014_v21, %v6785_v3  ;;  %v1099_v21 = vld [vmem:[%s6775_s19 + $0x6b8] sm:$0xff] }
 0x293   : > { %4028 = vmatprep.subr.bf16.mxu0 %v1691_v12  ;;  %4068 = vmatprep.subr.bf16.mxu1 %v1693_v13  ;;  %v948_v12 = vld [vmem:[%s6775_s19 + $0x200] sm:$0xff]  ;;  %v950_v13 = vld [vmem:[%s6775_s19 + $0x210] sm:$0xff] }
 0x294   : > { %v3496_v15 = vpop.f32.mrb[28].mxu0  ;;  %v3536_v19 = vpop.f32.mrb[28].mxu1  ;;  %v2252_v14 = vrot.slane %v2230_v10, %v6785_v3  ;;  %v2212_v16 = vcombine.high %v2196_v11, %v2196_v11 }
 0x295   : > { %v3497_v17 = vadd.f32 %v3496_v15, %v3457_v47  ;;  %v3498_v18 = vpop.f32.mrb[29].mxu0  ;;  %v3538_v24 = vpop.f32.mrb[29].mxu1  ;;  %v1545_v47 = vunpack.c.l.s8.bf16 %v1095_v43  ;;  %v1248_v15 = vunpack.c.l.s8.bf16 %v948_v12 }
 0x296   : > { %v3499_v22 = vpop.f32.mrb[30].mxu0  ;;  %v3539_v29 = vpop.f32.mrb[30].mxu1  ;;  %v1399_v18 = vunpack.c.h.s8.bf16 %v949_v57  ;;  %v2262_v20 = vcombine.high %v2252_v14, %v2252_v14  ;;  %v1400_v24 = vunpack.c.h.s8.bf16 %v950_v13 }
 0x297   : > { %v3537_v25 = vadd.f32 %v3536_v19, %v3497_v17  ;;  %v3500_v26 = vpop.f32.mrb[31].mxu0  ;;  %v3540_v31 = vpop.f32.mrb[31].mxu1  ;;  %v1250_v17 = vunpack.c.l.s8.bf16 %v950_v13  ;;  %v1401_v19 = vunpack.c.h.s8.bf16 %v951_v61  ;;  %v1101_v22 = vld [vmem:[%s6775_s19 + $0x6c8] sm:$0xff] }
 0x298   : > { %v1551_v26 = vunpack.c.l.s8.bf16 %v1101_v22  ;;  %v1699_v31 = vunpack.c.h.s8.bf16 %v1099_v21  ;;  %v1701_v32 = vunpack.c.h.s8.bf16 %v1101_v22  ;;  %v957_v13 = vld [vmem:[%s6775_s19 + $0x248] sm:$0xff] }
 0x29a   : > { %4029 = vmatpush1.bf16.xpose.msra.mxu0 %v1690_v23  ;;  %4069 = vmatpush1.bf16.xpose.msra.mxu1 %v1692_v27  ;;  %v1398_v23 = vunpack.c.h.s8.bf16 %v948_v12  ;;  %v1098_v27 = vld [vmem:[%s6775_s19 + $0x6b0] sm:$0xff] }
 0x29b   : > { %4102 = vmatprep.subr.bf16.mxu0 %v1245_v28  ;;  %4142 = vmatprep.subr.bf16.mxu1 %v1247_v30  ;;  %v1100_v28 = vld [vmem:[%s6775_s19 + $0x6c0] sm:$0xff]  ;;  %v1548_v29 = vunpack.c.l.s8.bf16 %v1098_v27 }
 0x29c   : > { %v1550_v30 = vunpack.c.l.s8.bf16 %v1100_v28 }
 0x2a1   : > { %4055 = vmatmul.mubr.bf16.vlgmr.msra.gmra.mrb[56].mxu0 %v2189_v33  ;;  %4095 = vmatmul.mubr.bf16.vlgmr.msra.gmra.mrb[56].mxu1 %v2211_v38  ;;  %v2215_v33 = vcombine.high %v7028_v55, %v7028_v55 }
 0x2a2   : > { %4103 = vmatpush1.bf16.xpose.msra.mxu0 %v1244_v37  ;;  %4143 = vmatpush1.bf16.xpose.msra.mxu1 %v1246_v39  ;;  %v955_v39 = vld [vmem:[%s6775_s19 + $0x238] sm:$0xff] }
 0x2a3   : > { %4104 = vmatprep.subr.bf16.mxu0 %v1395_v40  ;;  %4144 = vmatprep.subr.bf16.mxu1 %v1397_v41  ;;  %v7052_v40 = vrot.slane %v2215_v33, %v6785_v3  ;;  %v1255_v49 = vunpack.c.l.s8.bf16 %v955_v39 }
 0x2a4   : > { %4134 = vmatprep.mubr.bf16.mxu0 %v2210_v36  ;;  %4174 = vmatprep.mubr.bf16.mxu1 %v2214_v42  ;;  %v1698_v42 = vunpack.c.h.s8.bf16 %v1098_v27 }
 0x2aa   : > { %4105 = vmatpush1.bf16.xpose.msra.mxu0 %v1394_v45  ;;  %4145 = vmatpush1.bf16.xpose.msra.mxu1 %v1396_v46  ;;  %v1700_v46 = vunpack.c.h.s8.bf16 %v1100_v28 }
 0x2ab   : > { %4106 = vmatprep.subr.bf16.mxu0 %v1545_v47  ;;  %4146 = vmatprep.subr.bf16.mxu1 %v1547_v48  ;;  %v1253_v47 = vunpack.c.l.s8.bf16 %v953_v35 }
 0x2b2   : > { %4107 = vmatpush1.bf16.xpose.msra.mxu0 %v1544_v51  ;;  %4147 = vmatpush1.bf16.xpose.msra.mxu1 %v1546_v52  ;;  %v2231_v51 = vcombine.high %v7052_v40, %v7052_v40  ;;  %v2238_v52 = vrot.slane %v7034_v62, %v6785_v3  ;;  %v1103_v62 = vld [vmem:[%s6775_s19 + $0x6d8] sm:$0xff] }
 0x2b3   : > { %4108 = vmatprep.subr.bf16.mxu0 %v1695_v53  ;;  %4148 = vmatprep.subr.bf16.mxu1 %v1697_v54  ;;  %v952_v53 = vld [vmem:[%s6775_s19 + $0x220] sm:$0xff]  ;;  %v954_v54 = vld [vmem:[%s6775_s19 + $0x230] sm:$0xff] }
 0x2b4   : > { %v3576_v56 = vpop.f32.mrb[32].mxu0  ;;  %v3616_v60 = vpop.f32.mrb[32].mxu1  ;;  %v2259_v55 = vrot.slane %v2231_v51, %v6785_v3  ;;  %v2260_v57 = vcombine.high %v2238_v52, %v2238_v52 }
 0x2b5   : > { %v3577_v58 = vadd.f32 %v3576_v56, %v3537_v25  ;;  %v3578_v59 = vpop.f32.mrb[33].mxu0  ;;  %v3618_v1 = vpop.f32.mrb[33].mxu1  ;;  %v1549_v25 = vunpack.c.l.s8.bf16 %v1099_v21  ;;  %v1252_v56 = vunpack.c.l.s8.bf16 %v952_v53 }
 0x2b6   : > { %v3579_v63 = vpop.f32.mrb[34].mxu0  ;;  %v3619_v7 = vpop.f32.mrb[34].mxu1  ;;  %v1403_v59 = vunpack.c.h.s8.bf16 %v953_v35  ;;  %v2263_v61 = vcombine.high %v2259_v55, %v2259_v55  ;;  %v1404_v1 = vunpack.c.h.s8.bf16 %v954_v54 }
 0x2b7   : > { %v3617_v2 = vadd.f32 %v3616_v60, %v3577_v58  ;;  %v3580_v4 = vpop.f32.mrb[35].mxu0  ;;  %v3620_v9 = vpop.f32.mrb[35].mxu1  ;;  %v1254_v58 = vunpack.c.l.s8.bf16 %v954_v54  ;;  %v1405_v60 = vunpack.c.h.s8.bf16 %v955_v39  ;;  %v1105_v63 = vld [vmem:[%s6775_s19 + $0x6e8] sm:$0xff] }
 0x2b8   : > { %v1555_v4 = vunpack.c.l.s8.bf16 %v1105_v63  ;;  %v1703_v9 = vunpack.c.h.s8.bf16 %v1103_v62  ;;  %v1705_v10 = vunpack.c.h.s8.bf16 %v1105_v63  ;;  %v961_v54 = vld [vmem:[%s6775_s19 + $0x268] sm:$0xff] }
 0x2ba   : > { %4109 = vmatpush1.bf16.xpose.msra.mxu0 %v1694_v0  ;;  %4149 = vmatpush1.bf16.xpose.msra.mxu1 %v1696_v5  ;;  %v1402_v0 = vunpack.c.h.s8.bf16 %v952_v53  ;;  %v1102_v5 = vld [vmem:[%s6775_s19 + $0x6d0] sm:$0xff] }
 0x2bb   : > { %4182 = vmatprep.subr.bf16.mxu0 %v1249_v6  ;;  %4222 = vmatprep.subr.bf16.mxu1 %v1251_v8  ;;  %v1104_v6 = vld [vmem:[%s6775_s19 + $0x6e0] sm:$0xff]  ;;  %v1552_v7 = vunpack.c.l.s8.bf16 %v1102_v5 }
 0x2bc   : > { %v1554_v8 = vunpack.c.l.s8.bf16 %v1104_v6 }
 0x2c1   : > { %4135 = vmatmul.mubr.bf16.vlgmr.msra.gmra.mrb[60].mxu0 %v2196_v11  ;;  %4175 = vmatmul.mubr.bf16.vlgmr.msra.gmra.mrb[60].mxu1 %v2212_v16  ;;  %v7066_v11 = vld [vmem:[%s6773_s18 + $0x48] sm:$0xff] }
 0x2c2   : > { %4183 = vmatpush1.bf16.xpose.msra.mxu0 %v1248_v15  ;;  %4223 = vmatpush1.bf16.xpose.msra.mxu1 %v1250_v17  ;;  %v959_v17 = vld [vmem:[%s6775_s19 + $0x258] sm:$0xff] }
 0x2c3   : > { %4184 = vmatprep.subr.bf16.mxu0 %v1399_v18  ;;  %4224 = vmatprep.subr.bf16.mxu1 %v1401_v19  ;;  %v7072_v18 = vrot.slane %v7066_v11, %v6785_v3  ;;  %v1259_v27 = vunpack.c.l.s8.bf16 %v959_v17 }
 0x2c4   : > { %4214 = vmatprep.mubr.bf16.mxu0 %v2252_v14  ;;  %4254 = vmatprep.mubr.bf16.mxu1 %v2262_v20  ;;  %v1702_v20 = vunpack.c.h.s8.bf16 %v1102_v5 }
 0x2ca   : > { %4185 = vmatpush1.bf16.xpose.msra.mxu0 %v1398_v23  ;;  %4225 = vmatpush1.bf16.xpose.msra.mxu1 %v1400_v24  ;;  %v1704_v24 = vunpack.c.h.s8.bf16 %v1104_v6 }
 0x2cb   : > { %4186 = vmatprep.subr.bf16.mxu0 %v1549_v25  ;;  %4226 = vmatprep.subr.bf16.mxu1 %v1551_v26  ;;  %v1257_v25 = vunpack.c.l.s8.bf16 %v957_v13 }
 0x2d2   : > { %4187 = vmatpush1.bf16.xpose.msra.mxu0 %v1548_v29  ;;  %4227 = vmatpush1.bf16.xpose.msra.mxu1 %v1550_v30  ;;  %v2279_v29 = vcombine.high %v7072_v18, %v7072_v18  ;;  %v2245_v30 = vrot.slane %v7052_v40, %v6785_v3  ;;  %v1107_v40 = vld [vmem:[%s6775_s19 + $0x6f8] sm:$0xff] }
 0x2d3   : > { %4188 = vmatprep.subr.bf16.mxu0 %v1699_v31  ;;  %4228 = vmatprep.subr.bf16.mxu1 %v1701_v32  ;;  %v956_v31 = vld [vmem:[%s6775_s19 + $0x240] sm:$0xff]  ;;  %v958_v32 = vld [vmem:[%s6775_s19 + $0x250] sm:$0xff] }
 0x2d4   : > { %v3656_v34 = vpop.f32.mrb[36].mxu0  ;;  %v3696_v38 = vpop.f32.mrb[36].mxu1  ;;  %v2301_v33 = vrot.slane %v2279_v29, %v6785_v3  ;;  %v2261_v35 = vcombine.high %v2245_v30, %v2245_v30 }
 0x2d5   : > { %v3657_v36 = vadd.f32 %v3656_v34, %v3617_v2  ;;  %v3658_v37 = vpop.f32.mrb[37].mxu0  ;;  %v3698_v43 = vpop.f32.mrb[37].mxu1  ;;  %v1553_v2 = vunpack.c.l.s8.bf16 %v1103_v62  ;;  %v1256_v34 = vunpack.c.l.s8.bf16 %v956_v31 }
 0x2d6   : > { %v3659_v41 = vpop.f32.mrb[38].mxu0  ;;  %v3699_v48 = vpop.f32.mrb[38].mxu1  ;;  %v1407_v37 = vunpack.c.h.s8.bf16 %v957_v13  ;;  %v2311_v39 = vcombine.high %v2301_v33, %v2301_v33  ;;  %v1408_v43 = vunpack.c.h.s8.bf16 %v958_v32 }
 0x2d7   : > { %v3697_v44 = vadd.f32 %v3696_v38, %v3657_v36  ;;  %v3660_v45 = vpop.f32.mrb[39].mxu0  ;;  %v3700_v50 = vpop.f32.mrb[39].mxu1  ;;  %v1258_v36 = vunpack.c.l.s8.bf16 %v958_v32  ;;  %v1409_v38 = vunpack.c.h.s8.bf16 %v959_v17  ;;  %v1109_v41 = vld [vmem:[%s6775_s19 + $0x708] sm:$0xff] }
 0x2d8   : > { %v1559_v45 = vunpack.c.l.s8.bf16 %v1109_v41  ;;  %v1707_v50 = vunpack.c.h.s8.bf16 %v1107_v40  ;;  %v1709_v51 = vunpack.c.h.s8.bf16 %v1109_v41  ;;  %v965_v32 = vld [vmem:[%s6775_s19 + $0x288] sm:$0xff] }
 0x2da   : > { %4189 = vmatpush1.bf16.xpose.msra.mxu0 %v1698_v42  ;;  %4229 = vmatpush1.bf16.xpose.msra.mxu1 %v1700_v46  ;;  %v1406_v42 = vunpack.c.h.s8.bf16 %v956_v31  ;;  %v1106_v46 = vld [vmem:[%s6775_s19 + $0x6f0] sm:$0xff] }
 0x2db   : > { %4262 = vmatprep.subr.bf16.mxu0 %v1253_v47  ;;  %4302 = vmatprep.subr.bf16.mxu1 %v1255_v49  ;;  %v1108_v47 = vld [vmem:[%s6775_s19 + $0x700] sm:$0xff]  ;;  %v1556_v48 = vunpack.c.l.s8.bf16 %v1106_v46 }
 0x2dc   : > { %v1558_v49 = vunpack.c.l.s8.bf16 %v1108_v47 }
 0x2e1   : > { %4215 = vmatmul.mubr.bf16.vlgmr.msra.gmra.mrb[64].mxu0 %v2238_v52  ;;  %4255 = vmatmul.mubr.bf16.vlgmr.msra.gmra.mrb[64].mxu1 %v2260_v57  ;;  %v2264_v52 = vcombine.high %v7066_v11, %v7066_v11 }
 0x2e2   : > { %4263 = vmatpush1.bf16.xpose.msra.mxu0 %v1252_v56  ;;  %4303 = vmatpush1.bf16.xpose.msra.mxu1 %v1254_v58  ;;  %v963_v58 = vld [vmem:[%s6775_s19 + $0x278] sm:$0xff] }
 0x2e3   : > { %4264 = vmatprep.subr.bf16.mxu0 %v1403_v59  ;;  %4304 = vmatprep.subr.bf16.mxu1 %v1405_v60  ;;  %v7090_v59 = vrot.slane %v2264_v52, %v6785_v3  ;;  %v1263_v5 = vunpack.c.l.s8.bf16 %v963_v58 }
 0x2e4   : > { %4294 = vmatprep.mubr.bf16.mxu0 %v2259_v55  ;;  %4334 = vmatprep.mubr.bf16.mxu1 %v2263_v61  ;;  %v1706_v61 = vunpack.c.h.s8.bf16 %v1106_v46 }
 0x2ea   : > { %4265 = vmatpush1.bf16.xpose.msra.mxu0 %v1402_v0  ;;  %4305 = vmatpush1.bf16.xpose.msra.mxu1 %v1404_v1  ;;  %v1708_v1 = vunpack.c.h.s8.bf16 %v1108_v47 }
 0x2eb   : > { %4266 = vmatprep.subr.bf16.mxu0 %v1553_v2  ;;  %4306 = vmatprep.subr.bf16.mxu1 %v1555_v4  ;;  %v1261_v2 = vunpack.c.l.s8.bf16 %v961_v54 }
 0x2f2   : > { %4267 = vmatpush1.bf16.xpose.msra.mxu0 %v1552_v7  ;;  %4307 = vmatpush1.bf16.xpose.msra.mxu1 %v1554_v8  ;;  %v2280_v7 = vcombine.high %v7090_v59, %v7090_v59  ;;  %v2287_v8 = vrot.slane %v7072_v18, %v6785_v3  ;;  %v1111_v18 = vld [vmem:[%s6775_s19 + $0x718] sm:$0xff] }
 0x2f3   : > { %4268 = vmatprep.subr.bf16.mxu0 %v1703_v9  ;;  %4308 = vmatprep.subr.bf16.mxu1 %v1705_v10  ;;  %v960_v9 = vld [vmem:[%s6775_s19 + $0x260] sm:$0xff]  ;;  %v962_v10 = vld [vmem:[%s6775_s19 + $0x270] sm:$0xff] }
 0x2f4   : > { %v3736_v12 = vpop.f32.mrb[40].mxu0  ;;  %v3776_v16 = vpop.f32.mrb[40].mxu1  ;;  %v2308_v11 = vrot.slane %v2280_v7, %v6785_v3  ;;  %v2309_v13 = vcombine.high %v2287_v8, %v2287_v8 }
 0x2f5   : > { %v3737_v14 = vadd.f32 %v3736_v12, %v3697_v44  ;;  %v3738_v15 = vpop.f32.mrb[41].mxu0  ;;  %v3778_v21 = vpop.f32.mrb[41].mxu1  ;;  %v1557_v44 = vunpack.c.l.s8.bf16 %v1107_v40  ;;  %v1260_v12 = vunpack.c.l.s8.bf16 %v960_v9 }
 0x2f6   : > { %v3739_v19 = vpop.f32.mrb[42].mxu0  ;;  %v3779_v26 = vpop.f32.mrb[42].mxu1  ;;  %v1411_v15 = vunpack.c.h.s8.bf16 %v961_v54  ;;  %v2312_v17 = vcombine.high %v2308_v11, %v2308_v11  ;;  %v1412_v21 = vunpack.c.h.s8.bf16 %v962_v10 }
 0x2f7   : > { %v3777_v22 = vadd.f32 %v3776_v16, %v3737_v14  ;;  %v3740_v23 = vpop.f32.mrb[43].mxu0  ;;  %v3780_v28 = vpop.f32.mrb[43].mxu1  ;;  %v1262_v14 = vunpack.c.l.s8.bf16 %v962_v10  ;;  %v1413_v16 = vunpack.c.h.s8.bf16 %v963_v58  ;;  %v1113_v19 = vld [vmem:[%s6775_s19 + $0x728] sm:$0xff] }
 0x2f8   : > { %v1563_v23 = vunpack.c.l.s8.bf16 %v1113_v19  ;;  %v1711_v28 = vunpack.c.h.s8.bf16 %v1111_v18  ;;  %v1713_v29 = vunpack.c.h.s8.bf16 %v1113_v19  ;;  %v969_v10 = vld [vmem:[%s6775_s19 + $0x2a8] sm:$0xff] }
 0x2fa   : > { %4269 = vmatpush1.bf16.xpose.msra.mxu0 %v1702_v20  ;;  %4309 = vmatpush1.bf16.xpose.msra.mxu1 %v1704_v24  ;;  %v1410_v20 = vunpack.c.h.s8.bf16 %v960_v9  ;;  %v1110_v24 = vld [vmem:[%s6775_s19 + $0x710] sm:$0xff] }
 0x2fb   : > { %4342 = vmatprep.subr.bf16.mxu0 %v1257_v25  ;;  %4382 = vmatprep.subr.bf16.mxu1 %v1259_v27  ;;  %v1112_v25 = vld [vmem:[%s6775_s19 + $0x720] sm:$0xff]  ;;  %v1560_v26 = vunpack.c.l.s8.bf16 %v1110_v24 }
 0x2fc   : > { %v1562_v27 = vunpack.c.l.s8.bf16 %v1112_v25 }
 0x301   : > { %4295 = vmatmul.mubr.bf16.vlgmr.msra.gmra.mrb[68].mxu0 %v2245_v30  ;;  %4335 = vmatmul.mubr.bf16.vlgmr.msra.gmra.mrb[68].mxu1 %v2261_v35  ;;  %v7104_v30 = vld [vmem:[%s6773_s18 + $0x50] sm:$0xff] }
 0x302   : > { %4343 = vmatpush1.bf16.xpose.msra.mxu0 %v1256_v34  ;;  %4383 = vmatpush1.bf16.xpose.msra.mxu1 %v1258_v36  ;;  %v967_v36 = vld [vmem:[%s6775_s19 + $0x298] sm:$0xff] }
 0x303   : > { %4344 = vmatprep.subr.bf16.mxu0 %v1407_v37  ;;  %4384 = vmatprep.subr.bf16.mxu1 %v1409_v38  ;;  %v7110_v37 = vrot.slane %v7104_v30, %v6785_v3  ;;  %v1267_v46 = vunpack.c.l.s8.bf16 %v967_v36 }
 0x304   : > { %4374 = vmatprep.mubr.bf16.mxu0 %v2301_v33  ;;  %4414 = vmatprep.mubr.bf16.mxu1 %v2311_v39  ;;  %v1710_v39 = vunpack.c.h.s8.bf16 %v1110_v24 }
 0x30a   : > { %4345 = vmatpush1.bf16.xpose.msra.mxu0 %v1406_v42  ;;  %4385 = vmatpush1.bf16.xpose.msra.mxu1 %v1408_v43  ;;  %v1712_v43 = vunpack.c.h.s8.bf16 %v1112_v25 }
 0x30b   : > { %4346 = vmatprep.subr.bf16.mxu0 %v1557_v44  ;;  %4386 = vmatprep.subr.bf16.mxu1 %v1559_v45  ;;  %v1265_v44 = vunpack.c.l.s8.bf16 %v965_v32 }
 0x312   : > { %4347 = vmatpush1.bf16.xpose.msra.mxu0 %v1556_v48  ;;  %4387 = vmatpush1.bf16.xpose.msra.mxu1 %v1558_v49  ;;  %v2328_v48 = vcombine.high %v7110_v37, %v7110_v37  ;;  %v2294_v49 = vrot.slane %v7090_v59, %v6785_v3  ;;  %v1115_v59 = vld [vmem:[%s6775_s19 + $0x738] sm:$0xff] }
 0x313   : > { %4348 = vmatprep.subr.bf16.mxu0 %v1707_v50  ;;  %4388 = vmatprep.subr.bf16.mxu1 %v1709_v51  ;;  %v964_v50 = vld [vmem:[%s6775_s19 + $0x280] sm:$0xff]  ;;  %v966_v51 = vld [vmem:[%s6775_s19 + $0x290] sm:$0xff] }
 0x314   : > { %v3816_v53 = vpop.f32.mrb[44].mxu0  ;;  %v3856_v57 = vpop.f32.mrb[44].mxu1  ;;  %v2350_v52 = vrot.slane %v2328_v48, %v6785_v3  ;;  %v2310_v54 = vcombine.high %v2294_v49, %v2294_v49 }
 0x315   : > { %v3817_v55 = vadd.f32 %v3816_v53, %v3777_v22  ;;  %v3818_v56 = vpop.f32.mrb[45].mxu0  ;;  %v3858_v62 = vpop.f32.mrb[45].mxu1  ;;  %v1561_v22 = vunpack.c.l.s8.bf16 %v1111_v18  ;;  %v1264_v53 = vunpack.c.l.s8.bf16 %v964_v50 }
 0x316   : > { %v3819_v60 = vpop.f32.mrb[46].mxu0  ;;  %v3859_v4 = vpop.f32.mrb[46].mxu1  ;;  %v1415_v56 = vunpack.c.h.s8.bf16 %v965_v32  ;;  %v2360_v58 = vcombine.high %v2350_v52, %v2350_v52  ;;  %v1416_v62 = vunpack.c.h.s8.bf16 %v966_v51 }
 0x317   : > { %v3857_v63 = vadd.f32 %v3856_v57, %v3817_v55  ;;  %v3820_v0 = vpop.f32.mrb[47].mxu0  ;;  %v3860_v6 = vpop.f32.mrb[47].mxu1  ;;  %v1266_v55 = vunpack.c.l.s8.bf16 %v966_v51  ;;  %v1417_v57 = vunpack.c.h.s8.bf16 %v967_v36  ;;  %v1117_v60 = vld [vmem:[%s6775_s19 + $0x748] sm:$0xff] }
 0x318   : > { %v1567_v0 = vunpack.c.l.s8.bf16 %v1117_v60  ;;  %v1715_v6 = vunpack.c.h.s8.bf16 %v1115_v59  ;;  %v1717_v7 = vunpack.c.h.s8.bf16 %v1117_v60  ;;  %v973_v51 = vld [vmem:[%s6775_s19 + $0x2c8] sm:$0xff] }
 0x31a   : > { %4349 = vmatpush1.bf16.xpose.msra.mxu0 %v1706_v61  ;;  %4389 = vmatpush1.bf16.xpose.msra.mxu1 %v1708_v1  ;;  %v1414_v61 = vunpack.c.h.s8.bf16 %v964_v50  ;;  %v1114_v1 = vld [vmem:[%s6775_s19 + $0x730] sm:$0xff] }
 0x31b   : > { %4422 = vmatprep.subr.bf16.mxu0 %v1261_v2  ;;  %4462 = vmatprep.subr.bf16.mxu1 %v1263_v5  ;;  %v1116_v2 = vld [vmem:[%s6775_s19 + $0x740] sm:$0xff]  ;;  %v1564_v4 = vunpack.c.l.s8.bf16 %v1114_v1 }
 0x31c   : > { %v1566_v5 = vunpack.c.l.s8.bf16 %v1116_v2 }
 0x321   : > { %4375 = vmatmul.mubr.bf16.vlgmr.msra.gmra.mrb[72].mxu0 %v2287_v8  ;;  %4415 = vmatmul.mubr.bf16.vlgmr.msra.gmra.mrb[72].mxu1 %v2309_v13  ;;  %v2313_v8 = vcombine.high %v7104_v30, %v7104_v30 }
 0x322   : > { %4423 = vmatpush1.bf16.xpose.msra.mxu0 %v1260_v12  ;;  %4463 = vmatpush1.bf16.xpose.msra.mxu1 %v1262_v14  ;;  %v971_v14 = vld [vmem:[%s6775_s19 + $0x2b8] sm:$0xff] }
 0x323   : > { %4424 = vmatprep.subr.bf16.mxu0 %v1411_v15  ;;  %4464 = vmatprep.subr.bf16.mxu1 %v1413_v16  ;;  %v7128_v15 = vrot.slane %v2313_v8, %v6785_v3  ;;  %v1271_v24 = vunpack.c.l.s8.bf16 %v971_v14 }
 0x324   : > { %4454 = vmatprep.mubr.bf16.mxu0 %v2308_v11  ;;  %4494 = vmatprep.mubr.bf16.mxu1 %v2312_v17  ;;  %v1714_v17 = vunpack.c.h.s8.bf16 %v1114_v1 }
 0x32a   : > { %4425 = vmatpush1.bf16.xpose.msra.mxu0 %v1410_v20  ;;  %4465 = vmatpush1.bf16.xpose.msra.mxu1 %v1412_v21  ;;  %v1716_v21 = vunpack.c.h.s8.bf16 %v1116_v2 }
 0x32b   : > { %4426 = vmatprep.subr.bf16.mxu0 %v1561_v22  ;;  %4466 = vmatprep.subr.bf16.mxu1 %v1563_v23  ;;  %v1269_v22 = vunpack.c.l.s8.bf16 %v969_v10 }
 0x332   : > { %4427 = vmatpush1.bf16.xpose.msra.mxu0 %v1560_v26  ;;  %4467 = vmatpush1.bf16.xpose.msra.mxu1 %v1562_v27  ;;  %v2329_v26 = vcombine.high %v7128_v15, %v7128_v15  ;;  %v2336_v27 = vrot.slane %v7110_v37, %v6785_v3  ;;  %v1119_v37 = vld [vmem:[%s6775_s19 + $0x758] sm:$0xff] }
 0x333   : > { %4428 = vmatprep.subr.bf16.mxu0 %v1711_v28  ;;  %4468 = vmatprep.subr.bf16.mxu1 %v1713_v29  ;;  %v968_v28 = vld [vmem:[%s6775_s19 + $0x2a0] sm:$0xff]  ;;  %v970_v29 = vld [vmem:[%s6775_s19 + $0x2b0] sm:$0xff] }
 0x334   : > { %v3896_v31 = vpop.f32.mrb[48].mxu0  ;;  %v3936_v35 = vpop.f32.mrb[48].mxu1  ;;  %v2357_v30 = vrot.slane %v2329_v26, %v6785_v3  ;;  %v2358_v32 = vcombine.high %v2336_v27, %v2336_v27 }
 0x335   : > { %v3897_v33 = vadd.f32 %v3896_v31, %v3857_v63  ;;  %v3898_v34 = vpop.f32.mrb[49].mxu0  ;;  %v3938_v40 = vpop.f32.mrb[49].mxu1  ;;  %v1565_v63 = vunpack.c.l.s8.bf16 %v1115_v59  ;;  %v1268_v31 = vunpack.c.l.s8.bf16 %v968_v28 }
 0x336   : > { %v3899_v38 = vpop.f32.mrb[50].mxu0  ;;  %v3939_v45 = vpop.f32.mrb[50].mxu1  ;;  %v1419_v34 = vunpack.c.h.s8.bf16 %v969_v10  ;;  %v2361_v36 = vcombine.high %v2357_v30, %v2357_v30  ;;  %v1420_v40 = vunpack.c.h.s8.bf16 %v970_v29 }
 0x337   : > { %v3937_v41 = vadd.f32 %v3936_v35, %v3897_v33  ;;  %v3900_v42 = vpop.f32.mrb[51].mxu0  ;;  %v3940_v47 = vpop.f32.mrb[51].mxu1  ;;  %v1270_v33 = vunpack.c.l.s8.bf16 %v970_v29  ;;  %v1421_v35 = vunpack.c.h.s8.bf16 %v971_v14  ;;  %v1121_v38 = vld [vmem:[%s6775_s19 + $0x768] sm:$0xff] }
 0x338   : > { %v1571_v42 = vunpack.c.l.s8.bf16 %v1121_v38  ;;  %v1719_v47 = vunpack.c.h.s8.bf16 %v1119_v37  ;;  %v1721_v48 = vunpack.c.h.s8.bf16 %v1121_v38  ;;  %v977_v29 = vld [vmem:[%s6775_s19 + $0x2e8] sm:$0xff] }
 0x33a   : > { %4429 = vmatpush1.bf16.xpose.msra.mxu0 %v1710_v39  ;;  %4469 = vmatpush1.bf16.xpose.msra.mxu1 %v1712_v43  ;;  %v1418_v39 = vunpack.c.h.s8.bf16 %v968_v28  ;;  %v1118_v43 = vld [vmem:[%s6775_s19 + $0x750] sm:$0xff] }
 0x33b   : > { %4502 = vmatprep.subr.bf16.mxu0 %v1265_v44  ;;  %4542 = vmatprep.subr.bf16.mxu1 %v1267_v46  ;;  %v1120_v44 = vld [vmem:[%s6775_s19 + $0x760] sm:$0xff]  ;;  %v1568_v45 = vunpack.c.l.s8.bf16 %v1118_v43 }
 0x33c   : > { %v1570_v46 = vunpack.c.l.s8.bf16 %v1120_v44 }
 0x341   : > { %4455 = vmatmul.mubr.bf16.vlgmr.msra.gmra.mrb[76].mxu0 %v2294_v49  ;;  %4495 = vmatmul.mubr.bf16.vlgmr.msra.gmra.mrb[76].mxu1 %v2310_v54  ;;  %v7142_v49 = vld [vmem:[%s6773_s18 + $0x58] sm:$0xff] }
 0x342   : > { %4503 = vmatpush1.bf16.xpose.msra.mxu0 %v1264_v53  ;;  %4543 = vmatpush1.bf16.xpose.msra.mxu1 %v1266_v55  ;;  %v975_v55 = vld [vmem:[%s6775_s19 + $0x2d8] sm:$0xff] }
 0x343   : > { %4504 = vmatprep.subr.bf16.mxu0 %v1415_v56  ;;  %4544 = vmatprep.subr.bf16.mxu1 %v1417_v57  ;;  %v7148_v56 = vrot.slane %v7142_v49, %v6785_v3  ;;  %v1275_v1 = vunpack.c.l.s8.bf16 %v975_v55 }
 0x344   : > { %4534 = vmatprep.mubr.bf16.mxu0 %v2350_v52  ;;  %4574 = vmatprep.mubr.bf16.mxu1 %v2360_v58  ;;  %v1718_v58 = vunpack.c.h.s8.bf16 %v1118_v43 }
 0x34a   : > { %4505 = vmatpush1.bf16.xpose.msra.mxu0 %v1414_v61  ;;  %4545 = vmatpush1.bf16.xpose.msra.mxu1 %v1416_v62  ;;  %v1720_v62 = vunpack.c.h.s8.bf16 %v1120_v44 }
 0x34b   : > { %4506 = vmatprep.subr.bf16.mxu0 %v1565_v63  ;;  %4546 = vmatprep.subr.bf16.mxu1 %v1567_v0  ;;  %v1273_v63 = vunpack.c.l.s8.bf16 %v973_v51 }
 0x352   : > { %4507 = vmatpush1.bf16.xpose.msra.mxu0 %v1564_v4  ;;  %4547 = vmatpush1.bf16.xpose.msra.mxu1 %v1566_v5  ;;  %v2377_v4 = vcombine.high %v7148_v56, %v7148_v56  ;;  %v2343_v5 = vrot.slane %v7128_v15, %v6785_v3  ;;  %v1123_v15 = vld [vmem:[%s6775_s19 + $0x778] sm:$0xff] }
 0x353   : > { %4508 = vmatprep.subr.bf16.mxu0 %v1715_v6  ;;  %4548 = vmatprep.subr.bf16.mxu1 %v1717_v7  ;;  %v972_v6 = vld [vmem:[%s6775_s19 + $0x2c0] sm:$0xff]  ;;  %v974_v7 = vld [vmem:[%s6775_s19 + $0x2d0] sm:$0xff] }
 0x354   : > { %v3976_v9 = vpop.f32.mrb[52].mxu0  ;;  %v4016_v13 = vpop.f32.mrb[52].mxu1  ;;  %v2399_v8 = vrot.slane %v2377_v4, %v6785_v3  ;;  %v2359_v10 = vcombine.high %v2343_v5, %v2343_v5 }
 0x355   : > { %v3977_v11 = vadd.f32 %v3976_v9, %v3937_v41  ;;  %v3978_v12 = vpop.f32.mrb[53].mxu0  ;;  %v4018_v18 = vpop.f32.mrb[53].mxu1  ;;  %v1569_v41 = vunpack.c.l.s8.bf16 %v1119_v37  ;;  %v1272_v9 = vunpack.c.l.s8.bf16 %v972_v6 }
 0x356   : > { %v3979_v16 = vpop.f32.mrb[54].mxu0  ;;  %v4019_v23 = vpop.f32.mrb[54].mxu1  ;;  %v1423_v12 = vunpack.c.h.s8.bf16 %v973_v51  ;;  %v2409_v14 = vcombine.high %v2399_v8, %v2399_v8  ;;  %v1424_v18 = vunpack.c.h.s8.bf16 %v974_v7 }
 0x357   : > { %v4017_v19 = vadd.f32 %v4016_v13, %v3977_v11  ;;  %v3980_v20 = vpop.f32.mrb[55].mxu0  ;;  %v4020_v25 = vpop.f32.mrb[55].mxu1  ;;  %v1274_v11 = vunpack.c.l.s8.bf16 %v974_v7  ;;  %v1425_v13 = vunpack.c.h.s8.bf16 %v975_v55  ;;  %v1125_v16 = vld [vmem:[%s6775_s19 + $0x788] sm:$0xff] }
 0x358   : > { %v1575_v20 = vunpack.c.l.s8.bf16 %v1125_v16  ;;  %v1723_v25 = vunpack.c.h.s8.bf16 %v1123_v15  ;;  %v1725_v26 = vunpack.c.h.s8.bf16 %v1125_v16  ;;  %v981_v7 = vld [vmem:[%s6775_s19 + $0x308] sm:$0xff] }
 0x35a   : > { %4509 = vmatpush1.bf16.xpose.msra.mxu0 %v1714_v17  ;;  %4549 = vmatpush1.bf16.xpose.msra.mxu1 %v1716_v21  ;;  %v1422_v17 = vunpack.c.h.s8.bf16 %v972_v6  ;;  %v1122_v21 = vld [vmem:[%s6775_s19 + $0x770] sm:$0xff] }
 0x35b   : > { %4582 = vmatprep.subr.bf16.mxu0 %v1269_v22  ;;  %4622 = vmatprep.subr.bf16.mxu1 %v1271_v24  ;;  %v1124_v22 = vld [vmem:[%s6775_s19 + $0x780] sm:$0xff]  ;;  %v1572_v23 = vunpack.c.l.s8.bf16 %v1122_v21 }
 0x35c   : > { %v1574_v24 = vunpack.c.l.s8.bf16 %v1124_v22 }
 0x361   : > { %4535 = vmatmul.mubr.bf16.vlgmr.msra.gmra.mrb[80].mxu0 %v2336_v27  ;;  %4575 = vmatmul.mubr.bf16.vlgmr.msra.gmra.mrb[80].mxu1 %v2358_v32  ;;  %v2362_v27 = vcombine.high %v7142_v49, %v7142_v49 }
 0x362   : > { %4583 = vmatpush1.bf16.xpose.msra.mxu0 %v1268_v31  ;;  %4623 = vmatpush1.bf16.xpose.msra.mxu1 %v1270_v33  ;;  %v979_v33 = vld [vmem:[%s6775_s19 + $0x2f8] sm:$0xff] }
 0x363   : > { %4584 = vmatprep.subr.bf16.mxu0 %v1419_v34  ;;  %4624 = vmatprep.subr.bf16.mxu1 %v1421_v35  ;;  %v7166_v34 = vrot.slane %v2362_v27, %v6785_v3  ;;  %v1279_v43 = vunpack.c.l.s8.bf16 %v979_v33 }
 0x364   : > { %4614 = vmatprep.mubr.bf16.mxu0 %v2357_v30  ;;  %4654 = vmatprep.mubr.bf16.mxu1 %v2361_v36  ;;  %v1722_v36 = vunpack.c.h.s8.bf16 %v1122_v21 }
 0x36a   : > { %4585 = vmatpush1.bf16.xpose.msra.mxu0 %v1418_v39  ;;  %4625 = vmatpush1.bf16.xpose.msra.mxu1 %v1420_v40  ;;  %v1724_v40 = vunpack.c.h.s8.bf16 %v1124_v22 }
 0x36b   : > { %4586 = vmatprep.subr.bf16.mxu0 %v1569_v41  ;;  %4626 = vmatprep.subr.bf16.mxu1 %v1571_v42  ;;  %v1277_v41 = vunpack.c.l.s8.bf16 %v977_v29 }
 0x372   : > { %4587 = vmatpush1.bf16.xpose.msra.mxu0 %v1568_v45  ;;  %4627 = vmatpush1.bf16.xpose.msra.mxu1 %v1570_v46  ;;  %v2378_v45 = vcombine.high %v7166_v34, %v7166_v34  ;;  %v2385_v46 = vrot.slane %v7148_v56, %v6785_v3  ;;  %v1127_v56 = vld [vmem:[%s6775_s19 + $0x798] sm:$0xff] }
 0x373   : > { %4588 = vmatprep.subr.bf16.mxu0 %v1719_v47  ;;  %4628 = vmatprep.subr.bf16.mxu1 %v1721_v48  ;;  %v976_v47 = vld [vmem:[%s6775_s19 + $0x2e0] sm:$0xff]  ;;  %v978_v48 = vld [vmem:[%s6775_s19 + $0x2f0] sm:$0xff] }
 0x374   : > { %v4056_v50 = vpop.f32.mrb[56].mxu0  ;;  %v4096_v54 = vpop.f32.mrb[56].mxu1  ;;  %v2406_v49 = vrot.slane %v2378_v45, %v6785_v3  ;;  %v2407_v51 = vcombine.high %v2385_v46, %v2385_v46 }
 0x375   : > { %v4057_v52 = vadd.f32 %v4056_v50, %v4017_v19  ;;  %v4058_v53 = vpop.f32.mrb[57].mxu0  ;;  %v4098_v59 = vpop.f32.mrb[57].mxu1  ;;  %v1573_v19 = vunpack.c.l.s8.bf16 %v1123_v15  ;;  %v1276_v50 = vunpack.c.l.s8.bf16 %v976_v47 }
 0x376   : > { %v4059_v57 = vpop.f32.mrb[58].mxu0  ;;  %v4099_v0 = vpop.f32.mrb[58].mxu1  ;;  %v1427_v53 = vunpack.c.h.s8.bf16 %v977_v29  ;;  %v2410_v55 = vcombine.high %v2406_v49, %v2406_v49  ;;  %v1428_v59 = vunpack.c.h.s8.bf16 %v978_v48 }
 0x377   : > { %v4097_v60 = vadd.f32 %v4096_v54, %v4057_v52  ;;  %v4060_v61 = vpop.f32.mrb[59].mxu0  ;;  %v4100_v2 = vpop.f32.mrb[59].mxu1  ;;  %v1278_v52 = vunpack.c.l.s8.bf16 %v978_v48  ;;  %v1429_v54 = vunpack.c.h.s8.bf16 %v979_v33  ;;  %v1129_v57 = vld [vmem:[%s6775_s19 + $0x7a8] sm:$0xff] }
 0x378   : > { %v1579_v61 = vunpack.c.l.s8.bf16 %v1129_v57  ;;  %v1727_v2 = vunpack.c.h.s8.bf16 %v1127_v56  ;;  %v1729_v4 = vunpack.c.h.s8.bf16 %v1129_v57  ;;  %v985_v48 = vld [vmem:[%s6775_s19 + $0x328] sm:$0xff] }
 0x37a   : > { %4589 = vmatpush1.bf16.xpose.msra.mxu0 %v1718_v58  ;;  %4629 = vmatpush1.bf16.xpose.msra.mxu1 %v1720_v62  ;;  %v1426_v58 = vunpack.c.h.s8.bf16 %v976_v47  ;;  %v1126_v62 = vld [vmem:[%s6775_s19 + $0x790] sm:$0xff] }
 0x37b   : > { %4662 = vmatprep.subr.bf16.mxu0 %v1273_v63  ;;  %4702 = vmatprep.subr.bf16.mxu1 %v1275_v1  ;;  %v1128_v63 = vld [vmem:[%s6775_s19 + $0x7a0] sm:$0xff]  ;;  %v1576_v0 = vunpack.c.l.s8.bf16 %v1126_v62 }
 0x37c   : > { %v1578_v1 = vunpack.c.l.s8.bf16 %v1128_v63 }
 0x381   : > { %4615 = vmatmul.mubr.bf16.vlgmr.msra.gmra.mrb[84].mxu0 %v2343_v5  ;;  %4655 = vmatmul.mubr.bf16.vlgmr.msra.gmra.mrb[84].mxu1 %v2359_v10  ;;  %v7180_v5 = vld [vmem:[%s6773_s18 + $0x60] sm:$0xff] }
 0x382   : > { %4663 = vmatpush1.bf16.xpose.msra.mxu0 %v1272_v9  ;;  %4703 = vmatpush1.bf16.xpose.msra.mxu1 %v1274_v11  ;;  %v983_v11 = vld [vmem:[%s6775_s19 + $0x318] sm:$0xff] }
 0x383   : > { %4664 = vmatprep.subr.bf16.mxu0 %v1423_v12  ;;  %4704 = vmatprep.subr.bf16.mxu1 %v1425_v13  ;;  %v7186_v12 = vrot.slane %v7180_v5, %v6785_v3  ;;  %v1283_v21 = vunpack.c.l.s8.bf16 %v983_v11 }
 0x384   : > { %4694 = vmatprep.mubr.bf16.mxu0 %v2399_v8  ;;  %4734 = vmatprep.mubr.bf16.mxu1 %v2409_v14  ;;  %v1726_v14 = vunpack.c.h.s8.bf16 %v1126_v62 }
 0x38a   : > { %4665 = vmatpush1.bf16.xpose.msra.mxu0 %v1422_v17  ;;  %4705 = vmatpush1.bf16.xpose.msra.mxu1 %v1424_v18  ;;  %v1728_v18 = vunpack.c.h.s8.bf16 %v1128_v63 }
 0x38b   : > { %4666 = vmatprep.subr.bf16.mxu0 %v1573_v19  ;;  %4706 = vmatprep.subr.bf16.mxu1 %v1575_v20  ;;  %v1281_v19 = vunpack.c.l.s8.bf16 %v981_v7 }
 0x392   : > { %4667 = vmatpush1.bf16.xpose.msra.mxu0 %v1572_v23  ;;  %4707 = vmatpush1.bf16.xpose.msra.mxu1 %v1574_v24  ;;  %v2426_v23 = vcombine.high %v7186_v12, %v7186_v12  ;;  %v2392_v24 = vrot.slane %v7166_v34, %v6785_v3  ;;  %v1131_v34 = vld [vmem:[%s6775_s19 + $0x7b8] sm:$0xff] }
 0x393   : > { %4668 = vmatprep.subr.bf16.mxu0 %v1723_v25  ;;  %4708 = vmatprep.subr.bf16.mxu1 %v1725_v26  ;;  %v980_v25 = vld [vmem:[%s6775_s19 + $0x300] sm:$0xff]  ;;  %v982_v26 = vld [vmem:[%s6775_s19 + $0x310] sm:$0xff] }
 0x394   : > { %v4136_v28 = vpop.f32.mrb[60].mxu0  ;;  %v4176_v32 = vpop.f32.mrb[60].mxu1  ;;  %v2448_v27 = vrot.slane %v2426_v23, %v6785_v3  ;;  %v2408_v29 = vcombine.high %v2392_v24, %v2392_v24 }
 0x395   : > { %v4137_v30 = vadd.f32 %v4136_v28, %v4097_v60  ;;  %v4138_v31 = vpop.f32.mrb[61].mxu0  ;;  %v4178_v37 = vpop.f32.mrb[61].mxu1  ;;  %v1577_v60 = vunpack.c.l.s8.bf16 %v1127_v56  ;;  %v1280_v28 = vunpack.c.l.s8.bf16 %v980_v25 }
 0x396   : > { %v4139_v35 = vpop.f32.mrb[62].mxu0  ;;  %v4179_v42 = vpop.f32.mrb[62].mxu1  ;;  %v1431_v31 = vunpack.c.h.s8.bf16 %v981_v7  ;;  %v2458_v33 = vcombine.high %v2448_v27, %v2448_v27  ;;  %v1432_v37 = vunpack.c.h.s8.bf16 %v982_v26 }
 0x397   : > { %v4177_v38 = vadd.f32 %v4176_v32, %v4137_v30  ;;  %v4140_v39 = vpop.f32.mrb[63].mxu0  ;;  %v4180_v44 = vpop.f32.mrb[63].mxu1  ;;  %v1282_v30 = vunpack.c.l.s8.bf16 %v982_v26  ;;  %v1433_v32 = vunpack.c.h.s8.bf16 %v983_v11  ;;  %v1133_v35 = vld [vmem:[%s6775_s19 + $0x7c8] sm:$0xff] }
 0x398   : > { %v1583_v39 = vunpack.c.l.s8.bf16 %v1133_v35  ;;  %v1731_v44 = vunpack.c.h.s8.bf16 %v1131_v34  ;;  %v1733_v45 = vunpack.c.h.s8.bf16 %v1133_v35  ;;  %v989_v26 = vld [vmem:[%s6775_s19 + $0x348] sm:$0xff] }
 0x39a   : > { %4669 = vmatpush1.bf16.xpose.msra.mxu0 %v1722_v36  ;;  %4709 = vmatpush1.bf16.xpose.msra.mxu1 %v1724_v40  ;;  %v1430_v36 = vunpack.c.h.s8.bf16 %v980_v25  ;;  %v1130_v40 = vld [vmem:[%s6775_s19 + $0x7b0] sm:$0xff] }
 0x39b   : > { %4742 = vmatprep.subr.bf16.mxu0 %v1277_v41  ;;  %4782 = vmatprep.subr.bf16.mxu1 %v1279_v43  ;;  %v1132_v41 = vld [vmem:[%s6775_s19 + $0x7c0] sm:$0xff]  ;;  %v1580_v42 = vunpack.c.l.s8.bf16 %v1130_v40 }
 0x39c   : > { %v1582_v43 = vunpack.c.l.s8.bf16 %v1132_v41 }
 0x3a1   : > { %4695 = vmatmul.mubr.bf16.vlgmr.msra.gmra.mrb[88].mxu0 %v2385_v46  ;;  %4735 = vmatmul.mubr.bf16.vlgmr.msra.gmra.mrb[88].mxu1 %v2407_v51  ;;  %v2411_v46 = vcombine.high %v7180_v5, %v7180_v5 }
 0x3a2   : > { %4743 = vmatpush1.bf16.xpose.msra.mxu0 %v1276_v50  ;;  %4783 = vmatpush1.bf16.xpose.msra.mxu1 %v1278_v52  ;;  %v987_v52 = vld [vmem:[%s6775_s19 + $0x338] sm:$0xff] }
 0x3a3   : > { %4744 = vmatprep.subr.bf16.mxu0 %v1427_v53  ;;  %4784 = vmatprep.subr.bf16.mxu1 %v1429_v54  ;;  %v7204_v53 = vrot.slane %v2411_v46, %v6785_v3  ;;  %v1287_v62 = vunpack.c.l.s8.bf16 %v987_v52 }
 0x3a4   : > { %4774 = vmatprep.mubr.bf16.mxu0 %v2406_v49  ;;  %4814 = vmatprep.mubr.bf16.mxu1 %v2410_v55  ;;  %v1730_v55 = vunpack.c.h.s8.bf16 %v1130_v40 }
 0x3aa   : > { %4745 = vmatpush1.bf16.xpose.msra.mxu0 %v1426_v58  ;;  %4785 = vmatpush1.bf16.xpose.msra.mxu1 %v1428_v59  ;;  %v1732_v59 = vunpack.c.h.s8.bf16 %v1132_v41 }
 0x3ab   : > { %4746 = vmatprep.subr.bf16.mxu0 %v1577_v60  ;;  %4786 = vmatprep.subr.bf16.mxu1 %v1579_v61  ;;  %v1285_v60 = vunpack.c.l.s8.bf16 %v985_v48 }
 0x3b2   : > { %4747 = vmatpush1.bf16.xpose.msra.mxu0 %v1576_v0  ;;  %4787 = vmatpush1.bf16.xpose.msra.mxu1 %v1578_v1  ;;  %v2427_v0 = vcombine.high %v7204_v53, %v7204_v53  ;;  %v2434_v1 = vrot.slane %v7186_v12, %v6785_v3  ;;  %v1135_v12 = vld [vmem:[%s6775_s19 + $0x7d8] sm:$0xff] }
 0x3b3   : > { %4748 = vmatprep.subr.bf16.mxu0 %v1727_v2  ;;  %4788 = vmatprep.subr.bf16.mxu1 %v1729_v4  ;;  %v984_v2 = vld [vmem:[%s6775_s19 + $0x320] sm:$0xff]  ;;  %v986_v4 = vld [vmem:[%s6775_s19 + $0x330] sm:$0xff] }
 0x3b4   : > { %v4216_v6 = vpop.f32.mrb[64].mxu0  ;;  %v4256_v10 = vpop.f32.mrb[64].mxu1  ;;  %v2455_v5 = vrot.slane %v2427_v0, %v6785_v3  ;;  %v2456_v7 = vcombine.high %v2434_v1, %v2434_v1 }
 0x3b5   : > { %v4217_v8 = vadd.f32 %v4216_v6, %v4177_v38  ;;  %v4218_v9 = vpop.f32.mrb[65].mxu0  ;;  %v4258_v15 = vpop.f32.mrb[65].mxu1  ;;  %v1581_v38 = vunpack.c.l.s8.bf16 %v1131_v34  ;;  %v1284_v6 = vunpack.c.l.s8.bf16 %v984_v2 }
 0x3b6   : > { %v4219_v13 = vpop.f32.mrb[66].mxu0  ;;  %v4259_v20 = vpop.f32.mrb[66].mxu1  ;;  %v1435_v9 = vunpack.c.h.s8.bf16 %v985_v48  ;;  %v2459_v11 = vcombine.high %v2455_v5, %v2455_v5  ;;  %v1436_v15 = vunpack.c.h.s8.bf16 %v986_v4 }
 0x3b7   : > { %v4257_v16 = vadd.f32 %v4256_v10, %v4217_v8  ;;  %v4220_v17 = vpop.f32.mrb[67].mxu0  ;;  %v4260_v22 = vpop.f32.mrb[67].mxu1  ;;  %v1286_v8 = vunpack.c.l.s8.bf16 %v986_v4  ;;  %v1437_v10 = vunpack.c.h.s8.bf16 %v987_v52  ;;  %v1137_v13 = vld [vmem:[%s6775_s19 + $0x7e8] sm:$0xff] }
 0x3b8   : > { %v1587_v17 = vunpack.c.l.s8.bf16 %v1137_v13  ;;  %v1735_v22 = vunpack.c.h.s8.bf16 %v1135_v12  ;;  %v1737_v23 = vunpack.c.h.s8.bf16 %v1137_v13  ;;  %v993_v4 = vld [vmem:[%s6775_s19 + $0x368] sm:$0xff] }
 0x3ba   : > { %4749 = vmatpush1.bf16.xpose.msra.mxu0 %v1726_v14  ;;  %4789 = vmatpush1.bf16.xpose.msra.mxu1 %v1728_v18  ;;  %v1434_v14 = vunpack.c.h.s8.bf16 %v984_v2  ;;  %v1134_v18 = vld [vmem:[%s6775_s19 + $0x7d0] sm:$0xff] }
 0x3bb   : > { %4822 = vmatprep.subr.bf16.mxu0 %v1281_v19  ;;  %4862 = vmatprep.subr.bf16.mxu1 %v1283_v21  ;;  %v1136_v19 = vld [vmem:[%s6775_s19 + $0x7e0] sm:$0xff]  ;;  %v1584_v20 = vunpack.c.l.s8.bf16 %v1134_v18 }
 0x3bc   : > { %v1586_v21 = vunpack.c.l.s8.bf16 %v1136_v19 }
 0x3c1   : > { %4775 = vmatmul.mubr.bf16.vlgmr.msra.gmra.mrb[92].mxu0 %v2392_v24  ;;  %4815 = vmatmul.mubr.bf16.vlgmr.msra.gmra.mrb[92].mxu1 %v2408_v29  ;;  %v7218_v24 = vld [vmem:[%s6773_s18 + $0x68] sm:$0xff] }
 0x3c2   : > { %4823 = vmatpush1.bf16.xpose.msra.mxu0 %v1280_v28  ;;  %4863 = vmatpush1.bf16.xpose.msra.mxu1 %v1282_v30  ;;  %v991_v30 = vld [vmem:[%s6775_s19 + $0x358] sm:$0xff] }
 0x3c3   : > { %4824 = vmatprep.subr.bf16.mxu0 %v1431_v31  ;;  %4864 = vmatprep.subr.bf16.mxu1 %v1433_v32  ;;  %v7224_v31 = vrot.slane %v7218_v24, %v6785_v3  ;;  %v1291_v40 = vunpack.c.l.s8.bf16 %v991_v30 }
 0x3c4   : > { %4854 = vmatprep.mubr.bf16.mxu0 %v2448_v27  ;;  %4894 = vmatprep.mubr.bf16.mxu1 %v2458_v33  ;;  %v1734_v33 = vunpack.c.h.s8.bf16 %v1134_v18 }
 0x3ca   : > { %4825 = vmatpush1.bf16.xpose.msra.mxu0 %v1430_v36  ;;  %4865 = vmatpush1.bf16.xpose.msra.mxu1 %v1432_v37  ;;  %v1736_v37 = vunpack.c.h.s8.bf16 %v1136_v19 }
 0x3cb   : > { %4826 = vmatprep.subr.bf16.mxu0 %v1581_v38  ;;  %4866 = vmatprep.subr.bf16.mxu1 %v1583_v39  ;;  %v1289_v38 = vunpack.c.l.s8.bf16 %v989_v26 }
 0x3d2   : > { %4827 = vmatpush1.bf16.xpose.msra.mxu0 %v1580_v42  ;;  %4867 = vmatpush1.bf16.xpose.msra.mxu1 %v1582_v43  ;;  %v2475_v42 = vcombine.high %v7224_v31, %v7224_v31  ;;  %v2441_v43 = vrot.slane %v7204_v53, %v6785_v3  ;;  %v1139_v53 = vld [vmem:[%s6775_s19 + $0x7f8] sm:$0xff] }
 0x3d3   : > { %4828 = vmatprep.subr.bf16.mxu0 %v1731_v44  ;;  %4868 = vmatprep.subr.bf16.mxu1 %v1733_v45  ;;  %v988_v44 = vld [vmem:[%s6775_s19 + $0x340] sm:$0xff]  ;;  %v990_v45 = vld [vmem:[%s6775_s19 + $0x350] sm:$0xff] }
 0x3d4   : > { %v4296_v47 = vpop.f32.mrb[68].mxu0  ;;  %v4336_v51 = vpop.f32.mrb[68].mxu1  ;;  %v2497_v46 = vrot.slane %v2475_v42, %v6785_v3  ;;  %v2457_v48 = vcombine.high %v2441_v43, %v2441_v43 }
 0x3d5   : > { %v4297_v49 = vadd.f32 %v4296_v47, %v4257_v16  ;;  %v4298_v50 = vpop.f32.mrb[69].mxu0  ;;  %v4338_v56 = vpop.f32.mrb[69].mxu1  ;;  %v1585_v16 = vunpack.c.l.s8.bf16 %v1135_v12  ;;  %v1288_v47 = vunpack.c.l.s8.bf16 %v988_v44 }
 0x3d6   : > { %v4299_v54 = vpop.f32.mrb[70].mxu0  ;;  %v4339_v61 = vpop.f32.mrb[70].mxu1  ;;  %v1439_v50 = vunpack.c.h.s8.bf16 %v989_v26  ;;  %v2507_v52 = vcombine.high %v2497_v46, %v2497_v46  ;;  %v1440_v56 = vunpack.c.h.s8.bf16 %v990_v45 }
 0x3d7   : > { %v4337_v57 = vadd.f32 %v4336_v51, %v4297_v49  ;;  %v4300_v58 = vpop.f32.mrb[71].mxu0  ;;  %v4340_v63 = vpop.f32.mrb[71].mxu1  ;;  %v1290_v49 = vunpack.c.l.s8.bf16 %v990_v45  ;;  %v1441_v51 = vunpack.c.h.s8.bf16 %v991_v30  ;;  %v1141_v54 = vld [vmem:[%s6775_s19 + $0x808] sm:$0xff] }
 0x3d8   : > { %v1591_v58 = vunpack.c.l.s8.bf16 %v1141_v54  ;;  %v1739_v63 = vunpack.c.h.s8.bf16 %v1139_v53  ;;  %v1741_v0 = vunpack.c.h.s8.bf16 %v1141_v54  ;;  %v997_v45 = vld [vmem:[%s6775_s19 + $0x388] sm:$0xff] }
 0x3da   : > { %4829 = vmatpush1.bf16.xpose.msra.mxu0 %v1730_v55  ;;  %4869 = vmatpush1.bf16.xpose.msra.mxu1 %v1732_v59  ;;  %v1438_v55 = vunpack.c.h.s8.bf16 %v988_v44  ;;  %v1138_v59 = vld [vmem:[%s6775_s19 + $0x7f0] sm:$0xff] }
 0x3db   : > { %4902 = vmatprep.subr.bf16.mxu0 %v1285_v60  ;;  %4942 = vmatprep.subr.bf16.mxu1 %v1287_v62  ;;  %v1140_v60 = vld [vmem:[%s6775_s19 + $0x800] sm:$0xff]  ;;  %v1588_v61 = vunpack.c.l.s8.bf16 %v1138_v59 }
 0x3dc   : > { %v1590_v62 = vunpack.c.l.s8.bf16 %v1140_v60 }
 0x3e1   : > { %4855 = vmatmul.mubr.bf16.vlgmr.msra.gmra.mrb[96].mxu0 %v2434_v1  ;;  %4895 = vmatmul.mubr.bf16.vlgmr.msra.gmra.mrb[96].mxu1 %v2456_v7  ;;  %v2460_v1 = vcombine.high %v7218_v24, %v7218_v24 }
 0x3e2   : > { %4903 = vmatpush1.bf16.xpose.msra.mxu0 %v1284_v6  ;;  %4943 = vmatpush1.bf16.xpose.msra.mxu1 %v1286_v8  ;;  %v995_v8 = vld [vmem:[%s6775_s19 + $0x378] sm:$0xff] }
 0x3e3   : > { %4904 = vmatprep.subr.bf16.mxu0 %v1435_v9  ;;  %4944 = vmatprep.subr.bf16.mxu1 %v1437_v10  ;;  %v7242_v9 = vrot.slane %v2460_v1, %v6785_v3  ;;  %v1295_v18 = vunpack.c.l.s8.bf16 %v995_v8 }
 0x3e4   : > { %4934 = vmatprep.mubr.bf16.mxu0 %v2455_v5  ;;  %4974 = vmatprep.mubr.bf16.mxu1 %v2459_v11  ;;  %v1738_v11 = vunpack.c.h.s8.bf16 %v1138_v59 }
 0x3ea   : > { %4905 = vmatpush1.bf16.xpose.msra.mxu0 %v1434_v14  ;;  %4945 = vmatpush1.bf16.xpose.msra.mxu1 %v1436_v15  ;;  %v1740_v15 = vunpack.c.h.s8.bf16 %v1140_v60 }
 0x3eb   : > { %4906 = vmatprep.subr.bf16.mxu0 %v1585_v16  ;;  %4946 = vmatprep.subr.bf16.mxu1 %v1587_v17  ;;  %v1293_v16 = vunpack.c.l.s8.bf16 %v993_v4 }
 0x3f2   : > { %4907 = vmatpush1.bf16.xpose.msra.mxu0 %v1584_v20  ;;  %4947 = vmatpush1.bf16.xpose.msra.mxu1 %v1586_v21  ;;  %v2476_v20 = vcombine.high %v7242_v9, %v7242_v9  ;;  %v2483_v21 = vrot.slane %v7224_v31, %v6785_v3  ;;  %v1143_v31 = vld [vmem:[%s6775_s19 + $0x818] sm:$0xff] }
 0x3f3   : > { %4908 = vmatprep.subr.bf16.mxu0 %v1735_v22  ;;  %4948 = vmatprep.subr.bf16.mxu1 %v1737_v23  ;;  %v992_v22 = vld [vmem:[%s6775_s19 + $0x360] sm:$0xff]  ;;  %v994_v23 = vld [vmem:[%s6775_s19 + $0x370] sm:$0xff] }
 0x3f4   : > { %v4376_v25 = vpop.f32.mrb[72].mxu0  ;;  %v4416_v29 = vpop.f32.mrb[72].mxu1  ;;  %v2504_v24 = vrot.slane %v2476_v20, %v6785_v3  ;;  %v2505_v26 = vcombine.high %v2483_v21, %v2483_v21 }
 0x3f5   : > { %v4377_v27 = vadd.f32 %v4376_v25, %v4337_v57  ;;  %v4378_v28 = vpop.f32.mrb[73].mxu0  ;;  %v4418_v34 = vpop.f32.mrb[73].mxu1  ;;  %v1589_v57 = vunpack.c.l.s8.bf16 %v1139_v53  ;;  %v1292_v25 = vunpack.c.l.s8.bf16 %v992_v22 }
 0x3f6   : > { %v4379_v32 = vpop.f32.mrb[74].mxu0  ;;  %v4419_v39 = vpop.f32.mrb[74].mxu1  ;;  %v1443_v28 = vunpack.c.h.s8.bf16 %v993_v4  ;;  %v2508_v30 = vcombine.high %v2504_v24, %v2504_v24  ;;  %v1444_v34 = vunpack.c.h.s8.bf16 %v994_v23 }
 0x3f7   : > { %v4417_v35 = vadd.f32 %v4416_v29, %v4377_v27  ;;  %v4380_v36 = vpop.f32.mrb[75].mxu0  ;;  %v4420_v41 = vpop.f32.mrb[75].mxu1  ;;  %v1294_v27 = vunpack.c.l.s8.bf16 %v994_v23  ;;  %v1445_v29 = vunpack.c.h.s8.bf16 %v995_v8  ;;  %v1145_v32 = vld [vmem:[%s6775_s19 + $0x828] sm:$0xff] }
 0x3f8   : > { %v1595_v36 = vunpack.c.l.s8.bf16 %v1145_v32  ;;  %v1743_v41 = vunpack.c.h.s8.bf16 %v1143_v31  ;;  %v1745_v42 = vunpack.c.h.s8.bf16 %v1145_v32  ;;  %v1001_v23 = vld [vmem:[%s6775_s19 + $0x3a8] sm:$0xff] }
 0x3fa   : > { %4909 = vmatpush1.bf16.xpose.msra.mxu0 %v1734_v33  ;;  %4949 = vmatpush1.bf16.xpose.msra.mxu1 %v1736_v37  ;;  %v1442_v33 = vunpack.c.h.s8.bf16 %v992_v22  ;;  %v1142_v37 = vld [vmem:[%s6775_s19 + $0x810] sm:$0xff] }
 0x3fb   : > { %4982 = vmatprep.subr.bf16.mxu0 %v1289_v38  ;;  %5022 = vmatprep.subr.bf16.mxu1 %v1291_v40  ;;  %v1144_v38 = vld [vmem:[%s6775_s19 + $0x820] sm:$0xff]  ;;  %v1592_v39 = vunpack.c.l.s8.bf16 %v1142_v37 }
 0x3fc   : > { %v1594_v40 = vunpack.c.l.s8.bf16 %v1144_v38 }
 0x401   : > { %4935 = vmatmul.mubr.bf16.vlgmr.msra.gmra.mrb[100].mxu0 %v2441_v43  ;;  %4975 = vmatmul.mubr.bf16.vlgmr.msra.gmra.mrb[100].mxu1 %v2457_v48  ;;  %v7256_v43 = vld [vmem:[%s6773_s18 + $0x70] sm:$0xff] }
 0x402   : > { %4983 = vmatpush1.bf16.xpose.msra.mxu0 %v1288_v47  ;;  %5023 = vmatpush1.bf16.xpose.msra.mxu1 %v1290_v49  ;;  %v999_v49 = vld [vmem:[%s6775_s19 + $0x398] sm:$0xff] }
 0x403   : > { %4984 = vmatprep.subr.bf16.mxu0 %v1439_v50  ;;  %5024 = vmatprep.subr.bf16.mxu1 %v1441_v51  ;;  %v7262_v50 = vrot.slane %v7256_v43, %v6785_v3  ;;  %v1299_v59 = vunpack.c.l.s8.bf16 %v999_v49 }
 0x404   : > { %5014 = vmatprep.mubr.bf16.mxu0 %v2497_v46  ;;  %5054 = vmatprep.mubr.bf16.mxu1 %v2507_v52  ;;  %v1742_v52 = vunpack.c.h.s8.bf16 %v1142_v37 }
 0x40a   : > { %4985 = vmatpush1.bf16.xpose.msra.mxu0 %v1438_v55  ;;  %5025 = vmatpush1.bf16.xpose.msra.mxu1 %v1440_v56  ;;  %v1744_v56 = vunpack.c.h.s8.bf16 %v1144_v38 }
 0x40b   : > { %4986 = vmatprep.subr.bf16.mxu0 %v1589_v57  ;;  %5026 = vmatprep.subr.bf16.mxu1 %v1591_v58  ;;  %v1297_v57 = vunpack.c.l.s8.bf16 %v997_v45 }
 0x412   : > { %4987 = vmatpush1.bf16.xpose.msra.mxu0 %v1588_v61  ;;  %5027 = vmatpush1.bf16.xpose.msra.mxu1 %v1590_v62  ;;  %v2524_v61 = vcombine.high %v7262_v50, %v7262_v50  ;;  %v2490_v62 = vrot.slane %v7242_v9, %v6785_v3  ;;  %v1147_v9 = vld [vmem:[%s6775_s19 + $0x838] sm:$0xff] }
 0x413   : > { %4988 = vmatprep.subr.bf16.mxu0 %v1739_v63  ;;  %5028 = vmatprep.subr.bf16.mxu1 %v1741_v0  ;;  %v996_v63 = vld [vmem:[%s6775_s19 + $0x380] sm:$0xff]  ;;  %v998_v0 = vld [vmem:[%s6775_s19 + $0x390] sm:$0xff] }
 0x414   : > { %v4456_v2 = vpop.f32.mrb[76].mxu0  ;;  %v4496_v7 = vpop.f32.mrb[76].mxu1  ;;  %v2546_v1 = vrot.slane %v2524_v61, %v6785_v3  ;;  %v2506_v4 = vcombine.high %v2490_v62, %v2490_v62 }
 0x415   : > { %v4457_v5 = vadd.f32 %v4456_v2, %v4417_v35  ;;  %v4458_v6 = vpop.f32.mrb[77].mxu0  ;;  %v4498_v12 = vpop.f32.mrb[77].mxu1  ;;  %v1593_v35 = vunpack.c.l.s8.bf16 %v1143_v31  ;;  %v1296_v2 = vunpack.c.l.s8.bf16 %v996_v63 }
 0x416   : > { %v4459_v10 = vpop.f32.mrb[78].mxu0  ;;  %v4499_v17 = vpop.f32.mrb[78].mxu1  ;;  %v1447_v6 = vunpack.c.h.s8.bf16 %v997_v45  ;;  %v2556_v8 = vcombine.high %v2546_v1, %v2546_v1  ;;  %v1448_v12 = vunpack.c.h.s8.bf16 %v998_v0 }
 0x417   : > { %v4497_v13 = vadd.f32 %v4496_v7, %v4457_v5  ;;  %v4460_v14 = vpop.f32.mrb[79].mxu0  ;;  %v4500_v19 = vpop.f32.mrb[79].mxu1  ;;  %v1298_v5 = vunpack.c.l.s8.bf16 %v998_v0  ;;  %v1449_v7 = vunpack.c.h.s8.bf16 %v999_v49  ;;  %v1149_v10 = vld [vmem:[%s6775_s19 + $0x848] sm:$0xff] }
 0x418   : > { %v1599_v14 = vunpack.c.l.s8.bf16 %v1149_v10  ;;  %v1747_v19 = vunpack.c.h.s8.bf16 %v1147_v9  ;;  %v1749_v20 = vunpack.c.h.s8.bf16 %v1149_v10  ;;  %v1005_v0 = vld [vmem:[%s6775_s19 + $0x3c8] sm:$0xff] }
 0x41a   : > { %4989 = vmatpush1.bf16.xpose.msra.mxu0 %v1738_v11  ;;  %5029 = vmatpush1.bf16.xpose.msra.mxu1 %v1740_v15  ;;  %v1446_v11 = vunpack.c.h.s8.bf16 %v996_v63  ;;  %v1146_v15 = vld [vmem:[%s6775_s19 + $0x830] sm:$0xff] }
 0x41b   : > { %5062 = vmatprep.subr.bf16.mxu0 %v1293_v16  ;;  %5102 = vmatprep.subr.bf16.mxu1 %v1295_v18  ;;  %v1148_v16 = vld [vmem:[%s6775_s19 + $0x840] sm:$0xff]  ;;  %v1596_v17 = vunpack.c.l.s8.bf16 %v1146_v15 }
 0x41c   : > { %v1598_v18 = vunpack.c.l.s8.bf16 %v1148_v16 }
 0x421   : > { %5015 = vmatmul.mubr.bf16.vlgmr.msra.gmra.mrb[104].mxu0 %v2483_v21  ;;  %5055 = vmatmul.mubr.bf16.vlgmr.msra.gmra.mrb[104].mxu1 %v2505_v26  ;;  %v2509_v21 = vcombine.high %v7256_v43, %v7256_v43 }
 0x422   : > { %5063 = vmatpush1.bf16.xpose.msra.mxu0 %v1292_v25  ;;  %5103 = vmatpush1.bf16.xpose.msra.mxu1 %v1294_v27  ;;  %v1003_v27 = vld [vmem:[%s6775_s19 + $0x3b8] sm:$0xff] }
 0x423   : > { %5064 = vmatprep.subr.bf16.mxu0 %v1443_v28  ;;  %5104 = vmatprep.subr.bf16.mxu1 %v1445_v29  ;;  %v7280_v28 = vrot.slane %v2509_v21, %v6785_v3  ;;  %v1303_v37 = vunpack.c.l.s8.bf16 %v1003_v27 }
 0x424   : > { %5094 = vmatprep.mubr.bf16.mxu0 %v2504_v24  ;;  %5134 = vmatprep.mubr.bf16.mxu1 %v2508_v30  ;;  %v1746_v30 = vunpack.c.h.s8.bf16 %v1146_v15 }
 0x42a   : > { %5065 = vmatpush1.bf16.xpose.msra.mxu0 %v1442_v33  ;;  %5105 = vmatpush1.bf16.xpose.msra.mxu1 %v1444_v34  ;;  %v1748_v34 = vunpack.c.h.s8.bf16 %v1148_v16 }
 0x42b   : > { %5066 = vmatprep.subr.bf16.mxu0 %v1593_v35  ;;  %5106 = vmatprep.subr.bf16.mxu1 %v1595_v36  ;;  %v1301_v35 = vunpack.c.l.s8.bf16 %v1001_v23 }
 0x432   : > { %5067 = vmatpush1.bf16.xpose.msra.mxu0 %v1592_v39  ;;  %5107 = vmatpush1.bf16.xpose.msra.mxu1 %v1594_v40  ;;  %v2525_v39 = vcombine.high %v7280_v28, %v7280_v28  ;;  %v2532_v40 = vrot.slane %v7262_v50, %v6785_v3  ;;  %v1151_v50 = vld [vmem:[%s6775_s19 + $0x858] sm:$0xff] }
 0x433   : > { %5068 = vmatprep.subr.bf16.mxu0 %v1743_v41  ;;  %5108 = vmatprep.subr.bf16.mxu1 %v1745_v42  ;;  %v1000_v41 = vld [vmem:[%s6775_s19 + $0x3a0] sm:$0xff]  ;;  %v1002_v42 = vld [vmem:[%s6775_s19 + $0x3b0] sm:$0xff] }
 0x434   : > { %v4536_v44 = vpop.f32.mrb[80].mxu0  ;;  %v4576_v48 = vpop.f32.mrb[80].mxu1  ;;  %v2553_v43 = vrot.slane %v2525_v39, %v6785_v3  ;;  %v2554_v45 = vcombine.high %v2532_v40, %v2532_v40 }
 0x435   : > { %v4537_v46 = vadd.f32 %v4536_v44, %v4497_v13  ;;  %v4538_v47 = vpop.f32.mrb[81].mxu0  ;;  %v4578_v53 = vpop.f32.mrb[81].mxu1  ;;  %v1597_v13 = vunpack.c.l.s8.bf16 %v1147_v9  ;;  %v1300_v44 = vunpack.c.l.s8.bf16 %v1000_v41 }
 0x436   : > { %v4539_v51 = vpop.f32.mrb[82].mxu0  ;;  %v4579_v58 = vpop.f32.mrb[82].mxu1  ;;  %v1451_v47 = vunpack.c.h.s8.bf16 %v1001_v23  ;;  %v2557_v49 = vcombine.high %v2553_v43, %v2553_v43  ;;  %v1452_v53 = vunpack.c.h.s8.bf16 %v1002_v42 }
 0x437   : > { %v4577_v54 = vadd.f32 %v4576_v48, %v4537_v46  ;;  %v4540_v55 = vpop.f32.mrb[83].mxu0  ;;  %v4580_v60 = vpop.f32.mrb[83].mxu1  ;;  %v1302_v46 = vunpack.c.l.s8.bf16 %v1002_v42  ;;  %v1453_v48 = vunpack.c.h.s8.bf16 %v1003_v27  ;;  %v1153_v51 = vld [vmem:[%s6775_s19 + $0x868] sm:$0xff] }
 0x438   : > { %v1603_v55 = vunpack.c.l.s8.bf16 %v1153_v51  ;;  %v1751_v60 = vunpack.c.h.s8.bf16 %v1151_v50  ;;  %v1753_v61 = vunpack.c.h.s8.bf16 %v1153_v51  ;;  %v1009_v42 = vld [vmem:[%s6775_s19 + $0x3e8] sm:$0xff] }
 0x43a   : > { %5069 = vmatpush1.bf16.xpose.msra.mxu0 %v1742_v52  ;;  %5109 = vmatpush1.bf16.xpose.msra.mxu1 %v1744_v56  ;;  %v1450_v52 = vunpack.c.h.s8.bf16 %v1000_v41  ;;  %v1150_v56 = vld [vmem:[%s6775_s19 + $0x850] sm:$0xff] }
 0x43b   : > { %5142 = vmatprep.subr.bf16.mxu0 %v1297_v57  ;;  %5182 = vmatprep.subr.bf16.mxu1 %v1299_v59  ;;  %v1152_v57 = vld [vmem:[%s6775_s19 + $0x860] sm:$0xff]  ;;  %v1600_v58 = vunpack.c.l.s8.bf16 %v1150_v56 }
 0x43c   : > { %v1602_v59 = vunpack.c.l.s8.bf16 %v1152_v57 }
 0x441   : > { %5095 = vmatmul.mubr.bf16.vlgmr.msra.gmra.mrb[108].mxu0 %v2490_v62  ;;  %5135 = vmatmul.mubr.bf16.vlgmr.msra.gmra.mrb[108].mxu1 %v2506_v4  ;;  %v7294_v62 = vld [vmem:[%s6773_s18 + $0x78] sm:$0xff] }
 0x442   : > { %5143 = vmatpush1.bf16.xpose.msra.mxu0 %v1296_v2  ;;  %5183 = vmatpush1.bf16.xpose.msra.mxu1 %v1298_v5  ;;  %v1007_v5 = vld [vmem:[%s6775_s19 + $0x3d8] sm:$0xff] }
 0x443   : > { %5144 = vmatprep.subr.bf16.mxu0 %v1447_v6  ;;  %5184 = vmatprep.subr.bf16.mxu1 %v1449_v7  ;;  %v7300_v6 = vrot.slane %v7294_v62, %v6785_v3  ;;  %v1307_v15 = vunpack.c.l.s8.bf16 %v1007_v5 }
 0x444   : > { %5174 = vmatprep.mubr.bf16.mxu0 %v2546_v1  ;;  %5214 = vmatprep.mubr.bf16.mxu1 %v2556_v8  ;;  %v1750_v8 = vunpack.c.h.s8.bf16 %v1150_v56 }
 0x44a   : > { %5145 = vmatpush1.bf16.xpose.msra.mxu0 %v1446_v11  ;;  %5185 = vmatpush1.bf16.xpose.msra.mxu1 %v1448_v12  ;;  %v1752_v12 = vunpack.c.h.s8.bf16 %v1152_v57 }
 0x44b   : > { %5146 = vmatprep.subr.bf16.mxu0 %v1597_v13  ;;  %5186 = vmatprep.subr.bf16.mxu1 %v1599_v14  ;;  %v1305_v13 = vunpack.c.l.s8.bf16 %v1005_v0 }
 0x452   : > { %5147 = vmatpush1.bf16.xpose.msra.mxu0 %v1596_v17  ;;  %5187 = vmatpush1.bf16.xpose.msra.mxu1 %v1598_v18  ;;  %v2573_v17 = vcombine.high %v7300_v6, %v7300_v6  ;;  %v2539_v18 = vrot.slane %v7280_v28, %v6785_v3  ;;  %v1155_v28 = vld [vmem:[%s6775_s19 + $0x878] sm:$0xff] }
 0x453   : > { %5148 = vmatprep.subr.bf16.mxu0 %v1747_v19  ;;  %5188 = vmatprep.subr.bf16.mxu1 %v1749_v20  ;;  %v1004_v19 = vld [vmem:[%s6775_s19 + $0x3c0] sm:$0xff]  ;;  %v1006_v20 = vld [vmem:[%s6775_s19 + $0x3d0] sm:$0xff] }
 0x454   : > { %v4616_v22 = vpop.f32.mrb[84].mxu0  ;;  %v4656_v26 = vpop.f32.mrb[84].mxu1  ;;  %v2595_v21 = vrot.slane %v2573_v17, %v6785_v3  ;;  %v2555_v23 = vcombine.high %v2539_v18, %v2539_v18 }
 0x455   : > { %v4617_v24 = vadd.f32 %v4616_v22, %v4577_v54  ;;  %v4618_v25 = vpop.f32.mrb[85].mxu0  ;;  %v4658_v31 = vpop.f32.mrb[85].mxu1  ;;  %v1601_v54 = vunpack.c.l.s8.bf16 %v1151_v50  ;;  %v1304_v22 = vunpack.c.l.s8.bf16 %v1004_v19 }
 0x456   : > { %v4619_v29 = vpop.f32.mrb[86].mxu0  ;;  %v4659_v36 = vpop.f32.mrb[86].mxu1  ;;  %v1455_v25 = vunpack.c.h.s8.bf16 %v1005_v0  ;;  %v2605_v27 = vcombine.high %v2595_v21, %v2595_v21  ;;  %v1456_v31 = vunpack.c.h.s8.bf16 %v1006_v20 }
 0x457   : > { %v4657_v32 = vadd.f32 %v4656_v26, %v4617_v24  ;;  %v4620_v33 = vpop.f32.mrb[87].mxu0  ;;  %v4660_v38 = vpop.f32.mrb[87].mxu1  ;;  %v1306_v24 = vunpack.c.l.s8.bf16 %v1006_v20  ;;  %v1457_v26 = vunpack.c.h.s8.bf16 %v1007_v5  ;;  %v1157_v29 = vld [vmem:[%s6775_s19 + $0x888] sm:$0xff] }
 0x458   : > { %v1607_v33 = vunpack.c.l.s8.bf16 %v1157_v29  ;;  %v1755_v38 = vunpack.c.h.s8.bf16 %v1155_v28  ;;  %v1757_v39 = vunpack.c.h.s8.bf16 %v1157_v29  ;;  %v1013_v20 = vld [vmem:[%s6775_s19 + $0x408] sm:$0xff] }
 0x45a   : > { %5149 = vmatpush1.bf16.xpose.msra.mxu0 %v1746_v30  ;;  %5189 = vmatpush1.bf16.xpose.msra.mxu1 %v1748_v34  ;;  %v1454_v30 = vunpack.c.h.s8.bf16 %v1004_v19  ;;  %v1154_v34 = vld [vmem:[%s6775_s19 + $0x870] sm:$0xff] }
 0x45b   : > { %5222 = vmatprep.subr.bf16.mxu0 %v1301_v35  ;;  %5262 = vmatprep.subr.bf16.mxu1 %v1303_v37  ;;  %v1156_v35 = vld [vmem:[%s6775_s19 + $0x880] sm:$0xff]  ;;  %v1604_v36 = vunpack.c.l.s8.bf16 %v1154_v34 }
 0x45c   : > { %v1606_v37 = vunpack.c.l.s8.bf16 %v1156_v35 }
 0x461   : > { %5175 = vmatmul.mubr.bf16.vlgmr.msra.gmra.mrb[112].mxu0 %v2532_v40  ;;  %5215 = vmatmul.mubr.bf16.vlgmr.msra.gmra.mrb[112].mxu1 %v2554_v45  ;;  %v2558_v40 = vcombine.high %v7294_v62, %v7294_v62 }
 0x462   : > { %5223 = vmatpush1.bf16.xpose.msra.mxu0 %v1300_v44  ;;  %5263 = vmatpush1.bf16.xpose.msra.mxu1 %v1302_v46  ;;  %v1011_v46 = vld [vmem:[%s6775_s19 + $0x3f8] sm:$0xff] }
 0x463   : > { %5224 = vmatprep.subr.bf16.mxu0 %v1451_v47  ;;  %5264 = vmatprep.subr.bf16.mxu1 %v1453_v48  ;;  %v7318_v47 = vrot.slane %v2558_v40, %v6785_v3  ;;  %v1311_v56 = vunpack.c.l.s8.bf16 %v1011_v46 }
 0x464   : > { %5254 = vmatprep.mubr.bf16.mxu0 %v2553_v43  ;;  %5294 = vmatprep.mubr.bf16.mxu1 %v2557_v49  ;;  %v1754_v49 = vunpack.c.h.s8.bf16 %v1154_v34 }
 0x46a   : > { %5225 = vmatpush1.bf16.xpose.msra.mxu0 %v1450_v52  ;;  %5265 = vmatpush1.bf16.xpose.msra.mxu1 %v1452_v53  ;;  %v1756_v53 = vunpack.c.h.s8.bf16 %v1156_v35 }
 0x46b   : > { %5226 = vmatprep.subr.bf16.mxu0 %v1601_v54  ;;  %5266 = vmatprep.subr.bf16.mxu1 %v1603_v55  ;;  %v1309_v54 = vunpack.c.l.s8.bf16 %v1009_v42 }
 0x472   : > { %5227 = vmatpush1.bf16.xpose.msra.mxu0 %v1600_v58  ;;  %5267 = vmatpush1.bf16.xpose.msra.mxu1 %v1602_v59  ;;  %v2574_v58 = vcombine.high %v7318_v47, %v7318_v47  ;;  %v2581_v59 = vrot.slane %v7300_v6, %v6785_v3  ;;  %v1159_v6 = vld [vmem:[%s6775_s19 + $0x898] sm:$0xff] }
 0x473   : > { %5228 = vmatprep.subr.bf16.mxu0 %v1751_v60  ;;  %5268 = vmatprep.subr.bf16.mxu1 %v1753_v61  ;;  %v1008_v60 = vld [vmem:[%s6775_s19 + $0x3e0] sm:$0xff]  ;;  %v1010_v61 = vld [vmem:[%s6775_s19 + $0x3f0] sm:$0xff] }
 0x474   : > { %v4696_v63 = vpop.f32.mrb[88].mxu0  ;;  %v4736_v4 = vpop.f32.mrb[88].mxu1  ;;  %v2602_v62 = vrot.slane %v2574_v58, %v6785_v3  ;;  %v2603_v0 = vcombine.high %v2581_v59, %v2581_v59 }
 0x475   : > { %v4697_v1 = vadd.f32 %v4696_v63, %v4657_v32  ;;  %v4698_v2 = vpop.f32.mrb[89].mxu0  ;;  %v4738_v9 = vpop.f32.mrb[89].mxu1  ;;  %v1605_v32 = vunpack.c.l.s8.bf16 %v1155_v28  ;;  %v1308_v63 = vunpack.c.l.s8.bf16 %v1008_v60 }
 0x476   : > { %v4699_v7 = vpop.f32.mrb[90].mxu0  ;;  %v4739_v14 = vpop.f32.mrb[90].mxu1  ;;  %v1459_v2 = vunpack.c.h.s8.bf16 %v1009_v42  ;;  %v2606_v5 = vcombine.high %v2602_v62, %v2602_v62  ;;  %v1460_v9 = vunpack.c.h.s8.bf16 %v1010_v61 }
 0x477   : > { %v4737_v10 = vadd.f32 %v4736_v4, %v4697_v1  ;;  %v4700_v11 = vpop.f32.mrb[91].mxu0  ;;  %v4740_v16 = vpop.f32.mrb[91].mxu1  ;;  %v1310_v1 = vunpack.c.l.s8.bf16 %v1010_v61  ;;  %v1461_v4 = vunpack.c.h.s8.bf16 %v1011_v46  ;;  %v1161_v7 = vld [vmem:[%s6775_s19 + $0x8a8] sm:$0xff] }
 0x478   : > { %v1611_v11 = vunpack.c.l.s8.bf16 %v1161_v7  ;;  %v1759_v16 = vunpack.c.h.s8.bf16 %v1159_v6  ;;  %v1761_v17 = vunpack.c.h.s8.bf16 %v1161_v7  ;;  %v1017_v61 = vld [vmem:[%s6775_s19 + $0x428] sm:$0xff] }
 0x47a   : > { %5229 = vmatpush1.bf16.xpose.msra.mxu0 %v1750_v8  ;;  %5269 = vmatpush1.bf16.xpose.msra.mxu1 %v1752_v12  ;;  %v1458_v8 = vunpack.c.h.s8.bf16 %v1008_v60  ;;  %v1158_v12 = vld [vmem:[%s6775_s19 + $0x890] sm:$0xff] }
 0x47b   : > { %5302 = vmatprep.subr.bf16.mxu0 %v1305_v13  ;;  %5342 = vmatprep.subr.bf16.mxu1 %v1307_v15  ;;  %v1160_v13 = vld [vmem:[%s6775_s19 + $0x8a0] sm:$0xff]  ;;  %v1608_v14 = vunpack.c.l.s8.bf16 %v1158_v12 }
 0x47c   : > { %v1610_v15 = vunpack.c.l.s8.bf16 %v1160_v13 }
 0x481   : > { %5255 = vmatmul.mubr.bf16.vlgmr.msra.gmra.mrb[116].mxu0 %v2539_v18  ;;  %5295 = vmatmul.mubr.bf16.vlgmr.msra.gmra.mrb[116].mxu1 %v2555_v23  ;;  %v7332_v18 = vld [vmem:[%s6773_s18 + $0x80] sm:$0xff] }
 0x482   : > { %5303 = vmatpush1.bf16.xpose.msra.mxu0 %v1304_v22  ;;  %5343 = vmatpush1.bf16.xpose.msra.mxu1 %v1306_v24  ;;  %v1015_v24 = vld [vmem:[%s6775_s19 + $0x418] sm:$0xff] }
 0x483   : > { %5304 = vmatprep.subr.bf16.mxu0 %v1455_v25  ;;  %5344 = vmatprep.subr.bf16.mxu1 %v1457_v26  ;;  %v7338_v25 = vrot.slane %v7332_v18, %v6785_v3  ;;  %v1315_v34 = vunpack.c.l.s8.bf16 %v1015_v24 }
 0x484   : > { %5334 = vmatprep.mubr.bf16.mxu0 %v2595_v21  ;;  %5374 = vmatprep.mubr.bf16.mxu1 %v2605_v27  ;;  %v1758_v27 = vunpack.c.h.s8.bf16 %v1158_v12 }
 0x48a   : > { %5305 = vmatpush1.bf16.xpose.msra.mxu0 %v1454_v30  ;;  %5345 = vmatpush1.bf16.xpose.msra.mxu1 %v1456_v31  ;;  %v1760_v31 = vunpack.c.h.s8.bf16 %v1160_v13 }
 0x48b   : > { %5306 = vmatprep.subr.bf16.mxu0 %v1605_v32  ;;  %5346 = vmatprep.subr.bf16.mxu1 %v1607_v33  ;;  %v1313_v32 = vunpack.c.l.s8.bf16 %v1013_v20 }
 0x492   : > { %5307 = vmatpush1.bf16.xpose.msra.mxu0 %v1604_v36  ;;  %5347 = vmatpush1.bf16.xpose.msra.mxu1 %v1606_v37  ;;  %v2622_v36 = vcombine.high %v7338_v25, %v7338_v25  ;;  %v2588_v37 = vrot.slane %v7318_v47, %v6785_v3  ;;  %v1163_v47 = vld [vmem:[%s6775_s19 + $0x8b8] sm:$0xff] }
 0x493   : > { %5308 = vmatprep.subr.bf16.mxu0 %v1755_v38  ;;  %5348 = vmatprep.subr.bf16.mxu1 %v1757_v39  ;;  %v1012_v38 = vld [vmem:[%s6775_s19 + $0x400] sm:$0xff]  ;;  %v1014_v39 = vld [vmem:[%s6775_s19 + $0x410] sm:$0xff] }
 0x494   : > { %v4776_v41 = vpop.f32.mrb[92].mxu0  ;;  %v4816_v45 = vpop.f32.mrb[92].mxu1  ;;  %v2644_v40 = vrot.slane %v2622_v36, %v6785_v3  ;;  %v2604_v42 = vcombine.high %v2588_v37, %v2588_v37 }
 0x495   : > { %v4777_v43 = vadd.f32 %v4776_v41, %v4737_v10  ;;  %v4778_v44 = vpop.f32.mrb[93].mxu0  ;;  %v4818_v50 = vpop.f32.mrb[93].mxu1  ;;  %v1609_v10 = vunpack.c.l.s8.bf16 %v1159_v6  ;;  %v1312_v41 = vunpack.c.l.s8.bf16 %v1012_v38 }
 0x496   : > { %v4779_v48 = vpop.f32.mrb[94].mxu0  ;;  %v4819_v55 = vpop.f32.mrb[94].mxu1  ;;  %v1463_v44 = vunpack.c.h.s8.bf16 %v1013_v20  ;;  %v2654_v46 = vcombine.high %v2644_v40, %v2644_v40  ;;  %v1464_v50 = vunpack.c.h.s8.bf16 %v1014_v39 }
 0x497   : > { %v4817_v51 = vadd.f32 %v4816_v45, %v4777_v43  ;;  %v4780_v52 = vpop.f32.mrb[95].mxu0  ;;  %v4820_v57 = vpop.f32.mrb[95].mxu1  ;;  %v1314_v43 = vunpack.c.l.s8.bf16 %v1014_v39  ;;  %v1465_v45 = vunpack.c.h.s8.bf16 %v1015_v24  ;;  %v1165_v48 = vld [vmem:[%s6775_s19 + $0x8c8] sm:$0xff] }
 0x498   : > { %v1615_v52 = vunpack.c.l.s8.bf16 %v1165_v48  ;;  %v1763_v57 = vunpack.c.h.s8.bf16 %v1163_v47  ;;  %v1765_v58 = vunpack.c.h.s8.bf16 %v1165_v48  ;;  %v1021_v39 = vld [vmem:[%s6775_s19 + $0x448] sm:$0xff] }
 0x49a   : > { %5309 = vmatpush1.bf16.xpose.msra.mxu0 %v1754_v49  ;;  %5349 = vmatpush1.bf16.xpose.msra.mxu1 %v1756_v53  ;;  %v1462_v49 = vunpack.c.h.s8.bf16 %v1012_v38  ;;  %v1162_v53 = vld [vmem:[%s6775_s19 + $0x8b0] sm:$0xff] }
 0x49b   : > { %5382 = vmatprep.subr.bf16.mxu0 %v1309_v54  ;;  %5422 = vmatprep.subr.bf16.mxu1 %v1311_v56  ;;  %v1164_v54 = vld [vmem:[%s6775_s19 + $0x8c0] sm:$0xff]  ;;  %v1612_v55 = vunpack.c.l.s8.bf16 %v1162_v53 }
 0x49c   : > { %v1614_v56 = vunpack.c.l.s8.bf16 %v1164_v54 }
 0x4a1   : > { %5335 = vmatmul.mubr.bf16.vlgmr.msra.gmra.mrb[120].mxu0 %v2581_v59  ;;  %5375 = vmatmul.mubr.bf16.vlgmr.msra.gmra.mrb[120].mxu1 %v2603_v0  ;;  %v2607_v59 = vcombine.high %v7332_v18, %v7332_v18 }
 0x4a2   : > { %5383 = vmatpush1.bf16.xpose.msra.mxu0 %v1308_v63  ;;  %5423 = vmatpush1.bf16.xpose.msra.mxu1 %v1310_v1  ;;  %v1019_v1 = vld [vmem:[%s6775_s19 + $0x438] sm:$0xff] }
 0x4a3   : > { %5384 = vmatprep.subr.bf16.mxu0 %v1459_v2  ;;  %5424 = vmatprep.subr.bf16.mxu1 %v1461_v4  ;;  %v7356_v2 = vrot.slane %v2607_v59, %v6785_v3  ;;  %v1319_v12 = vunpack.c.l.s8.bf16 %v1019_v1 }
 0x4a4   : > { %5414 = vmatprep.mubr.bf16.mxu0 %v2602_v62  ;;  %5454 = vmatprep.mubr.bf16.mxu1 %v2606_v5  ;;  %v1762_v5 = vunpack.c.h.s8.bf16 %v1162_v53 }
 0x4aa   : > { %5385 = vmatpush1.bf16.xpose.msra.mxu0 %v1458_v8  ;;  %5425 = vmatpush1.bf16.xpose.msra.mxu1 %v1460_v9  ;;  %v1764_v9 = vunpack.c.h.s8.bf16 %v1164_v54 }
 0x4ab   : > { %5386 = vmatprep.subr.bf16.mxu0 %v1609_v10  ;;  %5426 = vmatprep.subr.bf16.mxu1 %v1611_v11  ;;  %v1317_v10 = vunpack.c.l.s8.bf16 %v1017_v61 }
 0x4b2   : > { %5387 = vmatpush1.bf16.xpose.msra.mxu0 %v1608_v14  ;;  %5427 = vmatpush1.bf16.xpose.msra.mxu1 %v1610_v15  ;;  %v2623_v14 = vcombine.high %v7356_v2, %v7356_v2  ;;  %v2630_v15 = vrot.slane %v7338_v25, %v6785_v3  ;;  %v1167_v25 = vld [vmem:[%s6775_s19 + $0x8d8] sm:$0xff] }
 0x4b3   : > { %5388 = vmatprep.subr.bf16.mxu0 %v1759_v16  ;;  %5428 = vmatprep.subr.bf16.mxu1 %v1761_v17  ;;  %v1016_v16 = vld [vmem:[%s6775_s19 + $0x420] sm:$0xff]  ;;  %v1018_v17 = vld [vmem:[%s6775_s19 + $0x430] sm:$0xff] }
 0x4b4   : > { %v4856_v19 = vpop.f32.mrb[96].mxu0  ;;  %v4896_v23 = vpop.f32.mrb[96].mxu1  ;;  %v2651_v18 = vrot.slane %v2623_v14, %v6785_v3  ;;  %v2652_v20 = vcombine.high %v2630_v15, %v2630_v15 }
 0x4b5   : > { %v4857_v21 = vadd.f32 %v4856_v19, %v4817_v51  ;;  %v4858_v22 = vpop.f32.mrb[97].mxu0  ;;  %v4898_v28 = vpop.f32.mrb[97].mxu1  ;;  %v1613_v51 = vunpack.c.l.s8.bf16 %v1163_v47  ;;  %v1316_v19 = vunpack.c.l.s8.bf16 %v1016_v16 }
 0x4b6   : > { %v4859_v26 = vpop.f32.mrb[98].mxu0  ;;  %v4899_v33 = vpop.f32.mrb[98].mxu1  ;;  %v1467_v22 = vunpack.c.h.s8.bf16 %v1017_v61  ;;  %v2655_v24 = vcombine.high %v2651_v18, %v2651_v18  ;;  %v1468_v28 = vunpack.c.h.s8.bf16 %v1018_v17 }
 0x4b7   : > { %v4897_v29 = vadd.f32 %v4896_v23, %v4857_v21  ;;  %v4860_v30 = vpop.f32.mrb[99].mxu0  ;;  %v4900_v35 = vpop.f32.mrb[99].mxu1  ;;  %v1318_v21 = vunpack.c.l.s8.bf16 %v1018_v17  ;;  %v1469_v23 = vunpack.c.h.s8.bf16 %v1019_v1  ;;  %v1169_v26 = vld [vmem:[%s6775_s19 + $0x8e8] sm:$0xff] }
 0x4b8   : > { %v1619_v30 = vunpack.c.l.s8.bf16 %v1169_v26  ;;  %v1767_v35 = vunpack.c.h.s8.bf16 %v1167_v25  ;;  %v1769_v36 = vunpack.c.h.s8.bf16 %v1169_v26  ;;  %v1025_v17 = vld [vmem:[%s6775_s19 + $0x468] sm:$0xff] }
 0x4ba   : > { %5389 = vmatpush1.bf16.xpose.msra.mxu0 %v1758_v27  ;;  %5429 = vmatpush1.bf16.xpose.msra.mxu1 %v1760_v31  ;;  %v1466_v27 = vunpack.c.h.s8.bf16 %v1016_v16  ;;  %v1166_v31 = vld [vmem:[%s6775_s19 + $0x8d0] sm:$0xff] }
 0x4bb   : > { %5462 = vmatprep.subr.bf16.mxu0 %v1313_v32  ;;  %5502 = vmatprep.subr.bf16.mxu1 %v1315_v34  ;;  %v1168_v32 = vld [vmem:[%s6775_s19 + $0x8e0] sm:$0xff]  ;;  %v1616_v33 = vunpack.c.l.s8.bf16 %v1166_v31 }
 0x4bc   : > { %v1618_v34 = vunpack.c.l.s8.bf16 %v1168_v32 }
 0x4c1   : > { %5415 = vmatmul.mubr.bf16.vlgmr.msra.gmra.mrb[124].mxu0 %v2588_v37  ;;  %5455 = vmatmul.mubr.bf16.vlgmr.msra.gmra.mrb[124].mxu1 %v2604_v42  ;;  %v7370_v37 = vld [vmem:[%s6773_s18 + $0x88] sm:$0xff] }
 0x4c2   : > { %5463 = vmatpush1.bf16.xpose.msra.mxu0 %v1312_v41  ;;  %5503 = vmatpush1.bf16.xpose.msra.mxu1 %v1314_v43  ;;  %v1023_v43 = vld [vmem:[%s6775_s19 + $0x458] sm:$0xff] }
 0x4c3   : > { %5464 = vmatprep.subr.bf16.mxu0 %v1463_v44  ;;  %5504 = vmatprep.subr.bf16.mxu1 %v1465_v45  ;;  %v7376_v44 = vrot.slane %v7370_v37, %v6785_v3  ;;  %v1323_v53 = vunpack.c.l.s8.bf16 %v1023_v43 }
 0x4c4   : > { %5494 = vmatprep.mubr.bf16.mxu0 %v2644_v40  ;;  %5534 = vmatprep.mubr.bf16.mxu1 %v2654_v46  ;;  %v1766_v46 = vunpack.c.h.s8.bf16 %v1166_v31 }
 0x4ca   : > { %5465 = vmatpush1.bf16.xpose.msra.mxu0 %v1462_v49  ;;  %5505 = vmatpush1.bf16.xpose.msra.mxu1 %v1464_v50  ;;  %v1768_v50 = vunpack.c.h.s8.bf16 %v1168_v32 }
 0x4cb   : > { %5466 = vmatprep.subr.bf16.mxu0 %v1613_v51  ;;  %5506 = vmatprep.subr.bf16.mxu1 %v1615_v52  ;;  %v1321_v51 = vunpack.c.l.s8.bf16 %v1021_v39 }
 0x4d2   : > { %5467 = vmatpush1.bf16.xpose.msra.mxu0 %v1612_v55  ;;  %5507 = vmatpush1.bf16.xpose.msra.mxu1 %v1614_v56  ;;  %v2671_v55 = vcombine.high %v7376_v44, %v7376_v44  ;;  %v2637_v56 = vrot.slane %v7356_v2, %v6785_v3  ;;  %v1171_v2 = vld [vmem:[%s6775_s19 + $0x8f8] sm:$0xff] }
 0x4d3   : > { %5468 = vmatprep.subr.bf16.mxu0 %v1763_v57  ;;  %5508 = vmatprep.subr.bf16.mxu1 %v1765_v58  ;;  %v1020_v57 = vld [vmem:[%s6775_s19 + $0x440] sm:$0xff]  ;;  %v1022_v58 = vld [vmem:[%s6775_s19 + $0x450] sm:$0xff] }
 0x4d4   : > { %v4936_v60 = vpop.f32.mrb[100].mxu0  ;;  %v4976_v0 = vpop.f32.mrb[100].mxu1  ;;  %v2693_v59 = vrot.slane %v2671_v55, %v6785_v3  ;;  %v2653_v61 = vcombine.high %v2637_v56, %v2637_v56 }
 0x4d5   : > { %v4937_v62 = vadd.f32 %v4936_v60, %v4897_v29  ;;  %v4938_v63 = vpop.f32.mrb[101].mxu0  ;;  %v4978_v6 = vpop.f32.mrb[101].mxu1  ;;  %v1617_v29 = vunpack.c.l.s8.bf16 %v1167_v25  ;;  %v1320_v60 = vunpack.c.l.s8.bf16 %v1020_v57 }
 0x4d6   : > { %v4939_v4 = vpop.f32.mrb[102].mxu0  ;;  %v4979_v11 = vpop.f32.mrb[102].mxu1  ;;  %v1471_v63 = vunpack.c.h.s8.bf16 %v1021_v39  ;;  %v2703_v1 = vcombine.high %v2693_v59, %v2693_v59  ;;  %v1472_v6 = vunpack.c.h.s8.bf16 %v1022_v58 }
 0x4d7   : > { %v4977_v7 = vadd.f32 %v4976_v0, %v4937_v62  ;;  %v4940_v8 = vpop.f32.mrb[103].mxu0  ;;  %v4980_v13 = vpop.f32.mrb[103].mxu1  ;;  %v1322_v62 = vunpack.c.l.s8.bf16 %v1022_v58  ;;  %v1473_v0 = vunpack.c.h.s8.bf16 %v1023_v43  ;;  %v1173_v4 = vld [vmem:[%s6775_s19 + $0x908] sm:$0xff] }
 0x4d8   : > { %v1623_v8 = vunpack.c.l.s8.bf16 %v1173_v4  ;;  %v1771_v13 = vunpack.c.h.s8.bf16 %v1171_v2  ;;  %v1773_v14 = vunpack.c.h.s8.bf16 %v1173_v4  ;;  %v1029_v58 = vld [vmem:[%s6775_s19 + $0x488] sm:$0xff] }
 0x4da   : > { %5469 = vmatpush1.bf16.xpose.msra.mxu0 %v1762_v5  ;;  %5509 = vmatpush1.bf16.xpose.msra.mxu1 %v1764_v9  ;;  %v1470_v5 = vunpack.c.h.s8.bf16 %v1020_v57  ;;  %v1170_v9 = vld [vmem:[%s6775_s19 + $0x8f0] sm:$0xff] }
 0x4db   : > { %5542 = vmatprep.subr.bf16.mxu0 %v1317_v10  ;;  %5582 = vmatprep.subr.bf16.mxu1 %v1319_v12  ;;  %v1172_v10 = vld [vmem:[%s6775_s19 + $0x900] sm:$0xff]  ;;  %v1620_v11 = vunpack.c.l.s8.bf16 %v1170_v9 }
 0x4dc   : > { %v1622_v12 = vunpack.c.l.s8.bf16 %v1172_v10 }
 0x4e1   : > { %5495 = vmatmul.mubr.bf16.vlgmr.msra.gmra.mrb[128].mxu0 %v2630_v15  ;;  %5535 = vmatmul.mubr.bf16.vlgmr.msra.gmra.mrb[128].mxu1 %v2652_v20  ;;  %v2656_v15 = vcombine.high %v7370_v37, %v7370_v37 }
 0x4e2   : > { %5543 = vmatpush1.bf16.xpose.msra.mxu0 %v1316_v19  ;;  %5583 = vmatpush1.bf16.xpose.msra.mxu1 %v1318_v21  ;;  %v1027_v21 = vld [vmem:[%s6775_s19 + $0x478] sm:$0xff] }
 0x4e3   : > { %5544 = vmatprep.subr.bf16.mxu0 %v1467_v22  ;;  %5584 = vmatprep.subr.bf16.mxu1 %v1469_v23  ;;  %v7394_v22 = vrot.slane %v2656_v15, %v6785_v3  ;;  %v1327_v31 = vunpack.c.l.s8.bf16 %v1027_v21 }
 0x4e4   : > { %5574 = vmatprep.mubr.bf16.mxu0 %v2651_v18  ;;  %5614 = vmatprep.mubr.bf16.mxu1 %v2655_v24  ;;  %v1770_v24 = vunpack.c.h.s8.bf16 %v1170_v9 }
 0x4ea   : > { %5545 = vmatpush1.bf16.xpose.msra.mxu0 %v1466_v27  ;;  %5585 = vmatpush1.bf16.xpose.msra.mxu1 %v1468_v28  ;;  %v1772_v28 = vunpack.c.h.s8.bf16 %v1172_v10 }
 0x4eb   : > { %5546 = vmatprep.subr.bf16.mxu0 %v1617_v29  ;;  %5586 = vmatprep.subr.bf16.mxu1 %v1619_v30  ;;  %v1325_v29 = vunpack.c.l.s8.bf16 %v1025_v17 }
 0x4f2   : > { %5547 = vmatpush1.bf16.xpose.msra.mxu0 %v1616_v33  ;;  %5587 = vmatpush1.bf16.xpose.msra.mxu1 %v1618_v34  ;;  %v2672_v33 = vcombine.high %v7394_v22, %v7394_v22  ;;  %v2679_v34 = vrot.slane %v7376_v44, %v6785_v3  ;;  %v1175_v44 = vld [vmem:[%s6775_s19 + $0x918] sm:$0xff] }
 0x4f3   : > { %5548 = vmatprep.subr.bf16.mxu0 %v1767_v35  ;;  %5588 = vmatprep.subr.bf16.mxu1 %v1769_v36  ;;  %v1024_v35 = vld [vmem:[%s6775_s19 + $0x460] sm:$0xff]  ;;  %v1026_v36 = vld [vmem:[%s6775_s19 + $0x470] sm:$0xff] }
 0x4f4   : > { %v5016_v38 = vpop.f32.mrb[104].mxu0  ;;  %v5056_v42 = vpop.f32.mrb[104].mxu1  ;;  %v2700_v37 = vrot.slane %v2672_v33, %v6785_v3  ;;  %v2701_v39 = vcombine.high %v2679_v34, %v2679_v34 }
 0x4f5   : > { %v5017_v40 = vadd.f32 %v5016_v38, %v4977_v7  ;;  %v5018_v41 = vpop.f32.mrb[105].mxu0  ;;  %v5058_v47 = vpop.f32.mrb[105].mxu1  ;;  %v1621_v7 = vunpack.c.l.s8.bf16 %v1171_v2  ;;  %v1324_v38 = vunpack.c.l.s8.bf16 %v1024_v35 }
 0x4f6   : > { %v5019_v45 = vpop.f32.mrb[106].mxu0  ;;  %v5059_v52 = vpop.f32.mrb[106].mxu1  ;;  %v1475_v41 = vunpack.c.h.s8.bf16 %v1025_v17  ;;  %v2704_v43 = vcombine.high %v2700_v37, %v2700_v37  ;;  %v1476_v47 = vunpack.c.h.s8.bf16 %v1026_v36 }
 0x4f7   : > { %v5057_v48 = vadd.f32 %v5056_v42, %v5017_v40  ;;  %v5020_v49 = vpop.f32.mrb[107].mxu0  ;;  %v5060_v54 = vpop.f32.mrb[107].mxu1  ;;  %v1326_v40 = vunpack.c.l.s8.bf16 %v1026_v36  ;;  %v1477_v42 = vunpack.c.h.s8.bf16 %v1027_v21  ;;  %v1177_v45 = vld [vmem:[%s6775_s19 + $0x928] sm:$0xff] }
 0x4f8   : > { %v1627_v49 = vunpack.c.l.s8.bf16 %v1177_v45  ;;  %v1775_v54 = vunpack.c.h.s8.bf16 %v1175_v44  ;;  %v1777_v55 = vunpack.c.h.s8.bf16 %v1177_v45  ;;  %v1033_v36 = vld [vmem:[%s6775_s19 + $0x4a8] sm:$0xff] }
 0x4fa   : > { %5549 = vmatpush1.bf16.xpose.msra.mxu0 %v1766_v46  ;;  %5589 = vmatpush1.bf16.xpose.msra.mxu1 %v1768_v50  ;;  %v1474_v46 = vunpack.c.h.s8.bf16 %v1024_v35  ;;  %v1174_v50 = vld [vmem:[%s6775_s19 + $0x910] sm:$0xff] }
 0x4fb   : > { %5622 = vmatprep.subr.bf16.mxu0 %v1321_v51  ;;  %5662 = vmatprep.subr.bf16.mxu1 %v1323_v53  ;;  %v1176_v51 = vld [vmem:[%s6775_s19 + $0x920] sm:$0xff]  ;;  %v1624_v52 = vunpack.c.l.s8.bf16 %v1174_v50 }
 0x4fc   : > { %v1626_v53 = vunpack.c.l.s8.bf16 %v1176_v51 }
 0x501   : > { %5575 = vmatmul.mubr.bf16.vlgmr.msra.gmra.mrb[132].mxu0 %v2637_v56  ;;  %5615 = vmatmul.mubr.bf16.vlgmr.msra.gmra.mrb[132].mxu1 %v2653_v61  ;;  %v7408_v56 = vld [vmem:[%s6773_s18 + $0x90] sm:$0x3f] }
 0x502   : > { %5623 = vmatpush1.bf16.xpose.msra.mxu0 %v1320_v60  ;;  %5663 = vmatpush1.bf16.xpose.msra.mxu1 %v1322_v62  ;;  %v1031_v62 = vld [vmem:[%s6775_s19 + $0x498] sm:$0xff] }
 0x503   : > { %5624 = vmatprep.subr.bf16.mxu0 %v1471_v63  ;;  %5664 = vmatprep.subr.bf16.mxu1 %v1473_v0  ;;  %v7414_v63 = vrot.slane %v7408_v56, %v6785_v3  ;;  %v1331_v9 = vunpack.c.l.s8.bf16 %v1031_v62 }
 0x504   : > { %5654 = vmatprep.mubr.bf16.mxu0 %v2693_v59  ;;  %5694 = vmatprep.mubr.bf16.mxu1 %v2703_v1  ;;  %v1774_v1 = vunpack.c.h.s8.bf16 %v1174_v50 }
 0x505   : > { %v2728_v50 = vrot.slane %v7414_v63, %v6785_v3 }
 0x50a   : > { %5625 = vmatpush1.bf16.xpose.msra.mxu0 %v1470_v5  ;;  %5665 = vmatpush1.bf16.xpose.msra.mxu1 %v1472_v6  ;;  %v1776_v6 = vunpack.c.h.s8.bf16 %v1176_v51  ;;  %v1032_v51 = vld [vmem:[%s6775_s19 + $0x4a0] sm:$0xff] }
 0x50b   : > { %5626 = vmatprep.subr.bf16.mxu0 %v1621_v7  ;;  %5666 = vmatprep.subr.bf16.mxu1 %v1623_v8  ;;  %v1329_v7 = vunpack.c.l.s8.bf16 %v1029_v58 }
 0x512   : > { %5627 = vmatpush1.bf16.xpose.msra.mxu0 %v1620_v11  ;;  %5667 = vmatpush1.bf16.xpose.msra.mxu1 %v1622_v12  ;;  %v2720_v11 = vcombine.high %v7414_v63, %v7414_v63  ;;  %v2686_v12 = vrot.slane %v7394_v22, %v6785_v3  ;;  %v1179_v22 = vld [vmem:[%s6775_s19 + $0x938] sm:$0xff] }
 0x513   : > { %5628 = vmatprep.subr.bf16.mxu0 %v1771_v13  ;;  %5668 = vmatprep.subr.bf16.mxu1 %v1773_v14  ;;  %v1028_v13 = vld [vmem:[%s6775_s19 + $0x480] sm:$0xff]  ;;  %v1030_v14 = vld [vmem:[%s6775_s19 + $0x490] sm:$0xff] }
 0x514   : > { %v5096_v16 = vpop.f32.mrb[108].mxu0  ;;  %v5136_v20 = vpop.f32.mrb[108].mxu1  ;;  %v2742_v15 = vrot.slane %v2720_v11, %v6785_v3  ;;  %v2702_v17 = vcombine.high %v2686_v12, %v2686_v12 }
 0x515   : > { %v5097_v18 = vadd.f32 %v5096_v16, %v5057_v48  ;;  %v5098_v19 = vpop.f32.mrb[109].mxu0  ;;  %v5138_v25 = vpop.f32.mrb[109].mxu1  ;;  %v1625_v48 = vunpack.c.l.s8.bf16 %v1175_v44  ;;  %v1328_v16 = vunpack.c.l.s8.bf16 %v1028_v13 }
 0x516   : > { %v5099_v23 = vpop.f32.mrb[110].mxu0  ;;  %v5139_v30 = vpop.f32.mrb[110].mxu1  ;;  %v1479_v19 = vunpack.c.h.s8.bf16 %v1029_v58  ;;  %v2751_v21 = vcombine.high %v2742_v15, %v2742_v15  ;;  %v1480_v25 = vunpack.c.h.s8.bf16 %v1030_v14  ;;  %v1482_v58 = vunpack.c.h.s8.bf16 %v1032_v51 }
 0x517   : > { %v5137_v26 = vadd.f32 %v5136_v20, %v5097_v18  ;;  %v5100_v27 = vpop.f32.mrb[111].mxu0  ;;  %v5140_v32 = vpop.f32.mrb[111].mxu1  ;;  %v1330_v18 = vunpack.c.l.s8.bf16 %v1030_v14  ;;  %v1481_v20 = vunpack.c.h.s8.bf16 %v1031_v62  ;;  %v1181_v23 = vld [vmem:[%s6775_s19 + $0x948] sm:$0xff] }
 0x518   : > { %v1631_v27 = vunpack.c.l.s8.bf16 %v1181_v23  ;;  %v1779_v32 = vunpack.c.h.s8.bf16 %v1179_v22  ;;  %v1781_v33 = vunpack.c.h.s8.bf16 %v1181_v23 }
 0x51a   : > { %5629 = vmatpush1.bf16.xpose.msra.mxu0 %v1770_v24  ;;  %5669 = vmatpush1.bf16.xpose.msra.mxu1 %v1772_v28  ;;  %v1478_v24 = vunpack.c.h.s8.bf16 %v1028_v13  ;;  %v1178_v28 = vld [vmem:[%s6775_s19 + $0x930] sm:$0xff] }
 0x51b   : > { %5702 = vmatprep.subr.bf16.mxu0 %v1325_v29  ;;  %5742 = vmatprep.subr.bf16.mxu1 %v1327_v31  ;;  %v1180_v29 = vld [vmem:[%s6775_s19 + $0x940] sm:$0xff]  ;;  %v1628_v30 = vunpack.c.l.s8.bf16 %v1178_v28 }
 0x51c   : > { %v1630_v31 = vunpack.c.l.s8.bf16 %v1180_v29  ;;  %v1780_v45 = vunpack.c.h.s8.bf16 %v1180_v29 }
 0x521   : > { %5655 = vmatmul.mubr.bf16.vlgmr.msra.gmra.mrb[136].mxu0 %v2679_v34  ;;  %5695 = vmatmul.mubr.bf16.vlgmr.msra.gmra.mrb[136].mxu1 %v2701_v39  ;;  %v2705_v34 = vcombine.high %v7408_v56, %v7408_v56 }
 0x522   : > { %5703 = vmatpush1.bf16.xpose.msra.mxu0 %v1324_v38  ;;  %5743 = vmatpush1.bf16.xpose.msra.mxu1 %v1326_v40 }
 0x523   : > { %5704 = vmatprep.subr.bf16.mxu0 %v1475_v41  ;;  %5744 = vmatprep.subr.bf16.mxu1 %v1477_v42  ;;  %v1778_v41 = vunpack.c.h.s8.bf16 %v1178_v28 }
 0x524   : > { %5734 = vmatprep.mubr.bf16.mxu0 %v2700_v37  ;;  %5774 = vmatprep.mubr.bf16.mxu1 %v2704_v43 }
 0x52a   : > { %5705 = vmatpush1.bf16.xpose.msra.mxu0 %v1474_v46  ;;  %5745 = vmatpush1.bf16.xpose.msra.mxu1 %v1476_v47  ;;  %v1333_v46 = vunpack.c.l.s8.bf16 %v1033_v36 }
 0x52b   : > { %5706 = vmatprep.subr.bf16.mxu0 %v1625_v48  ;;  %5746 = vmatprep.subr.bf16.mxu1 %v1627_v49  ;;  %v2719_v48 = vrot.slane %v2705_v34, %v6785_v3 }
 0x52d   : > { %v2735_v11 = vrot.slane %v2719_v48, %v6785_v3 }
 0x532   : > { %5707 = vmatpush1.bf16.xpose.msra.mxu0 %v1624_v52  ;;  %5747 = vmatpush1.bf16.xpose.msra.mxu1 %v1626_v53  ;;  %v2721_v52 = vcombine.high %v2719_v48, %v2719_v48  ;;  %v1332_v53 = vunpack.c.l.s8.bf16 %v1032_v51 }
 0x533   : > { %5708 = vmatprep.subr.bf16.mxu0 %v1775_v54  ;;  %5748 = vmatprep.subr.bf16.mxu1 %v1777_v55  ;;  %v2750_v54 = vcombine.high %v2728_v50, %v2728_v50  ;;  %v1483_v55 = vunpack.c.h.s8.bf16 %v1033_v36 }
 0x534   : > { %v5176_v57 = vpop.f32.mrb[112].mxu0  ;;  %v5216_v61 = vpop.f32.mrb[112].mxu1  ;;  %v2749_v56 = vrot.slane %v2721_v52, %v6785_v3 }
 0x535   : > { %v5177_v59 = vadd.f32 %v5176_v57, %v5137_v26  ;;  %v5178_v60 = vpop.f32.mrb[113].mxu0  ;;  %v5218_v2 = vpop.f32.mrb[113].mxu1  ;;  %v1629_v26 = vunpack.c.l.s8.bf16 %v1179_v22  ;;  %v1183_v57 = vld [vmem:[%s6775_s19 + $0x958] sm:$0xff] }
 0x536   : > { %v5179_v0 = vpop.f32.mrb[114].mxu0  ;;  %v5219_v8 = vpop.f32.mrb[114].mxu1  ;;  %v1182_v60 = vld [vmem:[%s6775_s19 + $0x950] sm:$0xff]  ;;  %v1783_v62 = vunpack.c.h.s8.bf16 %v1183_v57 }
 0x537   : > { %v5217_v4 = vadd.f32 %v5216_v61, %v5177_v59  ;;  %v5180_v5 = vpop.f32.mrb[115].mxu0  ;;  %v5220_v10 = vpop.f32.mrb[115].mxu1  ;;  %v1633_v59 = vunpack.c.l.s8.bf16 %v1183_v57  ;;  %v1632_v61 = vunpack.c.l.s8.bf16 %v1182_v60 }
 0x538   : > { %v1782_v5 = vunpack.c.h.s8.bf16 %v1182_v60 }
 0x53a   : > { %5709 = vmatpush1.bf16.xpose.msra.mxu0 %v1774_v1  ;;  %5749 = vmatpush1.bf16.xpose.msra.mxu1 %v1776_v6 }
 0x53b   : > { %5782 = vmatprep.subr.bf16.mxu0 %v1329_v7  ;;  %5822 = vmatprep.subr.bf16.mxu1 %v1331_v9 }
 0x541   : > { %5735 = vmatmul.mubr.bf16.vlgmr.msra.gmra.mrb[140].mxu0 %v2686_v12  ;;  %5775 = vmatmul.mubr.bf16.vlgmr.msra.gmra.mrb[140].mxu1 %v2702_v17 }
 0x542   : > { %5783 = vmatpush1.bf16.xpose.msra.mxu0 %v1328_v16  ;;  %5823 = vmatpush1.bf16.xpose.msra.mxu1 %v1330_v18 }
 0x543   : > { %5784 = vmatprep.subr.bf16.mxu0 %v1479_v19  ;;  %5824 = vmatprep.subr.bf16.mxu1 %v1481_v20 }
 0x544   : > { %5814 = vmatprep.mubr.bf16.mxu0 %v2742_v15  ;;  %5854 = vmatprep.mubr.bf16.mxu1 %v2751_v21 }
 0x54a   : > { %5785 = vmatpush1.bf16.xpose.msra.mxu0 %v1478_v24  ;;  %5825 = vmatpush1.bf16.xpose.msra.mxu1 %v1480_v25 }
 0x54b   : > { %5786 = vmatprep.subr.bf16.mxu0 %v1629_v26  ;;  %5826 = vmatprep.subr.bf16.mxu1 %v1631_v27 }
 0x552   : > { %5787 = vmatpush1.bf16.xpose.msra.mxu0 %v1628_v30  ;;  %5827 = vmatpush1.bf16.xpose.msra.mxu1 %v1630_v31 }
 0x553   : > { %5788 = vmatprep.subr.bf16.mxu0 %v1779_v32  ;;  %5828 = vmatprep.subr.bf16.mxu1 %v1781_v33 }
 0x554   : > { %v5256_v35 = vpop.f32.mrb[116].mxu0  ;;  %v5296_v39 = vpop.f32.mrb[116].mxu1 }
 0x555   : > { %v5257_v37 = vadd.f32 %v5256_v35, %v5217_v4  ;;  %v5258_v38 = vpop.f32.mrb[117].mxu0  ;;  %v5298_v42 = vpop.f32.mrb[117].mxu1 }
 0x556   : > { %v5259_v40 = vpop.f32.mrb[118].mxu0  ;;  %v5299_v47 = vpop.f32.mrb[118].mxu1 }
 0x557   : > { %v5297_v43 = vadd.f32 %v5296_v39, %v5257_v37  ;;  %v5260_v44 = vpop.f32.mrb[119].mxu0  ;;  %v5300_v49 = vpop.f32.mrb[119].mxu1 }
 0x55a   : > { %5789 = vmatpush1.bf16.xpose.msra.mxu0 %v1778_v41  ;;  %5829 = vmatpush1.bf16.xpose.msra.mxu1 %v1780_v45 }
 0x55b   : > { %5862 = vmatprep.subr.bf16.mxu0 %v1333_v46 }
 0x561   : > { %5815 = vmatmul.mubr.bf16.vlgmr.msra.gmra.mrb[144].mxu0 %v2728_v50  ;;  %5855 = vmatmul.mubr.bf16.vlgmr.msra.gmra.mrb[144].mxu1 %v2750_v54 }
 0x562   : > { %5863 = vmatpush1.bf16.xpose.msra.mxu0 %v1332_v53  ;;  %5894 = vmatprep.mubr.bf16.mxu0 %v2749_v56 }
 0x563   : > { %5864 = vmatprep.subr.bf16.mxu0 %v1483_v55 }
 0x56a   : > { %5865 = vmatpush1.bf16.xpose.msra.mxu0 %v1482_v58 }
 0x56b   : > { %5866 = vmatprep.subr.bf16.mxu0 %v1633_v59 }
 0x572   : > { %5867 = vmatpush1.bf16.xpose.msra.mxu0 %v1632_v61 }
 0x573   : > { %5868 = vmatprep.subr.bf16.mxu0 %v1783_v62 }
 0x574   : > { %v5336_v63 = vpop.f32.mrb[120].mxu0  ;;  %v5376_v2 = vpop.f32.mrb[120].mxu1 }
 0x575   : > { %v5337_v0 = vadd.f32 %v5336_v63, %v5297_v43  ;;  %v5338_v1 = vpop.f32.mrb[121].mxu0  ;;  %v5378_v6 = vpop.f32.mrb[121].mxu1 }
 0x576   : > { %v5339_v4 = vpop.f32.mrb[122].mxu0  ;;  %v5379_v9 = vpop.f32.mrb[122].mxu1 }
 0x577   : > { %v5377_v7 = vadd.f32 %v5376_v2, %v5337_v0  ;;  %v5340_v8 = vpop.f32.mrb[123].mxu0  ;;  %v5380_v10 = vpop.f32.mrb[123].mxu1 }
 0x578   : > { %v1784_v8 = vld [vmem:[#allocation2] sm:$0x3] }
 0x57a   : > { %5869 = vmatpush1.bf16.xpose.msra.mxu0 %v1782_v5 }
 0x581   : > { %5895 = vmatmul.mubr.bf16.vlgmr.msra.gmra.mrb[148].mxu0 %v2735_v11 }
 0x594   : > { %v5416_v12 = vpop.f32.mrb[124].mxu0  ;;  %v5456_v15 = vpop.f32.mrb[124].mxu1 }
 0x595   : > { %v5417_v13 = vadd.f32 %v5416_v12, %v5377_v7  ;;  %v5418_v14 = vpop.f32.mrb[125].mxu0  ;;  %v5458_v17 = vpop.f32.mrb[125].mxu1 }
 0x596   : > { %v5419_v16 = vpop.f32.mrb[126].mxu0  ;;  %v5459_v20 = vpop.f32.mrb[126].mxu1  ;;  %v6005_v17 = vld [vmem:[%s7464_s3] ss:$0 sm:$0xff] (!%p6003_p10) }
 0x597   : > { %v5457_v18 = vadd.f32 %v5456_v15, %v5417_v13  ;;  %v5420_v19 = vpop.f32.mrb[127].mxu0  ;;  %v5460_v21 = vpop.f32.mrb[127].mxu1  ;;  %v6004_v16 = vld [vmem:[%s7463_s2] ss:$0 sm:$0xff] (!%p6003_p10) }
 0x598   : > { %v6006_v20 = vld [vmem:[%s7465_s4] ss:$0 sm:$0xff] (!%p6003_p10) }
 0x5b4   : > { %v5496_v22 = vpop.f32.mrb[128].mxu0  ;;  %v5536_v25 = vpop.f32.mrb[128].mxu1 }
 0x5b5   : > { %v5497_v23 = vadd.f32 %v5496_v22, %v5457_v18  ;;  %v5498_v24 = vpop.f32.mrb[129].mxu0  ;;  %v5538_v27 = vpop.f32.mrb[129].mxu1 }
 0x5b6   : > { %v5499_v26 = vpop.f32.mrb[130].mxu0  ;;  %v5539_v3 = vpop.f32.mrb[130].mxu1  ;;  %v6007_v24 = vld [vmem:[#allocation3] ss:$0 sm:$0xff] (!%p6003_p10) }
 0x5b7   : > { %v5537_v28 = vadd.f32 %v5536_v25, %v5497_v23  ;;  %v5500_v29 = vpop.f32.mrb[131].mxu0  ;;  %v5540_v30 = vpop.f32.mrb[131].mxu1 }
 0x5d4   : > { %v5576_v31 = vpop.f32.mrb[132].mxu0  ;;  %v5616_v34 = vpop.f32.mrb[132].mxu1 }
 0x5d5   : > { %v5577_v32 = vadd.f32 %v5576_v31, %v5537_v28  ;;  %v5578_v33 = vpop.f32.mrb[133].mxu0  ;;  %v5618_v36 = vpop.f32.mrb[133].mxu1 }
 0x5d6   : > { %v5579_v35 = vpop.f32.mrb[134].mxu0  ;;  %v5619_v39 = vpop.f32.mrb[134].mxu1 }
 0x5d7   : > { %v5617_v37 = vadd.f32 %v5616_v34, %v5577_v32  ;;  %v5580_v38 = vpop.f32.mrb[135].mxu0  ;;  %v5620_v40 = vpop.f32.mrb[135].mxu1 }
 0x5f4   : > { %v5656_v41 = vpop.f32.mrb[136].mxu0  ;;  %v5696_v44 = vpop.f32.mrb[136].mxu1 }
 0x5f5   : > { %v5657_v42 = vadd.f32 %v5656_v41, %v5617_v37  ;;  %v5658_v43 = vpop.f32.mrb[137].mxu0  ;;  %v5698_v46 = vpop.f32.mrb[137].mxu1 }
 0x5f6   : > { %v5659_v45 = vpop.f32.mrb[138].mxu0  ;;  %v5699_v49 = vpop.f32.mrb[138].mxu1 }
 0x5f7   : > { %v5697_v47 = vadd.f32 %v5696_v44, %v5657_v42  ;;  %v5660_v48 = vpop.f32.mrb[139].mxu0  ;;  %v5700_v50 = vpop.f32.mrb[139].mxu1 }
 0x614   : > { %v5736_v51 = vpop.f32.mrb[140].mxu0  ;;  %v5776_v54 = vpop.f32.mrb[140].mxu1 }
 0x615   : > { %v5737_v52 = vadd.f32 %v5736_v51, %v5697_v47  ;;  %v5738_v53 = vpop.f32.mrb[141].mxu0  ;;  %v5778_v56 = vpop.f32.mrb[141].mxu1 }
 0x616   : > { %v5739_v55 = vpop.f32.mrb[142].mxu0  ;;  %v5779_v59 = vpop.f32.mrb[142].mxu1 }
 0x617   : > { %v5777_v57 = vadd.f32 %v5776_v54, %v5737_v52  ;;  %v5740_v58 = vpop.f32.mrb[143].mxu0  ;;  %v5780_v60 = vpop.f32.mrb[143].mxu1 }
 0x634   : > { %v5816_v61 = vpop.f32.mrb[144].mxu0  ;;  %v5856_v0 = vpop.f32.mrb[144].mxu1 }
 0x635   : > { %v5817_v62 = vadd.f32 %v5816_v61, %v5777_v57  ;;  %v5818_v63 = vpop.f32.mrb[145].mxu0  ;;  %v5858_v2 = vpop.f32.mrb[145].mxu1 }
 0x636   : > { %v5819_v1 = vpop.f32.mrb[146].mxu0  ;;  %v5859_v6 = vpop.f32.mrb[146].mxu1 }
 0x637   : > { %v5857_v4 = vadd.f32 %v5856_v0, %v5817_v62  ;;  %v5820_v5 = vpop.f32.mrb[147].mxu0  ;;  %v5860_v7 = vpop.f32.mrb[147].mxu1 }
 0x653   : > { %5908 = sbr.rel (%p6003_p10) target bundleno = 1815 (0x717), region = 75 }
 0x654   : > { %v5896_v9 = vpop.f32.mrb[148].mxu0 }
 0x655   : > { %v5897_v10 = vadd.f32 %v5896_v9, %v5857_v4  ;;  %v5898_v11 = vpop.f32.mrb[149].mxu0 }
 0x656   : > { %v5899_v12 = vpop.f32.mrb[150].mxu0 }
 0x657   : > { %v5902_v13 = vadd.f32 %v5897_v10, %v1784_v8  ;;  %v5900_v14 = vpop.f32.mrb[151].mxu0 }
 0x659   : > { %5904 = vst.msk [vmem:[#allocation2] sm:$0x3] %vm5903_vm1, %v5902_v13 }
 0x660   : > { %v5909_v15 = vld [vmem:[#allocation2] sm:$0x3] }
 0x661   : > { %v5917_v18 = vmul.f32 %v6004_v16, %v5909_v15 }
 0x663   : > { %v5925_v19 = vadd.f32 %v6005_v17, %v5917_v18 }
 0x665   : > { %v5926_v21 = vmax.f32 %v5925_v19, 0.0 }
 0x667   : > { %v5934_v22 = vmul.f32 %v6006_v20, %v5926_v21 }
 0x669   : > { %v5935_v23 = vsel %vm5903_vm1, %v5934_v22, 0.0 }
 0x66a   : > { %5936 = vadd.xlane.f32.xlu0 %v5935_v23 }
 0x6f7   : > { %v5937_v25 = vpop.xlane.xlu0 %5936 }
 0x6f8   : > { %v5945_v26 = vadd.f32 %v6007_v24, %v5937_v25 }
 0x6fa   : > { %v5946_v27 = vsub.f32 0.0, %v5945_v26 }
 0x6fc   : > { %v5947_v28 = vmul.f32 1.442695, %v5946_v27 }
 0x6fe   : > { %6058 = vpow2.f32 %v5947_v28 }
 0x708   : > { %v6059_v29 = vpop.eup %6058 }
 0x709   : > { %v5949_v3 = vadd.f32 1.0, %v6059_v29 }
 0x70b   : > { %6060 = vrcp.f32 %v5949_v3 }
 0x715   : > { %v6061_v30 = vpop.eup %6060 }
 0x716   : > { %5953 = vst.msk [vmem:[%s7467_s6] sm:$0x3] %vm5952_vm2, %v6061_v30 }
 0x717 PF: > { %p15_p11 = scmp.ge.s32.totalorder %s6145_s26, 5   ;;  %s7468_s23 = smov %s6080_s24 }
 0x718   : > { %s7469_s24 = smov %s6154_s29  ;;  %s7470_s25 = smov %s6145_s26 }
 0x719   :  { %17 = sbr.rel (!%p15_p11) target bundleno = 5 (0x5), region = 109 }

</bundles_post_ra>
